<compile_context>
chip_gen: v6e
topology: v6e:2x2x1
jax: 0.10.0
libtpu: 0.0.40
codegen_flags: <defaults>
</compile_context>

<pallas_src>
import jax
import jax.numpy as jnp
from jax.experimental import pallas as pl
from jax.experimental.pallas import tpu as pltpu

# ---- model hyper-parameters --------------------------------------------------
HIDDEN = 32
H4 = HIDDEN // 4
ENC_STEPS = 8
DEC_STEPS = 4
PRED_DIM = 4          # JAAD / PIE branch
IN_DIM = 4            # box input
BATCH = 2
LANES = 128
OUT_COLS = DEC_STEPS * PRED_DIM       # 16 output lanes per (enc_step, batch) row

# ---- parameter slab layout (static, 8-row aligned blocks, 128 lanes) ---------
_PARAM_SHAPES = [
    ("embed_w", (IN_DIM, HIDDEN)), ("embed_b", (1, HIDDEN)),
    ("tec_wih_x", (HIDDEN, 3 * HIDDEN)), ("tec_wih_g", (H4, 3 * HIDDEN)),
    ("tec_whh", (HIDDEN, 3 * HIDDEN)),
    ("tec_bih", (1, 3 * HIDDEN)), ("tec_bhh", (1, 3 * HIDDEN)),
    ("e2g_w", (HIDDEN, H4)), ("e2g_b", (1, H4)),
    ("goal_wih", (H4, 3 * H4)), ("goal_whh", (H4, 3 * H4)),
    ("goal_bih", (1, 3 * H4)), ("goal_bhh", (1, 3 * H4)),
    ("gh2i_w", (H4, H4)), ("gh2i_b", (1, H4)),
    ("g2e_blk", (DEC_STEPS * H4, DEC_STEPS * H4)), ("g2e_b4", (1, DEC_STEPS * H4)),
    ("enc_attn_blk", (DEC_STEPS * H4, DEC_STEPS)), ("enc_attn_b", (1, 1)),
    ("e2d_w", (HIDDEN, HIDDEN)), ("e2d_b", (1, HIDDEN)),
    ("g2d_blk", (DEC_STEPS * H4, DEC_STEPS * H4)), ("g2d_b4", (1, DEC_STEPS * H4)),
    ("dec_attn_blk", (DEC_STEPS * H4, DEC_STEPS)), ("dec_attn_b", (1, 1)),
    ("gh2t_blk", (DEC_STEPS * H4, DEC_STEPS * HIDDEN)), ("gh2t_b4", (1, DEC_STEPS * HIDDEN)),
    ("reg_blk", (DEC_STEPS * HIDDEN, DEC_STEPS * PRED_DIM)), ("reg_b4", (1, DEC_STEPS * PRED_DIM)),
    ("dh2i_w", (HIDDEN, HIDDEN)), ("dh2i_b", (1, HIDDEN)),
    ("dec_wih_g", (H4, 3 * HIDDEN)), ("dec_wih_d", (HIDDEN, 3 * HIDDEN)),
    ("dec_whh", (HIDDEN, 3 * HIDDEN)),
    ("dec_bih", (1, 3 * HIDDEN)), ("dec_bhh", (1, 3 * HIDDEN)),
]

_LAYOUT = {}
_SLAB_ROWS = 0
for _name, (_r, _c) in _PARAM_SHAPES:
    assert _c <= LANES
    _LAYOUT[_name] = (_SLAB_ROWS, _r, _c)
    _SLAB_ROWS += -(-_r // 8) * 8   # pad each block to a multiple of 8 sublanes


def _block_diag(w, n):
    """(r, c) block -> (n*r, n*c) block-diagonal weight (apply one Linear to n
    lane-concatenated slots with a single matmul)."""
    r, c = w.shape
    out = jnp.zeros((n * r, n * c), jnp.float32)
    for i in range(n):
        out = out.at[i * r:(i + 1) * r, i * c:(i + 1) * c].set(w)
    return out


def pack_params(params):
    """Pack/pre-transform every parameter into one (rows, 128) f32 slab.

    Call ONCE per weight set, OUTSIDE the jitted forward (hoisted per review)."""
    prep = {}
    prep["embed_w"] = params["embed_w"]
    prep["embed_b"] = params["embed_b"]
    # GRU input->hidden weights split so the kernel never lane-concats inputs.
    prep["tec_wih_x"] = params["tec_wih"][:HIDDEN]   # feature part
    prep["tec_wih_g"] = params["tec_wih"][HIDDEN:]   # goal_for_enc part
    prep["tec_whh"] = params["tec_whh"]
    prep["tec_bih"] = params["tec_bih"]
    prep["tec_bhh"] = params["tec_bhh"]
    prep["e2g_w"] = params["e2g_w"]; prep["e2g_b"] = params["e2g_b"]
    prep["goal_wih"] = params["goal_wih"]; prep["goal_whh"] = params["goal_whh"]
    prep["goal_bih"] = params["goal_bih"]; prep["goal_bhh"] = params["goal_bhh"]
    prep["gh2i_w"] = params["gh2i_w"]; prep["gh2i_b"] = params["gh2i_b"]
    prep["g2e_blk"] = _block_diag(params["g2e_w"], DEC_STEPS)
    prep["g2e_b4"] = jnp.tile(params["g2e_b"], (1, DEC_STEPS))
    prep["enc_attn_blk"] = _block_diag(params["enc_attn_w"], DEC_STEPS)
    prep["enc_attn_b"] = params["enc_attn_b"].reshape(1, 1)
    prep["e2d_w"] = params["e2d_w"]; prep["e2d_b"] = params["e2d_b"]
    prep["g2d_blk"] = _block_diag(params["g2d_w"], DEC_STEPS)
    prep["g2d_b4"] = jnp.tile(params["g2d_b"], (1, DEC_STEPS))
    prep["dec_attn_blk"] = _block_diag(params["dec_attn_w"], DEC_STEPS)
    prep["dec_attn_b"] = params["dec_attn_b"].reshape(1, 1)
    prep["gh2t_blk"] = _block_diag(params["gh2t_w"], DEC_STEPS)
    prep["gh2t_b4"] = jnp.tile(params["gh2t_b"], (1, DEC_STEPS))
    prep["reg_blk"] = _block_diag(params["reg_w"], DEC_STEPS)
    prep["reg_b4"] = jnp.tile(params["reg_b"], (1, DEC_STEPS))
    prep["dh2i_w"] = params["dh2i_w"]; prep["dh2i_b"] = params["dh2i_b"]
    prep["dec_wih_g"] = params["dec_wih"][:H4]       # goal_dec_input part
    prep["dec_wih_d"] = params["dec_wih"][H4:]       # dec_dec_input part
    prep["dec_whh"] = params["dec_whh"]
    prep["dec_bih"] = params["dec_bih"]; prep["dec_bhh"] = params["dec_bhh"]

    slab = jnp.zeros((_SLAB_ROWS, LANES), jnp.float32)
    for name, (r0, r, c) in _LAYOUT.items():
        slab = slab.at[r0:r0 + r, :c].set(prep[name].reshape(r, c).astype(jnp.float32))
    return slab


# ------------------------------ kernel helpers --------------------------------
def _dot(a, b):
    return jnp.dot(a, b, preferred_element_type=jnp.float32)


def _gru_from_gates(gi, gh, h, hid):
    """nn.GRUCell combine (gate order r, z, n) given pre-activations."""
    r = jax.nn.sigmoid(gi[:, 0 * hid:1 * hid] + gh[:, 0 * hid:1 * hid])
    z = jax.nn.sigmoid(gi[:, 1 * hid:2 * hid] + gh[:, 1 * hid:2 * hid])
    n = jnp.tanh(gi[:, 2 * hid:3 * hid] + r * gh[:, 2 * hid:3 * hid])
    return (1.0 - z) * n + z * h


def _softmax_lastdim(x):
    m = jnp.max(x, axis=-1, keepdims=True)
    e = jnp.exp(x - m)
    return e / jnp.sum(e, axis=-1, keepdims=True)   # exact (numerical-parity concern)


# --------------------------------- kernel -------------------------------------
def sgnet_kernel(traj_ref, p_ref, goal_out_ref, dec_out_ref,
                 gix_ref, henc_ref, ghid_ref):
    """Full SGNet forward. traj rows are ordered (enc_step, batch)."""
    EB = traj_ref.shape[0]              # ENC_STEPS * B
    B = EB // ENC_STEPS

    def gp(name):                       # slice a weight block at its use site
        r0, r, c = _LAYOUT[name]
        return p_ref[r0:r0 + r, 0:c]

    # ---- phase 0: batched embedding + feature part of encoder-GRU preactivation
    feat = jnp.maximum(_dot(traj_ref[...], gp("embed_w")) + gp("embed_b"), 0.0)  # (EB, H)
    gix_ref[...] = _dot(feat, gp("tec_wih_x")) + gp("tec_bih")                   # (EB, 3H)

    # ---- weights needed inside the serial encoder/SGE loop (loaded once) -------
    tec_wih_g = gp("tec_wih_g"); tec_whh = gp("tec_whh"); tec_bhh = gp("tec_bhh")
    e2g_w = gp("e2g_w"); e2g_b = gp("e2g_b")
    goal_wih = gp("goal_wih"); goal_whh = gp("goal_whh")
    goal_bih = gp("goal_bih"); goal_bhh = gp("goal_bhh")
    gh2i_w = gp("gh2i_w"); gh2i_b = gp("gh2i_b")
    g2e_blk = gp("g2e_blk"); g2e_b4 = gp("g2e_b4")
    enc_attn_blk = gp("enc_attn_blk"); enc_attn_b = gp("enc_attn_b")

    goal_for_enc = jnp.zeros((B, H4), jnp.float32)
    h_enc = jnp.zeros((B, HIDDEN), jnp.float32)

    for t in range(ENC_STEPS):                                  # unrolled (8 steps)
        r0 = t * B
        # traj_enc_cell GRU; input = [feat_t, goal_for_enc] via split weights
        gi = gix_ref[r0:r0 + B, :] + _dot(goal_for_enc, tec_wih_g)
        gh = _dot(h_enc, tec_whh) + tec_bhh
        h_enc = _gru_from_gates(gi, gh, h_enc, HIDDEN)
        henc_ref[r0:r0 + B, :] = h_enc          # stash for deferred decoder phase

        # ------------------------------- SGE ----------------------------------
        ghid = jnp.maximum(_dot(h_enc, e2g_w) + e2g_b, 0.0)     # goal_hidden (B,H4)
        goal_input = jnp.zeros((B, H4), jnp.float32)
        parts = []
        for d in range(DEC_STEPS):                              # serial goal GRU
            ggi = _dot(goal_input, goal_wih) + goal_bih
            ggh = _dot(ghid, goal_whh) + goal_bhh
            ghid = _gru_from_gates(ggi, ggh, ghid, H4)
            parts.append(ghid)
            if d + 1 < DEC_STEPS:
                goal_input = jnp.maximum(_dot(ghid, gh2i_w) + gh2i_b, 0.0)
        ghid_cat = jnp.concatenate(parts, axis=1)               # (B, DEC*H4)
        ghid_ref[r0:r0 + B, :] = ghid_cat       # stash for goal head / dec attention

        # encoder goal attention (feeds only the NEXT encoder step)
        if t + 1 < ENC_STEPS:
            gfe = jnp.maximum(_dot(ghid_cat, g2e_blk) + g2e_b4, 0.0)            # (B, DEC*H4)
            logits = jnp.maximum(_dot(jnp.tanh(gfe), enc_attn_blk) + enc_attn_b, 0.0)
            attn = _softmax_lastdim(logits)                                      # (B, DEC)
            goal_for_enc = sum(attn[:, d:d + 1] * gfe[:, d * H4:(d + 1) * H4]
                               for d in range(DEC_STEPS))

    # -------------- deferred phase: batched over all ENC_STEPS steps -------------
    henc_all = henc_ref[...]                    # (EB, HIDDEN)
    ghid_all = ghid_ref[...]                    # (EB, DEC*H4)

    # decoder init hidden, goal_to_dec and dec-attention logits: 3 matmuls total
    dec_h = jnp.maximum(_dot(henc_all, gp("e2d_w")) + gp("e2d_b"), 0.0)          # (EB, H)
    gfd = jnp.maximum(_dot(ghid_all, gp("g2d_blk")) + gp("g2d_b4"), 0.0)         # (EB, DEC*H4)
    dec_attn_b = gp("dec_attn_b")
    dec_logits = jnp.maximum(_dot(jnp.tanh(gfd), gp("dec_attn_blk")) + dec_attn_b, 0.0)
    pad_logit = jnp.maximum(dec_attn_b, 0.0)    # ReLU(bias): logit of zero-padded slots

    dh2i_w = gp("dh2i_w"); dh2i_b = gp("dh2i_b")
    dec_wih_g = gp("dec_wih_g"); dec_wih_d = gp("dec_wih_d")
    dec_whh = gp("dec_whh"); dec_bih = gp("dec_bih"); dec_bhh = gp("dec_bhh")
    lane = jax.lax.broadcasted_iota(jnp.int32, (EB, DEC_STEPS), 1)

    dh_parts = []
    for d in range(DEC_STEPS):                                  # serial decoder GRU
        logits_d = dec_logits if d == 0 else jnp.where(lane >= d, dec_logits, pad_logit)
        attn = _softmax_lastdim(logits_d)                                        # (EB, DEC)
        goal_in = sum(attn[:, k:k + 1] * gfd[:, k * H4:(k + 1) * H4]
                      for k in range(d, DEC_STEPS))                              # (EB, H4)
        dec_in = jnp.maximum(_dot(dec_h, dh2i_w) + dh2i_b, 0.0)                  # (EB, H)
        dgi = _dot(goal_in, dec_wih_g) + _dot(dec_in, dec_wih_d) + dec_bih
        dgh = _dot(dec_h, dec_whh) + dec_bhh
        dec_h = _gru_from_gates(dgi, dgh, dec_h, HIDDEN)
        dh_parts.append(dec_h)

    # regressor + accumulate_traj for all ENC*DEC decoder outputs: 1 block-diag matmul
    dh_cat = jnp.concatenate(dh_parts, axis=1)                                   # (EB, DEC*H)
    obs4 = jnp.concatenate([traj_ref[...]] * DEC_STEPS, axis=1)                  # (EB, DEC*4)
    dec_out_ref[...] = jnp.tanh(_dot(dh_cat, gp("reg_blk")) + gp("reg_b4")) + obs4

    # goal-trajectory head for all ENC*DEC goals: 2 block-diag matmuls
    gth = jnp.maximum(_dot(ghid_all, gp("gh2t_blk")) + gp("gh2t_b4"), 0.0)       # (EB, DEC*H)
    goal_out_ref[...] = jnp.tanh(_dot(gth, gp("reg_blk")) + gp("reg_b4"))


# -------------------------------- wrapper --------------------------------------
@jax.jit
def sgnet_forward(traj, slab):
    """traj: (B, ENC_STEPS, 4) float32; slab: packed params from pack_params()."""
    B = traj.shape[0]
    EB = ENC_STEPS * B
    # rows ordered (enc_step, batch) so the deferred phases batch over enc steps
    traj_eb = jnp.transpose(traj, (1, 0, 2)).reshape(EB, IN_DIM).astype(jnp.float32)

    goal_flat, dec_flat = pl.pallas_call(
        sgnet_kernel,
        out_shape=(jax.ShapeDtypeStruct((EB, OUT_COLS), jnp.float32),
                   jax.ShapeDtypeStruct((EB, OUT_COLS), jnp.float32)),
        scratch_shapes=[pltpu.VMEM((EB, 3 * HIDDEN), jnp.float32),        # gi_x preact
                        pltpu.VMEM((EB, HIDDEN), jnp.float32),            # h_enc stash
                        pltpu.VMEM((EB, DEC_STEPS * H4), jnp.float32)],   # goal hiddens
    )(traj_eb, slab)

    all_goal_traj = goal_flat.reshape(ENC_STEPS, B, DEC_STEPS, PRED_DIM).transpose(1, 0, 2, 3)
    all_dec_traj = dec_flat.reshape(ENC_STEPS, B, DEC_STEPS, PRED_DIM).transpose(1, 0, 2, 3)
    pred_traj = all_dec_traj[:, -1]                   # (B, DEC_STEPS, 4)
    return {"pred_traj": pred_traj, "ori_output": (all_goal_traj, all_dec_traj)}


# --------------------------- deterministic init --------------------------------
def init_params(key):
    def lin(k, fan_in, fan_out):
        k1, k2 = jax.random.split(k)
        bound = 1.0 / (fan_in ** 0.5)
        w = jax.random.uniform(k1, (fan_in, fan_out), jnp.float32, -bound, bound)
        b = jax.random.uniform(k2, (1, fan_out), jnp.float32, -bound, bound)
        return w, b

    def gru(k, in_dim, hid):
        k1, k2, k3, k4 = jax.random.split(k, 4)
        bound = 1.0 / (hid ** 0.5)
        wih = jax.random.uniform(k1, (in_dim, 3 * hid), jnp.float32, -bound, bound)
        whh = jax.random.uniform(k2, (hid, 3 * hid), jnp.float32, -bound, bound)
        bih = jax.random.uniform(k3, (1, 3 * hid), jnp.float32, -bound, bound)
        bhh = jax.random.uniform(k4, (1, 3 * hid), jnp.float32, -bound, bound)
        return wih, whh, bih, bhh

    keys = jax.random.split(key, 14)
    p = {}
    p["embed_w"], p["embed_b"] = lin(keys[0], IN_DIM, HIDDEN)
    p["reg_w"], p["reg_b"] = lin(keys[1], HIDDEN, PRED_DIM)
    p["enc_attn_w"], p["enc_attn_b"] = lin(keys[2], H4, 1)
    p["dec_attn_w"], p["dec_attn_b"] = lin(keys[3], H4, 1)
    p["e2g_w"], p["e2g_b"] = lin(keys[4], HIDDEN, H4)
    p["e2d_w"], p["e2d_b"] = lin(keys[5], HIDDEN, HIDDEN)
    p["gh2i_w"], p["gh2i_b"] = lin(keys[6], H4, H4)
    p["dh2i_w"], p["dh2i_b"] = lin(keys[7], HIDDEN, HIDDEN)
    p["gh2t_w"], p["gh2t_b"] = lin(keys[8], H4, HIDDEN)
    p["g2e_w"], p["g2e_b"] = lin(keys[9], H4, H4)
    p["g2d_w"], p["g2d_b"] = lin(keys[10], H4, H4)
    p["tec_wih"], p["tec_whh"], p["tec_bih"], p["tec_bhh"] = gru(keys[11], HIDDEN + H4, HIDDEN)
    p["goal_wih"], p["goal_whh"], p["goal_bih"], p["goal_bhh"] = gru(keys[12], H4, H4)
    p["dec_wih"], p["dec_whh"], p["dec_bih"], p["dec_bhh"] = gru(keys[13], HIDDEN + H4, HIDDEN)
    return p


# TODO(synk): flow_enc_cell is declared in SGNet.__init__ but never used in the
# JAAD/PIE forward path, so it is intentionally not materialized.

if __name__ == "__main__":
    key = jax.random.PRNGKey(0)
    k_in, k_p = jax.random.split(key)
    traj = jax.random.normal(k_in, (BATCH, ENC_STEPS, IN_DIM), jnp.float32)
    params = init_params(k_p)
    slab = pack_params(params)            # packed once, outside the jitted forward
    out = sgnet_forward(traj, slab)
    jax.block_until_ready(out)
    assert out["pred_traj"].shape == (BATCH, DEC_STEPS, PRED_DIM)
    assert out["ori_output"][0].shape == (BATCH, ENC_STEPS, DEC_STEPS, PRED_DIM)
    assert out["ori_output"][1].shape == (BATCH, ENC_STEPS, DEC_STEPS, PRED_DIM)
    assert bool(jnp.all(jnp.isfinite(out["ori_output"][0])))
    assert bool(jnp.all(jnp.isfinite(out["ori_output"][1])))
    print("KERNEL_OK")
</pallas_src>

<mosaic_0001>
module attributes {stable_mosaic.version = 11 : i64} {
  func.func @sgnet_kernel(%arg0: memref<16x4xf32, #tpu.memory_space<vmem>>, %arg1: memref<696x128xf32, #tpu.memory_space<vmem>>, %arg2: memref<16x16xf32, #tpu.memory_space<vmem>>, %arg3: memref<16x16xf32, #tpu.memory_space<vmem>>, %arg4: memref<16x96xf32, #tpu.memory_space<vmem>>, %arg5: memref<16x32xf32, #tpu.memory_space<vmem>>, %arg6: memref<16x32xf32, #tpu.memory_space<vmem>>) attributes {dimension_semantics = [], scalar_prefetch = 0 : i64, scratch_operands = 3 : i64, tpu.core_type = #tpu.core_type<tc>} {
    %c0 = arith.constant 0 : index
    %c0_0 = arith.constant 0 : index
    %0 = vector.load %arg0[%c0, %c0_0] : memref<16x4xf32, #tpu.memory_space<vmem>>, vector<16x4xf32>
    %c0_1 = arith.constant 0 : index
    %c0_2 = arith.constant 0 : index
    %1 = vector.load %arg1[%c0_1, %c0_2] : memref<696x128xf32, #tpu.memory_space<vmem>>, vector<4x32xf32>
    %cst = arith.constant dense<0.000000e+00> : vector<16x32xf32>
    %2 = tpu.matmul %0, %1, %cst {dimension_numbers = #tpu.dot_dimension_numbers<[1], [0], [0], [1], [0, 0, 1, 1], [], []>} : vector<16x4xf32>, vector<4x32xf32>, vector<16x32xf32> -> vector<16x32xf32>
    %c8 = arith.constant 8 : index
    %c0_3 = arith.constant 0 : index
    %3 = vector.load %arg1[%c8, %c0_3] : memref<696x128xf32, #tpu.memory_space<vmem>>, vector<1x32xf32>
    %4 = vector.broadcast %3 : vector<1x32xf32> to vector<16x32xf32>
    %5 = arith.addf %2, %4 : vector<16x32xf32>
    %cst_4 = arith.constant 0.000000e+00 : f32
    %6 = vector.broadcast %cst_4 : f32 to vector<16x32xf32>
    %7 = arith.maximumf %5, %6 : vector<16x32xf32>
    %c16 = arith.constant 16 : index
    %c0_5 = arith.constant 0 : index
    %8 = vector.load %arg1[%c16, %c0_5] : memref<696x128xf32, #tpu.memory_space<vmem>>, vector<32x96xf32>
    %cst_6 = arith.constant dense<0.000000e+00> : vector<16x96xf32>
    %9 = tpu.matmul %7, %8, %cst_6 {dimension_numbers = #tpu.dot_dimension_numbers<[1], [0], [0], [1], [0, 0, 1, 1], [], []>} : vector<16x32xf32>, vector<32x96xf32>, vector<16x96xf32> -> vector<16x96xf32>
    %c88 = arith.constant 88 : index
    %c0_7 = arith.constant 0 : index
    %10 = vector.load %arg1[%c88, %c0_7] : memref<696x128xf32, #tpu.memory_space<vmem>>, vector<1x96xf32>
    %11 = vector.broadcast %10 : vector<1x96xf32> to vector<16x96xf32>
    %12 = arith.addf %9, %11 : vector<16x96xf32>
    %c0_8 = arith.constant 0 : index
    %c0_9 = arith.constant 0 : index
    %13 = vector.load %arg4[%c0_8, %c0_9] : memref<16x96xf32, #tpu.memory_space<vmem>>, vector<16x96xf32>
    tpu.vector_store %arg4[%c0_8, %c0_9], %12 {strides = array<i32>} : memref<16x96xf32, #tpu.memory_space<vmem>>, vector<16x96xf32>,
    %c48 = arith.constant 48 : index
    %c0_10 = arith.constant 0 : index
    %14 = vector.load %arg1[%c48, %c0_10] : memref<696x128xf32, #tpu.memory_space<vmem>>, vector<8x96xf32>
    %c56 = arith.constant 56 : index
    %c0_11 = arith.constant 0 : index
    %15 = vector.load %arg1[%c56, %c0_11] : memref<696x128xf32, #tpu.memory_space<vmem>>, vector<32x96xf32>
    %c96 = arith.constant 96 : index
    %c0_12 = arith.constant 0 : index
    %16 = vector.load %arg1[%c96, %c0_12] : memref<696x128xf32, #tpu.memory_space<vmem>>, vector<1x96xf32>
    %c104 = arith.constant 104 : index
    %c0_13 = arith.constant 0 : index
    %17 = vector.load %arg1[%c104, %c0_13] : memref<696x128xf32, #tpu.memory_space<vmem>>, vector<32x8xf32>
    %c136 = arith.constant 136 : index
    %c0_14 = arith.constant 0 : index
    %18 = vector.load %arg1[%c136, %c0_14] : memref<696x128xf32, #tpu.memory_space<vmem>>, vector<1x8xf32>
    %c144 = arith.constant 144 : index
    %c0_15 = arith.constant 0 : index
    %19 = vector.load %arg1[%c144, %c0_15] : memref<696x128xf32, #tpu.memory_space<vmem>>, vector<8x24xf32>
    %c152 = arith.constant 152 : index
    %c0_16 = arith.constant 0 : index
    %20 = vector.load %arg1[%c152, %c0_16] : memref<696x128xf32, #tpu.memory_space<vmem>>, vector<8x24xf32>
    %c160 = arith.constant 160 : index
    %c0_17 = arith.constant 0 : index
    %21 = vector.load %arg1[%c160, %c0_17] : memref<696x128xf32, #tpu.memory_space<vmem>>, vector<1x24xf32>
    %c168 = arith.constant 168 : index
    %c0_18 = arith.constant 0 : index
    %22 = vector.load %arg1[%c168, %c0_18] : memref<696x128xf32, #tpu.memory_space<vmem>>, vector<1x24xf32>
    %c176 = arith.constant 176 : index
    %c0_19 = arith.constant 0 : index
    %23 = vector.load %arg1[%c176, %c0_19] : memref<696x128xf32, #tpu.memory_space<vmem>>, vector<8x8xf32>
    %c184 = arith.constant 184 : index
    %c0_20 = arith.constant 0 : index
    %24 = vector.load %arg1[%c184, %c0_20] : memref<696x128xf32, #tpu.memory_space<vmem>>, vector<1x8xf32>
    %c192 = arith.constant 192 : index
    %c0_21 = arith.constant 0 : index
    %25 = vector.load %arg1[%c192, %c0_21] : memref<696x128xf32, #tpu.memory_space<vmem>>, vector<32x32xf32>
    %c224 = arith.constant 224 : index
    %c0_22 = arith.constant 0 : index
    %26 = vector.load %arg1[%c224, %c0_22] : memref<696x128xf32, #tpu.memory_space<vmem>>, vector<1x32xf32>
    %c232 = arith.constant 232 : index
    %c0_23 = arith.constant 0 : index
    %27 = vector.load %arg1[%c232, %c0_23] : memref<696x128xf32, #tpu.memory_space<vmem>>, vector<32x4xf32>
    %c264 = arith.constant 264 : index
    %c0_24 = arith.constant 0 : index
    %28 = vector.load %arg1[%c264, %c0_24] : memref<696x128xf32, #tpu.memory_space<vmem>>, vector<1x1xf32>
    %cst_25 = arith.constant 0.000000e+00 : f32
    %29 = vector.broadcast %cst_25 : f32 to vector<2x8xf32>
    %cst_26 = arith.constant 0.000000e+00 : f32
    %30 = vector.broadcast %cst_26 : f32 to vector<2x32xf32>
    %c0_27 = arith.constant 0 : index
    %c0_28 = arith.constant 0 : index
    %31 = vector.load %arg4[%c0_27, %c0_28] : memref<16x96xf32, #tpu.memory_space<vmem>>, vector<2x96xf32>
    %cst_29 = arith.constant dense<0.000000e+00> : vector<2x96xf32>
    %32 = tpu.matmul %29, %14, %cst_29 {dimension_numbers = #tpu.dot_dimension_numbers<[1], [0], [0], [1], [0, 0, 1, 1], [], []>} : vector<2x8xf32>, vector<8x96xf32>, vector<2x96xf32> -> vector<2x96xf32>
    %33 = arith.addf %31, %32 : vector<2x96xf32>
    %cst_30 = arith.constant dense<0.000000e+00> : vector<2x96xf32>
    %34 = tpu.matmul %30, %15, %cst_30 {dimension_numbers = #tpu.dot_dimension_numbers<[1], [0], [0], [1], [0, 0, 1, 1], [], []>} : vector<2x32xf32>, vector<32x96xf32>, vector<2x96xf32> -> vector<2x96xf32>
    %35 = vector.broadcast %16 : vector<1x96xf32> to vector<2x96xf32>
    %36 = arith.addf %34, %35 : vector<2x96xf32>
    %37 = vector.extract_strided_slice %33 {offsets = [0, 0], sizes = [2, 32], strides = [1, 1]} : vector<2x96xf32> to vector<2x32xf32>
    %38 = vector.extract_strided_slice %36 {offsets = [0, 0], sizes = [2, 32], strides = [1, 1]} : vector<2x96xf32> to vector<2x32xf32>
    %39 = arith.addf %37, %38 : vector<2x32xf32>
    %40 = arith.negf %39 : vector<2x32xf32>
    %41 = math.exp %40 : vector<2x32xf32>
    %cst_31 = arith.constant 1.000000e+00 : f32
    %42 = vector.broadcast %cst_31 : f32 to vector<2x32xf32>
    %43 = arith.addf %42, %41 : vector<2x32xf32>
    %44 = arith.divf %42, %43 : vector<2x32xf32>
    %45 = vector.extract_strided_slice %33 {offsets = [0, 32], sizes = [2, 32], strides = [1, 1]} : vector<2x96xf32> to vector<2x32xf32>
    %46 = vector.extract_strided_slice %36 {offsets = [0, 32], sizes = [2, 32], strides = [1, 1]} : vector<2x96xf32> to vector<2x32xf32>
    %47 = arith.addf %45, %46 : vector<2x32xf32>
    %48 = arith.negf %47 : vector<2x32xf32>
    %49 = math.exp %48 : vector<2x32xf32>
    %cst_32 = arith.constant 1.000000e+00 : f32
    %50 = vector.broadcast %cst_32 : f32 to vector<2x32xf32>
    %51 = arith.addf %50, %49 : vector<2x32xf32>
    %52 = arith.divf %50, %51 : vector<2x32xf32>
    %53 = vector.extract_strided_slice %33 {offsets = [0, 64], sizes = [2, 32], strides = [1, 1]} : vector<2x96xf32> to vector<2x32xf32>
    %54 = vector.extract_strided_slice %36 {offsets = [0, 64], sizes = [2, 32], strides = [1, 1]} : vector<2x96xf32> to vector<2x32xf32>
    %55 = arith.mulf %44, %54 : vector<2x32xf32>
    %56 = arith.addf %53, %55 : vector<2x32xf32>
    %57 = math.tanh %56 : vector<2x32xf32>
    %cst_33 = arith.constant 1.000000e+00 : f32
    %58 = vector.broadcast %cst_33 : f32 to vector<2x32xf32>
    %59 = arith.subf %58, %52 : vector<2x32xf32>
    %60 = arith.mulf %59, %57 : vector<2x32xf32>
    %61 = arith.mulf %52, %30 : vector<2x32xf32>
    %62 = arith.addf %60, %61 : vector<2x32xf32>
    %c0_34 = arith.constant 0 : index
    %c0_35 = arith.constant 0 : index
    %63 = vector.load %arg5[%c0_34, %c0_35] : memref<16x32xf32, #tpu.memory_space<vmem>>, vector<2x32xf32>
    tpu.vector_store %arg5[%c0_34, %c0_35], %62 {strides = array<i32>} : memref<16x32xf32, #tpu.memory_space<vmem>>, vector<2x32xf32>,
    %cst_36 = arith.constant dense<0.000000e+00> : vector<2x8xf32>
    %64 = tpu.matmul %62, %17, %cst_36 {dimension_numbers = #tpu.dot_dimension_numbers<[1], [0], [0], [1], [0, 0, 1, 1], [], []>} : vector<2x32xf32>, vector<32x8xf32>, vector<2x8xf32> -> vector<2x8xf32>
    %65 = vector.broadcast %18 : vector<1x8xf32> to vector<2x8xf32>
    %66 = arith.addf %64, %65 : vector<2x8xf32>
    %cst_37 = arith.constant 0.000000e+00 : f32
    %67 = vector.broadcast %cst_37 : f32 to vector<2x8xf32>
    %68 = arith.maximumf %66, %67 : vector<2x8xf32>
    %cst_38 = arith.constant 0.000000e+00 : f32
    %69 = vector.broadcast %cst_38 : f32 to vector<2x8xf32>
    %cst_39 = arith.constant dense<0.000000e+00> : vector<2x24xf32>
    %70 = tpu.matmul %69, %19, %cst_39 {dimension_numbers = #tpu.dot_dimension_numbers<[1], [0], [0], [1], [0, 0, 1, 1], [], []>} : vector<2x8xf32>, vector<8x24xf32>, vector<2x24xf32> -> vector<2x24xf32>
    %71 = vector.broadcast %21 : vector<1x24xf32> to vector<2x24xf32>
    %72 = arith.addf %70, %71 : vector<2x24xf32>
    %cst_40 = arith.constant dense<0.000000e+00> : vector<2x24xf32>
    %73 = tpu.matmul %68, %20, %cst_40 {dimension_numbers = #tpu.dot_dimension_numbers<[1], [0], [0], [1], [0, 0, 1, 1], [], []>} : vector<2x8xf32>, vector<8x24xf32>, vector<2x24xf32> -> vector<2x24xf32>
    %74 = vector.broadcast %22 : vector<1x24xf32> to vector<2x24xf32>
    %75 = arith.addf %73, %74 : vector<2x24xf32>
    %76 = vector.extract_strided_slice %72 {offsets = [0, 0], sizes = [2, 8], strides = [1, 1]} : vector<2x24xf32> to vector<2x8xf32>
    %77 = vector.extract_strided_slice %75 {offsets = [0, 0], sizes = [2, 8], strides = [1, 1]} : vector<2x24xf32> to vector<2x8xf32>
    %78 = arith.addf %76, %77 : vector<2x8xf32>
    %79 = arith.negf %78 : vector<2x8xf32>
    %80 = math.exp %79 : vector<2x8xf32>
    %cst_41 = arith.constant 1.000000e+00 : f32
    %81 = vector.broadcast %cst_41 : f32 to vector<2x8xf32>
    %82 = arith.addf %81, %80 : vector<2x8xf32>
    %83 = arith.divf %81, %82 : vector<2x8xf32>
    %84 = vector.extract_strided_slice %72 {offsets = [0, 8], sizes = [2, 8], strides = [1, 1]} : vector<2x24xf32> to vector<2x8xf32>
    %85 = vector.extract_strided_slice %75 {offsets = [0, 8], sizes = [2, 8], strides = [1, 1]} : vector<2x24xf32> to vector<2x8xf32>
    %86 = arith.addf %84, %85 : vector<2x8xf32>
    %87 = arith.negf %86 : vector<2x8xf32>
    %88 = math.exp %87 : vector<2x8xf32>
    %cst_42 = arith.constant 1.000000e+00 : f32
    %89 = vector.broadcast %cst_42 : f32 to vector<2x8xf32>
    %90 = arith.addf %89, %88 : vector<2x8xf32>
    %91 = arith.divf %89, %90 : vector<2x8xf32>
    %92 = vector.extract_strided_slice %72 {offsets = [0, 16], sizes = [2, 8], strides = [1, 1]} : vector<2x24xf32> to vector<2x8xf32>
    %93 = vector.extract_strided_slice %75 {offsets = [0, 16], sizes = [2, 8], strides = [1, 1]} : vector<2x24xf32> to vector<2x8xf32>
    %94 = arith.mulf %83, %93 : vector<2x8xf32>
    %95 = arith.addf %92, %94 : vector<2x8xf32>
    %96 = math.tanh %95 : vector<2x8xf32>
    %cst_43 = arith.constant 1.000000e+00 : f32
    %97 = vector.broadcast %cst_43 : f32 to vector<2x8xf32>
    %98 = arith.subf %97, %91 : vector<2x8xf32>
    %99 = arith.mulf %98, %96 : vector<2x8xf32>
    %100 = arith.mulf %91, %68 : vector<2x8xf32>
    %101 = arith.addf %99, %100 : vector<2x8xf32>
    %cst_44 = arith.constant dense<0.000000e+00> : vector<2x8xf32>
    %102 = tpu.matmul %101, %23, %cst_44 {dimension_numbers = #tpu.dot_dimension_numbers<[1], [0], [0], [1], [0, 0, 1, 1], [], []>} : vector<2x8xf32>, vector<8x8xf32>, vector<2x8xf32> -> vector<2x8xf32>
    %103 = vector.broadcast %24 : vector<1x8xf32> to vector<2x8xf32>
    %104 = arith.addf %102, %103 : vector<2x8xf32>
    %cst_45 = arith.constant 0.000000e+00 : f32
    %105 = vector.broadcast %cst_45 : f32 to vector<2x8xf32>
    %106 = arith.maximumf %104, %105 : vector<2x8xf32>
    %cst_46 = arith.constant dense<0.000000e+00> : vector<2x24xf32>
    %107 = tpu.matmul %106, %19, %cst_46 {dimension_numbers = #tpu.dot_dimension_numbers<[1], [0], [0], [1], [0, 0, 1, 1], [], []>} : vector<2x8xf32>, vector<8x24xf32>, vector<2x24xf32> -> vector<2x24xf32>
    %108 = vector.broadcast %21 : vector<1x24xf32> to vector<2x24xf32>
    %109 = arith.addf %107, %108 : vector<2x24xf32>
    %cst_47 = arith.constant dense<0.000000e+00> : vector<2x24xf32>
    %110 = tpu.matmul %101, %20, %cst_47 {dimension_numbers = #tpu.dot_dimension_numbers<[1], [0], [0], [1], [0, 0, 1, 1], [], []>} : vector<2x8xf32>, vector<8x24xf32>, vector<2x24xf32> -> vector<2x24xf32>
    %111 = vector.broadcast %22 : vector<1x24xf32> to vector<2x24xf32>
    %112 = arith.addf %110, %111 : vector<2x24xf32>
    %113 = vector.extract_strided_slice %109 {offsets = [0, 0], sizes = [2, 8], strides = [1, 1]} : vector<2x24xf32> to vector<2x8xf32>
    %114 = vector.extract_strided_slice %112 {offsets = [0, 0], sizes = [2, 8], strides = [1, 1]} : vector<2x24xf32> to vector<2x8xf32>
    %115 = arith.addf %113, %114 : vector<2x8xf32>
    %116 = arith.negf %115 : vector<2x8xf32>
    %117 = math.exp %116 : vector<2x8xf32>
    %cst_48 = arith.constant 1.000000e+00 : f32
    %118 = vector.broadcast %cst_48 : f32 to vector<2x8xf32>
    %119 = arith.addf %118, %117 : vector<2x8xf32>
    %120 = arith.divf %118, %119 : vector<2x8xf32>
    %121 = vector.extract_strided_slice %109 {offsets = [0, 8], sizes = [2, 8], strides = [1, 1]} : vector<2x24xf32> to vector<2x8xf32>
    %122 = vector.extract_strided_slice %112 {offsets = [0, 8], sizes = [2, 8], strides = [1, 1]} : vector<2x24xf32> to vector<2x8xf32>
    %123 = arith.addf %121, %122 : vector<2x8xf32>
    %124 = arith.negf %123 : vector<2x8xf32>
    %125 = math.exp %124 : vector<2x8xf32>
    %cst_49 = arith.constant 1.000000e+00 : f32
    %126 = vector.broadcast %cst_49 : f32 to vector<2x8xf32>
    %127 = arith.addf %126, %125 : vector<2x8xf32>
    %128 = arith.divf %126, %127 : vector<2x8xf32>
    %129 = vector.extract_strided_slice %109 {offsets = [0, 16], sizes = [2, 8], strides = [1, 1]} : vector<2x24xf32> to vector<2x8xf32>
    %130 = vector.extract_strided_slice %112 {offsets = [0, 16], sizes = [2, 8], strides = [1, 1]} : vector<2x24xf32> to vector<2x8xf32>
    %131 = arith.mulf %120, %130 : vector<2x8xf32>
    %132 = arith.addf %129, %131 : vector<2x8xf32>
    %133 = math.tanh %132 : vector<2x8xf32>
    %cst_50 = arith.constant 1.000000e+00 : f32
    %134 = vector.broadcast %cst_50 : f32 to vector<2x8xf32>
    %135 = arith.subf %134, %128 : vector<2x8xf32>
    %136 = arith.mulf %135, %133 : vector<2x8xf32>
    %137 = arith.mulf %128, %101 : vector<2x8xf32>
    %138 = arith.addf %136, %137 : vector<2x8xf32>
    %cst_51 = arith.constant dense<0.000000e+00> : vector<2x8xf32>
    %139 = tpu.matmul %138, %23, %cst_51 {dimension_numbers = #tpu.dot_dimension_numbers<[1], [0], [0], [1], [0, 0, 1, 1], [], []>} : vector<2x8xf32>, vector<8x8xf32>, vector<2x8xf32> -> vector<2x8xf32>
    %140 = vector.broadcast %24 : vector<1x8xf32> to vector<2x8xf32>
    %141 = arith.addf %139, %140 : vector<2x8xf32>
    %cst_52 = arith.constant 0.000000e+00 : f32
    %142 = vector.broadcast %cst_52 : f32 to vector<2x8xf32>
    %143 = arith.maximumf %141, %142 : vector<2x8xf32>
    %cst_53 = arith.constant dense<0.000000e+00> : vector<2x24xf32>
    %144 = tpu.matmul %143, %19, %cst_53 {dimension_numbers = #tpu.dot_dimension_numbers<[1], [0], [0], [1], [0, 0, 1, 1], [], []>} : vector<2x8xf32>, vector<8x24xf32>, vector<2x24xf32> -> vector<2x24xf32>
    %145 = vector.broadcast %21 : vector<1x24xf32> to vector<2x24xf32>
    %146 = arith.addf %144, %145 : vector<2x24xf32>
    %cst_54 = arith.constant dense<0.000000e+00> : vector<2x24xf32>
    %147 = tpu.matmul %138, %20, %cst_54 {dimension_numbers = #tpu.dot_dimension_numbers<[1], [0], [0], [1], [0, 0, 1, 1], [], []>} : vector<2x8xf32>, vector<8x24xf32>, vector<2x24xf32> -> vector<2x24xf32>
    %148 = vector.broadcast %22 : vector<1x24xf32> to vector<2x24xf32>
    %149 = arith.addf %147, %148 : vector<2x24xf32>
    %150 = vector.extract_strided_slice %146 {offsets = [0, 0], sizes = [2, 8], strides = [1, 1]} : vector<2x24xf32> to vector<2x8xf32>
    %151 = vector.extract_strided_slice %149 {offsets = [0, 0], sizes = [2, 8], strides = [1, 1]} : vector<2x24xf32> to vector<2x8xf32>
    %152 = arith.addf %150, %151 : vector<2x8xf32>
    %153 = arith.negf %152 : vector<2x8xf32>
    %154 = math.exp %153 : vector<2x8xf32>
    %cst_55 = arith.constant 1.000000e+00 : f32
    %155 = vector.broadcast %cst_55 : f32 to vector<2x8xf32>
    %156 = arith.addf %155, %154 : vector<2x8xf32>
    %157 = arith.divf %155, %156 : vector<2x8xf32>
    %158 = vector.extract_strided_slice %146 {offsets = [0, 8], sizes = [2, 8], strides = [1, 1]} : vector<2x24xf32> to vector<2x8xf32>
    %159 = vector.extract_strided_slice %149 {offsets = [0, 8], sizes = [2, 8], strides = [1, 1]} : vector<2x24xf32> to vector<2x8xf32>
    %160 = arith.addf %158, %159 : vector<2x8xf32>
    %161 = arith.negf %160 : vector<2x8xf32>
    %162 = math.exp %161 : vector<2x8xf32>
    %cst_56 = arith.constant 1.000000e+00 : f32
    %163 = vector.broadcast %cst_56 : f32 to vector<2x8xf32>
    %164 = arith.addf %163, %162 : vector<2x8xf32>
    %165 = arith.divf %163, %164 : vector<2x8xf32>
    %166 = vector.extract_strided_slice %146 {offsets = [0, 16], sizes = [2, 8], strides = [1, 1]} : vector<2x24xf32> to vector<2x8xf32>
    %167 = vector.extract_strided_slice %149 {offsets = [0, 16], sizes = [2, 8], strides = [1, 1]} : vector<2x24xf32> to vector<2x8xf32>
    %168 = arith.mulf %157, %167 : vector<2x8xf32>
    %169 = arith.addf %166, %168 : vector<2x8xf32>
    %170 = math.tanh %169 : vector<2x8xf32>
    %cst_57 = arith.constant 1.000000e+00 : f32
    %171 = vector.broadcast %cst_57 : f32 to vector<2x8xf32>
    %172 = arith.subf %171, %165 : vector<2x8xf32>
    %173 = arith.mulf %172, %170 : vector<2x8xf32>
    %174 = arith.mulf %165, %138 : vector<2x8xf32>
    %175 = arith.addf %173, %174 : vector<2x8xf32>
    %cst_58 = arith.constant dense<0.000000e+00> : vector<2x8xf32>
    %176 = tpu.matmul %175, %23, %cst_58 {dimension_numbers = #tpu.dot_dimension_numbers<[1], [0], [0], [1], [0, 0, 1, 1], [], []>} : vector<2x8xf32>, vector<8x8xf32>, vector<2x8xf32> -> vector<2x8xf32>
    %177 = vector.broadcast %24 : vector<1x8xf32> to vector<2x8xf32>
    %178 = arith.addf %176, %177 : vector<2x8xf32>
    %cst_59 = arith.constant 0.000000e+00 : f32
    %179 = vector.broadcast %cst_59 : f32 to vector<2x8xf32>
    %180 = arith.maximumf %178, %179 : vector<2x8xf32>
    %cst_60 = arith.constant dense<0.000000e+00> : vector<2x24xf32>
    %181 = tpu.matmul %180, %19, %cst_60 {dimension_numbers = #tpu.dot_dimension_numbers<[1], [0], [0], [1], [0, 0, 1, 1], [], []>} : vector<2x8xf32>, vector<8x24xf32>, vector<2x24xf32> -> vector<2x24xf32>
    %182 = vector.broadcast %21 : vector<1x24xf32> to vector<2x24xf32>
    %183 = arith.addf %181, %182 : vector<2x24xf32>
    %cst_61 = arith.constant dense<0.000000e+00> : vector<2x24xf32>
    %184 = tpu.matmul %175, %20, %cst_61 {dimension_numbers = #tpu.dot_dimension_numbers<[1], [0], [0], [1], [0, 0, 1, 1], [], []>} : vector<2x8xf32>, vector<8x24xf32>, vector<2x24xf32> -> vector<2x24xf32>
    %185 = vector.broadcast %22 : vector<1x24xf32> to vector<2x24xf32>
    %186 = arith.addf %184, %185 : vector<2x24xf32>
    %187 = vector.extract_strided_slice %183 {offsets = [0, 0], sizes = [2, 8], strides = [1, 1]} : vector<2x24xf32> to vector<2x8xf32>
    %188 = vector.extract_strided_slice %186 {offsets = [0, 0], sizes = [2, 8], strides = [1, 1]} : vector<2x24xf32> to vector<2x8xf32>
    %189 = arith.addf %187, %188 : vector<2x8xf32>
    %190 = arith.negf %189 : vector<2x8xf32>
    %191 = math.exp %190 : vector<2x8xf32>
    %cst_62 = arith.constant 1.000000e+00 : f32
    %192 = vector.broadcast %cst_62 : f32 to vector<2x8xf32>
    %193 = arith.addf %192, %191 : vector<2x8xf32>
    %194 = arith.divf %192, %193 : vector<2x8xf32>
    %195 = vector.extract_strided_slice %183 {offsets = [0, 8], sizes = [2, 8], strides = [1, 1]} : vector<2x24xf32> to vector<2x8xf32>
    %196 = vector.extract_strided_slice %186 {offsets = [0, 8], sizes = [2, 8], strides = [1, 1]} : vector<2x24xf32> to vector<2x8xf32>
    %197 = arith.addf %195, %196 : vector<2x8xf32>
    %198 = arith.negf %197 : vector<2x8xf32>
    %199 = math.exp %198 : vector<2x8xf32>
    %cst_63 = arith.constant 1.000000e+00 : f32
    %200 = vector.broadcast %cst_63 : f32 to vector<2x8xf32>
    %201 = arith.addf %200, %199 : vector<2x8xf32>
    %202 = arith.divf %200, %201 : vector<2x8xf32>
    %203 = vector.extract_strided_slice %183 {offsets = [0, 16], sizes = [2, 8], strides = [1, 1]} : vector<2x24xf32> to vector<2x8xf32>
    %204 = vector.extract_strided_slice %186 {offsets = [0, 16], sizes = [2, 8], strides = [1, 1]} : vector<2x24xf32> to vector<2x8xf32>
    %205 = arith.mulf %194, %204 : vector<2x8xf32>
    %206 = arith.addf %203, %205 : vector<2x8xf32>
    %207 = math.tanh %206 : vector<2x8xf32>
    %cst_64 = arith.constant 1.000000e+00 : f32
    %208 = vector.broadcast %cst_64 : f32 to vector<2x8xf32>
    %209 = arith.subf %208, %202 : vector<2x8xf32>
    %210 = arith.mulf %209, %207 : vector<2x8xf32>
    %211 = arith.mulf %202, %175 : vector<2x8xf32>
    %212 = arith.addf %210, %211 : vector<2x8xf32>
    %213 = tpu.concatenate %101, %138, %175, %212 in 1 : vector<2x8xf32>, vector<2x8xf32>, vector<2x8xf32>, vector<2x8xf32> -> vector<2x32xf32>
    %c0_65 = arith.constant 0 : index
    %c0_66 = arith.constant 0 : index
    %214 = vector.load %arg6[%c0_65, %c0_66] : memref<16x32xf32, #tpu.memory_space<vmem>>, vector<2x32xf32>
    tpu.vector_store %arg6[%c0_65, %c0_66], %213 {strides = array<i32>} : memref<16x32xf32, #tpu.memory_space<vmem>>, vector<2x32xf32>,
    %cst_67 = arith.constant dense<0.000000e+00> : vector<2x32xf32>
    %215 = tpu.matmul %213, %25, %cst_67 {dimension_numbers = #tpu.dot_dimension_numbers<[1], [0], [0], [1], [0, 0, 1, 1], [], []>} : vector<2x32xf32>, vector<32x32xf32>, vector<2x32xf32> -> vector<2x32xf32>
    %216 = vector.broadcast %26 : vector<1x32xf32> to vector<2x32xf32>
    %217 = arith.addf %215, %216 : vector<2x32xf32>
    %cst_68 = arith.constant 0.000000e+00 : f32
    %218 = vector.broadcast %cst_68 : f32 to vector<2x32xf32>
    %219 = arith.maximumf %217, %218 : vector<2x32xf32>
    %220 = math.tanh %219 : vector<2x32xf32>
    %cst_69 = arith.constant dense<0.000000e+00> : vector<2x4xf32>
    %221 = tpu.matmul %220, %27, %cst_69 {dimension_numbers = #tpu.dot_dimension_numbers<[1], [0], [0], [1], [0, 0, 1, 1], [], []>} : vector<2x32xf32>, vector<32x4xf32>, vector<2x4xf32> -> vector<2x4xf32>
    %222 = vector.broadcast %28 : vector<1x1xf32> to vector<2x4xf32>
    %223 = arith.addf %221, %222 : vector<2x4xf32>
    %cst_70 = arith.constant 0.000000e+00 : f32
    %224 = vector.broadcast %cst_70 : f32 to vector<2x4xf32>
    %225 = arith.maximumf %223, %224 : vector<2x4xf32>
    %cst_71 = arith.constant dense<0xFF800000> : vector<2xf32>
    %226 = vector.multi_reduction <maximumf>, %225, %cst_71 [1] : vector<2x4xf32> to vector<2xf32>
    %227 = vector.shape_cast %226 : vector<2xf32> to vector<2x1xf32>
    %228 = vector.broadcast %227 : vector<2x1xf32> to vector<2x4xf32>
    %229 = arith.subf %225, %228 : vector<2x4xf32>
    %230 = math.exp %229 : vector<2x4xf32>
    %cst_72 = arith.constant dense<0.000000e+00> : vector<2xf32>
    %231 = vector.multi_reduction <add>, %230, %cst_72 [1] : vector<2x4xf32> to vector<2xf32>
    %232 = vector.shape_cast %231 : vector<2xf32> to vector<2x1xf32>
    %233 = vector.broadcast %232 : vector<2x1xf32> to vector<2x4xf32>
    %234 = arith.divf %230, %233 : vector<2x4xf32>
    %235 = vector.extract_strided_slice %234 {offsets = [0, 0], sizes = [2, 1], strides = [1, 1]} : vector<2x4xf32> to vector<2x1xf32>
    %236 = vector.extract_strided_slice %219 {offsets = [0, 0], sizes = [2, 8], strides = [1, 1]} : vector<2x32xf32> to vector<2x8xf32>
    %237 = vector.broadcast %235 : vector<2x1xf32> to vector<2x8xf32>
    %238 = arith.mulf %237, %236 : vector<2x8xf32>
    %cst_73 = arith.constant 0.000000e+00 : f32
    %239 = vector.broadcast %cst_73 : f32 to vector<2x8xf32>
    %240 = arith.addf %239, %238 : vector<2x8xf32>
    %241 = vector.extract_strided_slice %234 {offsets = [0, 1], sizes = [2, 1], strides = [1, 1]} : vector<2x4xf32> to vector<2x1xf32>
    %242 = vector.extract_strided_slice %219 {offsets = [0, 8], sizes = [2, 8], strides = [1, 1]} : vector<2x32xf32> to vector<2x8xf32>
    %243 = vector.broadcast %241 : vector<2x1xf32> to vector<2x8xf32>
    %244 = arith.mulf %243, %242 : vector<2x8xf32>
    %245 = arith.addf %240, %244 : vector<2x8xf32>
    %246 = vector.extract_strided_slice %234 {offsets = [0, 2], sizes = [2, 1], strides = [1, 1]} : vector<2x4xf32> to vector<2x1xf32>
    %247 = vector.extract_strided_slice %219 {offsets = [0, 16], sizes = [2, 8], strides = [1, 1]} : vector<2x32xf32> to vector<2x8xf32>
    %248 = vector.broadcast %246 : vector<2x1xf32> to vector<2x8xf32>
    %249 = arith.mulf %248, %247 : vector<2x8xf32>
    %250 = arith.addf %245, %249 : vector<2x8xf32>
    %251 = vector.extract_strided_slice %234 {offsets = [0, 3], sizes = [2, 1], strides = [1, 1]} : vector<2x4xf32> to vector<2x1xf32>
    %252 = vector.extract_strided_slice %219 {offsets = [0, 24], sizes = [2, 8], strides = [1, 1]} : vector<2x32xf32> to vector<2x8xf32>
    %253 = vector.broadcast %251 : vector<2x1xf32> to vector<2x8xf32>
    %254 = arith.mulf %253, %252 : vector<2x8xf32>
    %255 = arith.addf %250, %254 : vector<2x8xf32>
    %c2 = arith.constant 2 : index
    %c0_74 = arith.constant 0 : index
    %256 = vector.load %arg4[%c2, %c0_74] : memref<16x96xf32, #tpu.memory_space<vmem>>, vector<2x96xf32>
    %cst_75 = arith.constant dense<0.000000e+00> : vector<2x96xf32>
    %257 = tpu.matmul %255, %14, %cst_75 {dimension_numbers = #tpu.dot_dimension_numbers<[1], [0], [0], [1], [0, 0, 1, 1], [], []>} : vector<2x8xf32>, vector<8x96xf32>, vector<2x96xf32> -> vector<2x96xf32>
    %258 = arith.addf %256, %257 : vector<2x96xf32>
    %cst_76 = arith.constant dense<0.000000e+00> : vector<2x96xf32>
    %259 = tpu.matmul %62, %15, %cst_76 {dimension_numbers = #tpu.dot_dimension_numbers<[1], [0], [0], [1], [0, 0, 1, 1], [], []>} : vector<2x32xf32>, vector<32x96xf32>, vector<2x96xf32> -> vector<2x96xf32>
    %260 = vector.broadcast %16 : vector<1x96xf32> to vector<2x96xf32>
    %261 = arith.addf %259, %260 : vector<2x96xf32>
    %262 = vector.extract_strided_slice %258 {offsets = [0, 0], sizes = [2, 32], strides = [1, 1]} : vector<2x96xf32> to vector<2x32xf32>
    %263 = vector.extract_strided_slice %261 {offsets = [0, 0], sizes = [2, 32], strides = [1, 1]} : vector<2x96xf32> to vector<2x32xf32>
    %264 = arith.addf %262, %263 : vector<2x32xf32>
    %265 = arith.negf %264 : vector<2x32xf32>
    %266 = math.exp %265 : vector<2x32xf32>
    %cst_77 = arith.constant 1.000000e+00 : f32
    %267 = vector.broadcast %cst_77 : f32 to vector<2x32xf32>
    %268 = arith.addf %267, %266 : vector<2x32xf32>
    %269 = arith.divf %267, %268 : vector<2x32xf32>
    %270 = vector.extract_strided_slice %258 {offsets = [0, 32], sizes = [2, 32], strides = [1, 1]} : vector<2x96xf32> to vector<2x32xf32>
    %271 = vector.extract_strided_slice %261 {offsets = [0, 32], sizes = [2, 32], strides = [1, 1]} : vector<2x96xf32> to vector<2x32xf32>
    %272 = arith.addf %270, %271 : vector<2x32xf32>
    %273 = arith.negf %272 : vector<2x32xf32>
    %274 = math.exp %273 : vector<2x32xf32>
    %cst_78 = arith.constant 1.000000e+00 : f32
    %275 = vector.broadcast %cst_78 : f32 to vector<2x32xf32>
    %276 = arith.addf %275, %274 : vector<2x32xf32>
    %277 = arith.divf %275, %276 : vector<2x32xf32>
    %278 = vector.extract_strided_slice %258 {offsets = [0, 64], sizes = [2, 32], strides = [1, 1]} : vector<2x96xf32> to vector<2x32xf32>
    %279 = vector.extract_strided_slice %261 {offsets = [0, 64], sizes = [2, 32], strides = [1, 1]} : vector<2x96xf32> to vector<2x32xf32>
    %280 = arith.mulf %269, %279 : vector<2x32xf32>
    %281 = arith.addf %278, %280 : vector<2x32xf32>
    %282 = math.tanh %281 : vector<2x32xf32>
    %cst_79 = arith.constant 1.000000e+00 : f32
    %283 = vector.broadcast %cst_79 : f32 to vector<2x32xf32>
    %284 = arith.subf %283, %277 : vector<2x32xf32>
    %285 = arith.mulf %284, %282 : vector<2x32xf32>
    %286 = arith.mulf %277, %62 : vector<2x32xf32>
    %287 = arith.addf %285, %286 : vector<2x32xf32>
    %c2_80 = arith.constant 2 : index
    %c0_81 = arith.constant 0 : index
    %288 = vector.load %arg5[%c2_80, %c0_81] : memref<16x32xf32, #tpu.memory_space<vmem>>, vector<2x32xf32>
    tpu.vector_store %arg5[%c2_80, %c0_81], %287 {strides = array<i32>} : memref<16x32xf32, #tpu.memory_space<vmem>>, vector<2x32xf32>,
    %cst_82 = arith.constant dense<0.000000e+00> : vector<2x8xf32>
    %289 = tpu.matmul %287, %17, %cst_82 {dimension_numbers = #tpu.dot_dimension_numbers<[1], [0], [0], [1], [0, 0, 1, 1], [], []>} : vector<2x32xf32>, vector<32x8xf32>, vector<2x8xf32> -> vector<2x8xf32>
    %290 = vector.broadcast %18 : vector<1x8xf32> to vector<2x8xf32>
    %291 = arith.addf %289, %290 : vector<2x8xf32>
    %cst_83 = arith.constant 0.000000e+00 : f32
    %292 = vector.broadcast %cst_83 : f32 to vector<2x8xf32>
    %293 = arith.maximumf %291, %292 : vector<2x8xf32>
    %cst_84 = arith.constant 0.000000e+00 : f32
    %294 = vector.broadcast %cst_84 : f32 to vector<2x8xf32>
    %cst_85 = arith.constant dense<0.000000e+00> : vector<2x24xf32>
    %295 = tpu.matmul %294, %19, %cst_85 {dimension_numbers = #tpu.dot_dimension_numbers<[1], [0], [0], [1], [0, 0, 1, 1], [], []>} : vector<2x8xf32>, vector<8x24xf32>, vector<2x24xf32> -> vector<2x24xf32>
    %296 = vector.broadcast %21 : vector<1x24xf32> to vector<2x24xf32>
    %297 = arith.addf %295, %296 : vector<2x24xf32>
    %cst_86 = arith.constant dense<0.000000e+00> : vector<2x24xf32>
    %298 = tpu.matmul %293, %20, %cst_86 {dimension_numbers = #tpu.dot_dimension_numbers<[1], [0], [0], [1], [0, 0, 1, 1], [], []>} : vector<2x8xf32>, vector<8x24xf32>, vector<2x24xf32> -> vector<2x24xf32>
    %299 = vector.broadcast %22 : vector<1x24xf32> to vector<2x24xf32>
    %300 = arith.addf %298, %299 : vector<2x24xf32>
    %301 = vector.extract_strided_slice %297 {offsets = [0, 0], sizes = [2, 8], strides = [1, 1]} : vector<2x24xf32> to vector<2x8xf32>
    %302 = vector.extract_strided_slice %300 {offsets = [0, 0], sizes = [2, 8], strides = [1, 1]} : vector<2x24xf32> to vector<2x8xf32>
    %303 = arith.addf %301, %302 : vector<2x8xf32>
    %304 = arith.negf %303 : vector<2x8xf32>
    %305 = math.exp %304 : vector<2x8xf32>
    %cst_87 = arith.constant 1.000000e+00 : f32
    %306 = vector.broadcast %cst_87 : f32 to vector<2x8xf32>
    %307 = arith.addf %306, %305 : vector<2x8xf32>
    %308 = arith.divf %306, %307 : vector<2x8xf32>
    %309 = vector.extract_strided_slice %297 {offsets = [0, 8], sizes = [2, 8], strides = [1, 1]} : vector<2x24xf32> to vector<2x8xf32>
    %310 = vector.extract_strided_slice %300 {offsets = [0, 8], sizes = [2, 8], strides = [1, 1]} : vector<2x24xf32> to vector<2x8xf32>
    %311 = arith.addf %309, %310 : vector<2x8xf32>
    %312 = arith.negf %311 : vector<2x8xf32>
    %313 = math.exp %312 : vector<2x8xf32>
    %cst_88 = arith.constant 1.000000e+00 : f32
    %314 = vector.broadcast %cst_88 : f32 to vector<2x8xf32>
    %315 = arith.addf %314, %313 : vector<2x8xf32>
    %316 = arith.divf %314, %315 : vector<2x8xf32>
    %317 = vector.extract_strided_slice %297 {offsets = [0, 16], sizes = [2, 8], strides = [1, 1]} : vector<2x24xf32> to vector<2x8xf32>
    %318 = vector.extract_strided_slice %300 {offsets = [0, 16], sizes = [2, 8], strides = [1, 1]} : vector<2x24xf32> to vector<2x8xf32>
    %319 = arith.mulf %308, %318 : vector<2x8xf32>
    %320 = arith.addf %317, %319 : vector<2x8xf32>
    %321 = math.tanh %320 : vector<2x8xf32>
    %cst_89 = arith.constant 1.000000e+00 : f32
    %322 = vector.broadcast %cst_89 : f32 to vector<2x8xf32>
    %323 = arith.subf %322, %316 : vector<2x8xf32>
    %324 = arith.mulf %323, %321 : vector<2x8xf32>
    %325 = arith.mulf %316, %293 : vector<2x8xf32>
    %326 = arith.addf %324, %325 : vector<2x8xf32>
    %cst_90 = arith.constant dense<0.000000e+00> : vector<2x8xf32>
    %327 = tpu.matmul %326, %23, %cst_90 {dimension_numbers = #tpu.dot_dimension_numbers<[1], [0], [0], [1], [0, 0, 1, 1], [], []>} : vector<2x8xf32>, vector<8x8xf32>, vector<2x8xf32> -> vector<2x8xf32>
    %328 = vector.broadcast %24 : vector<1x8xf32> to vector<2x8xf32>
    %329 = arith.addf %327, %328 : vector<2x8xf32>
    %cst_91 = arith.constant 0.000000e+00 : f32
    %330 = vector.broadcast %cst_91 : f32 to vector<2x8xf32>
    %331 = arith.maximumf %329, %330 : vector<2x8xf32>
    %cst_92 = arith.constant dense<0.000000e+00> : vector<2x24xf32>
    %332 = tpu.matmul %331, %19, %cst_92 {dimension_numbers = #tpu.dot_dimension_numbers<[1], [0], [0], [1], [0, 0, 1, 1], [], []>} : vector<2x8xf32>, vector<8x24xf32>, vector<2x24xf32> -> vector<2x24xf32>
    %333 = vector.broadcast %21 : vector<1x24xf32> to vector<2x24xf32>
    %334 = arith.addf %332, %333 : vector<2x24xf32>
    %cst_93 = arith.constant dense<0.000000e+00> : vector<2x24xf32>
    %335 = tpu.matmul %326, %20, %cst_93 {dimension_numbers = #tpu.dot_dimension_numbers<[1], [0], [0], [1], [0, 0, 1, 1], [], []>} : vector<2x8xf32>, vector<8x24xf32>, vector<2x24xf32> -> vector<2x24xf32>
    %336 = vector.broadcast %22 : vector<1x24xf32> to vector<2x24xf32>
    %337 = arith.addf %335, %336 : vector<2x24xf32>
    %338 = vector.extract_strided_slice %334 {offsets = [0, 0], sizes = [2, 8], strides = [1, 1]} : vector<2x24xf32> to vector<2x8xf32>
    %339 = vector.extract_strided_slice %337 {offsets = [0, 0], sizes = [2, 8], strides = [1, 1]} : vector<2x24xf32> to vector<2x8xf32>
    %340 = arith.addf %338, %339 : vector<2x8xf32>
    %341 = arith.negf %340 : vector<2x8xf32>
    %342 = math.exp %341 : vector<2x8xf32>
    %cst_94 = arith.constant 1.000000e+00 : f32
    %343 = vector.broadcast %cst_94 : f32 to vector<2x8xf32>
    %344 = arith.addf %343, %342 : vector<2x8xf32>
    %345 = arith.divf %343, %344 : vector<2x8xf32>
    %346 = vector.extract_strided_slice %334 {offsets = [0, 8], sizes = [2, 8], strides = [1, 1]} : vector<2x24xf32> to vector<2x8xf32>
    %347 = vector.extract_strided_slice %337 {offsets = [0, 8], sizes = [2, 8], strides = [1, 1]} : vector<2x24xf32> to vector<2x8xf32>
    %348 = arith.addf %346, %347 : vector<2x8xf32>
    %349 = arith.negf %348 : vector<2x8xf32>
    %350 = math.exp %349 : vector<2x8xf32>
    %cst_95 = arith.constant 1.000000e+00 : f32
    %351 = vector.broadcast %cst_95 : f32 to vector<2x8xf32>
    %352 = arith.addf %351, %350 : vector<2x8xf32>
    %353 = arith.divf %351, %352 : vector<2x8xf32>
    %354 = vector.extract_strided_slice %334 {offsets = [0, 16], sizes = [2, 8], strides = [1, 1]} : vector<2x24xf32> to vector<2x8xf32>
    %355 = vector.extract_strided_slice %337 {offsets = [0, 16], sizes = [2, 8], strides = [1, 1]} : vector<2x24xf32> to vector<2x8xf32>
    %356 = arith.mulf %345, %355 : vector<2x8xf32>
    %357 = arith.addf %354, %356 : vector<2x8xf32>
    %358 = math.tanh %357 : vector<2x8xf32>
    %cst_96 = arith.constant 1.000000e+00 : f32
    %359 = vector.broadcast %cst_96 : f32 to vector<2x8xf32>
    %360 = arith.subf %359, %353 : vector<2x8xf32>
    %361 = arith.mulf %360, %358 : vector<2x8xf32>
    %362 = arith.mulf %353, %326 : vector<2x8xf32>
    %363 = arith.addf %361, %362 : vector<2x8xf32>
    %cst_97 = arith.constant dense<0.000000e+00> : vector<2x8xf32>
    %364 = tpu.matmul %363, %23, %cst_97 {dimension_numbers = #tpu.dot_dimension_numbers<[1], [0], [0], [1], [0, 0, 1, 1], [], []>} : vector<2x8xf32>, vector<8x8xf32>, vector<2x8xf32> -> vector<2x8xf32>
    %365 = vector.broadcast %24 : vector<1x8xf32> to vector<2x8xf32>
    %366 = arith.addf %364, %365 : vector<2x8xf32>
    %cst_98 = arith.constant 0.000000e+00 : f32
    %367 = vector.broadcast %cst_98 : f32 to vector<2x8xf32>
    %368 = arith.maximumf %366, %367 : vector<2x8xf32>
    %cst_99 = arith.constant dense<0.000000e+00> : vector<2x24xf32>
    %369 = tpu.matmul %368, %19, %cst_99 {dimension_numbers = #tpu.dot_dimension_numbers<[1], [0], [0], [1], [0, 0, 1, 1], [], []>} : vector<2x8xf32>, vector<8x24xf32>, vector<2x24xf32> -> vector<2x24xf32>
    %370 = vector.broadcast %21 : vector<1x24xf32> to vector<2x24xf32>
    %371 = arith.addf %369, %370 : vector<2x24xf32>
    %cst_100 = arith.constant dense<0.000000e+00> : vector<2x24xf32>
    %372 = tpu.matmul %363, %20, %cst_100 {dimension_numbers = #tpu.dot_dimension_numbers<[1], [0], [0], [1], [0, 0, 1, 1], [], []>} : vector<2x8xf32>, vector<8x24xf32>, vector<2x24xf32> -> vector<2x24xf32>
    %373 = vector.broadcast %22 : vector<1x24xf32> to vector<2x24xf32>
    %374 = arith.addf %372, %373 : vector<2x24xf32>
    %375 = vector.extract_strided_slice %371 {offsets = [0, 0], sizes = [2, 8], strides = [1, 1]} : vector<2x24xf32> to vector<2x8xf32>
    %376 = vector.extract_strided_slice %374 {offsets = [0, 0], sizes = [2, 8], strides = [1, 1]} : vector<2x24xf32> to vector<2x8xf32>
    %377 = arith.addf %375, %376 : vector<2x8xf32>
    %378 = arith.negf %377 : vector<2x8xf32>
    %379 = math.exp %378 : vector<2x8xf32>
    %cst_101 = arith.constant 1.000000e+00 : f32
    %380 = vector.broadcast %cst_101 : f32 to vector<2x8xf32>
    %381 = arith.addf %380, %379 : vector<2x8xf32>
    %382 = arith.divf %380, %381 : vector<2x8xf32>
    %383 = vector.extract_strided_slice %371 {offsets = [0, 8], sizes = [2, 8], strides = [1, 1]} : vector<2x24xf32> to vector<2x8xf32>
    %384 = vector.extract_strided_slice %374 {offsets = [0, 8], sizes = [2, 8], strides = [1, 1]} : vector<2x24xf32> to vector<2x8xf32>
    %385 = arith.addf %383, %384 : vector<2x8xf32>
    %386 = arith.negf %385 : vector<2x8xf32>
    %387 = math.exp %386 : vector<2x8xf32>
    %cst_102 = arith.constant 1.000000e+00 : f32
    %388 = vector.broadcast %cst_102 : f32 to vector<2x8xf32>
    %389 = arith.addf %388, %387 : vector<2x8xf32>
    %390 = arith.divf %388, %389 : vector<2x8xf32>
    %391 = vector.extract_strided_slice %371 {offsets = [0, 16], sizes = [2, 8], strides = [1, 1]} : vector<2x24xf32> to vector<2x8xf32>
    %392 = vector.extract_strided_slice %374 {offsets = [0, 16], sizes = [2, 8], strides = [1, 1]} : vector<2x24xf32> to vector<2x8xf32>
    %393 = arith.mulf %382, %392 : vector<2x8xf32>
    %394 = arith.addf %391, %393 : vector<2x8xf32>
    %395 = math.tanh %394 : vector<2x8xf32>
    %cst_103 = arith.constant 1.000000e+00 : f32
    %396 = vector.broadcast %cst_103 : f32 to vector<2x8xf32>
    %397 = arith.subf %396, %390 : vector<2x8xf32>
    %398 = arith.mulf %397, %395 : vector<2x8xf32>
    %399 = arith.mulf %390, %363 : vector<2x8xf32>
    %400 = arith.addf %398, %399 : vector<2x8xf32>
    %cst_104 = arith.constant dense<0.000000e+00> : vector<2x8xf32>
    %401 = tpu.matmul %400, %23, %cst_104 {dimension_numbers = #tpu.dot_dimension_numbers<[1], [0], [0], [1], [0, 0, 1, 1], [], []>} : vector<2x8xf32>, vector<8x8xf32>, vector<2x8xf32> -> vector<2x8xf32>
    %402 = vector.broadcast %24 : vector<1x8xf32> to vector<2x8xf32>
    %403 = arith.addf %401, %402 : vector<2x8xf32>
    %cst_105 = arith.constant 0.000000e+00 : f32
    %404 = vector.broadcast %cst_105 : f32 to vector<2x8xf32>
    %405 = arith.maximumf %403, %404 : vector<2x8xf32>
    %cst_106 = arith.constant dense<0.000000e+00> : vector<2x24xf32>
    %406 = tpu.matmul %405, %19, %cst_106 {dimension_numbers = #tpu.dot_dimension_numbers<[1], [0], [0], [1], [0, 0, 1, 1], [], []>} : vector<2x8xf32>, vector<8x24xf32>, vector<2x24xf32> -> vector<2x24xf32>
    %407 = vector.broadcast %21 : vector<1x24xf32> to vector<2x24xf32>
    %408 = arith.addf %406, %407 : vector<2x24xf32>
    %cst_107 = arith.constant dense<0.000000e+00> : vector<2x24xf32>
    %409 = tpu.matmul %400, %20, %cst_107 {dimension_numbers = #tpu.dot_dimension_numbers<[1], [0], [0], [1], [0, 0, 1, 1], [], []>} : vector<2x8xf32>, vector<8x24xf32>, vector<2x24xf32> -> vector<2x24xf32>
    %410 = vector.broadcast %22 : vector<1x24xf32> to vector<2x24xf32>
    %411 = arith.addf %409, %410 : vector<2x24xf32>
    %412 = vector.extract_strided_slice %408 {offsets = [0, 0], sizes = [2, 8], strides = [1, 1]} : vector<2x24xf32> to vector<2x8xf32>
    %413 = vector.extract_strided_slice %411 {offsets = [0, 0], sizes = [2, 8], strides = [1, 1]} : vector<2x24xf32> to vector<2x8xf32>
    %414 = arith.addf %412, %413 : vector<2x8xf32>
    %415 = arith.negf %414 : vector<2x8xf32>
    %416 = math.exp %415 : vector<2x8xf32>
    %cst_108 = arith.constant 1.000000e+00 : f32
    %417 = vector.broadcast %cst_108 : f32 to vector<2x8xf32>
    %418 = arith.addf %417, %416 : vector<2x8xf32>
    %419 = arith.divf %417, %418 : vector<2x8xf32>
    %420 = vector.extract_strided_slice %408 {offsets = [0, 8], sizes = [2, 8], strides = [1, 1]} : vector<2x24xf32> to vector<2x8xf32>
    %421 = vector.extract_strided_slice %411 {offsets = [0, 8], sizes = [2, 8], strides = [1, 1]} : vector<2x24xf32> to vector<2x8xf32>
    %422 = arith.addf %420, %421 : vector<2x8xf32>
    %423 = arith.negf %422 : vector<2x8xf32>
    %424 = math.exp %423 : vector<2x8xf32>
    %cst_109 = arith.constant 1.000000e+00 : f32
    %425 = vector.broadcast %cst_109 : f32 to vector<2x8xf32>
    %426 = arith.addf %425, %424 : vector<2x8xf32>
    %427 = arith.divf %425, %426 : vector<2x8xf32>
    %428 = vector.extract_strided_slice %408 {offsets = [0, 16], sizes = [2, 8], strides = [1, 1]} : vector<2x24xf32> to vector<2x8xf32>
    %429 = vector.extract_strided_slice %411 {offsets = [0, 16], sizes = [2, 8], strides = [1, 1]} : vector<2x24xf32> to vector<2x8xf32>
    %430 = arith.mulf %419, %429 : vector<2x8xf32>
    %431 = arith.addf %428, %430 : vector<2x8xf32>
    %432 = math.tanh %431 : vector<2x8xf32>
    %cst_110 = arith.constant 1.000000e+00 : f32
    %433 = vector.broadcast %cst_110 : f32 to vector<2x8xf32>
    %434 = arith.subf %433, %427 : vector<2x8xf32>
    %435 = arith.mulf %434, %432 : vector<2x8xf32>
    %436 = arith.mulf %427, %400 : vector<2x8xf32>
    %437 = arith.addf %435, %436 : vector<2x8xf32>
    %438 = tpu.concatenate %326, %363, %400, %437 in 1 : vector<2x8xf32>, vector<2x8xf32>, vector<2x8xf32>, vector<2x8xf32> -> vector<2x32xf32>
    %c2_111 = arith.constant 2 : index
    %c0_112 = arith.constant 0 : index
    %439 = vector.load %arg6[%c2_111, %c0_112] : memref<16x32xf32, #tpu.memory_space<vmem>>, vector<2x32xf32>
    tpu.vector_store %arg6[%c2_111, %c0_112], %438 {strides = array<i32>} : memref<16x32xf32, #tpu.memory_space<vmem>>, vector<2x32xf32>,
    %cst_113 = arith.constant dense<0.000000e+00> : vector<2x32xf32>
    %440 = tpu.matmul %438, %25, %cst_113 {dimension_numbers = #tpu.dot_dimension_numbers<[1], [0], [0], [1], [0, 0, 1, 1], [], []>} : vector<2x32xf32>, vector<32x32xf32>, vector<2x32xf32> -> vector<2x32xf32>
    %441 = vector.broadcast %26 : vector<1x32xf32> to vector<2x32xf32>
    %442 = arith.addf %440, %441 : vector<2x32xf32>
    %cst_114 = arith.constant 0.000000e+00 : f32
    %443 = vector.broadcast %cst_114 : f32 to vector<2x32xf32>
    %444 = arith.maximumf %442, %443 : vector<2x32xf32>
    %445 = math.tanh %444 : vector<2x32xf32>
    %cst_115 = arith.constant dense<0.000000e+00> : vector<2x4xf32>
    %446 = tpu.matmul %445, %27, %cst_115 {dimension_numbers = #tpu.dot_dimension_numbers<[1], [0], [0], [1], [0, 0, 1, 1], [], []>} : vector<2x32xf32>, vector<32x4xf32>, vector<2x4xf32> -> vector<2x4xf32>
    %447 = vector.broadcast %28 : vector<1x1xf32> to vector<2x4xf32>
    %448 = arith.addf %446, %447 : vector<2x4xf32>
    %cst_116 = arith.constant 0.000000e+00 : f32
    %449 = vector.broadcast %cst_116 : f32 to vector<2x4xf32>
    %450 = arith.maximumf %448, %449 : vector<2x4xf32>
    %cst_117 = arith.constant dense<0xFF800000> : vector<2xf32>
    %451 = vector.multi_reduction <maximumf>, %450, %cst_117 [1] : vector<2x4xf32> to vector<2xf32>
    %452 = vector.shape_cast %451 : vector<2xf32> to vector<2x1xf32>
    %453 = vector.broadcast %452 : vector<2x1xf32> to vector<2x4xf32>
    %454 = arith.subf %450, %453 : vector<2x4xf32>
    %455 = math.exp %454 : vector<2x4xf32>
    %cst_118 = arith.constant dense<0.000000e+00> : vector<2xf32>
    %456 = vector.multi_reduction <add>, %455, %cst_118 [1] : vector<2x4xf32> to vector<2xf32>
    %457 = vector.shape_cast %456 : vector<2xf32> to vector<2x1xf32>
    %458 = vector.broadcast %457 : vector<2x1xf32> to vector<2x4xf32>
    %459 = arith.divf %455, %458 : vector<2x4xf32>
    %460 = vector.extract_strided_slice %459 {offsets = [0, 0], sizes = [2, 1], strides = [1, 1]} : vector<2x4xf32> to vector<2x1xf32>
    %461 = vector.extract_strided_slice %444 {offsets = [0, 0], sizes = [2, 8], strides = [1, 1]} : vector<2x32xf32> to vector<2x8xf32>
    %462 = vector.broadcast %460 : vector<2x1xf32> to vector<2x8xf32>
    %463 = arith.mulf %462, %461 : vector<2x8xf32>
    %cst_119 = arith.constant 0.000000e+00 : f32
    %464 = vector.broadcast %cst_119 : f32 to vector<2x8xf32>
    %465 = arith.addf %464, %463 : vector<2x8xf32>
    %466 = vector.extract_strided_slice %459 {offsets = [0, 1], sizes = [2, 1], strides = [1, 1]} : vector<2x4xf32> to vector<2x1xf32>
    %467 = vector.extract_strided_slice %444 {offsets = [0, 8], sizes = [2, 8], strides = [1, 1]} : vector<2x32xf32> to vector<2x8xf32>
    %468 = vector.broadcast %466 : vector<2x1xf32> to vector<2x8xf32>
    %469 = arith.mulf %468, %467 : vector<2x8xf32>
    %470 = arith.addf %465, %469 : vector<2x8xf32>
    %471 = vector.extract_strided_slice %459 {offsets = [0, 2], sizes = [2, 1], strides = [1, 1]} : vector<2x4xf32> to vector<2x1xf32>
    %472 = vector.extract_strided_slice %444 {offsets = [0, 16], sizes = [2, 8], strides = [1, 1]} : vector<2x32xf32> to vector<2x8xf32>
    %473 = vector.broadcast %471 : vector<2x1xf32> to vector<2x8xf32>
    %474 = arith.mulf %473, %472 : vector<2x8xf32>
    %475 = arith.addf %470, %474 : vector<2x8xf32>
    %476 = vector.extract_strided_slice %459 {offsets = [0, 3], sizes = [2, 1], strides = [1, 1]} : vector<2x4xf32> to vector<2x1xf32>
    %477 = vector.extract_strided_slice %444 {offsets = [0, 24], sizes = [2, 8], strides = [1, 1]} : vector<2x32xf32> to vector<2x8xf32>
    %478 = vector.broadcast %476 : vector<2x1xf32> to vector<2x8xf32>
    %479 = arith.mulf %478, %477 : vector<2x8xf32>
    %480 = arith.addf %475, %479 : vector<2x8xf32>
    %c4 = arith.constant 4 : index
    %c0_120 = arith.constant 0 : index
    %481 = vector.load %arg4[%c4, %c0_120] : memref<16x96xf32, #tpu.memory_space<vmem>>, vector<2x96xf32>
    %cst_121 = arith.constant dense<0.000000e+00> : vector<2x96xf32>
    %482 = tpu.matmul %480, %14, %cst_121 {dimension_numbers = #tpu.dot_dimension_numbers<[1], [0], [0], [1], [0, 0, 1, 1], [], []>} : vector<2x8xf32>, vector<8x96xf32>, vector<2x96xf32> -> vector<2x96xf32>
    %483 = arith.addf %481, %482 : vector<2x96xf32>
    %cst_122 = arith.constant dense<0.000000e+00> : vector<2x96xf32>
    %484 = tpu.matmul %287, %15, %cst_122 {dimension_numbers = #tpu.dot_dimension_numbers<[1], [0], [0], [1], [0, 0, 1, 1], [], []>} : vector<2x32xf32>, vector<32x96xf32>, vector<2x96xf32> -> vector<2x96xf32>
    %485 = vector.broadcast %16 : vector<1x96xf32> to vector<2x96xf32>
    %486 = arith.addf %484, %485 : vector<2x96xf32>
    %487 = vector.extract_strided_slice %483 {offsets = [0, 0], sizes = [2, 32], strides = [1, 1]} : vector<2x96xf32> to vector<2x32xf32>
    %488 = vector.extract_strided_slice %486 {offsets = [0, 0], sizes = [2, 32], strides = [1, 1]} : vector<2x96xf32> to vector<2x32xf32>
    %489 = arith.addf %487, %488 : vector<2x32xf32>
    %490 = arith.negf %489 : vector<2x32xf32>
    %491 = math.exp %490 : vector<2x32xf32>
    %cst_123 = arith.constant 1.000000e+00 : f32
    %492 = vector.broadcast %cst_123 : f32 to vector<2x32xf32>
    %493 = arith.addf %492, %491 : vector<2x32xf32>
    %494 = arith.divf %492, %493 : vector<2x32xf32>
    %495 = vector.extract_strided_slice %483 {offsets = [0, 32], sizes = [2, 32], strides = [1, 1]} : vector<2x96xf32> to vector<2x32xf32>
    %496 = vector.extract_strided_slice %486 {offsets = [0, 32], sizes = [2, 32], strides = [1, 1]} : vector<2x96xf32> to vector<2x32xf32>
    %497 = arith.addf %495, %496 : vector<2x32xf32>
    %498 = arith.negf %497 : vector<2x32xf32>
    %499 = math.exp %498 : vector<2x32xf32>
    %cst_124 = arith.constant 1.000000e+00 : f32
    %500 = vector.broadcast %cst_124 : f32 to vector<2x32xf32>
    %501 = arith.addf %500, %499 : vector<2x32xf32>
    %502 = arith.divf %500, %501 : vector<2x32xf32>
    %503 = vector.extract_strided_slice %483 {offsets = [0, 64], sizes = [2, 32], strides = [1, 1]} : vector<2x96xf32> to vector<2x32xf32>
    %504 = vector.extract_strided_slice %486 {offsets = [0, 64], sizes = [2, 32], strides = [1, 1]} : vector<2x96xf32> to vector<2x32xf32>
    %505 = arith.mulf %494, %504 : vector<2x32xf32>
    %506 = arith.addf %503, %505 : vector<2x32xf32>
    %507 = math.tanh %506 : vector<2x32xf32>
    %cst_125 = arith.constant 1.000000e+00 : f32
    %508 = vector.broadcast %cst_125 : f32 to vector<2x32xf32>
    %509 = arith.subf %508, %502 : vector<2x32xf32>
    %510 = arith.mulf %509, %507 : vector<2x32xf32>
    %511 = arith.mulf %502, %287 : vector<2x32xf32>
    %512 = arith.addf %510, %511 : vector<2x32xf32>
    %c4_126 = arith.constant 4 : index
    %c0_127 = arith.constant 0 : index
    %513 = vector.load %arg5[%c4_126, %c0_127] : memref<16x32xf32, #tpu.memory_space<vmem>>, vector<2x32xf32>
    tpu.vector_store %arg5[%c4_126, %c0_127], %512 {strides = array<i32>} : memref<16x32xf32, #tpu.memory_space<vmem>>, vector<2x32xf32>,
    %cst_128 = arith.constant dense<0.000000e+00> : vector<2x8xf32>
    %514 = tpu.matmul %512, %17, %cst_128 {dimension_numbers = #tpu.dot_dimension_numbers<[1], [0], [0], [1], [0, 0, 1, 1], [], []>} : vector<2x32xf32>, vector<32x8xf32>, vector<2x8xf32> -> vector<2x8xf32>
    %515 = vector.broadcast %18 : vector<1x8xf32> to vector<2x8xf32>
    %516 = arith.addf %514, %515 : vector<2x8xf32>
    %cst_129 = arith.constant 0.000000e+00 : f32
    %517 = vector.broadcast %cst_129 : f32 to vector<2x8xf32>
    %518 = arith.maximumf %516, %517 : vector<2x8xf32>
    %cst_130 = arith.constant 0.000000e+00 : f32
    %519 = vector.broadcast %cst_130 : f32 to vector<2x8xf32>
    %cst_131 = arith.constant dense<0.000000e+00> : vector<2x24xf32>
    %520 = tpu.matmul %519, %19, %cst_131 {dimension_numbers = #tpu.dot_dimension_numbers<[1], [0], [0], [1], [0, 0, 1, 1], [], []>} : vector<2x8xf32>, vector<8x24xf32>, vector<2x24xf32> -> vector<2x24xf32>
    %521 = vector.broadcast %21 : vector<1x24xf32> to vector<2x24xf32>
    %522 = arith.addf %520, %521 : vector<2x24xf32>
    %cst_132 = arith.constant dense<0.000000e+00> : vector<2x24xf32>
    %523 = tpu.matmul %518, %20, %cst_132 {dimension_numbers = #tpu.dot_dimension_numbers<[1], [0], [0], [1], [0, 0, 1, 1], [], []>} : vector<2x8xf32>, vector<8x24xf32>, vector<2x24xf32> -> vector<2x24xf32>
    %524 = vector.broadcast %22 : vector<1x24xf32> to vector<2x24xf32>
    %525 = arith.addf %523, %524 : vector<2x24xf32>
    %526 = vector.extract_strided_slice %522 {offsets = [0, 0], sizes = [2, 8], strides = [1, 1]} : vector<2x24xf32> to vector<2x8xf32>
    %527 = vector.extract_strided_slice %525 {offsets = [0, 0], sizes = [2, 8], strides = [1, 1]} : vector<2x24xf32> to vector<2x8xf32>
    %528 = arith.addf %526, %527 : vector<2x8xf32>
    %529 = arith.negf %528 : vector<2x8xf32>
    %530 = math.exp %529 : vector<2x8xf32>
    %cst_133 = arith.constant 1.000000e+00 : f32
    %531 = vector.broadcast %cst_133 : f32 to vector<2x8xf32>
    %532 = arith.addf %531, %530 : vector<2x8xf32>
    %533 = arith.divf %531, %532 : vector<2x8xf32>
    %534 = vector.extract_strided_slice %522 {offsets = [0, 8], sizes = [2, 8], strides = [1, 1]} : vector<2x24xf32> to vector<2x8xf32>
    %535 = vector.extract_strided_slice %525 {offsets = [0, 8], sizes = [2, 8], strides = [1, 1]} : vector<2x24xf32> to vector<2x8xf32>
    %536 = arith.addf %534, %535 : vector<2x8xf32>
    %537 = arith.negf %536 : vector<2x8xf32>
    %538 = math.exp %537 : vector<2x8xf32>
    %cst_134 = arith.constant 1.000000e+00 : f32
    %539 = vector.broadcast %cst_134 : f32 to vector<2x8xf32>
    %540 = arith.addf %539, %538 : vector<2x8xf32>
    %541 = arith.divf %539, %540 : vector<2x8xf32>
    %542 = vector.extract_strided_slice %522 {offsets = [0, 16], sizes = [2, 8], strides = [1, 1]} : vector<2x24xf32> to vector<2x8xf32>
    %543 = vector.extract_strided_slice %525 {offsets = [0, 16], sizes = [2, 8], strides = [1, 1]} : vector<2x24xf32> to vector<2x8xf32>
    %544 = arith.mulf %533, %543 : vector<2x8xf32>
    %545 = arith.addf %542, %544 : vector<2x8xf32>
    %546 = math.tanh %545 : vector<2x8xf32>
    %cst_135 = arith.constant 1.000000e+00 : f32
    %547 = vector.broadcast %cst_135 : f32 to vector<2x8xf32>
    %548 = arith.subf %547, %541 : vector<2x8xf32>
    %549 = arith.mulf %548, %546 : vector<2x8xf32>
    %550 = arith.mulf %541, %518 : vector<2x8xf32>
    %551 = arith.addf %549, %550 : vector<2x8xf32>
    %cst_136 = arith.constant dense<0.000000e+00> : vector<2x8xf32>
    %552 = tpu.matmul %551, %23, %cst_136 {dimension_numbers = #tpu.dot_dimension_numbers<[1], [0], [0], [1], [0, 0, 1, 1], [], []>} : vector<2x8xf32>, vector<8x8xf32>, vector<2x8xf32> -> vector<2x8xf32>
    %553 = vector.broadcast %24 : vector<1x8xf32> to vector<2x8xf32>
    %554 = arith.addf %552, %553 : vector<2x8xf32>
    %cst_137 = arith.constant 0.000000e+00 : f32
    %555 = vector.broadcast %cst_137 : f32 to vector<2x8xf32>
    %556 = arith.maximumf %554, %555 : vector<2x8xf32>
    %cst_138 = arith.constant dense<0.000000e+00> : vector<2x24xf32>
    %557 = tpu.matmul %556, %19, %cst_138 {dimension_numbers = #tpu.dot_dimension_numbers<[1], [0], [0], [1], [0, 0, 1, 1], [], []>} : vector<2x8xf32>, vector<8x24xf32>, vector<2x24xf32> -> vector<2x24xf32>
    %558 = vector.broadcast %21 : vector<1x24xf32> to vector<2x24xf32>
    %559 = arith.addf %557, %558 : vector<2x24xf32>
    %cst_139 = arith.constant dense<0.000000e+00> : vector<2x24xf32>
    %560 = tpu.matmul %551, %20, %cst_139 {dimension_numbers = #tpu.dot_dimension_numbers<[1], [0], [0], [1], [0, 0, 1, 1], [], []>} : vector<2x8xf32>, vector<8x24xf32>, vector<2x24xf32> -> vector<2x24xf32>
    %561 = vector.broadcast %22 : vector<1x24xf32> to vector<2x24xf32>
    %562 = arith.addf %560, %561 : vector<2x24xf32>
    %563 = vector.extract_strided_slice %559 {offsets = [0, 0], sizes = [2, 8], strides = [1, 1]} : vector<2x24xf32> to vector<2x8xf32>
    %564 = vector.extract_strided_slice %562 {offsets = [0, 0], sizes = [2, 8], strides = [1, 1]} : vector<2x24xf32> to vector<2x8xf32>
    %565 = arith.addf %563, %564 : vector<2x8xf32>
    %566 = arith.negf %565 : vector<2x8xf32>
    %567 = math.exp %566 : vector<2x8xf32>
    %cst_140 = arith.constant 1.000000e+00 : f32
    %568 = vector.broadcast %cst_140 : f32 to vector<2x8xf32>
    %569 = arith.addf %568, %567 : vector<2x8xf32>
    %570 = arith.divf %568, %569 : vector<2x8xf32>
    %571 = vector.extract_strided_slice %559 {offsets = [0, 8], sizes = [2, 8], strides = [1, 1]} : vector<2x24xf32> to vector<2x8xf32>
    %572 = vector.extract_strided_slice %562 {offsets = [0, 8], sizes = [2, 8], strides = [1, 1]} : vector<2x24xf32> to vector<2x8xf32>
    %573 = arith.addf %571, %572 : vector<2x8xf32>
    %574 = arith.negf %573 : vector<2x8xf32>
    %575 = math.exp %574 : vector<2x8xf32>
    %cst_141 = arith.constant 1.000000e+00 : f32
    %576 = vector.broadcast %cst_141 : f32 to vector<2x8xf32>
    %577 = arith.addf %576, %575 : vector<2x8xf32>
    %578 = arith.divf %576, %577 : vector<2x8xf32>
    %579 = vector.extract_strided_slice %559 {offsets = [0, 16], sizes = [2, 8], strides = [1, 1]} : vector<2x24xf32> to vector<2x8xf32>
    %580 = vector.extract_strided_slice %562 {offsets = [0, 16], sizes = [2, 8], strides = [1, 1]} : vector<2x24xf32> to vector<2x8xf32>
    %581 = arith.mulf %570, %580 : vector<2x8xf32>
    %582 = arith.addf %579, %581 : vector<2x8xf32>
    %583 = math.tanh %582 : vector<2x8xf32>
    %cst_142 = arith.constant 1.000000e+00 : f32
    %584 = vector.broadcast %cst_142 : f32 to vector<2x8xf32>
    %585 = arith.subf %584, %578 : vector<2x8xf32>
    %586 = arith.mulf %585, %583 : vector<2x8xf32>
    %587 = arith.mulf %578, %551 : vector<2x8xf32>
    %588 = arith.addf %586, %587 : vector<2x8xf32>
    %cst_143 = arith.constant dense<0.000000e+00> : vector<2x8xf32>
    %589 = tpu.matmul %588, %23, %cst_143 {dimension_numbers = #tpu.dot_dimension_numbers<[1], [0], [0], [1], [0, 0, 1, 1], [], []>} : vector<2x8xf32>, vector<8x8xf32>, vector<2x8xf32> -> vector<2x8xf32>
    %590 = vector.broadcast %24 : vector<1x8xf32> to vector<2x8xf32>
    %591 = arith.addf %589, %590 : vector<2x8xf32>
    %cst_144 = arith.constant 0.000000e+00 : f32
    %592 = vector.broadcast %cst_144 : f32 to vector<2x8xf32>
    %593 = arith.maximumf %591, %592 : vector<2x8xf32>
    %cst_145 = arith.constant dense<0.000000e+00> : vector<2x24xf32>
    %594 = tpu.matmul %593, %19, %cst_145 {dimension_numbers = #tpu.dot_dimension_numbers<[1], [0], [0], [1], [0, 0, 1, 1], [], []>} : vector<2x8xf32>, vector<8x24xf32>, vector<2x24xf32> -> vector<2x24xf32>
    %595 = vector.broadcast %21 : vector<1x24xf32> to vector<2x24xf32>
    %596 = arith.addf %594, %595 : vector<2x24xf32>
    %cst_146 = arith.constant dense<0.000000e+00> : vector<2x24xf32>
    %597 = tpu.matmul %588, %20, %cst_146 {dimension_numbers = #tpu.dot_dimension_numbers<[1], [0], [0], [1], [0, 0, 1, 1], [], []>} : vector<2x8xf32>, vector<8x24xf32>, vector<2x24xf32> -> vector<2x24xf32>
    %598 = vector.broadcast %22 : vector<1x24xf32> to vector<2x24xf32>
    %599 = arith.addf %597, %598 : vector<2x24xf32>
    %600 = vector.extract_strided_slice %596 {offsets = [0, 0], sizes = [2, 8], strides = [1, 1]} : vector<2x24xf32> to vector<2x8xf32>
    %601 = vector.extract_strided_slice %599 {offsets = [0, 0], sizes = [2, 8], strides = [1, 1]} : vector<2x24xf32> to vector<2x8xf32>
    %602 = arith.addf %600, %601 : vector<2x8xf32>
    %603 = arith.negf %602 : vector<2x8xf32>
    %604 = math.exp %603 : vector<2x8xf32>
    %cst_147 = arith.constant 1.000000e+00 : f32
    %605 = vector.broadcast %cst_147 : f32 to vector<2x8xf32>
    %606 = arith.addf %605, %604 : vector<2x8xf32>
    %607 = arith.divf %605, %606 : vector<2x8xf32>
    %608 = vector.extract_strided_slice %596 {offsets = [0, 8], sizes = [2, 8], strides = [1, 1]} : vector<2x24xf32> to vector<2x8xf32>
    %609 = vector.extract_strided_slice %599 {offsets = [0, 8], sizes = [2, 8], strides = [1, 1]} : vector<2x24xf32> to vector<2x8xf32>
    %610 = arith.addf %608, %609 : vector<2x8xf32>
    %611 = arith.negf %610 : vector<2x8xf32>
    %612 = math.exp %611 : vector<2x8xf32>
    %cst_148 = arith.constant 1.000000e+00 : f32
    %613 = vector.broadcast %cst_148 : f32 to vector<2x8xf32>
    %614 = arith.addf %613, %612 : vector<2x8xf32>
    %615 = arith.divf %613, %614 : vector<2x8xf32>
    %616 = vector.extract_strided_slice %596 {offsets = [0, 16], sizes = [2, 8], strides = [1, 1]} : vector<2x24xf32> to vector<2x8xf32>
    %617 = vector.extract_strided_slice %599 {offsets = [0, 16], sizes = [2, 8], strides = [1, 1]} : vector<2x24xf32> to vector<2x8xf32>
    %618 = arith.mulf %607, %617 : vector<2x8xf32>
    %619 = arith.addf %616, %618 : vector<2x8xf32>
    %620 = math.tanh %619 : vector<2x8xf32>
    %cst_149 = arith.constant 1.000000e+00 : f32
    %621 = vector.broadcast %cst_149 : f32 to vector<2x8xf32>
    %622 = arith.subf %621, %615 : vector<2x8xf32>
    %623 = arith.mulf %622, %620 : vector<2x8xf32>
    %624 = arith.mulf %615, %588 : vector<2x8xf32>
    %625 = arith.addf %623, %624 : vector<2x8xf32>
    %cst_150 = arith.constant dense<0.000000e+00> : vector<2x8xf32>
    %626 = tpu.matmul %625, %23, %cst_150 {dimension_numbers = #tpu.dot_dimension_numbers<[1], [0], [0], [1], [0, 0, 1, 1], [], []>} : vector<2x8xf32>, vector<8x8xf32>, vector<2x8xf32> -> vector<2x8xf32>
    %627 = vector.broadcast %24 : vector<1x8xf32> to vector<2x8xf32>
    %628 = arith.addf %626, %627 : vector<2x8xf32>
    %cst_151 = arith.constant 0.000000e+00 : f32
    %629 = vector.broadcast %cst_151 : f32 to vector<2x8xf32>
    %630 = arith.maximumf %628, %629 : vector<2x8xf32>
    %cst_152 = arith.constant dense<0.000000e+00> : vector<2x24xf32>
    %631 = tpu.matmul %630, %19, %cst_152 {dimension_numbers = #tpu.dot_dimension_numbers<[1], [0], [0], [1], [0, 0, 1, 1], [], []>} : vector<2x8xf32>, vector<8x24xf32>, vector<2x24xf32> -> vector<2x24xf32>
    %632 = vector.broadcast %21 : vector<1x24xf32> to vector<2x24xf32>
    %633 = arith.addf %631, %632 : vector<2x24xf32>
    %cst_153 = arith.constant dense<0.000000e+00> : vector<2x24xf32>
    %634 = tpu.matmul %625, %20, %cst_153 {dimension_numbers = #tpu.dot_dimension_numbers<[1], [0], [0], [1], [0, 0, 1, 1], [], []>} : vector<2x8xf32>, vector<8x24xf32>, vector<2x24xf32> -> vector<2x24xf32>
    %635 = vector.broadcast %22 : vector<1x24xf32> to vector<2x24xf32>
    %636 = arith.addf %634, %635 : vector<2x24xf32>
    %637 = vector.extract_strided_slice %633 {offsets = [0, 0], sizes = [2, 8], strides = [1, 1]} : vector<2x24xf32> to vector<2x8xf32>
    %638 = vector.extract_strided_slice %636 {offsets = [0, 0], sizes = [2, 8], strides = [1, 1]} : vector<2x24xf32> to vector<2x8xf32>
    %639 = arith.addf %637, %638 : vector<2x8xf32>
    %640 = arith.negf %639 : vector<2x8xf32>
    %641 = math.exp %640 : vector<2x8xf32>
    %cst_154 = arith.constant 1.000000e+00 : f32
    %642 = vector.broadcast %cst_154 : f32 to vector<2x8xf32>
    %643 = arith.addf %642, %641 : vector<2x8xf32>
    %644 = arith.divf %642, %643 : vector<2x8xf32>
    %645 = vector.extract_strided_slice %633 {offsets = [0, 8], sizes = [2, 8], strides = [1, 1]} : vector<2x24xf32> to vector<2x8xf32>
    %646 = vector.extract_strided_slice %636 {offsets = [0, 8], sizes = [2, 8], strides = [1, 1]} : vector<2x24xf32> to vector<2x8xf32>
    %647 = arith.addf %645, %646 : vector<2x8xf32>
    %648 = arith.negf %647 : vector<2x8xf32>
    %649 = math.exp %648 : vector<2x8xf32>
    %cst_155 = arith.constant 1.000000e+00 : f32
    %650 = vector.broadcast %cst_155 : f32 to vector<2x8xf32>
    %651 = arith.addf %650, %649 : vector<2x8xf32>
    %652 = arith.divf %650, %651 : vector<2x8xf32>
    %653 = vector.extract_strided_slice %633 {offsets = [0, 16], sizes = [2, 8], strides = [1, 1]} : vector<2x24xf32> to vector<2x8xf32>
    %654 = vector.extract_strided_slice %636 {offsets = [0, 16], sizes = [2, 8], strides = [1, 1]} : vector<2x24xf32> to vector<2x8xf32>
    %655 = arith.mulf %644, %654 : vector<2x8xf32>
    %656 = arith.addf %653, %655 : vector<2x8xf32>
    %657 = math.tanh %656 : vector<2x8xf32>
    %cst_156 = arith.constant 1.000000e+00 : f32
    %658 = vector.broadcast %cst_156 : f32 to vector<2x8xf32>
    %659 = arith.subf %658, %652 : vector<2x8xf32>
    %660 = arith.mulf %659, %657 : vector<2x8xf32>
    %661 = arith.mulf %652, %625 : vector<2x8xf32>
    %662 = arith.addf %660, %661 : vector<2x8xf32>
    %663 = tpu.concatenate %551, %588, %625, %662 in 1 : vector<2x8xf32>, vector<2x8xf32>, vector<2x8xf32>, vector<2x8xf32> -> vector<2x32xf32>
    %c4_157 = arith.constant 4 : index
    %c0_158 = arith.constant 0 : index
    %664 = vector.load %arg6[%c4_157, %c0_158] : memref<16x32xf32, #tpu.memory_space<vmem>>, vector<2x32xf32>
    tpu.vector_store %arg6[%c4_157, %c0_158], %663 {strides = array<i32>} : memref<16x32xf32, #tpu.memory_space<vmem>>, vector<2x32xf32>,
    %cst_159 = arith.constant dense<0.000000e+00> : vector<2x32xf32>
    %665 = tpu.matmul %663, %25, %cst_159 {dimension_numbers = #tpu.dot_dimension_numbers<[1], [0], [0], [1], [0, 0, 1, 1], [], []>} : vector<2x32xf32>, vector<32x32xf32>, vector<2x32xf32> -> vector<2x32xf32>
    %666 = vector.broadcast %26 : vector<1x32xf32> to vector<2x32xf32>
    %667 = arith.addf %665, %666 : vector<2x32xf32>
    %cst_160 = arith.constant 0.000000e+00 : f32
    %668 = vector.broadcast %cst_160 : f32 to vector<2x32xf32>
    %669 = arith.maximumf %667, %668 : vector<2x32xf32>
    %670 = math.tanh %669 : vector<2x32xf32>
    %cst_161 = arith.constant dense<0.000000e+00> : vector<2x4xf32>
    %671 = tpu.matmul %670, %27, %cst_161 {dimension_numbers = #tpu.dot_dimension_numbers<[1], [0], [0], [1], [0, 0, 1, 1], [], []>} : vector<2x32xf32>, vector<32x4xf32>, vector<2x4xf32> -> vector<2x4xf32>
    %672 = vector.broadcast %28 : vector<1x1xf32> to vector<2x4xf32>
    %673 = arith.addf %671, %672 : vector<2x4xf32>
    %cst_162 = arith.constant 0.000000e+00 : f32
    %674 = vector.broadcast %cst_162 : f32 to vector<2x4xf32>
    %675 = arith.maximumf %673, %674 : vector<2x4xf32>
    %cst_163 = arith.constant dense<0xFF800000> : vector<2xf32>
    %676 = vector.multi_reduction <maximumf>, %675, %cst_163 [1] : vector<2x4xf32> to vector<2xf32>
    %677 = vector.shape_cast %676 : vector<2xf32> to vector<2x1xf32>
    %678 = vector.broadcast %677 : vector<2x1xf32> to vector<2x4xf32>
    %679 = arith.subf %675, %678 : vector<2x4xf32>
    %680 = math.exp %679 : vector<2x4xf32>
    %cst_164 = arith.constant dense<0.000000e+00> : vector<2xf32>
    %681 = vector.multi_reduction <add>, %680, %cst_164 [1] : vector<2x4xf32> to vector<2xf32>
    %682 = vector.shape_cast %681 : vector<2xf32> to vector<2x1xf32>
    %683 = vector.broadcast %682 : vector<2x1xf32> to vector<2x4xf32>
    %684 = arith.divf %680, %683 : vector<2x4xf32>
    %685 = vector.extract_strided_slice %684 {offsets = [0, 0], sizes = [2, 1], strides = [1, 1]} : vector<2x4xf32> to vector<2x1xf32>
    %686 = vector.extract_strided_slice %669 {offsets = [0, 0], sizes = [2, 8], strides = [1, 1]} : vector<2x32xf32> to vector<2x8xf32>
    %687 = vector.broadcast %685 : vector<2x1xf32> to vector<2x8xf32>
    %688 = arith.mulf %687, %686 : vector<2x8xf32>
    %cst_165 = arith.constant 0.000000e+00 : f32
    %689 = vector.broadcast %cst_165 : f32 to vector<2x8xf32>
    %690 = arith.addf %689, %688 : vector<2x8xf32>
    %691 = vector.extract_strided_slice %684 {offsets = [0, 1], sizes = [2, 1], strides = [1, 1]} : vector<2x4xf32> to vector<2x1xf32>
    %692 = vector.extract_strided_slice %669 {offsets = [0, 8], sizes = [2, 8], strides = [1, 1]} : vector<2x32xf32> to vector<2x8xf32>
    %693 = vector.broadcast %691 : vector<2x1xf32> to vector<2x8xf32>
    %694 = arith.mulf %693, %692 : vector<2x8xf32>
    %695 = arith.addf %690, %694 : vector<2x8xf32>
    %696 = vector.extract_strided_slice %684 {offsets = [0, 2], sizes = [2, 1], strides = [1, 1]} : vector<2x4xf32> to vector<2x1xf32>
    %697 = vector.extract_strided_slice %669 {offsets = [0, 16], sizes = [2, 8], strides = [1, 1]} : vector<2x32xf32> to vector<2x8xf32>
    %698 = vector.broadcast %696 : vector<2x1xf32> to vector<2x8xf32>
    %699 = arith.mulf %698, %697 : vector<2x8xf32>
    %700 = arith.addf %695, %699 : vector<2x8xf32>
    %701 = vector.extract_strided_slice %684 {offsets = [0, 3], sizes = [2, 1], strides = [1, 1]} : vector<2x4xf32> to vector<2x1xf32>
    %702 = vector.extract_strided_slice %669 {offsets = [0, 24], sizes = [2, 8], strides = [1, 1]} : vector<2x32xf32> to vector<2x8xf32>
    %703 = vector.broadcast %701 : vector<2x1xf32> to vector<2x8xf32>
    %704 = arith.mulf %703, %702 : vector<2x8xf32>
    %705 = arith.addf %700, %704 : vector<2x8xf32>
    %c6 = arith.constant 6 : index
    %c0_166 = arith.constant 0 : index
    %706 = vector.load %arg4[%c6, %c0_166] : memref<16x96xf32, #tpu.memory_space<vmem>>, vector<2x96xf32>
    %cst_167 = arith.constant dense<0.000000e+00> : vector<2x96xf32>
    %707 = tpu.matmul %705, %14, %cst_167 {dimension_numbers = #tpu.dot_dimension_numbers<[1], [0], [0], [1], [0, 0, 1, 1], [], []>} : vector<2x8xf32>, vector<8x96xf32>, vector<2x96xf32> -> vector<2x96xf32>
    %708 = arith.addf %706, %707 : vector<2x96xf32>
    %cst_168 = arith.constant dense<0.000000e+00> : vector<2x96xf32>
    %709 = tpu.matmul %512, %15, %cst_168 {dimension_numbers = #tpu.dot_dimension_numbers<[1], [0], [0], [1], [0, 0, 1, 1], [], []>} : vector<2x32xf32>, vector<32x96xf32>, vector<2x96xf32> -> vector<2x96xf32>
    %710 = vector.broadcast %16 : vector<1x96xf32> to vector<2x96xf32>
    %711 = arith.addf %709, %710 : vector<2x96xf32>
    %712 = vector.extract_strided_slice %708 {offsets = [0, 0], sizes = [2, 32], strides = [1, 1]} : vector<2x96xf32> to vector<2x32xf32>
    %713 = vector.extract_strided_slice %711 {offsets = [0, 0], sizes = [2, 32], strides = [1, 1]} : vector<2x96xf32> to vector<2x32xf32>
    %714 = arith.addf %712, %713 : vector<2x32xf32>
    %715 = arith.negf %714 : vector<2x32xf32>
    %716 = math.exp %715 : vector<2x32xf32>
    %cst_169 = arith.constant 1.000000e+00 : f32
    %717 = vector.broadcast %cst_169 : f32 to vector<2x32xf32>
    %718 = arith.addf %717, %716 : vector<2x32xf32>
    %719 = arith.divf %717, %718 : vector<2x32xf32>
    %720 = vector.extract_strided_slice %708 {offsets = [0, 32], sizes = [2, 32], strides = [1, 1]} : vector<2x96xf32> to vector<2x32xf32>
    %721 = vector.extract_strided_slice %711 {offsets = [0, 32], sizes = [2, 32], strides = [1, 1]} : vector<2x96xf32> to vector<2x32xf32>
    %722 = arith.addf %720, %721 : vector<2x32xf32>
    %723 = arith.negf %722 : vector<2x32xf32>
    %724 = math.exp %723 : vector<2x32xf32>
    %cst_170 = arith.constant 1.000000e+00 : f32
    %725 = vector.broadcast %cst_170 : f32 to vector<2x32xf32>
    %726 = arith.addf %725, %724 : vector<2x32xf32>
    %727 = arith.divf %725, %726 : vector<2x32xf32>
    %728 = vector.extract_strided_slice %708 {offsets = [0, 64], sizes = [2, 32], strides = [1, 1]} : vector<2x96xf32> to vector<2x32xf32>
    %729 = vector.extract_strided_slice %711 {offsets = [0, 64], sizes = [2, 32], strides = [1, 1]} : vector<2x96xf32> to vector<2x32xf32>
    %730 = arith.mulf %719, %729 : vector<2x32xf32>
    %731 = arith.addf %728, %730 : vector<2x32xf32>
    %732 = math.tanh %731 : vector<2x32xf32>
    %cst_171 = arith.constant 1.000000e+00 : f32
    %733 = vector.broadcast %cst_171 : f32 to vector<2x32xf32>
    %734 = arith.subf %733, %727 : vector<2x32xf32>
    %735 = arith.mulf %734, %732 : vector<2x32xf32>
    %736 = arith.mulf %727, %512 : vector<2x32xf32>
    %737 = arith.addf %735, %736 : vector<2x32xf32>
    %c6_172 = arith.constant 6 : index
    %c0_173 = arith.constant 0 : index
    %738 = vector.load %arg5[%c6_172, %c0_173] : memref<16x32xf32, #tpu.memory_space<vmem>>, vector<2x32xf32>
    tpu.vector_store %arg5[%c6_172, %c0_173], %737 {strides = array<i32>} : memref<16x32xf32, #tpu.memory_space<vmem>>, vector<2x32xf32>,
    %cst_174 = arith.constant dense<0.000000e+00> : vector<2x8xf32>
    %739 = tpu.matmul %737, %17, %cst_174 {dimension_numbers = #tpu.dot_dimension_numbers<[1], [0], [0], [1], [0, 0, 1, 1], [], []>} : vector<2x32xf32>, vector<32x8xf32>, vector<2x8xf32> -> vector<2x8xf32>
    %740 = vector.broadcast %18 : vector<1x8xf32> to vector<2x8xf32>
    %741 = arith.addf %739, %740 : vector<2x8xf32>
    %cst_175 = arith.constant 0.000000e+00 : f32
    %742 = vector.broadcast %cst_175 : f32 to vector<2x8xf32>
    %743 = arith.maximumf %741, %742 : vector<2x8xf32>
    %cst_176 = arith.constant 0.000000e+00 : f32
    %744 = vector.broadcast %cst_176 : f32 to vector<2x8xf32>
    %cst_177 = arith.constant dense<0.000000e+00> : vector<2x24xf32>
    %745 = tpu.matmul %744, %19, %cst_177 {dimension_numbers = #tpu.dot_dimension_numbers<[1], [0], [0], [1], [0, 0, 1, 1], [], []>} : vector<2x8xf32>, vector<8x24xf32>, vector<2x24xf32> -> vector<2x24xf32>
    %746 = vector.broadcast %21 : vector<1x24xf32> to vector<2x24xf32>
    %747 = arith.addf %745, %746 : vector<2x24xf32>
    %cst_178 = arith.constant dense<0.000000e+00> : vector<2x24xf32>
    %748 = tpu.matmul %743, %20, %cst_178 {dimension_numbers = #tpu.dot_dimension_numbers<[1], [0], [0], [1], [0, 0, 1, 1], [], []>} : vector<2x8xf32>, vector<8x24xf32>, vector<2x24xf32> -> vector<2x24xf32>
    %749 = vector.broadcast %22 : vector<1x24xf32> to vector<2x24xf32>
    %750 = arith.addf %748, %749 : vector<2x24xf32>
    %751 = vector.extract_strided_slice %747 {offsets = [0, 0], sizes = [2, 8], strides = [1, 1]} : vector<2x24xf32> to vector<2x8xf32>
    %752 = vector.extract_strided_slice %750 {offsets = [0, 0], sizes = [2, 8], strides = [1, 1]} : vector<2x24xf32> to vector<2x8xf32>
    %753 = arith.addf %751, %752 : vector<2x8xf32>
    %754 = arith.negf %753 : vector<2x8xf32>
    %755 = math.exp %754 : vector<2x8xf32>
    %cst_179 = arith.constant 1.000000e+00 : f32
    %756 = vector.broadcast %cst_179 : f32 to vector<2x8xf32>
    %757 = arith.addf %756, %755 : vector<2x8xf32>
    %758 = arith.divf %756, %757 : vector<2x8xf32>
    %759 = vector.extract_strided_slice %747 {offsets = [0, 8], sizes = [2, 8], strides = [1, 1]} : vector<2x24xf32> to vector<2x8xf32>
    %760 = vector.extract_strided_slice %750 {offsets = [0, 8], sizes = [2, 8], strides = [1, 1]} : vector<2x24xf32> to vector<2x8xf32>
    %761 = arith.addf %759, %760 : vector<2x8xf32>
    %762 = arith.negf %761 : vector<2x8xf32>
    %763 = math.exp %762 : vector<2x8xf32>
    %cst_180 = arith.constant 1.000000e+00 : f32
    %764 = vector.broadcast %cst_180 : f32 to vector<2x8xf32>
    %765 = arith.addf %764, %763 : vector<2x8xf32>
    %766 = arith.divf %764, %765 : vector<2x8xf32>
    %767 = vector.extract_strided_slice %747 {offsets = [0, 16], sizes = [2, 8], strides = [1, 1]} : vector<2x24xf32> to vector<2x8xf32>
    %768 = vector.extract_strided_slice %750 {offsets = [0, 16], sizes = [2, 8], strides = [1, 1]} : vector<2x24xf32> to vector<2x8xf32>
    %769 = arith.mulf %758, %768 : vector<2x8xf32>
    %770 = arith.addf %767, %769 : vector<2x8xf32>
    %771 = math.tanh %770 : vector<2x8xf32>
    %cst_181 = arith.constant 1.000000e+00 : f32
    %772 = vector.broadcast %cst_181 : f32 to vector<2x8xf32>
    %773 = arith.subf %772, %766 : vector<2x8xf32>
    %774 = arith.mulf %773, %771 : vector<2x8xf32>
    %775 = arith.mulf %766, %743 : vector<2x8xf32>
    %776 = arith.addf %774, %775 : vector<2x8xf32>
    %cst_182 = arith.constant dense<0.000000e+00> : vector<2x8xf32>
    %777 = tpu.matmul %776, %23, %cst_182 {dimension_numbers = #tpu.dot_dimension_numbers<[1], [0], [0], [1], [0, 0, 1, 1], [], []>} : vector<2x8xf32>, vector<8x8xf32>, vector<2x8xf32> -> vector<2x8xf32>
    %778 = vector.broadcast %24 : vector<1x8xf32> to vector<2x8xf32>
    %779 = arith.addf %777, %778 : vector<2x8xf32>
    %cst_183 = arith.constant 0.000000e+00 : f32
    %780 = vector.broadcast %cst_183 : f32 to vector<2x8xf32>
    %781 = arith.maximumf %779, %780 : vector<2x8xf32>
    %cst_184 = arith.constant dense<0.000000e+00> : vector<2x24xf32>
    %782 = tpu.matmul %781, %19, %cst_184 {dimension_numbers = #tpu.dot_dimension_numbers<[1], [0], [0], [1], [0, 0, 1, 1], [], []>} : vector<2x8xf32>, vector<8x24xf32>, vector<2x24xf32> -> vector<2x24xf32>
    %783 = vector.broadcast %21 : vector<1x24xf32> to vector<2x24xf32>
    %784 = arith.addf %782, %783 : vector<2x24xf32>
    %cst_185 = arith.constant dense<0.000000e+00> : vector<2x24xf32>
    %785 = tpu.matmul %776, %20, %cst_185 {dimension_numbers = #tpu.dot_dimension_numbers<[1], [0], [0], [1], [0, 0, 1, 1], [], []>} : vector<2x8xf32>, vector<8x24xf32>, vector<2x24xf32> -> vector<2x24xf32>
    %786 = vector.broadcast %22 : vector<1x24xf32> to vector<2x24xf32>
    %787 = arith.addf %785, %786 : vector<2x24xf32>
    %788 = vector.extract_strided_slice %784 {offsets = [0, 0], sizes = [2, 8], strides = [1, 1]} : vector<2x24xf32> to vector<2x8xf32>
    %789 = vector.extract_strided_slice %787 {offsets = [0, 0], sizes = [2, 8], strides = [1, 1]} : vector<2x24xf32> to vector<2x8xf32>
    %790 = arith.addf %788, %789 : vector<2x8xf32>
    %791 = arith.negf %790 : vector<2x8xf32>
    %792 = math.exp %791 : vector<2x8xf32>
    %cst_186 = arith.constant 1.000000e+00 : f32
    %793 = vector.broadcast %cst_186 : f32 to vector<2x8xf32>
    %794 = arith.addf %793, %792 : vector<2x8xf32>
    %795 = arith.divf %793, %794 : vector<2x8xf32>
    %796 = vector.extract_strided_slice %784 {offsets = [0, 8], sizes = [2, 8], strides = [1, 1]} : vector<2x24xf32> to vector<2x8xf32>
    %797 = vector.extract_strided_slice %787 {offsets = [0, 8], sizes = [2, 8], strides = [1, 1]} : vector<2x24xf32> to vector<2x8xf32>
    %798 = arith.addf %796, %797 : vector<2x8xf32>
    %799 = arith.negf %798 : vector<2x8xf32>
    %800 = math.exp %799 : vector<2x8xf32>
    %cst_187 = arith.constant 1.000000e+00 : f32
    %801 = vector.broadcast %cst_187 : f32 to vector<2x8xf32>
    %802 = arith.addf %801, %800 : vector<2x8xf32>
    %803 = arith.divf %801, %802 : vector<2x8xf32>
    %804 = vector.extract_strided_slice %784 {offsets = [0, 16], sizes = [2, 8], strides = [1, 1]} : vector<2x24xf32> to vector<2x8xf32>
    %805 = vector.extract_strided_slice %787 {offsets = [0, 16], sizes = [2, 8], strides = [1, 1]} : vector<2x24xf32> to vector<2x8xf32>
    %806 = arith.mulf %795, %805 : vector<2x8xf32>
    %807 = arith.addf %804, %806 : vector<2x8xf32>
    %808 = math.tanh %807 : vector<2x8xf32>
    %cst_188 = arith.constant 1.000000e+00 : f32
    %809 = vector.broadcast %cst_188 : f32 to vector<2x8xf32>
    %810 = arith.subf %809, %803 : vector<2x8xf32>
    %811 = arith.mulf %810, %808 : vector<2x8xf32>
    %812 = arith.mulf %803, %776 : vector<2x8xf32>
    %813 = arith.addf %811, %812 : vector<2x8xf32>
    %cst_189 = arith.constant dense<0.000000e+00> : vector<2x8xf32>
    %814 = tpu.matmul %813, %23, %cst_189 {dimension_numbers = #tpu.dot_dimension_numbers<[1], [0], [0], [1], [0, 0, 1, 1], [], []>} : vector<2x8xf32>, vector<8x8xf32>, vector<2x8xf32> -> vector<2x8xf32>
    %815 = vector.broadcast %24 : vector<1x8xf32> to vector<2x8xf32>
    %816 = arith.addf %814, %815 : vector<2x8xf32>
    %cst_190 = arith.constant 0.000000e+00 : f32
    %817 = vector.broadcast %cst_190 : f32 to vector<2x8xf32>
    %818 = arith.maximumf %816, %817 : vector<2x8xf32>
    %cst_191 = arith.constant dense<0.000000e+00> : vector<2x24xf32>
    %819 = tpu.matmul %818, %19, %cst_191 {dimension_numbers = #tpu.dot_dimension_numbers<[1], [0], [0], [1], [0, 0, 1, 1], [], []>} : vector<2x8xf32>, vector<8x24xf32>, vector<2x24xf32> -> vector<2x24xf32>
    %820 = vector.broadcast %21 : vector<1x24xf32> to vector<2x24xf32>
    %821 = arith.addf %819, %820 : vector<2x24xf32>
    %cst_192 = arith.constant dense<0.000000e+00> : vector<2x24xf32>
    %822 = tpu.matmul %813, %20, %cst_192 {dimension_numbers = #tpu.dot_dimension_numbers<[1], [0], [0], [1], [0, 0, 1, 1], [], []>} : vector<2x8xf32>, vector<8x24xf32>, vector<2x24xf32> -> vector<2x24xf32>
    %823 = vector.broadcast %22 : vector<1x24xf32> to vector<2x24xf32>
    %824 = arith.addf %822, %823 : vector<2x24xf32>
    %825 = vector.extract_strided_slice %821 {offsets = [0, 0], sizes = [2, 8], strides = [1, 1]} : vector<2x24xf32> to vector<2x8xf32>
    %826 = vector.extract_strided_slice %824 {offsets = [0, 0], sizes = [2, 8], strides = [1, 1]} : vector<2x24xf32> to vector<2x8xf32>
    %827 = arith.addf %825, %826 : vector<2x8xf32>
    %828 = arith.negf %827 : vector<2x8xf32>
    %829 = math.exp %828 : vector<2x8xf32>
    %cst_193 = arith.constant 1.000000e+00 : f32
    %830 = vector.broadcast %cst_193 : f32 to vector<2x8xf32>
    %831 = arith.addf %830, %829 : vector<2x8xf32>
    %832 = arith.divf %830, %831 : vector<2x8xf32>
    %833 = vector.extract_strided_slice %821 {offsets = [0, 8], sizes = [2, 8], strides = [1, 1]} : vector<2x24xf32> to vector<2x8xf32>
    %834 = vector.extract_strided_slice %824 {offsets = [0, 8], sizes = [2, 8], strides = [1, 1]} : vector<2x24xf32> to vector<2x8xf32>
    %835 = arith.addf %833, %834 : vector<2x8xf32>
    %836 = arith.negf %835 : vector<2x8xf32>
    %837 = math.exp %836 : vector<2x8xf32>
    %cst_194 = arith.constant 1.000000e+00 : f32
    %838 = vector.broadcast %cst_194 : f32 to vector<2x8xf32>
    %839 = arith.addf %838, %837 : vector<2x8xf32>
    %840 = arith.divf %838, %839 : vector<2x8xf32>
    %841 = vector.extract_strided_slice %821 {offsets = [0, 16], sizes = [2, 8], strides = [1, 1]} : vector<2x24xf32> to vector<2x8xf32>
    %842 = vector.extract_strided_slice %824 {offsets = [0, 16], sizes = [2, 8], strides = [1, 1]} : vector<2x24xf32> to vector<2x8xf32>
    %843 = arith.mulf %832, %842 : vector<2x8xf32>
    %844 = arith.addf %841, %843 : vector<2x8xf32>
    %845 = math.tanh %844 : vector<2x8xf32>
    %cst_195 = arith.constant 1.000000e+00 : f32
    %846 = vector.broadcast %cst_195 : f32 to vector<2x8xf32>
    %847 = arith.subf %846, %840 : vector<2x8xf32>
    %848 = arith.mulf %847, %845 : vector<2x8xf32>
    %849 = arith.mulf %840, %813 : vector<2x8xf32>
    %850 = arith.addf %848, %849 : vector<2x8xf32>
    %cst_196 = arith.constant dense<0.000000e+00> : vector<2x8xf32>
    %851 = tpu.matmul %850, %23, %cst_196 {dimension_numbers = #tpu.dot_dimension_numbers<[1], [0], [0], [1], [0, 0, 1, 1], [], []>} : vector<2x8xf32>, vector<8x8xf32>, vector<2x8xf32> -> vector<2x8xf32>
    %852 = vector.broadcast %24 : vector<1x8xf32> to vector<2x8xf32>
    %853 = arith.addf %851, %852 : vector<2x8xf32>
    %cst_197 = arith.constant 0.000000e+00 : f32
    %854 = vector.broadcast %cst_197 : f32 to vector<2x8xf32>
    %855 = arith.maximumf %853, %854 : vector<2x8xf32>
    %cst_198 = arith.constant dense<0.000000e+00> : vector<2x24xf32>
    %856 = tpu.matmul %855, %19, %cst_198 {dimension_numbers = #tpu.dot_dimension_numbers<[1], [0], [0], [1], [0, 0, 1, 1], [], []>} : vector<2x8xf32>, vector<8x24xf32>, vector<2x24xf32> -> vector<2x24xf32>
    %857 = vector.broadcast %21 : vector<1x24xf32> to vector<2x24xf32>
    %858 = arith.addf %856, %857 : vector<2x24xf32>
    %cst_199 = arith.constant dense<0.000000e+00> : vector<2x24xf32>
    %859 = tpu.matmul %850, %20, %cst_199 {dimension_numbers = #tpu.dot_dimension_numbers<[1], [0], [0], [1], [0, 0, 1, 1], [], []>} : vector<2x8xf32>, vector<8x24xf32>, vector<2x24xf32> -> vector<2x24xf32>
    %860 = vector.broadcast %22 : vector<1x24xf32> to vector<2x24xf32>
    %861 = arith.addf %859, %860 : vector<2x24xf32>
    %862 = vector.extract_strided_slice %858 {offsets = [0, 0], sizes = [2, 8], strides = [1, 1]} : vector<2x24xf32> to vector<2x8xf32>
    %863 = vector.extract_strided_slice %861 {offsets = [0, 0], sizes = [2, 8], strides = [1, 1]} : vector<2x24xf32> to vector<2x8xf32>
    %864 = arith.addf %862, %863 : vector<2x8xf32>
    %865 = arith.negf %864 : vector<2x8xf32>
    %866 = math.exp %865 : vector<2x8xf32>
    %cst_200 = arith.constant 1.000000e+00 : f32
    %867 = vector.broadcast %cst_200 : f32 to vector<2x8xf32>
    %868 = arith.addf %867, %866 : vector<2x8xf32>
    %869 = arith.divf %867, %868 : vector<2x8xf32>
    %870 = vector.extract_strided_slice %858 {offsets = [0, 8], sizes = [2, 8], strides = [1, 1]} : vector<2x24xf32> to vector<2x8xf32>
    %871 = vector.extract_strided_slice %861 {offsets = [0, 8], sizes = [2, 8], strides = [1, 1]} : vector<2x24xf32> to vector<2x8xf32>
    %872 = arith.addf %870, %871 : vector<2x8xf32>
    %873 = arith.negf %872 : vector<2x8xf32>
    %874 = math.exp %873 : vector<2x8xf32>
    %cst_201 = arith.constant 1.000000e+00 : f32
    %875 = vector.broadcast %cst_201 : f32 to vector<2x8xf32>
    %876 = arith.addf %875, %874 : vector<2x8xf32>
    %877 = arith.divf %875, %876 : vector<2x8xf32>
    %878 = vector.extract_strided_slice %858 {offsets = [0, 16], sizes = [2, 8], strides = [1, 1]} : vector<2x24xf32> to vector<2x8xf32>
    %879 = vector.extract_strided_slice %861 {offsets = [0, 16], sizes = [2, 8], strides = [1, 1]} : vector<2x24xf32> to vector<2x8xf32>
    %880 = arith.mulf %869, %879 : vector<2x8xf32>
    %881 = arith.addf %878, %880 : vector<2x8xf32>
    %882 = math.tanh %881 : vector<2x8xf32>
    %cst_202 = arith.constant 1.000000e+00 : f32
    %883 = vector.broadcast %cst_202 : f32 to vector<2x8xf32>
    %884 = arith.subf %883, %877 : vector<2x8xf32>
    %885 = arith.mulf %884, %882 : vector<2x8xf32>
    %886 = arith.mulf %877, %850 : vector<2x8xf32>
    %887 = arith.addf %885, %886 : vector<2x8xf32>
    %888 = tpu.concatenate %776, %813, %850, %887 in 1 : vector<2x8xf32>, vector<2x8xf32>, vector<2x8xf32>, vector<2x8xf32> -> vector<2x32xf32>
    %c6_203 = arith.constant 6 : index
    %c0_204 = arith.constant 0 : index
    %889 = vector.load %arg6[%c6_203, %c0_204] : memref<16x32xf32, #tpu.memory_space<vmem>>, vector<2x32xf32>
    tpu.vector_store %arg6[%c6_203, %c0_204], %888 {strides = array<i32>} : memref<16x32xf32, #tpu.memory_space<vmem>>, vector<2x32xf32>,
    %cst_205 = arith.constant dense<0.000000e+00> : vector<2x32xf32>
    %890 = tpu.matmul %888, %25, %cst_205 {dimension_numbers = #tpu.dot_dimension_numbers<[1], [0], [0], [1], [0, 0, 1, 1], [], []>} : vector<2x32xf32>, vector<32x32xf32>, vector<2x32xf32> -> vector<2x32xf32>
    %891 = vector.broadcast %26 : vector<1x32xf32> to vector<2x32xf32>
    %892 = arith.addf %890, %891 : vector<2x32xf32>
    %cst_206 = arith.constant 0.000000e+00 : f32
    %893 = vector.broadcast %cst_206 : f32 to vector<2x32xf32>
    %894 = arith.maximumf %892, %893 : vector<2x32xf32>
    %895 = math.tanh %894 : vector<2x32xf32>
    %cst_207 = arith.constant dense<0.000000e+00> : vector<2x4xf32>
    %896 = tpu.matmul %895, %27, %cst_207 {dimension_numbers = #tpu.dot_dimension_numbers<[1], [0], [0], [1], [0, 0, 1, 1], [], []>} : vector<2x32xf32>, vector<32x4xf32>, vector<2x4xf32> -> vector<2x4xf32>
    %897 = vector.broadcast %28 : vector<1x1xf32> to vector<2x4xf32>
    %898 = arith.addf %896, %897 : vector<2x4xf32>
    %cst_208 = arith.constant 0.000000e+00 : f32
    %899 = vector.broadcast %cst_208 : f32 to vector<2x4xf32>
    %900 = arith.maximumf %898, %899 : vector<2x4xf32>
    %cst_209 = arith.constant dense<0xFF800000> : vector<2xf32>
    %901 = vector.multi_reduction <maximumf>, %900, %cst_209 [1] : vector<2x4xf32> to vector<2xf32>
    %902 = vector.shape_cast %901 : vector<2xf32> to vector<2x1xf32>
    %903 = vector.broadcast %902 : vector<2x1xf32> to vector<2x4xf32>
    %904 = arith.subf %900, %903 : vector<2x4xf32>
    %905 = math.exp %904 : vector<2x4xf32>
    %cst_210 = arith.constant dense<0.000000e+00> : vector<2xf32>
    %906 = vector.multi_reduction <add>, %905, %cst_210 [1] : vector<2x4xf32> to vector<2xf32>
    %907 = vector.shape_cast %906 : vector<2xf32> to vector<2x1xf32>
    %908 = vector.broadcast %907 : vector<2x1xf32> to vector<2x4xf32>
    %909 = arith.divf %905, %908 : vector<2x4xf32>
    %910 = vector.extract_strided_slice %909 {offsets = [0, 0], sizes = [2, 1], strides = [1, 1]} : vector<2x4xf32> to vector<2x1xf32>
    %911 = vector.extract_strided_slice %894 {offsets = [0, 0], sizes = [2, 8], strides = [1, 1]} : vector<2x32xf32> to vector<2x8xf32>
    %912 = vector.broadcast %910 : vector<2x1xf32> to vector<2x8xf32>
    %913 = arith.mulf %912, %911 : vector<2x8xf32>
    %cst_211 = arith.constant 0.000000e+00 : f32
    %914 = vector.broadcast %cst_211 : f32 to vector<2x8xf32>
    %915 = arith.addf %914, %913 : vector<2x8xf32>
    %916 = vector.extract_strided_slice %909 {offsets = [0, 1], sizes = [2, 1], strides = [1, 1]} : vector<2x4xf32> to vector<2x1xf32>
    %917 = vector.extract_strided_slice %894 {offsets = [0, 8], sizes = [2, 8], strides = [1, 1]} : vector<2x32xf32> to vector<2x8xf32>
    %918 = vector.broadcast %916 : vector<2x1xf32> to vector<2x8xf32>
    %919 = arith.mulf %918, %917 : vector<2x8xf32>
    %920 = arith.addf %915, %919 : vector<2x8xf32>
    %921 = vector.extract_strided_slice %909 {offsets = [0, 2], sizes = [2, 1], strides = [1, 1]} : vector<2x4xf32> to vector<2x1xf32>
    %922 = vector.extract_strided_slice %894 {offsets = [0, 16], sizes = [2, 8], strides = [1, 1]} : vector<2x32xf32> to vector<2x8xf32>
    %923 = vector.broadcast %921 : vector<2x1xf32> to vector<2x8xf32>
    %924 = arith.mulf %923, %922 : vector<2x8xf32>
    %925 = arith.addf %920, %924 : vector<2x8xf32>
    %926 = vector.extract_strided_slice %909 {offsets = [0, 3], sizes = [2, 1], strides = [1, 1]} : vector<2x4xf32> to vector<2x1xf32>
    %927 = vector.extract_strided_slice %894 {offsets = [0, 24], sizes = [2, 8], strides = [1, 1]} : vector<2x32xf32> to vector<2x8xf32>
    %928 = vector.broadcast %926 : vector<2x1xf32> to vector<2x8xf32>
    %929 = arith.mulf %928, %927 : vector<2x8xf32>
    %930 = arith.addf %925, %929 : vector<2x8xf32>
    %c8_212 = arith.constant 8 : index
    %c0_213 = arith.constant 0 : index
    %931 = vector.load %arg4[%c8_212, %c0_213] : memref<16x96xf32, #tpu.memory_space<vmem>>, vector<2x96xf32>
    %cst_214 = arith.constant dense<0.000000e+00> : vector<2x96xf32>
    %932 = tpu.matmul %930, %14, %cst_214 {dimension_numbers = #tpu.dot_dimension_numbers<[1], [0], [0], [1], [0, 0, 1, 1], [], []>} : vector<2x8xf32>, vector<8x96xf32>, vector<2x96xf32> -> vector<2x96xf32>
    %933 = arith.addf %931, %932 : vector<2x96xf32>
    %cst_215 = arith.constant dense<0.000000e+00> : vector<2x96xf32>
    %934 = tpu.matmul %737, %15, %cst_215 {dimension_numbers = #tpu.dot_dimension_numbers<[1], [0], [0], [1], [0, 0, 1, 1], [], []>} : vector<2x32xf32>, vector<32x96xf32>, vector<2x96xf32> -> vector<2x96xf32>
    %935 = vector.broadcast %16 : vector<1x96xf32> to vector<2x96xf32>
    %936 = arith.addf %934, %935 : vector<2x96xf32>
    %937 = vector.extract_strided_slice %933 {offsets = [0, 0], sizes = [2, 32], strides = [1, 1]} : vector<2x96xf32> to vector<2x32xf32>
    %938 = vector.extract_strided_slice %936 {offsets = [0, 0], sizes = [2, 32], strides = [1, 1]} : vector<2x96xf32> to vector<2x32xf32>
    %939 = arith.addf %937, %938 : vector<2x32xf32>
    %940 = arith.negf %939 : vector<2x32xf32>
    %941 = math.exp %940 : vector<2x32xf32>
    %cst_216 = arith.constant 1.000000e+00 : f32
    %942 = vector.broadcast %cst_216 : f32 to vector<2x32xf32>
    %943 = arith.addf %942, %941 : vector<2x32xf32>
    %944 = arith.divf %942, %943 : vector<2x32xf32>
    %945 = vector.extract_strided_slice %933 {offsets = [0, 32], sizes = [2, 32], strides = [1, 1]} : vector<2x96xf32> to vector<2x32xf32>
    %946 = vector.extract_strided_slice %936 {offsets = [0, 32], sizes = [2, 32], strides = [1, 1]} : vector<2x96xf32> to vector<2x32xf32>
    %947 = arith.addf %945, %946 : vector<2x32xf32>
    %948 = arith.negf %947 : vector<2x32xf32>
    %949 = math.exp %948 : vector<2x32xf32>
    %cst_217 = arith.constant 1.000000e+00 : f32
    %950 = vector.broadcast %cst_217 : f32 to vector<2x32xf32>
    %951 = arith.addf %950, %949 : vector<2x32xf32>
    %952 = arith.divf %950, %951 : vector<2x32xf32>
    %953 = vector.extract_strided_slice %933 {offsets = [0, 64], sizes = [2, 32], strides = [1, 1]} : vector<2x96xf32> to vector<2x32xf32>
    %954 = vector.extract_strided_slice %936 {offsets = [0, 64], sizes = [2, 32], strides = [1, 1]} : vector<2x96xf32> to vector<2x32xf32>
    %955 = arith.mulf %944, %954 : vector<2x32xf32>
    %956 = arith.addf %953, %955 : vector<2x32xf32>
    %957 = math.tanh %956 : vector<2x32xf32>
    %cst_218 = arith.constant 1.000000e+00 : f32
    %958 = vector.broadcast %cst_218 : f32 to vector<2x32xf32>
    %959 = arith.subf %958, %952 : vector<2x32xf32>
    %960 = arith.mulf %959, %957 : vector<2x32xf32>
    %961 = arith.mulf %952, %737 : vector<2x32xf32>
    %962 = arith.addf %960, %961 : vector<2x32xf32>
    %c8_219 = arith.constant 8 : index
    %c0_220 = arith.constant 0 : index
    %963 = vector.load %arg5[%c8_219, %c0_220] : memref<16x32xf32, #tpu.memory_space<vmem>>, vector<2x32xf32>
    tpu.vector_store %arg5[%c8_219, %c0_220], %962 {strides = array<i32>} : memref<16x32xf32, #tpu.memory_space<vmem>>, vector<2x32xf32>,
    %cst_221 = arith.constant dense<0.000000e+00> : vector<2x8xf32>
    %964 = tpu.matmul %962, %17, %cst_221 {dimension_numbers = #tpu.dot_dimension_numbers<[1], [0], [0], [1], [0, 0, 1, 1], [], []>} : vector<2x32xf32>, vector<32x8xf32>, vector<2x8xf32> -> vector<2x8xf32>
    %965 = vector.broadcast %18 : vector<1x8xf32> to vector<2x8xf32>
    %966 = arith.addf %964, %965 : vector<2x8xf32>
    %cst_222 = arith.constant 0.000000e+00 : f32
    %967 = vector.broadcast %cst_222 : f32 to vector<2x8xf32>
    %968 = arith.maximumf %966, %967 : vector<2x8xf32>
    %cst_223 = arith.constant 0.000000e+00 : f32
    %969 = vector.broadcast %cst_223 : f32 to vector<2x8xf32>
    %cst_224 = arith.constant dense<0.000000e+00> : vector<2x24xf32>
    %970 = tpu.matmul %969, %19, %cst_224 {dimension_numbers = #tpu.dot_dimension_numbers<[1], [0], [0], [1], [0, 0, 1, 1], [], []>} : vector<2x8xf32>, vector<8x24xf32>, vector<2x24xf32> -> vector<2x24xf32>
    %971 = vector.broadcast %21 : vector<1x24xf32> to vector<2x24xf32>
    %972 = arith.addf %970, %971 : vector<2x24xf32>
    %cst_225 = arith.constant dense<0.000000e+00> : vector<2x24xf32>
    %973 = tpu.matmul %968, %20, %cst_225 {dimension_numbers = #tpu.dot_dimension_numbers<[1], [0], [0], [1], [0, 0, 1, 1], [], []>} : vector<2x8xf32>, vector<8x24xf32>, vector<2x24xf32> -> vector<2x24xf32>
    %974 = vector.broadcast %22 : vector<1x24xf32> to vector<2x24xf32>
    %975 = arith.addf %973, %974 : vector<2x24xf32>
    %976 = vector.extract_strided_slice %972 {offsets = [0, 0], sizes = [2, 8], strides = [1, 1]} : vector<2x24xf32> to vector<2x8xf32>
    %977 = vector.extract_strided_slice %975 {offsets = [0, 0], sizes = [2, 8], strides = [1, 1]} : vector<2x24xf32> to vector<2x8xf32>
    %978 = arith.addf %976, %977 : vector<2x8xf32>
    %979 = arith.negf %978 : vector<2x8xf32>
    %980 = math.exp %979 : vector<2x8xf32>
    %cst_226 = arith.constant 1.000000e+00 : f32
    %981 = vector.broadcast %cst_226 : f32 to vector<2x8xf32>
    %982 = arith.addf %981, %980 : vector<2x8xf32>
    %983 = arith.divf %981, %982 : vector<2x8xf32>
    %984 = vector.extract_strided_slice %972 {offsets = [0, 8], sizes = [2, 8], strides = [1, 1]} : vector<2x24xf32> to vector<2x8xf32>
    %985 = vector.extract_strided_slice %975 {offsets = [0, 8], sizes = [2, 8], strides = [1, 1]} : vector<2x24xf32> to vector<2x8xf32>
    %986 = arith.addf %984, %985 : vector<2x8xf32>
    %987 = arith.negf %986 : vector<2x8xf32>
    %988 = math.exp %987 : vector<2x8xf32>
    %cst_227 = arith.constant 1.000000e+00 : f32
    %989 = vector.broadcast %cst_227 : f32 to vector<2x8xf32>
    %990 = arith.addf %989, %988 : vector<2x8xf32>
    %991 = arith.divf %989, %990 : vector<2x8xf32>
    %992 = vector.extract_strided_slice %972 {offsets = [0, 16], sizes = [2, 8], strides = [1, 1]} : vector<2x24xf32> to vector<2x8xf32>
    %993 = vector.extract_strided_slice %975 {offsets = [0, 16], sizes = [2, 8], strides = [1, 1]} : vector<2x24xf32> to vector<2x8xf32>
    %994 = arith.mulf %983, %993 : vector<2x8xf32>
    %995 = arith.addf %992, %994 : vector<2x8xf32>
    %996 = math.tanh %995 : vector<2x8xf32>
    %cst_228 = arith.constant 1.000000e+00 : f32
    %997 = vector.broadcast %cst_228 : f32 to vector<2x8xf32>
    %998 = arith.subf %997, %991 : vector<2x8xf32>
    %999 = arith.mulf %998, %996 : vector<2x8xf32>
    %1000 = arith.mulf %991, %968 : vector<2x8xf32>
    %1001 = arith.addf %999, %1000 : vector<2x8xf32>
    %cst_229 = arith.constant dense<0.000000e+00> : vector<2x8xf32>
    %1002 = tpu.matmul %1001, %23, %cst_229 {dimension_numbers = #tpu.dot_dimension_numbers<[1], [0], [0], [1], [0, 0, 1, 1], [], []>} : vector<2x8xf32>, vector<8x8xf32>, vector<2x8xf32> -> vector<2x8xf32>
    %1003 = vector.broadcast %24 : vector<1x8xf32> to vector<2x8xf32>
    %1004 = arith.addf %1002, %1003 : vector<2x8xf32>
    %cst_230 = arith.constant 0.000000e+00 : f32
    %1005 = vector.broadcast %cst_230 : f32 to vector<2x8xf32>
    %1006 = arith.maximumf %1004, %1005 : vector<2x8xf32>
    %cst_231 = arith.constant dense<0.000000e+00> : vector<2x24xf32>
    %1007 = tpu.matmul %1006, %19, %cst_231 {dimension_numbers = #tpu.dot_dimension_numbers<[1], [0], [0], [1], [0, 0, 1, 1], [], []>} : vector<2x8xf32>, vector<8x24xf32>, vector<2x24xf32> -> vector<2x24xf32>
    %1008 = vector.broadcast %21 : vector<1x24xf32> to vector<2x24xf32>
    %1009 = arith.addf %1007, %1008 : vector<2x24xf32>
    %cst_232 = arith.constant dense<0.000000e+00> : vector<2x24xf32>
    %1010 = tpu.matmul %1001, %20, %cst_232 {dimension_numbers = #tpu.dot_dimension_numbers<[1], [0], [0], [1], [0, 0, 1, 1], [], []>} : vector<2x8xf32>, vector<8x24xf32>, vector<2x24xf32> -> vector<2x24xf32>
    %1011 = vector.broadcast %22 : vector<1x24xf32> to vector<2x24xf32>
    %1012 = arith.addf %1010, %1011 : vector<2x24xf32>
    %1013 = vector.extract_strided_slice %1009 {offsets = [0, 0], sizes = [2, 8], strides = [1, 1]} : vector<2x24xf32> to vector<2x8xf32>
    %1014 = vector.extract_strided_slice %1012 {offsets = [0, 0], sizes = [2, 8], strides = [1, 1]} : vector<2x24xf32> to vector<2x8xf32>
    %1015 = arith.addf %1013, %1014 : vector<2x8xf32>
    %1016 = arith.negf %1015 : vector<2x8xf32>
    %1017 = math.exp %1016 : vector<2x8xf32>
    %cst_233 = arith.constant 1.000000e+00 : f32
    %1018 = vector.broadcast %cst_233 : f32 to vector<2x8xf32>
    %1019 = arith.addf %1018, %1017 : vector<2x8xf32>
    %1020 = arith.divf %1018, %1019 : vector<2x8xf32>
    %1021 = vector.extract_strided_slice %1009 {offsets = [0, 8], sizes = [2, 8], strides = [1, 1]} : vector<2x24xf32> to vector<2x8xf32>
    %1022 = vector.extract_strided_slice %1012 {offsets = [0, 8], sizes = [2, 8], strides = [1, 1]} : vector<2x24xf32> to vector<2x8xf32>
    %1023 = arith.addf %1021, %1022 : vector<2x8xf32>
    %1024 = arith.negf %1023 : vector<2x8xf32>
    %1025 = math.exp %1024 : vector<2x8xf32>
    %cst_234 = arith.constant 1.000000e+00 : f32
    %1026 = vector.broadcast %cst_234 : f32 to vector<2x8xf32>
    %1027 = arith.addf %1026, %1025 : vector<2x8xf32>
    %1028 = arith.divf %1026, %1027 : vector<2x8xf32>
    %1029 = vector.extract_strided_slice %1009 {offsets = [0, 16], sizes = [2, 8], strides = [1, 1]} : vector<2x24xf32> to vector<2x8xf32>
    %1030 = vector.extract_strided_slice %1012 {offsets = [0, 16], sizes = [2, 8], strides = [1, 1]} : vector<2x24xf32> to vector<2x8xf32>
    %1031 = arith.mulf %1020, %1030 : vector<2x8xf32>
    %1032 = arith.addf %1029, %1031 : vector<2x8xf32>
    %1033 = math.tanh %1032 : vector<2x8xf32>
    %cst_235 = arith.constant 1.000000e+00 : f32
    %1034 = vector.broadcast %cst_235 : f32 to vector<2x8xf32>
    %1035 = arith.subf %1034, %1028 : vector<2x8xf32>
    %1036 = arith.mulf %1035, %1033 : vector<2x8xf32>
    %1037 = arith.mulf %1028, %1001 : vector<2x8xf32>
    %1038 = arith.addf %1036, %1037 : vector<2x8xf32>
    %cst_236 = arith.constant dense<0.000000e+00> : vector<2x8xf32>
    %1039 = tpu.matmul %1038, %23, %cst_236 {dimension_numbers = #tpu.dot_dimension_numbers<[1], [0], [0], [1], [0, 0, 1, 1], [], []>} : vector<2x8xf32>, vector<8x8xf32>, vector<2x8xf32> -> vector<2x8xf32>
    %1040 = vector.broadcast %24 : vector<1x8xf32> to vector<2x8xf32>
    %1041 = arith.addf %1039, %1040 : vector<2x8xf32>
    %cst_237 = arith.constant 0.000000e+00 : f32
    %1042 = vector.broadcast %cst_237 : f32 to vector<2x8xf32>
    %1043 = arith.maximumf %1041, %1042 : vector<2x8xf32>
    %cst_238 = arith.constant dense<0.000000e+00> : vector<2x24xf32>
    %1044 = tpu.matmul %1043, %19, %cst_238 {dimension_numbers = #tpu.dot_dimension_numbers<[1], [0], [0], [1], [0, 0, 1, 1], [], []>} : vector<2x8xf32>, vector<8x24xf32>, vector<2x24xf32> -> vector<2x24xf32>
    %1045 = vector.broadcast %21 : vector<1x24xf32> to vector<2x24xf32>
    %1046 = arith.addf %1044, %1045 : vector<2x24xf32>
    %cst_239 = arith.constant dense<0.000000e+00> : vector<2x24xf32>
    %1047 = tpu.matmul %1038, %20, %cst_239 {dimension_numbers = #tpu.dot_dimension_numbers<[1], [0], [0], [1], [0, 0, 1, 1], [], []>} : vector<2x8xf32>, vector<8x24xf32>, vector<2x24xf32> -> vector<2x24xf32>
    %1048 = vector.broadcast %22 : vector<1x24xf32> to vector<2x24xf32>
    %1049 = arith.addf %1047, %1048 : vector<2x24xf32>
    %1050 = vector.extract_strided_slice %1046 {offsets = [0, 0], sizes = [2, 8], strides = [1, 1]} : vector<2x24xf32> to vector<2x8xf32>
    %1051 = vector.extract_strided_slice %1049 {offsets = [0, 0], sizes = [2, 8], strides = [1, 1]} : vector<2x24xf32> to vector<2x8xf32>
    %1052 = arith.addf %1050, %1051 : vector<2x8xf32>
    %1053 = arith.negf %1052 : vector<2x8xf32>
    %1054 = math.exp %1053 : vector<2x8xf32>
    %cst_240 = arith.constant 1.000000e+00 : f32
    %1055 = vector.broadcast %cst_240 : f32 to vector<2x8xf32>
    %1056 = arith.addf %1055, %1054 : vector<2x8xf32>
    %1057 = arith.divf %1055, %1056 : vector<2x8xf32>
    %1058 = vector.extract_strided_slice %1046 {offsets = [0, 8], sizes = [2, 8], strides = [1, 1]} : vector<2x24xf32> to vector<2x8xf32>
    %1059 = vector.extract_strided_slice %1049 {offsets = [0, 8], sizes = [2, 8], strides = [1, 1]} : vector<2x24xf32> to vector<2x8xf32>
    %1060 = arith.addf %1058, %1059 : vector<2x8xf32>
    %1061 = arith.negf %1060 : vector<2x8xf32>
    %1062 = math.exp %1061 : vector<2x8xf32>
    %cst_241 = arith.constant 1.000000e+00 : f32
    %1063 = vector.broadcast %cst_241 : f32 to vector<2x8xf32>
    %1064 = arith.addf %1063, %1062 : vector<2x8xf32>
    %1065 = arith.divf %1063, %1064 : vector<2x8xf32>
    %1066 = vector.extract_strided_slice %1046 {offsets = [0, 16], sizes = [2, 8], strides = [1, 1]} : vector<2x24xf32> to vector<2x8xf32>
    %1067 = vector.extract_strided_slice %1049 {offsets = [0, 16], sizes = [2, 8], strides = [1, 1]} : vector<2x24xf32> to vector<2x8xf32>
    %1068 = arith.mulf %1057, %1067 : vector<2x8xf32>
    %1069 = arith.addf %1066, %1068 : vector<2x8xf32>
    %1070 = math.tanh %1069 : vector<2x8xf32>
    %cst_242 = arith.constant 1.000000e+00 : f32
    %1071 = vector.broadcast %cst_242 : f32 to vector<2x8xf32>
    %1072 = arith.subf %1071, %1065 : vector<2x8xf32>
    %1073 = arith.mulf %1072, %1070 : vector<2x8xf32>
    %1074 = arith.mulf %1065, %1038 : vector<2x8xf32>
    %1075 = arith.addf %1073, %1074 : vector<2x8xf32>
    %cst_243 = arith.constant dense<0.000000e+00> : vector<2x8xf32>
    %1076 = tpu.matmul %1075, %23, %cst_243 {dimension_numbers = #tpu.dot_dimension_numbers<[1], [0], [0], [1], [0, 0, 1, 1], [], []>} : vector<2x8xf32>, vector<8x8xf32>, vector<2x8xf32> -> vector<2x8xf32>
    %1077 = vector.broadcast %24 : vector<1x8xf32> to vector<2x8xf32>
    %1078 = arith.addf %1076, %1077 : vector<2x8xf32>
    %cst_244 = arith.constant 0.000000e+00 : f32
    %1079 = vector.broadcast %cst_244 : f32 to vector<2x8xf32>
    %1080 = arith.maximumf %1078, %1079 : vector<2x8xf32>
    %cst_245 = arith.constant dense<0.000000e+00> : vector<2x24xf32>
    %1081 = tpu.matmul %1080, %19, %cst_245 {dimension_numbers = #tpu.dot_dimension_numbers<[1], [0], [0], [1], [0, 0, 1, 1], [], []>} : vector<2x8xf32>, vector<8x24xf32>, vector<2x24xf32> -> vector<2x24xf32>
    %1082 = vector.broadcast %21 : vector<1x24xf32> to vector<2x24xf32>
    %1083 = arith.addf %1081, %1082 : vector<2x24xf32>
    %cst_246 = arith.constant dense<0.000000e+00> : vector<2x24xf32>
    %1084 = tpu.matmul %1075, %20, %cst_246 {dimension_numbers = #tpu.dot_dimension_numbers<[1], [0], [0], [1], [0, 0, 1, 1], [], []>} : vector<2x8xf32>, vector<8x24xf32>, vector<2x24xf32> -> vector<2x24xf32>
    %1085 = vector.broadcast %22 : vector<1x24xf32> to vector<2x24xf32>
    %1086 = arith.addf %1084, %1085 : vector<2x24xf32>
    %1087 = vector.extract_strided_slice %1083 {offsets = [0, 0], sizes = [2, 8], strides = [1, 1]} : vector<2x24xf32> to vector<2x8xf32>
    %1088 = vector.extract_strided_slice %1086 {offsets = [0, 0], sizes = [2, 8], strides = [1, 1]} : vector<2x24xf32> to vector<2x8xf32>
    %1089 = arith.addf %1087, %1088 : vector<2x8xf32>
    %1090 = arith.negf %1089 : vector<2x8xf32>
    %1091 = math.exp %1090 : vector<2x8xf32>
    %cst_247 = arith.constant 1.000000e+00 : f32
    %1092 = vector.broadcast %cst_247 : f32 to vector<2x8xf32>
    %1093 = arith.addf %1092, %1091 : vector<2x8xf32>
    %1094 = arith.divf %1092, %1093 : vector<2x8xf32>
    %1095 = vector.extract_strided_slice %1083 {offsets = [0, 8], sizes = [2, 8], strides = [1, 1]} : vector<2x24xf32> to vector<2x8xf32>
    %1096 = vector.extract_strided_slice %1086 {offsets = [0, 8], sizes = [2, 8], strides = [1, 1]} : vector<2x24xf32> to vector<2x8xf32>
    %1097 = arith.addf %1095, %1096 : vector<2x8xf32>
    %1098 = arith.negf %1097 : vector<2x8xf32>
    %1099 = math.exp %1098 : vector<2x8xf32>
    %cst_248 = arith.constant 1.000000e+00 : f32
    %1100 = vector.broadcast %cst_248 : f32 to vector<2x8xf32>
    %1101 = arith.addf %1100, %1099 : vector<2x8xf32>
    %1102 = arith.divf %1100, %1101 : vector<2x8xf32>
    %1103 = vector.extract_strided_slice %1083 {offsets = [0, 16], sizes = [2, 8], strides = [1, 1]} : vector<2x24xf32> to vector<2x8xf32>
    %1104 = vector.extract_strided_slice %1086 {offsets = [0, 16], sizes = [2, 8], strides = [1, 1]} : vector<2x24xf32> to vector<2x8xf32>
    %1105 = arith.mulf %1094, %1104 : vector<2x8xf32>
    %1106 = arith.addf %1103, %1105 : vector<2x8xf32>
    %1107 = math.tanh %1106 : vector<2x8xf32>
    %cst_249 = arith.constant 1.000000e+00 : f32
    %1108 = vector.broadcast %cst_249 : f32 to vector<2x8xf32>
    %1109 = arith.subf %1108, %1102 : vector<2x8xf32>
    %1110 = arith.mulf %1109, %1107 : vector<2x8xf32>
    %1111 = arith.mulf %1102, %1075 : vector<2x8xf32>
    %1112 = arith.addf %1110, %1111 : vector<2x8xf32>
    %1113 = tpu.concatenate %1001, %1038, %1075, %1112 in 1 : vector<2x8xf32>, vector<2x8xf32>, vector<2x8xf32>, vector<2x8xf32> -> vector<2x32xf32>
    %c8_250 = arith.constant 8 : index
    %c0_251 = arith.constant 0 : index
    %1114 = vector.load %arg6[%c8_250, %c0_251] : memref<16x32xf32, #tpu.memory_space<vmem>>, vector<2x32xf32>
    tpu.vector_store %arg6[%c8_250, %c0_251], %1113 {strides = array<i32>} : memref<16x32xf32, #tpu.memory_space<vmem>>, vector<2x32xf32>,
    %cst_252 = arith.constant dense<0.000000e+00> : vector<2x32xf32>
    %1115 = tpu.matmul %1113, %25, %cst_252 {dimension_numbers = #tpu.dot_dimension_numbers<[1], [0], [0], [1], [0, 0, 1, 1], [], []>} : vector<2x32xf32>, vector<32x32xf32>, vector<2x32xf32> -> vector<2x32xf32>
    %1116 = vector.broadcast %26 : vector<1x32xf32> to vector<2x32xf32>
    %1117 = arith.addf %1115, %1116 : vector<2x32xf32>
    %cst_253 = arith.constant 0.000000e+00 : f32
    %1118 = vector.broadcast %cst_253 : f32 to vector<2x32xf32>
    %1119 = arith.maximumf %1117, %1118 : vector<2x32xf32>
    %1120 = math.tanh %1119 : vector<2x32xf32>
    %cst_254 = arith.constant dense<0.000000e+00> : vector<2x4xf32>
    %1121 = tpu.matmul %1120, %27, %cst_254 {dimension_numbers = #tpu.dot_dimension_numbers<[1], [0], [0], [1], [0, 0, 1, 1], [], []>} : vector<2x32xf32>, vector<32x4xf32>, vector<2x4xf32> -> vector<2x4xf32>
    %1122 = vector.broadcast %28 : vector<1x1xf32> to vector<2x4xf32>
    %1123 = arith.addf %1121, %1122 : vector<2x4xf32>
    %cst_255 = arith.constant 0.000000e+00 : f32
    %1124 = vector.broadcast %cst_255 : f32 to vector<2x4xf32>
    %1125 = arith.maximumf %1123, %1124 : vector<2x4xf32>
    %cst_256 = arith.constant dense<0xFF800000> : vector<2xf32>
    %1126 = vector.multi_reduction <maximumf>, %1125, %cst_256 [1] : vector<2x4xf32> to vector<2xf32>
    %1127 = vector.shape_cast %1126 : vector<2xf32> to vector<2x1xf32>
    %1128 = vector.broadcast %1127 : vector<2x1xf32> to vector<2x4xf32>
    %1129 = arith.subf %1125, %1128 : vector<2x4xf32>
    %1130 = math.exp %1129 : vector<2x4xf32>
    %cst_257 = arith.constant dense<0.000000e+00> : vector<2xf32>
    %1131 = vector.multi_reduction <add>, %1130, %cst_257 [1] : vector<2x4xf32> to vector<2xf32>
    %1132 = vector.shape_cast %1131 : vector<2xf32> to vector<2x1xf32>
    %1133 = vector.broadcast %1132 : vector<2x1xf32> to vector<2x4xf32>
    %1134 = arith.divf %1130, %1133 : vector<2x4xf32>
    %1135 = vector.extract_strided_slice %1134 {offsets = [0, 0], sizes = [2, 1], strides = [1, 1]} : vector<2x4xf32> to vector<2x1xf32>
    %1136 = vector.extract_strided_slice %1119 {offsets = [0, 0], sizes = [2, 8], strides = [1, 1]} : vector<2x32xf32> to vector<2x8xf32>
    %1137 = vector.broadcast %1135 : vector<2x1xf32> to vector<2x8xf32>
    %1138 = arith.mulf %1137, %1136 : vector<2x8xf32>
    %cst_258 = arith.constant 0.000000e+00 : f32
    %1139 = vector.broadcast %cst_258 : f32 to vector<2x8xf32>
    %1140 = arith.addf %1139, %1138 : vector<2x8xf32>
    %1141 = vector.extract_strided_slice %1134 {offsets = [0, 1], sizes = [2, 1], strides = [1, 1]} : vector<2x4xf32> to vector<2x1xf32>
    %1142 = vector.extract_strided_slice %1119 {offsets = [0, 8], sizes = [2, 8], strides = [1, 1]} : vector<2x32xf32> to vector<2x8xf32>
    %1143 = vector.broadcast %1141 : vector<2x1xf32> to vector<2x8xf32>
    %1144 = arith.mulf %1143, %1142 : vector<2x8xf32>
    %1145 = arith.addf %1140, %1144 : vector<2x8xf32>
    %1146 = vector.extract_strided_slice %1134 {offsets = [0, 2], sizes = [2, 1], strides = [1, 1]} : vector<2x4xf32> to vector<2x1xf32>
    %1147 = vector.extract_strided_slice %1119 {offsets = [0, 16], sizes = [2, 8], strides = [1, 1]} : vector<2x32xf32> to vector<2x8xf32>
    %1148 = vector.broadcast %1146 : vector<2x1xf32> to vector<2x8xf32>
    %1149 = arith.mulf %1148, %1147 : vector<2x8xf32>
    %1150 = arith.addf %1145, %1149 : vector<2x8xf32>
    %1151 = vector.extract_strided_slice %1134 {offsets = [0, 3], sizes = [2, 1], strides = [1, 1]} : vector<2x4xf32> to vector<2x1xf32>
    %1152 = vector.extract_strided_slice %1119 {offsets = [0, 24], sizes = [2, 8], strides = [1, 1]} : vector<2x32xf32> to vector<2x8xf32>
    %1153 = vector.broadcast %1151 : vector<2x1xf32> to vector<2x8xf32>
    %1154 = arith.mulf %1153, %1152 : vector<2x8xf32>
    %1155 = arith.addf %1150, %1154 : vector<2x8xf32>
    %c10 = arith.constant 10 : index
    %c0_259 = arith.constant 0 : index
    %1156 = vector.load %arg4[%c10, %c0_259] : memref<16x96xf32, #tpu.memory_space<vmem>>, vector<2x96xf32>
    %cst_260 = arith.constant dense<0.000000e+00> : vector<2x96xf32>
    %1157 = tpu.matmul %1155, %14, %cst_260 {dimension_numbers = #tpu.dot_dimension_numbers<[1], [0], [0], [1], [0, 0, 1, 1], [], []>} : vector<2x8xf32>, vector<8x96xf32>, vector<2x96xf32> -> vector<2x96xf32>
    %1158 = arith.addf %1156, %1157 : vector<2x96xf32>
    %cst_261 = arith.constant dense<0.000000e+00> : vector<2x96xf32>
    %1159 = tpu.matmul %962, %15, %cst_261 {dimension_numbers = #tpu.dot_dimension_numbers<[1], [0], [0], [1], [0, 0, 1, 1], [], []>} : vector<2x32xf32>, vector<32x96xf32>, vector<2x96xf32> -> vector<2x96xf32>
    %1160 = vector.broadcast %16 : vector<1x96xf32> to vector<2x96xf32>
    %1161 = arith.addf %1159, %1160 : vector<2x96xf32>
    %1162 = vector.extract_strided_slice %1158 {offsets = [0, 0], sizes = [2, 32], strides = [1, 1]} : vector<2x96xf32> to vector<2x32xf32>
    %1163 = vector.extract_strided_slice %1161 {offsets = [0, 0], sizes = [2, 32], strides = [1, 1]} : vector<2x96xf32> to vector<2x32xf32>
    %1164 = arith.addf %1162, %1163 : vector<2x32xf32>
    %1165 = arith.negf %1164 : vector<2x32xf32>
    %1166 = math.exp %1165 : vector<2x32xf32>
    %cst_262 = arith.constant 1.000000e+00 : f32
    %1167 = vector.broadcast %cst_262 : f32 to vector<2x32xf32>
    %1168 = arith.addf %1167, %1166 : vector<2x32xf32>
    %1169 = arith.divf %1167, %1168 : vector<2x32xf32>
    %1170 = vector.extract_strided_slice %1158 {offsets = [0, 32], sizes = [2, 32], strides = [1, 1]} : vector<2x96xf32> to vector<2x32xf32>
    %1171 = vector.extract_strided_slice %1161 {offsets = [0, 32], sizes = [2, 32], strides = [1, 1]} : vector<2x96xf32> to vector<2x32xf32>
    %1172 = arith.addf %1170, %1171 : vector<2x32xf32>
    %1173 = arith.negf %1172 : vector<2x32xf32>
    %1174 = math.exp %1173 : vector<2x32xf32>
    %cst_263 = arith.constant 1.000000e+00 : f32
    %1175 = vector.broadcast %cst_263 : f32 to vector<2x32xf32>
    %1176 = arith.addf %1175, %1174 : vector<2x32xf32>
    %1177 = arith.divf %1175, %1176 : vector<2x32xf32>
    %1178 = vector.extract_strided_slice %1158 {offsets = [0, 64], sizes = [2, 32], strides = [1, 1]} : vector<2x96xf32> to vector<2x32xf32>
    %1179 = vector.extract_strided_slice %1161 {offsets = [0, 64], sizes = [2, 32], strides = [1, 1]} : vector<2x96xf32> to vector<2x32xf32>
    %1180 = arith.mulf %1169, %1179 : vector<2x32xf32>
    %1181 = arith.addf %1178, %1180 : vector<2x32xf32>
    %1182 = math.tanh %1181 : vector<2x32xf32>
    %cst_264 = arith.constant 1.000000e+00 : f32
    %1183 = vector.broadcast %cst_264 : f32 to vector<2x32xf32>
    %1184 = arith.subf %1183, %1177 : vector<2x32xf32>
    %1185 = arith.mulf %1184, %1182 : vector<2x32xf32>
    %1186 = arith.mulf %1177, %962 : vector<2x32xf32>
    %1187 = arith.addf %1185, %1186 : vector<2x32xf32>
    %c10_265 = arith.constant 10 : index
    %c0_266 = arith.constant 0 : index
    %1188 = vector.load %arg5[%c10_265, %c0_266] : memref<16x32xf32, #tpu.memory_space<vmem>>, vector<2x32xf32>
    tpu.vector_store %arg5[%c10_265, %c0_266], %1187 {strides = array<i32>} : memref<16x32xf32, #tpu.memory_space<vmem>>, vector<2x32xf32>,
    %cst_267 = arith.constant dense<0.000000e+00> : vector<2x8xf32>
    %1189 = tpu.matmul %1187, %17, %cst_267 {dimension_numbers = #tpu.dot_dimension_numbers<[1], [0], [0], [1], [0, 0, 1, 1], [], []>} : vector<2x32xf32>, vector<32x8xf32>, vector<2x8xf32> -> vector<2x8xf32>
    %1190 = vector.broadcast %18 : vector<1x8xf32> to vector<2x8xf32>
    %1191 = arith.addf %1189, %1190 : vector<2x8xf32>
    %cst_268 = arith.constant 0.000000e+00 : f32
    %1192 = vector.broadcast %cst_268 : f32 to vector<2x8xf32>
    %1193 = arith.maximumf %1191, %1192 : vector<2x8xf32>
    %cst_269 = arith.constant 0.000000e+00 : f32
    %1194 = vector.broadcast %cst_269 : f32 to vector<2x8xf32>
    %cst_270 = arith.constant dense<0.000000e+00> : vector<2x24xf32>
    %1195 = tpu.matmul %1194, %19, %cst_270 {dimension_numbers = #tpu.dot_dimension_numbers<[1], [0], [0], [1], [0, 0, 1, 1], [], []>} : vector<2x8xf32>, vector<8x24xf32>, vector<2x24xf32> -> vector<2x24xf32>
    %1196 = vector.broadcast %21 : vector<1x24xf32> to vector<2x24xf32>
    %1197 = arith.addf %1195, %1196 : vector<2x24xf32>
    %cst_271 = arith.constant dense<0.000000e+00> : vector<2x24xf32>
    %1198 = tpu.matmul %1193, %20, %cst_271 {dimension_numbers = #tpu.dot_dimension_numbers<[1], [0], [0], [1], [0, 0, 1, 1], [], []>} : vector<2x8xf32>, vector<8x24xf32>, vector<2x24xf32> -> vector<2x24xf32>
    %1199 = vector.broadcast %22 : vector<1x24xf32> to vector<2x24xf32>
    %1200 = arith.addf %1198, %1199 : vector<2x24xf32>
    %1201 = vector.extract_strided_slice %1197 {offsets = [0, 0], sizes = [2, 8], strides = [1, 1]} : vector<2x24xf32> to vector<2x8xf32>
    %1202 = vector.extract_strided_slice %1200 {offsets = [0, 0], sizes = [2, 8], strides = [1, 1]} : vector<2x24xf32> to vector<2x8xf32>
    %1203 = arith.addf %1201, %1202 : vector<2x8xf32>
    %1204 = arith.negf %1203 : vector<2x8xf32>
    %1205 = math.exp %1204 : vector<2x8xf32>
    %cst_272 = arith.constant 1.000000e+00 : f32
    %1206 = vector.broadcast %cst_272 : f32 to vector<2x8xf32>
    %1207 = arith.addf %1206, %1205 : vector<2x8xf32>
    %1208 = arith.divf %1206, %1207 : vector<2x8xf32>
    %1209 = vector.extract_strided_slice %1197 {offsets = [0, 8], sizes = [2, 8], strides = [1, 1]} : vector<2x24xf32> to vector<2x8xf32>
    %1210 = vector.extract_strided_slice %1200 {offsets = [0, 8], sizes = [2, 8], strides = [1, 1]} : vector<2x24xf32> to vector<2x8xf32>
    %1211 = arith.addf %1209, %1210 : vector<2x8xf32>
    %1212 = arith.negf %1211 : vector<2x8xf32>
    %1213 = math.exp %1212 : vector<2x8xf32>
    %cst_273 = arith.constant 1.000000e+00 : f32
    %1214 = vector.broadcast %cst_273 : f32 to vector<2x8xf32>
    %1215 = arith.addf %1214, %1213 : vector<2x8xf32>
    %1216 = arith.divf %1214, %1215 : vector<2x8xf32>
    %1217 = vector.extract_strided_slice %1197 {offsets = [0, 16], sizes = [2, 8], strides = [1, 1]} : vector<2x24xf32> to vector<2x8xf32>
    %1218 = vector.extract_strided_slice %1200 {offsets = [0, 16], sizes = [2, 8], strides = [1, 1]} : vector<2x24xf32> to vector<2x8xf32>
    %1219 = arith.mulf %1208, %1218 : vector<2x8xf32>
    %1220 = arith.addf %1217, %1219 : vector<2x8xf32>
    %1221 = math.tanh %1220 : vector<2x8xf32>
    %cst_274 = arith.constant 1.000000e+00 : f32
    %1222 = vector.broadcast %cst_274 : f32 to vector<2x8xf32>
    %1223 = arith.subf %1222, %1216 : vector<2x8xf32>
    %1224 = arith.mulf %1223, %1221 : vector<2x8xf32>
    %1225 = arith.mulf %1216, %1193 : vector<2x8xf32>
    %1226 = arith.addf %1224, %1225 : vector<2x8xf32>
    %cst_275 = arith.constant dense<0.000000e+00> : vector<2x8xf32>
    %1227 = tpu.matmul %1226, %23, %cst_275 {dimension_numbers = #tpu.dot_dimension_numbers<[1], [0], [0], [1], [0, 0, 1, 1], [], []>} : vector<2x8xf32>, vector<8x8xf32>, vector<2x8xf32> -> vector<2x8xf32>
    %1228 = vector.broadcast %24 : vector<1x8xf32> to vector<2x8xf32>
    %1229 = arith.addf %1227, %1228 : vector<2x8xf32>
    %cst_276 = arith.constant 0.000000e+00 : f32
    %1230 = vector.broadcast %cst_276 : f32 to vector<2x8xf32>
    %1231 = arith.maximumf %1229, %1230 : vector<2x8xf32>
    %cst_277 = arith.constant dense<0.000000e+00> : vector<2x24xf32>
    %1232 = tpu.matmul %1231, %19, %cst_277 {dimension_numbers = #tpu.dot_dimension_numbers<[1], [0], [0], [1], [0, 0, 1, 1], [], []>} : vector<2x8xf32>, vector<8x24xf32>, vector<2x24xf32> -> vector<2x24xf32>
    %1233 = vector.broadcast %21 : vector<1x24xf32> to vector<2x24xf32>
    %1234 = arith.addf %1232, %1233 : vector<2x24xf32>
    %cst_278 = arith.constant dense<0.000000e+00> : vector<2x24xf32>
    %1235 = tpu.matmul %1226, %20, %cst_278 {dimension_numbers = #tpu.dot_dimension_numbers<[1], [0], [0], [1], [0, 0, 1, 1], [], []>} : vector<2x8xf32>, vector<8x24xf32>, vector<2x24xf32> -> vector<2x24xf32>
    %1236 = vector.broadcast %22 : vector<1x24xf32> to vector<2x24xf32>
    %1237 = arith.addf %1235, %1236 : vector<2x24xf32>
    %1238 = vector.extract_strided_slice %1234 {offsets = [0, 0], sizes = [2, 8], strides = [1, 1]} : vector<2x24xf32> to vector<2x8xf32>
    %1239 = vector.extract_strided_slice %1237 {offsets = [0, 0], sizes = [2, 8], strides = [1, 1]} : vector<2x24xf32> to vector<2x8xf32>
    %1240 = arith.addf %1238, %1239 : vector<2x8xf32>
    %1241 = arith.negf %1240 : vector<2x8xf32>
    %1242 = math.exp %1241 : vector<2x8xf32>
    %cst_279 = arith.constant 1.000000e+00 : f32
    %1243 = vector.broadcast %cst_279 : f32 to vector<2x8xf32>
    %1244 = arith.addf %1243, %1242 : vector<2x8xf32>
    %1245 = arith.divf %1243, %1244 : vector<2x8xf32>
    %1246 = vector.extract_strided_slice %1234 {offsets = [0, 8], sizes = [2, 8], strides = [1, 1]} : vector<2x24xf32> to vector<2x8xf32>
    %1247 = vector.extract_strided_slice %1237 {offsets = [0, 8], sizes = [2, 8], strides = [1, 1]} : vector<2x24xf32> to vector<2x8xf32>
    %1248 = arith.addf %1246, %1247 : vector<2x8xf32>
    %1249 = arith.negf %1248 : vector<2x8xf32>
    %1250 = math.exp %1249 : vector<2x8xf32>
    %cst_280 = arith.constant 1.000000e+00 : f32
    %1251 = vector.broadcast %cst_280 : f32 to vector<2x8xf32>
    %1252 = arith.addf %1251, %1250 : vector<2x8xf32>
    %1253 = arith.divf %1251, %1252 : vector<2x8xf32>
    %1254 = vector.extract_strided_slice %1234 {offsets = [0, 16], sizes = [2, 8], strides = [1, 1]} : vector<2x24xf32> to vector<2x8xf32>
    %1255 = vector.extract_strided_slice %1237 {offsets = [0, 16], sizes = [2, 8], strides = [1, 1]} : vector<2x24xf32> to vector<2x8xf32>
    %1256 = arith.mulf %1245, %1255 : vector<2x8xf32>
    %1257 = arith.addf %1254, %1256 : vector<2x8xf32>
    %1258 = math.tanh %1257 : vector<2x8xf32>
    %cst_281 = arith.constant 1.000000e+00 : f32
    %1259 = vector.broadcast %cst_281 : f32 to vector<2x8xf32>
    %1260 = arith.subf %1259, %1253 : vector<2x8xf32>
    %1261 = arith.mulf %1260, %1258 : vector<2x8xf32>
    %1262 = arith.mulf %1253, %1226 : vector<2x8xf32>
    %1263 = arith.addf %1261, %1262 : vector<2x8xf32>
    %cst_282 = arith.constant dense<0.000000e+00> : vector<2x8xf32>
    %1264 = tpu.matmul %1263, %23, %cst_282 {dimension_numbers = #tpu.dot_dimension_numbers<[1], [0], [0], [1], [0, 0, 1, 1], [], []>} : vector<2x8xf32>, vector<8x8xf32>, vector<2x8xf32> -> vector<2x8xf32>
    %1265 = vector.broadcast %24 : vector<1x8xf32> to vector<2x8xf32>
    %1266 = arith.addf %1264, %1265 : vector<2x8xf32>
    %cst_283 = arith.constant 0.000000e+00 : f32
    %1267 = vector.broadcast %cst_283 : f32 to vector<2x8xf32>
    %1268 = arith.maximumf %1266, %1267 : vector<2x8xf32>
    %cst_284 = arith.constant dense<0.000000e+00> : vector<2x24xf32>
    %1269 = tpu.matmul %1268, %19, %cst_284 {dimension_numbers = #tpu.dot_dimension_numbers<[1], [0], [0], [1], [0, 0, 1, 1], [], []>} : vector<2x8xf32>, vector<8x24xf32>, vector<2x24xf32> -> vector<2x24xf32>
    %1270 = vector.broadcast %21 : vector<1x24xf32> to vector<2x24xf32>
    %1271 = arith.addf %1269, %1270 : vector<2x24xf32>
    %cst_285 = arith.constant dense<0.000000e+00> : vector<2x24xf32>
    %1272 = tpu.matmul %1263, %20, %cst_285 {dimension_numbers = #tpu.dot_dimension_numbers<[1], [0], [0], [1], [0, 0, 1, 1], [], []>} : vector<2x8xf32>, vector<8x24xf32>, vector<2x24xf32> -> vector<2x24xf32>
    %1273 = vector.broadcast %22 : vector<1x24xf32> to vector<2x24xf32>
    %1274 = arith.addf %1272, %1273 : vector<2x24xf32>
    %1275 = vector.extract_strided_slice %1271 {offsets = [0, 0], sizes = [2, 8], strides = [1, 1]} : vector<2x24xf32> to vector<2x8xf32>
    %1276 = vector.extract_strided_slice %1274 {offsets = [0, 0], sizes = [2, 8], strides = [1, 1]} : vector<2x24xf32> to vector<2x8xf32>
    %1277 = arith.addf %1275, %1276 : vector<2x8xf32>
    %1278 = arith.negf %1277 : vector<2x8xf32>
    %1279 = math.exp %1278 : vector<2x8xf32>
    %cst_286 = arith.constant 1.000000e+00 : f32
    %1280 = vector.broadcast %cst_286 : f32 to vector<2x8xf32>
    %1281 = arith.addf %1280, %1279 : vector<2x8xf32>
    %1282 = arith.divf %1280, %1281 : vector<2x8xf32>
    %1283 = vector.extract_strided_slice %1271 {offsets = [0, 8], sizes = [2, 8], strides = [1, 1]} : vector<2x24xf32> to vector<2x8xf32>
    %1284 = vector.extract_strided_slice %1274 {offsets = [0, 8], sizes = [2, 8], strides = [1, 1]} : vector<2x24xf32> to vector<2x8xf32>
    %1285 = arith.addf %1283, %1284 : vector<2x8xf32>
    %1286 = arith.negf %1285 : vector<2x8xf32>
    %1287 = math.exp %1286 : vector<2x8xf32>
    %cst_287 = arith.constant 1.000000e+00 : f32
    %1288 = vector.broadcast %cst_287 : f32 to vector<2x8xf32>
    %1289 = arith.addf %1288, %1287 : vector<2x8xf32>
    %1290 = arith.divf %1288, %1289 : vector<2x8xf32>
    %1291 = vector.extract_strided_slice %1271 {offsets = [0, 16], sizes = [2, 8], strides = [1, 1]} : vector<2x24xf32> to vector<2x8xf32>
    %1292 = vector.extract_strided_slice %1274 {offsets = [0, 16], sizes = [2, 8], strides = [1, 1]} : vector<2x24xf32> to vector<2x8xf32>
    %1293 = arith.mulf %1282, %1292 : vector<2x8xf32>
    %1294 = arith.addf %1291, %1293 : vector<2x8xf32>
    %1295 = math.tanh %1294 : vector<2x8xf32>
    %cst_288 = arith.constant 1.000000e+00 : f32
    %1296 = vector.broadcast %cst_288 : f32 to vector<2x8xf32>
    %1297 = arith.subf %1296, %1290 : vector<2x8xf32>
    %1298 = arith.mulf %1297, %1295 : vector<2x8xf32>
    %1299 = arith.mulf %1290, %1263 : vector<2x8xf32>
    %1300 = arith.addf %1298, %1299 : vector<2x8xf32>
    %cst_289 = arith.constant dense<0.000000e+00> : vector<2x8xf32>
    %1301 = tpu.matmul %1300, %23, %cst_289 {dimension_numbers = #tpu.dot_dimension_numbers<[1], [0], [0], [1], [0, 0, 1, 1], [], []>} : vector<2x8xf32>, vector<8x8xf32>, vector<2x8xf32> -> vector<2x8xf32>
    %1302 = vector.broadcast %24 : vector<1x8xf32> to vector<2x8xf32>
    %1303 = arith.addf %1301, %1302 : vector<2x8xf32>
    %cst_290 = arith.constant 0.000000e+00 : f32
    %1304 = vector.broadcast %cst_290 : f32 to vector<2x8xf32>
    %1305 = arith.maximumf %1303, %1304 : vector<2x8xf32>
    %cst_291 = arith.constant dense<0.000000e+00> : vector<2x24xf32>
    %1306 = tpu.matmul %1305, %19, %cst_291 {dimension_numbers = #tpu.dot_dimension_numbers<[1], [0], [0], [1], [0, 0, 1, 1], [], []>} : vector<2x8xf32>, vector<8x24xf32>, vector<2x24xf32> -> vector<2x24xf32>
    %1307 = vector.broadcast %21 : vector<1x24xf32> to vector<2x24xf32>
    %1308 = arith.addf %1306, %1307 : vector<2x24xf32>
    %cst_292 = arith.constant dense<0.000000e+00> : vector<2x24xf32>
    %1309 = tpu.matmul %1300, %20, %cst_292 {dimension_numbers = #tpu.dot_dimension_numbers<[1], [0], [0], [1], [0, 0, 1, 1], [], []>} : vector<2x8xf32>, vector<8x24xf32>, vector<2x24xf32> -> vector<2x24xf32>
    %1310 = vector.broadcast %22 : vector<1x24xf32> to vector<2x24xf32>
    %1311 = arith.addf %1309, %1310 : vector<2x24xf32>
    %1312 = vector.extract_strided_slice %1308 {offsets = [0, 0], sizes = [2, 8], strides = [1, 1]} : vector<2x24xf32> to vector<2x8xf32>
    %1313 = vector.extract_strided_slice %1311 {offsets = [0, 0], sizes = [2, 8], strides = [1, 1]} : vector<2x24xf32> to vector<2x8xf32>
    %1314 = arith.addf %1312, %1313 : vector<2x8xf32>
    %1315 = arith.negf %1314 : vector<2x8xf32>
    %1316 = math.exp %1315 : vector<2x8xf32>
    %cst_293 = arith.constant 1.000000e+00 : f32
    %1317 = vector.broadcast %cst_293 : f32 to vector<2x8xf32>
    %1318 = arith.addf %1317, %1316 : vector<2x8xf32>
    %1319 = arith.divf %1317, %1318 : vector<2x8xf32>
    %1320 = vector.extract_strided_slice %1308 {offsets = [0, 8], sizes = [2, 8], strides = [1, 1]} : vector<2x24xf32> to vector<2x8xf32>
    %1321 = vector.extract_strided_slice %1311 {offsets = [0, 8], sizes = [2, 8], strides = [1, 1]} : vector<2x24xf32> to vector<2x8xf32>
    %1322 = arith.addf %1320, %1321 : vector<2x8xf32>
    %1323 = arith.negf %1322 : vector<2x8xf32>
    %1324 = math.exp %1323 : vector<2x8xf32>
    %cst_294 = arith.constant 1.000000e+00 : f32
    %1325 = vector.broadcast %cst_294 : f32 to vector<2x8xf32>
    %1326 = arith.addf %1325, %1324 : vector<2x8xf32>
    %1327 = arith.divf %1325, %1326 : vector<2x8xf32>
    %1328 = vector.extract_strided_slice %1308 {offsets = [0, 16], sizes = [2, 8], strides = [1, 1]} : vector<2x24xf32> to vector<2x8xf32>
    %1329 = vector.extract_strided_slice %1311 {offsets = [0, 16], sizes = [2, 8], strides = [1, 1]} : vector<2x24xf32> to vector<2x8xf32>
    %1330 = arith.mulf %1319, %1329 : vector<2x8xf32>
    %1331 = arith.addf %1328, %1330 : vector<2x8xf32>
    %1332 = math.tanh %1331 : vector<2x8xf32>
    %cst_295 = arith.constant 1.000000e+00 : f32
    %1333 = vector.broadcast %cst_295 : f32 to vector<2x8xf32>
    %1334 = arith.subf %1333, %1327 : vector<2x8xf32>
    %1335 = arith.mulf %1334, %1332 : vector<2x8xf32>
    %1336 = arith.mulf %1327, %1300 : vector<2x8xf32>
    %1337 = arith.addf %1335, %1336 : vector<2x8xf32>
    %1338 = tpu.concatenate %1226, %1263, %1300, %1337 in 1 : vector<2x8xf32>, vector<2x8xf32>, vector<2x8xf32>, vector<2x8xf32> -> vector<2x32xf32>
    %c10_296 = arith.constant 10 : index
    %c0_297 = arith.constant 0 : index
    %1339 = vector.load %arg6[%c10_296, %c0_297] : memref<16x32xf32, #tpu.memory_space<vmem>>, vector<2x32xf32>
    tpu.vector_store %arg6[%c10_296, %c0_297], %1338 {strides = array<i32>} : memref<16x32xf32, #tpu.memory_space<vmem>>, vector<2x32xf32>,
    %cst_298 = arith.constant dense<0.000000e+00> : vector<2x32xf32>
    %1340 = tpu.matmul %1338, %25, %cst_298 {dimension_numbers = #tpu.dot_dimension_numbers<[1], [0], [0], [1], [0, 0, 1, 1], [], []>} : vector<2x32xf32>, vector<32x32xf32>, vector<2x32xf32> -> vector<2x32xf32>
    %1341 = vector.broadcast %26 : vector<1x32xf32> to vector<2x32xf32>
    %1342 = arith.addf %1340, %1341 : vector<2x32xf32>
    %cst_299 = arith.constant 0.000000e+00 : f32
    %1343 = vector.broadcast %cst_299 : f32 to vector<2x32xf32>
    %1344 = arith.maximumf %1342, %1343 : vector<2x32xf32>
    %1345 = math.tanh %1344 : vector<2x32xf32>
    %cst_300 = arith.constant dense<0.000000e+00> : vector<2x4xf32>
    %1346 = tpu.matmul %1345, %27, %cst_300 {dimension_numbers = #tpu.dot_dimension_numbers<[1], [0], [0], [1], [0, 0, 1, 1], [], []>} : vector<2x32xf32>, vector<32x4xf32>, vector<2x4xf32> -> vector<2x4xf32>
    %1347 = vector.broadcast %28 : vector<1x1xf32> to vector<2x4xf32>
    %1348 = arith.addf %1346, %1347 : vector<2x4xf32>
    %cst_301 = arith.constant 0.000000e+00 : f32
    %1349 = vector.broadcast %cst_301 : f32 to vector<2x4xf32>
    %1350 = arith.maximumf %1348, %1349 : vector<2x4xf32>
    %cst_302 = arith.constant dense<0xFF800000> : vector<2xf32>
    %1351 = vector.multi_reduction <maximumf>, %1350, %cst_302 [1] : vector<2x4xf32> to vector<2xf32>
    %1352 = vector.shape_cast %1351 : vector<2xf32> to vector<2x1xf32>
    %1353 = vector.broadcast %1352 : vector<2x1xf32> to vector<2x4xf32>
    %1354 = arith.subf %1350, %1353 : vector<2x4xf32>
    %1355 = math.exp %1354 : vector<2x4xf32>
    %cst_303 = arith.constant dense<0.000000e+00> : vector<2xf32>
    %1356 = vector.multi_reduction <add>, %1355, %cst_303 [1] : vector<2x4xf32> to vector<2xf32>
    %1357 = vector.shape_cast %1356 : vector<2xf32> to vector<2x1xf32>
    %1358 = vector.broadcast %1357 : vector<2x1xf32> to vector<2x4xf32>
    %1359 = arith.divf %1355, %1358 : vector<2x4xf32>
    %1360 = vector.extract_strided_slice %1359 {offsets = [0, 0], sizes = [2, 1], strides = [1, 1]} : vector<2x4xf32> to vector<2x1xf32>
    %1361 = vector.extract_strided_slice %1344 {offsets = [0, 0], sizes = [2, 8], strides = [1, 1]} : vector<2x32xf32> to vector<2x8xf32>
    %1362 = vector.broadcast %1360 : vector<2x1xf32> to vector<2x8xf32>
    %1363 = arith.mulf %1362, %1361 : vector<2x8xf32>
    %cst_304 = arith.constant 0.000000e+00 : f32
    %1364 = vector.broadcast %cst_304 : f32 to vector<2x8xf32>
    %1365 = arith.addf %1364, %1363 : vector<2x8xf32>
    %1366 = vector.extract_strided_slice %1359 {offsets = [0, 1], sizes = [2, 1], strides = [1, 1]} : vector<2x4xf32> to vector<2x1xf32>
    %1367 = vector.extract_strided_slice %1344 {offsets = [0, 8], sizes = [2, 8], strides = [1, 1]} : vector<2x32xf32> to vector<2x8xf32>
    %1368 = vector.broadcast %1366 : vector<2x1xf32> to vector<2x8xf32>
    %1369 = arith.mulf %1368, %1367 : vector<2x8xf32>
    %1370 = arith.addf %1365, %1369 : vector<2x8xf32>
    %1371 = vector.extract_strided_slice %1359 {offsets = [0, 2], sizes = [2, 1], strides = [1, 1]} : vector<2x4xf32> to vector<2x1xf32>
    %1372 = vector.extract_strided_slice %1344 {offsets = [0, 16], sizes = [2, 8], strides = [1, 1]} : vector<2x32xf32> to vector<2x8xf32>
    %1373 = vector.broadcast %1371 : vector<2x1xf32> to vector<2x8xf32>
    %1374 = arith.mulf %1373, %1372 : vector<2x8xf32>
    %1375 = arith.addf %1370, %1374 : vector<2x8xf32>
    %1376 = vector.extract_strided_slice %1359 {offsets = [0, 3], sizes = [2, 1], strides = [1, 1]} : vector<2x4xf32> to vector<2x1xf32>
    %1377 = vector.extract_strided_slice %1344 {offsets = [0, 24], sizes = [2, 8], strides = [1, 1]} : vector<2x32xf32> to vector<2x8xf32>
    %1378 = vector.broadcast %1376 : vector<2x1xf32> to vector<2x8xf32>
    %1379 = arith.mulf %1378, %1377 : vector<2x8xf32>
    %1380 = arith.addf %1375, %1379 : vector<2x8xf32>
    %c12 = arith.constant 12 : index
    %c0_305 = arith.constant 0 : index
    %1381 = vector.load %arg4[%c12, %c0_305] : memref<16x96xf32, #tpu.memory_space<vmem>>, vector<2x96xf32>
    %cst_306 = arith.constant dense<0.000000e+00> : vector<2x96xf32>
    %1382 = tpu.matmul %1380, %14, %cst_306 {dimension_numbers = #tpu.dot_dimension_numbers<[1], [0], [0], [1], [0, 0, 1, 1], [], []>} : vector<2x8xf32>, vector<8x96xf32>, vector<2x96xf32> -> vector<2x96xf32>
    %1383 = arith.addf %1381, %1382 : vector<2x96xf32>
    %cst_307 = arith.constant dense<0.000000e+00> : vector<2x96xf32>
    %1384 = tpu.matmul %1187, %15, %cst_307 {dimension_numbers = #tpu.dot_dimension_numbers<[1], [0], [0], [1], [0, 0, 1, 1], [], []>} : vector<2x32xf32>, vector<32x96xf32>, vector<2x96xf32> -> vector<2x96xf32>
    %1385 = vector.broadcast %16 : vector<1x96xf32> to vector<2x96xf32>
    %1386 = arith.addf %1384, %1385 : vector<2x96xf32>
    %1387 = vector.extract_strided_slice %1383 {offsets = [0, 0], sizes = [2, 32], strides = [1, 1]} : vector<2x96xf32> to vector<2x32xf32>
    %1388 = vector.extract_strided_slice %1386 {offsets = [0, 0], sizes = [2, 32], strides = [1, 1]} : vector<2x96xf32> to vector<2x32xf32>
    %1389 = arith.addf %1387, %1388 : vector<2x32xf32>
    %1390 = arith.negf %1389 : vector<2x32xf32>
    %1391 = math.exp %1390 : vector<2x32xf32>
    %cst_308 = arith.constant 1.000000e+00 : f32
    %1392 = vector.broadcast %cst_308 : f32 to vector<2x32xf32>
    %1393 = arith.addf %1392, %1391 : vector<2x32xf32>
    %1394 = arith.divf %1392, %1393 : vector<2x32xf32>
    %1395 = vector.extract_strided_slice %1383 {offsets = [0, 32], sizes = [2, 32], strides = [1, 1]} : vector<2x96xf32> to vector<2x32xf32>
    %1396 = vector.extract_strided_slice %1386 {offsets = [0, 32], sizes = [2, 32], strides = [1, 1]} : vector<2x96xf32> to vector<2x32xf32>
    %1397 = arith.addf %1395, %1396 : vector<2x32xf32>
    %1398 = arith.negf %1397 : vector<2x32xf32>
    %1399 = math.exp %1398 : vector<2x32xf32>
    %cst_309 = arith.constant 1.000000e+00 : f32
    %1400 = vector.broadcast %cst_309 : f32 to vector<2x32xf32>
    %1401 = arith.addf %1400, %1399 : vector<2x32xf32>
    %1402 = arith.divf %1400, %1401 : vector<2x32xf32>
    %1403 = vector.extract_strided_slice %1383 {offsets = [0, 64], sizes = [2, 32], strides = [1, 1]} : vector<2x96xf32> to vector<2x32xf32>
    %1404 = vector.extract_strided_slice %1386 {offsets = [0, 64], sizes = [2, 32], strides = [1, 1]} : vector<2x96xf32> to vector<2x32xf32>
    %1405 = arith.mulf %1394, %1404 : vector<2x32xf32>
    %1406 = arith.addf %1403, %1405 : vector<2x32xf32>
    %1407 = math.tanh %1406 : vector<2x32xf32>
    %cst_310 = arith.constant 1.000000e+00 : f32
    %1408 = vector.broadcast %cst_310 : f32 to vector<2x32xf32>
    %1409 = arith.subf %1408, %1402 : vector<2x32xf32>
    %1410 = arith.mulf %1409, %1407 : vector<2x32xf32>
    %1411 = arith.mulf %1402, %1187 : vector<2x32xf32>
    %1412 = arith.addf %1410, %1411 : vector<2x32xf32>
    %c12_311 = arith.constant 12 : index
    %c0_312 = arith.constant 0 : index
    %1413 = vector.load %arg5[%c12_311, %c0_312] : memref<16x32xf32, #tpu.memory_space<vmem>>, vector<2x32xf32>
    tpu.vector_store %arg5[%c12_311, %c0_312], %1412 {strides = array<i32>} : memref<16x32xf32, #tpu.memory_space<vmem>>, vector<2x32xf32>,
    %cst_313 = arith.constant dense<0.000000e+00> : vector<2x8xf32>
    %1414 = tpu.matmul %1412, %17, %cst_313 {dimension_numbers = #tpu.dot_dimension_numbers<[1], [0], [0], [1], [0, 0, 1, 1], [], []>} : vector<2x32xf32>, vector<32x8xf32>, vector<2x8xf32> -> vector<2x8xf32>
    %1415 = vector.broadcast %18 : vector<1x8xf32> to vector<2x8xf32>
    %1416 = arith.addf %1414, %1415 : vector<2x8xf32>
    %cst_314 = arith.constant 0.000000e+00 : f32
    %1417 = vector.broadcast %cst_314 : f32 to vector<2x8xf32>
    %1418 = arith.maximumf %1416, %1417 : vector<2x8xf32>
    %cst_315 = arith.constant 0.000000e+00 : f32
    %1419 = vector.broadcast %cst_315 : f32 to vector<2x8xf32>
    %cst_316 = arith.constant dense<0.000000e+00> : vector<2x24xf32>
    %1420 = tpu.matmul %1419, %19, %cst_316 {dimension_numbers = #tpu.dot_dimension_numbers<[1], [0], [0], [1], [0, 0, 1, 1], [], []>} : vector<2x8xf32>, vector<8x24xf32>, vector<2x24xf32> -> vector<2x24xf32>
    %1421 = vector.broadcast %21 : vector<1x24xf32> to vector<2x24xf32>
    %1422 = arith.addf %1420, %1421 : vector<2x24xf32>
    %cst_317 = arith.constant dense<0.000000e+00> : vector<2x24xf32>
    %1423 = tpu.matmul %1418, %20, %cst_317 {dimension_numbers = #tpu.dot_dimension_numbers<[1], [0], [0], [1], [0, 0, 1, 1], [], []>} : vector<2x8xf32>, vector<8x24xf32>, vector<2x24xf32> -> vector<2x24xf32>
    %1424 = vector.broadcast %22 : vector<1x24xf32> to vector<2x24xf32>
    %1425 = arith.addf %1423, %1424 : vector<2x24xf32>
    %1426 = vector.extract_strided_slice %1422 {offsets = [0, 0], sizes = [2, 8], strides = [1, 1]} : vector<2x24xf32> to vector<2x8xf32>
    %1427 = vector.extract_strided_slice %1425 {offsets = [0, 0], sizes = [2, 8], strides = [1, 1]} : vector<2x24xf32> to vector<2x8xf32>
    %1428 = arith.addf %1426, %1427 : vector<2x8xf32>
    %1429 = arith.negf %1428 : vector<2x8xf32>
    %1430 = math.exp %1429 : vector<2x8xf32>
    %cst_318 = arith.constant 1.000000e+00 : f32
    %1431 = vector.broadcast %cst_318 : f32 to vector<2x8xf32>
    %1432 = arith.addf %1431, %1430 : vector<2x8xf32>
    %1433 = arith.divf %1431, %1432 : vector<2x8xf32>
    %1434 = vector.extract_strided_slice %1422 {offsets = [0, 8], sizes = [2, 8], strides = [1, 1]} : vector<2x24xf32> to vector<2x8xf32>
    %1435 = vector.extract_strided_slice %1425 {offsets = [0, 8], sizes = [2, 8], strides = [1, 1]} : vector<2x24xf32> to vector<2x8xf32>
    %1436 = arith.addf %1434, %1435 : vector<2x8xf32>
    %1437 = arith.negf %1436 : vector<2x8xf32>
    %1438 = math.exp %1437 : vector<2x8xf32>
    %cst_319 = arith.constant 1.000000e+00 : f32
    %1439 = vector.broadcast %cst_319 : f32 to vector<2x8xf32>
    %1440 = arith.addf %1439, %1438 : vector<2x8xf32>
    %1441 = arith.divf %1439, %1440 : vector<2x8xf32>
    %1442 = vector.extract_strided_slice %1422 {offsets = [0, 16], sizes = [2, 8], strides = [1, 1]} : vector<2x24xf32> to vector<2x8xf32>
    %1443 = vector.extract_strided_slice %1425 {offsets = [0, 16], sizes = [2, 8], strides = [1, 1]} : vector<2x24xf32> to vector<2x8xf32>
    %1444 = arith.mulf %1433, %1443 : vector<2x8xf32>
    %1445 = arith.addf %1442, %1444 : vector<2x8xf32>
    %1446 = math.tanh %1445 : vector<2x8xf32>
    %cst_320 = arith.constant 1.000000e+00 : f32
    %1447 = vector.broadcast %cst_320 : f32 to vector<2x8xf32>
    %1448 = arith.subf %1447, %1441 : vector<2x8xf32>
    %1449 = arith.mulf %1448, %1446 : vector<2x8xf32>
    %1450 = arith.mulf %1441, %1418 : vector<2x8xf32>
    %1451 = arith.addf %1449, %1450 : vector<2x8xf32>
    %cst_321 = arith.constant dense<0.000000e+00> : vector<2x8xf32>
    %1452 = tpu.matmul %1451, %23, %cst_321 {dimension_numbers = #tpu.dot_dimension_numbers<[1], [0], [0], [1], [0, 0, 1, 1], [], []>} : vector<2x8xf32>, vector<8x8xf32>, vector<2x8xf32> -> vector<2x8xf32>
    %1453 = vector.broadcast %24 : vector<1x8xf32> to vector<2x8xf32>
    %1454 = arith.addf %1452, %1453 : vector<2x8xf32>
    %cst_322 = arith.constant 0.000000e+00 : f32
    %1455 = vector.broadcast %cst_322 : f32 to vector<2x8xf32>
    %1456 = arith.maximumf %1454, %1455 : vector<2x8xf32>
    %cst_323 = arith.constant dense<0.000000e+00> : vector<2x24xf32>
    %1457 = tpu.matmul %1456, %19, %cst_323 {dimension_numbers = #tpu.dot_dimension_numbers<[1], [0], [0], [1], [0, 0, 1, 1], [], []>} : vector<2x8xf32>, vector<8x24xf32>, vector<2x24xf32> -> vector<2x24xf32>
    %1458 = vector.broadcast %21 : vector<1x24xf32> to vector<2x24xf32>
    %1459 = arith.addf %1457, %1458 : vector<2x24xf32>
    %cst_324 = arith.constant dense<0.000000e+00> : vector<2x24xf32>
    %1460 = tpu.matmul %1451, %20, %cst_324 {dimension_numbers = #tpu.dot_dimension_numbers<[1], [0], [0], [1], [0, 0, 1, 1], [], []>} : vector<2x8xf32>, vector<8x24xf32>, vector<2x24xf32> -> vector<2x24xf32>
    %1461 = vector.broadcast %22 : vector<1x24xf32> to vector<2x24xf32>
    %1462 = arith.addf %1460, %1461 : vector<2x24xf32>
    %1463 = vector.extract_strided_slice %1459 {offsets = [0, 0], sizes = [2, 8], strides = [1, 1]} : vector<2x24xf32> to vector<2x8xf32>
    %1464 = vector.extract_strided_slice %1462 {offsets = [0, 0], sizes = [2, 8], strides = [1, 1]} : vector<2x24xf32> to vector<2x8xf32>
    %1465 = arith.addf %1463, %1464 : vector<2x8xf32>
    %1466 = arith.negf %1465 : vector<2x8xf32>
    %1467 = math.exp %1466 : vector<2x8xf32>
    %cst_325 = arith.constant 1.000000e+00 : f32
    %1468 = vector.broadcast %cst_325 : f32 to vector<2x8xf32>
    %1469 = arith.addf %1468, %1467 : vector<2x8xf32>
    %1470 = arith.divf %1468, %1469 : vector<2x8xf32>
    %1471 = vector.extract_strided_slice %1459 {offsets = [0, 8], sizes = [2, 8], strides = [1, 1]} : vector<2x24xf32> to vector<2x8xf32>
    %1472 = vector.extract_strided_slice %1462 {offsets = [0, 8], sizes = [2, 8], strides = [1, 1]} : vector<2x24xf32> to vector<2x8xf32>
    %1473 = arith.addf %1471, %1472 : vector<2x8xf32>
    %1474 = arith.negf %1473 : vector<2x8xf32>
    %1475 = math.exp %1474 : vector<2x8xf32>
    %cst_326 = arith.constant 1.000000e+00 : f32
    %1476 = vector.broadcast %cst_326 : f32 to vector<2x8xf32>
    %1477 = arith.addf %1476, %1475 : vector<2x8xf32>
    %1478 = arith.divf %1476, %1477 : vector<2x8xf32>
    %1479 = vector.extract_strided_slice %1459 {offsets = [0, 16], sizes = [2, 8], strides = [1, 1]} : vector<2x24xf32> to vector<2x8xf32>
    %1480 = vector.extract_strided_slice %1462 {offsets = [0, 16], sizes = [2, 8], strides = [1, 1]} : vector<2x24xf32> to vector<2x8xf32>
    %1481 = arith.mulf %1470, %1480 : vector<2x8xf32>
    %1482 = arith.addf %1479, %1481 : vector<2x8xf32>
    %1483 = math.tanh %1482 : vector<2x8xf32>
    %cst_327 = arith.constant 1.000000e+00 : f32
    %1484 = vector.broadcast %cst_327 : f32 to vector<2x8xf32>
    %1485 = arith.subf %1484, %1478 : vector<2x8xf32>
    %1486 = arith.mulf %1485, %1483 : vector<2x8xf32>
    %1487 = arith.mulf %1478, %1451 : vector<2x8xf32>
    %1488 = arith.addf %1486, %1487 : vector<2x8xf32>
    %cst_328 = arith.constant dense<0.000000e+00> : vector<2x8xf32>
    %1489 = tpu.matmul %1488, %23, %cst_328 {dimension_numbers = #tpu.dot_dimension_numbers<[1], [0], [0], [1], [0, 0, 1, 1], [], []>} : vector<2x8xf32>, vector<8x8xf32>, vector<2x8xf32> -> vector<2x8xf32>
    %1490 = vector.broadcast %24 : vector<1x8xf32> to vector<2x8xf32>
    %1491 = arith.addf %1489, %1490 : vector<2x8xf32>
    %cst_329 = arith.constant 0.000000e+00 : f32
    %1492 = vector.broadcast %cst_329 : f32 to vector<2x8xf32>
    %1493 = arith.maximumf %1491, %1492 : vector<2x8xf32>
    %cst_330 = arith.constant dense<0.000000e+00> : vector<2x24xf32>
    %1494 = tpu.matmul %1493, %19, %cst_330 {dimension_numbers = #tpu.dot_dimension_numbers<[1], [0], [0], [1], [0, 0, 1, 1], [], []>} : vector<2x8xf32>, vector<8x24xf32>, vector<2x24xf32> -> vector<2x24xf32>
    %1495 = vector.broadcast %21 : vector<1x24xf32> to vector<2x24xf32>
    %1496 = arith.addf %1494, %1495 : vector<2x24xf32>
    %cst_331 = arith.constant dense<0.000000e+00> : vector<2x24xf32>
    %1497 = tpu.matmul %1488, %20, %cst_331 {dimension_numbers = #tpu.dot_dimension_numbers<[1], [0], [0], [1], [0, 0, 1, 1], [], []>} : vector<2x8xf32>, vector<8x24xf32>, vector<2x24xf32> -> vector<2x24xf32>
    %1498 = vector.broadcast %22 : vector<1x24xf32> to vector<2x24xf32>
    %1499 = arith.addf %1497, %1498 : vector<2x24xf32>
    %1500 = vector.extract_strided_slice %1496 {offsets = [0, 0], sizes = [2, 8], strides = [1, 1]} : vector<2x24xf32> to vector<2x8xf32>
    %1501 = vector.extract_strided_slice %1499 {offsets = [0, 0], sizes = [2, 8], strides = [1, 1]} : vector<2x24xf32> to vector<2x8xf32>
    %1502 = arith.addf %1500, %1501 : vector<2x8xf32>
    %1503 = arith.negf %1502 : vector<2x8xf32>
    %1504 = math.exp %1503 : vector<2x8xf32>
    %cst_332 = arith.constant 1.000000e+00 : f32
    %1505 = vector.broadcast %cst_332 : f32 to vector<2x8xf32>
    %1506 = arith.addf %1505, %1504 : vector<2x8xf32>
    %1507 = arith.divf %1505, %1506 : vector<2x8xf32>
    %1508 = vector.extract_strided_slice %1496 {offsets = [0, 8], sizes = [2, 8], strides = [1, 1]} : vector<2x24xf32> to vector<2x8xf32>
    %1509 = vector.extract_strided_slice %1499 {offsets = [0, 8], sizes = [2, 8], strides = [1, 1]} : vector<2x24xf32> to vector<2x8xf32>
    %1510 = arith.addf %1508, %1509 : vector<2x8xf32>
    %1511 = arith.negf %1510 : vector<2x8xf32>
    %1512 = math.exp %1511 : vector<2x8xf32>
    %cst_333 = arith.constant 1.000000e+00 : f32
    %1513 = vector.broadcast %cst_333 : f32 to vector<2x8xf32>
    %1514 = arith.addf %1513, %1512 : vector<2x8xf32>
    %1515 = arith.divf %1513, %1514 : vector<2x8xf32>
    %1516 = vector.extract_strided_slice %1496 {offsets = [0, 16], sizes = [2, 8], strides = [1, 1]} : vector<2x24xf32> to vector<2x8xf32>
    %1517 = vector.extract_strided_slice %1499 {offsets = [0, 16], sizes = [2, 8], strides = [1, 1]} : vector<2x24xf32> to vector<2x8xf32>
    %1518 = arith.mulf %1507, %1517 : vector<2x8xf32>
    %1519 = arith.addf %1516, %1518 : vector<2x8xf32>
    %1520 = math.tanh %1519 : vector<2x8xf32>
    %cst_334 = arith.constant 1.000000e+00 : f32
    %1521 = vector.broadcast %cst_334 : f32 to vector<2x8xf32>
    %1522 = arith.subf %1521, %1515 : vector<2x8xf32>
    %1523 = arith.mulf %1522, %1520 : vector<2x8xf32>
    %1524 = arith.mulf %1515, %1488 : vector<2x8xf32>
    %1525 = arith.addf %1523, %1524 : vector<2x8xf32>
    %cst_335 = arith.constant dense<0.000000e+00> : vector<2x8xf32>
    %1526 = tpu.matmul %1525, %23, %cst_335 {dimension_numbers = #tpu.dot_dimension_numbers<[1], [0], [0], [1], [0, 0, 1, 1], [], []>} : vector<2x8xf32>, vector<8x8xf32>, vector<2x8xf32> -> vector<2x8xf32>
    %1527 = vector.broadcast %24 : vector<1x8xf32> to vector<2x8xf32>
    %1528 = arith.addf %1526, %1527 : vector<2x8xf32>
    %cst_336 = arith.constant 0.000000e+00 : f32
    %1529 = vector.broadcast %cst_336 : f32 to vector<2x8xf32>
    %1530 = arith.maximumf %1528, %1529 : vector<2x8xf32>
    %cst_337 = arith.constant dense<0.000000e+00> : vector<2x24xf32>
    %1531 = tpu.matmul %1530, %19, %cst_337 {dimension_numbers = #tpu.dot_dimension_numbers<[1], [0], [0], [1], [0, 0, 1, 1], [], []>} : vector<2x8xf32>, vector<8x24xf32>, vector<2x24xf32> -> vector<2x24xf32>
    %1532 = vector.broadcast %21 : vector<1x24xf32> to vector<2x24xf32>
    %1533 = arith.addf %1531, %1532 : vector<2x24xf32>
    %cst_338 = arith.constant dense<0.000000e+00> : vector<2x24xf32>
    %1534 = tpu.matmul %1525, %20, %cst_338 {dimension_numbers = #tpu.dot_dimension_numbers<[1], [0], [0], [1], [0, 0, 1, 1], [], []>} : vector<2x8xf32>, vector<8x24xf32>, vector<2x24xf32> -> vector<2x24xf32>
    %1535 = vector.broadcast %22 : vector<1x24xf32> to vector<2x24xf32>
    %1536 = arith.addf %1534, %1535 : vector<2x24xf32>
    %1537 = vector.extract_strided_slice %1533 {offsets = [0, 0], sizes = [2, 8], strides = [1, 1]} : vector<2x24xf32> to vector<2x8xf32>
    %1538 = vector.extract_strided_slice %1536 {offsets = [0, 0], sizes = [2, 8], strides = [1, 1]} : vector<2x24xf32> to vector<2x8xf32>
    %1539 = arith.addf %1537, %1538 : vector<2x8xf32>
    %1540 = arith.negf %1539 : vector<2x8xf32>
    %1541 = math.exp %1540 : vector<2x8xf32>
    %cst_339 = arith.constant 1.000000e+00 : f32
    %1542 = vector.broadcast %cst_339 : f32 to vector<2x8xf32>
    %1543 = arith.addf %1542, %1541 : vector<2x8xf32>
    %1544 = arith.divf %1542, %1543 : vector<2x8xf32>
    %1545 = vector.extract_strided_slice %1533 {offsets = [0, 8], sizes = [2, 8], strides = [1, 1]} : vector<2x24xf32> to vector<2x8xf32>
    %1546 = vector.extract_strided_slice %1536 {offsets = [0, 8], sizes = [2, 8], strides = [1, 1]} : vector<2x24xf32> to vector<2x8xf32>
    %1547 = arith.addf %1545, %1546 : vector<2x8xf32>
    %1548 = arith.negf %1547 : vector<2x8xf32>
    %1549 = math.exp %1548 : vector<2x8xf32>
    %cst_340 = arith.constant 1.000000e+00 : f32
    %1550 = vector.broadcast %cst_340 : f32 to vector<2x8xf32>
    %1551 = arith.addf %1550, %1549 : vector<2x8xf32>
    %1552 = arith.divf %1550, %1551 : vector<2x8xf32>
    %1553 = vector.extract_strided_slice %1533 {offsets = [0, 16], sizes = [2, 8], strides = [1, 1]} : vector<2x24xf32> to vector<2x8xf32>
    %1554 = vector.extract_strided_slice %1536 {offsets = [0, 16], sizes = [2, 8], strides = [1, 1]} : vector<2x24xf32> to vector<2x8xf32>
    %1555 = arith.mulf %1544, %1554 : vector<2x8xf32>
    %1556 = arith.addf %1553, %1555 : vector<2x8xf32>
    %1557 = math.tanh %1556 : vector<2x8xf32>
    %cst_341 = arith.constant 1.000000e+00 : f32
    %1558 = vector.broadcast %cst_341 : f32 to vector<2x8xf32>
    %1559 = arith.subf %1558, %1552 : vector<2x8xf32>
    %1560 = arith.mulf %1559, %1557 : vector<2x8xf32>
    %1561 = arith.mulf %1552, %1525 : vector<2x8xf32>
    %1562 = arith.addf %1560, %1561 : vector<2x8xf32>
    %1563 = tpu.concatenate %1451, %1488, %1525, %1562 in 1 : vector<2x8xf32>, vector<2x8xf32>, vector<2x8xf32>, vector<2x8xf32> -> vector<2x32xf32>
    %c12_342 = arith.constant 12 : index
    %c0_343 = arith.constant 0 : index
    %1564 = vector.load %arg6[%c12_342, %c0_343] : memref<16x32xf32, #tpu.memory_space<vmem>>, vector<2x32xf32>
    tpu.vector_store %arg6[%c12_342, %c0_343], %1563 {strides = array<i32>} : memref<16x32xf32, #tpu.memory_space<vmem>>, vector<2x32xf32>,
    %cst_344 = arith.constant dense<0.000000e+00> : vector<2x32xf32>
    %1565 = tpu.matmul %1563, %25, %cst_344 {dimension_numbers = #tpu.dot_dimension_numbers<[1], [0], [0], [1], [0, 0, 1, 1], [], []>} : vector<2x32xf32>, vector<32x32xf32>, vector<2x32xf32> -> vector<2x32xf32>
    %1566 = vector.broadcast %26 : vector<1x32xf32> to vector<2x32xf32>
    %1567 = arith.addf %1565, %1566 : vector<2x32xf32>
    %cst_345 = arith.constant 0.000000e+00 : f32
    %1568 = vector.broadcast %cst_345 : f32 to vector<2x32xf32>
    %1569 = arith.maximumf %1567, %1568 : vector<2x32xf32>
    %1570 = math.tanh %1569 : vector<2x32xf32>
    %cst_346 = arith.constant dense<0.000000e+00> : vector<2x4xf32>
    %1571 = tpu.matmul %1570, %27, %cst_346 {dimension_numbers = #tpu.dot_dimension_numbers<[1], [0], [0], [1], [0, 0, 1, 1], [], []>} : vector<2x32xf32>, vector<32x4xf32>, vector<2x4xf32> -> vector<2x4xf32>
    %1572 = vector.broadcast %28 : vector<1x1xf32> to vector<2x4xf32>
    %1573 = arith.addf %1571, %1572 : vector<2x4xf32>
    %cst_347 = arith.constant 0.000000e+00 : f32
    %1574 = vector.broadcast %cst_347 : f32 to vector<2x4xf32>
    %1575 = arith.maximumf %1573, %1574 : vector<2x4xf32>
    %cst_348 = arith.constant dense<0xFF800000> : vector<2xf32>
    %1576 = vector.multi_reduction <maximumf>, %1575, %cst_348 [1] : vector<2x4xf32> to vector<2xf32>
    %1577 = vector.shape_cast %1576 : vector<2xf32> to vector<2x1xf32>
    %1578 = vector.broadcast %1577 : vector<2x1xf32> to vector<2x4xf32>
    %1579 = arith.subf %1575, %1578 : vector<2x4xf32>
    %1580 = math.exp %1579 : vector<2x4xf32>
    %cst_349 = arith.constant dense<0.000000e+00> : vector<2xf32>
    %1581 = vector.multi_reduction <add>, %1580, %cst_349 [1] : vector<2x4xf32> to vector<2xf32>
    %1582 = vector.shape_cast %1581 : vector<2xf32> to vector<2x1xf32>
    %1583 = vector.broadcast %1582 : vector<2x1xf32> to vector<2x4xf32>
    %1584 = arith.divf %1580, %1583 : vector<2x4xf32>
    %1585 = vector.extract_strided_slice %1584 {offsets = [0, 0], sizes = [2, 1], strides = [1, 1]} : vector<2x4xf32> to vector<2x1xf32>
    %1586 = vector.extract_strided_slice %1569 {offsets = [0, 0], sizes = [2, 8], strides = [1, 1]} : vector<2x32xf32> to vector<2x8xf32>
    %1587 = vector.broadcast %1585 : vector<2x1xf32> to vector<2x8xf32>
    %1588 = arith.mulf %1587, %1586 : vector<2x8xf32>
    %cst_350 = arith.constant 0.000000e+00 : f32
    %1589 = vector.broadcast %cst_350 : f32 to vector<2x8xf32>
    %1590 = arith.addf %1589, %1588 : vector<2x8xf32>
    %1591 = vector.extract_strided_slice %1584 {offsets = [0, 1], sizes = [2, 1], strides = [1, 1]} : vector<2x4xf32> to vector<2x1xf32>
    %1592 = vector.extract_strided_slice %1569 {offsets = [0, 8], sizes = [2, 8], strides = [1, 1]} : vector<2x32xf32> to vector<2x8xf32>
    %1593 = vector.broadcast %1591 : vector<2x1xf32> to vector<2x8xf32>
    %1594 = arith.mulf %1593, %1592 : vector<2x8xf32>
    %1595 = arith.addf %1590, %1594 : vector<2x8xf32>
    %1596 = vector.extract_strided_slice %1584 {offsets = [0, 2], sizes = [2, 1], strides = [1, 1]} : vector<2x4xf32> to vector<2x1xf32>
    %1597 = vector.extract_strided_slice %1569 {offsets = [0, 16], sizes = [2, 8], strides = [1, 1]} : vector<2x32xf32> to vector<2x8xf32>
    %1598 = vector.broadcast %1596 : vector<2x1xf32> to vector<2x8xf32>
    %1599 = arith.mulf %1598, %1597 : vector<2x8xf32>
    %1600 = arith.addf %1595, %1599 : vector<2x8xf32>
    %1601 = vector.extract_strided_slice %1584 {offsets = [0, 3], sizes = [2, 1], strides = [1, 1]} : vector<2x4xf32> to vector<2x1xf32>
    %1602 = vector.extract_strided_slice %1569 {offsets = [0, 24], sizes = [2, 8], strides = [1, 1]} : vector<2x32xf32> to vector<2x8xf32>
    %1603 = vector.broadcast %1601 : vector<2x1xf32> to vector<2x8xf32>
    %1604 = arith.mulf %1603, %1602 : vector<2x8xf32>
    %1605 = arith.addf %1600, %1604 : vector<2x8xf32>
    %c14 = arith.constant 14 : index
    %c0_351 = arith.constant 0 : index
    %1606 = vector.load %arg4[%c14, %c0_351] : memref<16x96xf32, #tpu.memory_space<vmem>>, vector<2x96xf32>
    %cst_352 = arith.constant dense<0.000000e+00> : vector<2x96xf32>
    %1607 = tpu.matmul %1605, %14, %cst_352 {dimension_numbers = #tpu.dot_dimension_numbers<[1], [0], [0], [1], [0, 0, 1, 1], [], []>} : vector<2x8xf32>, vector<8x96xf32>, vector<2x96xf32> -> vector<2x96xf32>
    %1608 = arith.addf %1606, %1607 : vector<2x96xf32>
    %cst_353 = arith.constant dense<0.000000e+00> : vector<2x96xf32>
    %1609 = tpu.matmul %1412, %15, %cst_353 {dimension_numbers = #tpu.dot_dimension_numbers<[1], [0], [0], [1], [0, 0, 1, 1], [], []>} : vector<2x32xf32>, vector<32x96xf32>, vector<2x96xf32> -> vector<2x96xf32>
    %1610 = vector.broadcast %16 : vector<1x96xf32> to vector<2x96xf32>
    %1611 = arith.addf %1609, %1610 : vector<2x96xf32>
    %1612 = vector.extract_strided_slice %1608 {offsets = [0, 0], sizes = [2, 32], strides = [1, 1]} : vector<2x96xf32> to vector<2x32xf32>
    %1613 = vector.extract_strided_slice %1611 {offsets = [0, 0], sizes = [2, 32], strides = [1, 1]} : vector<2x96xf32> to vector<2x32xf32>
    %1614 = arith.addf %1612, %1613 : vector<2x32xf32>
    %1615 = arith.negf %1614 : vector<2x32xf32>
    %1616 = math.exp %1615 : vector<2x32xf32>
    %cst_354 = arith.constant 1.000000e+00 : f32
    %1617 = vector.broadcast %cst_354 : f32 to vector<2x32xf32>
    %1618 = arith.addf %1617, %1616 : vector<2x32xf32>
    %1619 = arith.divf %1617, %1618 : vector<2x32xf32>
    %1620 = vector.extract_strided_slice %1608 {offsets = [0, 32], sizes = [2, 32], strides = [1, 1]} : vector<2x96xf32> to vector<2x32xf32>
    %1621 = vector.extract_strided_slice %1611 {offsets = [0, 32], sizes = [2, 32], strides = [1, 1]} : vector<2x96xf32> to vector<2x32xf32>
    %1622 = arith.addf %1620, %1621 : vector<2x32xf32>
    %1623 = arith.negf %1622 : vector<2x32xf32>
    %1624 = math.exp %1623 : vector<2x32xf32>
    %cst_355 = arith.constant 1.000000e+00 : f32
    %1625 = vector.broadcast %cst_355 : f32 to vector<2x32xf32>
    %1626 = arith.addf %1625, %1624 : vector<2x32xf32>
    %1627 = arith.divf %1625, %1626 : vector<2x32xf32>
    %1628 = vector.extract_strided_slice %1608 {offsets = [0, 64], sizes = [2, 32], strides = [1, 1]} : vector<2x96xf32> to vector<2x32xf32>
    %1629 = vector.extract_strided_slice %1611 {offsets = [0, 64], sizes = [2, 32], strides = [1, 1]} : vector<2x96xf32> to vector<2x32xf32>
    %1630 = arith.mulf %1619, %1629 : vector<2x32xf32>
    %1631 = arith.addf %1628, %1630 : vector<2x32xf32>
    %1632 = math.tanh %1631 : vector<2x32xf32>
    %cst_356 = arith.constant 1.000000e+00 : f32
    %1633 = vector.broadcast %cst_356 : f32 to vector<2x32xf32>
    %1634 = arith.subf %1633, %1627 : vector<2x32xf32>
    %1635 = arith.mulf %1634, %1632 : vector<2x32xf32>
    %1636 = arith.mulf %1627, %1412 : vector<2x32xf32>
    %1637 = arith.addf %1635, %1636 : vector<2x32xf32>
    %c14_357 = arith.constant 14 : index
    %c0_358 = arith.constant 0 : index
    %1638 = vector.load %arg5[%c14_357, %c0_358] : memref<16x32xf32, #tpu.memory_space<vmem>>, vector<2x32xf32>
    tpu.vector_store %arg5[%c14_357, %c0_358], %1637 {strides = array<i32>} : memref<16x32xf32, #tpu.memory_space<vmem>>, vector<2x32xf32>,
    %cst_359 = arith.constant dense<0.000000e+00> : vector<2x8xf32>
    %1639 = tpu.matmul %1637, %17, %cst_359 {dimension_numbers = #tpu.dot_dimension_numbers<[1], [0], [0], [1], [0, 0, 1, 1], [], []>} : vector<2x32xf32>, vector<32x8xf32>, vector<2x8xf32> -> vector<2x8xf32>
    %1640 = vector.broadcast %18 : vector<1x8xf32> to vector<2x8xf32>
    %1641 = arith.addf %1639, %1640 : vector<2x8xf32>
    %cst_360 = arith.constant 0.000000e+00 : f32
    %1642 = vector.broadcast %cst_360 : f32 to vector<2x8xf32>
    %1643 = arith.maximumf %1641, %1642 : vector<2x8xf32>
    %cst_361 = arith.constant 0.000000e+00 : f32
    %1644 = vector.broadcast %cst_361 : f32 to vector<2x8xf32>
    %cst_362 = arith.constant dense<0.000000e+00> : vector<2x24xf32>
    %1645 = tpu.matmul %1644, %19, %cst_362 {dimension_numbers = #tpu.dot_dimension_numbers<[1], [0], [0], [1], [0, 0, 1, 1], [], []>} : vector<2x8xf32>, vector<8x24xf32>, vector<2x24xf32> -> vector<2x24xf32>
    %1646 = vector.broadcast %21 : vector<1x24xf32> to vector<2x24xf32>
    %1647 = arith.addf %1645, %1646 : vector<2x24xf32>
    %cst_363 = arith.constant dense<0.000000e+00> : vector<2x24xf32>
    %1648 = tpu.matmul %1643, %20, %cst_363 {dimension_numbers = #tpu.dot_dimension_numbers<[1], [0], [0], [1], [0, 0, 1, 1], [], []>} : vector<2x8xf32>, vector<8x24xf32>, vector<2x24xf32> -> vector<2x24xf32>
    %1649 = vector.broadcast %22 : vector<1x24xf32> to vector<2x24xf32>
    %1650 = arith.addf %1648, %1649 : vector<2x24xf32>
    %1651 = vector.extract_strided_slice %1647 {offsets = [0, 0], sizes = [2, 8], strides = [1, 1]} : vector<2x24xf32> to vector<2x8xf32>
    %1652 = vector.extract_strided_slice %1650 {offsets = [0, 0], sizes = [2, 8], strides = [1, 1]} : vector<2x24xf32> to vector<2x8xf32>
    %1653 = arith.addf %1651, %1652 : vector<2x8xf32>
    %1654 = arith.negf %1653 : vector<2x8xf32>
    %1655 = math.exp %1654 : vector<2x8xf32>
    %cst_364 = arith.constant 1.000000e+00 : f32
    %1656 = vector.broadcast %cst_364 : f32 to vector<2x8xf32>
    %1657 = arith.addf %1656, %1655 : vector<2x8xf32>
    %1658 = arith.divf %1656, %1657 : vector<2x8xf32>
    %1659 = vector.extract_strided_slice %1647 {offsets = [0, 8], sizes = [2, 8], strides = [1, 1]} : vector<2x24xf32> to vector<2x8xf32>
    %1660 = vector.extract_strided_slice %1650 {offsets = [0, 8], sizes = [2, 8], strides = [1, 1]} : vector<2x24xf32> to vector<2x8xf32>
    %1661 = arith.addf %1659, %1660 : vector<2x8xf32>
    %1662 = arith.negf %1661 : vector<2x8xf32>
    %1663 = math.exp %1662 : vector<2x8xf32>
    %cst_365 = arith.constant 1.000000e+00 : f32
    %1664 = vector.broadcast %cst_365 : f32 to vector<2x8xf32>
    %1665 = arith.addf %1664, %1663 : vector<2x8xf32>
    %1666 = arith.divf %1664, %1665 : vector<2x8xf32>
    %1667 = vector.extract_strided_slice %1647 {offsets = [0, 16], sizes = [2, 8], strides = [1, 1]} : vector<2x24xf32> to vector<2x8xf32>
    %1668 = vector.extract_strided_slice %1650 {offsets = [0, 16], sizes = [2, 8], strides = [1, 1]} : vector<2x24xf32> to vector<2x8xf32>
    %1669 = arith.mulf %1658, %1668 : vector<2x8xf32>
    %1670 = arith.addf %1667, %1669 : vector<2x8xf32>
    %1671 = math.tanh %1670 : vector<2x8xf32>
    %cst_366 = arith.constant 1.000000e+00 : f32
    %1672 = vector.broadcast %cst_366 : f32 to vector<2x8xf32>
    %1673 = arith.subf %1672, %1666 : vector<2x8xf32>
    %1674 = arith.mulf %1673, %1671 : vector<2x8xf32>
    %1675 = arith.mulf %1666, %1643 : vector<2x8xf32>
    %1676 = arith.addf %1674, %1675 : vector<2x8xf32>
    %cst_367 = arith.constant dense<0.000000e+00> : vector<2x8xf32>
    %1677 = tpu.matmul %1676, %23, %cst_367 {dimension_numbers = #tpu.dot_dimension_numbers<[1], [0], [0], [1], [0, 0, 1, 1], [], []>} : vector<2x8xf32>, vector<8x8xf32>, vector<2x8xf32> -> vector<2x8xf32>
    %1678 = vector.broadcast %24 : vector<1x8xf32> to vector<2x8xf32>
    %1679 = arith.addf %1677, %1678 : vector<2x8xf32>
    %cst_368 = arith.constant 0.000000e+00 : f32
    %1680 = vector.broadcast %cst_368 : f32 to vector<2x8xf32>
    %1681 = arith.maximumf %1679, %1680 : vector<2x8xf32>
    %cst_369 = arith.constant dense<0.000000e+00> : vector<2x24xf32>
    %1682 = tpu.matmul %1681, %19, %cst_369 {dimension_numbers = #tpu.dot_dimension_numbers<[1], [0], [0], [1], [0, 0, 1, 1], [], []>} : vector<2x8xf32>, vector<8x24xf32>, vector<2x24xf32> -> vector<2x24xf32>
    %1683 = vector.broadcast %21 : vector<1x24xf32> to vector<2x24xf32>
    %1684 = arith.addf %1682, %1683 : vector<2x24xf32>
    %cst_370 = arith.constant dense<0.000000e+00> : vector<2x24xf32>
    %1685 = tpu.matmul %1676, %20, %cst_370 {dimension_numbers = #tpu.dot_dimension_numbers<[1], [0], [0], [1], [0, 0, 1, 1], [], []>} : vector<2x8xf32>, vector<8x24xf32>, vector<2x24xf32> -> vector<2x24xf32>
    %1686 = vector.broadcast %22 : vector<1x24xf32> to vector<2x24xf32>
    %1687 = arith.addf %1685, %1686 : vector<2x24xf32>
    %1688 = vector.extract_strided_slice %1684 {offsets = [0, 0], sizes = [2, 8], strides = [1, 1]} : vector<2x24xf32> to vector<2x8xf32>
    %1689 = vector.extract_strided_slice %1687 {offsets = [0, 0], sizes = [2, 8], strides = [1, 1]} : vector<2x24xf32> to vector<2x8xf32>
    %1690 = arith.addf %1688, %1689 : vector<2x8xf32>
    %1691 = arith.negf %1690 : vector<2x8xf32>
    %1692 = math.exp %1691 : vector<2x8xf32>
    %cst_371 = arith.constant 1.000000e+00 : f32
    %1693 = vector.broadcast %cst_371 : f32 to vector<2x8xf32>
    %1694 = arith.addf %1693, %1692 : vector<2x8xf32>
    %1695 = arith.divf %1693, %1694 : vector<2x8xf32>
    %1696 = vector.extract_strided_slice %1684 {offsets = [0, 8], sizes = [2, 8], strides = [1, 1]} : vector<2x24xf32> to vector<2x8xf32>
    %1697 = vector.extract_strided_slice %1687 {offsets = [0, 8], sizes = [2, 8], strides = [1, 1]} : vector<2x24xf32> to vector<2x8xf32>
    %1698 = arith.addf %1696, %1697 : vector<2x8xf32>
    %1699 = arith.negf %1698 : vector<2x8xf32>
    %1700 = math.exp %1699 : vector<2x8xf32>
    %cst_372 = arith.constant 1.000000e+00 : f32
    %1701 = vector.broadcast %cst_372 : f32 to vector<2x8xf32>
    %1702 = arith.addf %1701, %1700 : vector<2x8xf32>
    %1703 = arith.divf %1701, %1702 : vector<2x8xf32>
    %1704 = vector.extract_strided_slice %1684 {offsets = [0, 16], sizes = [2, 8], strides = [1, 1]} : vector<2x24xf32> to vector<2x8xf32>
    %1705 = vector.extract_strided_slice %1687 {offsets = [0, 16], sizes = [2, 8], strides = [1, 1]} : vector<2x24xf32> to vector<2x8xf32>
    %1706 = arith.mulf %1695, %1705 : vector<2x8xf32>
    %1707 = arith.addf %1704, %1706 : vector<2x8xf32>
    %1708 = math.tanh %1707 : vector<2x8xf32>
    %cst_373 = arith.constant 1.000000e+00 : f32
    %1709 = vector.broadcast %cst_373 : f32 to vector<2x8xf32>
    %1710 = arith.subf %1709, %1703 : vector<2x8xf32>
    %1711 = arith.mulf %1710, %1708 : vector<2x8xf32>
    %1712 = arith.mulf %1703, %1676 : vector<2x8xf32>
    %1713 = arith.addf %1711, %1712 : vector<2x8xf32>
    %cst_374 = arith.constant dense<0.000000e+00> : vector<2x8xf32>
    %1714 = tpu.matmul %1713, %23, %cst_374 {dimension_numbers = #tpu.dot_dimension_numbers<[1], [0], [0], [1], [0, 0, 1, 1], [], []>} : vector<2x8xf32>, vector<8x8xf32>, vector<2x8xf32> -> vector<2x8xf32>
    %1715 = vector.broadcast %24 : vector<1x8xf32> to vector<2x8xf32>
    %1716 = arith.addf %1714, %1715 : vector<2x8xf32>
    %cst_375 = arith.constant 0.000000e+00 : f32
    %1717 = vector.broadcast %cst_375 : f32 to vector<2x8xf32>
    %1718 = arith.maximumf %1716, %1717 : vector<2x8xf32>
    %cst_376 = arith.constant dense<0.000000e+00> : vector<2x24xf32>
    %1719 = tpu.matmul %1718, %19, %cst_376 {dimension_numbers = #tpu.dot_dimension_numbers<[1], [0], [0], [1], [0, 0, 1, 1], [], []>} : vector<2x8xf32>, vector<8x24xf32>, vector<2x24xf32> -> vector<2x24xf32>
    %1720 = vector.broadcast %21 : vector<1x24xf32> to vector<2x24xf32>
    %1721 = arith.addf %1719, %1720 : vector<2x24xf32>
    %cst_377 = arith.constant dense<0.000000e+00> : vector<2x24xf32>
    %1722 = tpu.matmul %1713, %20, %cst_377 {dimension_numbers = #tpu.dot_dimension_numbers<[1], [0], [0], [1], [0, 0, 1, 1], [], []>} : vector<2x8xf32>, vector<8x24xf32>, vector<2x24xf32> -> vector<2x24xf32>
    %1723 = vector.broadcast %22 : vector<1x24xf32> to vector<2x24xf32>
    %1724 = arith.addf %1722, %1723 : vector<2x24xf32>
    %1725 = vector.extract_strided_slice %1721 {offsets = [0, 0], sizes = [2, 8], strides = [1, 1]} : vector<2x24xf32> to vector<2x8xf32>
    %1726 = vector.extract_strided_slice %1724 {offsets = [0, 0], sizes = [2, 8], strides = [1, 1]} : vector<2x24xf32> to vector<2x8xf32>
    %1727 = arith.addf %1725, %1726 : vector<2x8xf32>
    %1728 = arith.negf %1727 : vector<2x8xf32>
    %1729 = math.exp %1728 : vector<2x8xf32>
    %cst_378 = arith.constant 1.000000e+00 : f32
    %1730 = vector.broadcast %cst_378 : f32 to vector<2x8xf32>
    %1731 = arith.addf %1730, %1729 : vector<2x8xf32>
    %1732 = arith.divf %1730, %1731 : vector<2x8xf32>
    %1733 = vector.extract_strided_slice %1721 {offsets = [0, 8], sizes = [2, 8], strides = [1, 1]} : vector<2x24xf32> to vector<2x8xf32>
    %1734 = vector.extract_strided_slice %1724 {offsets = [0, 8], sizes = [2, 8], strides = [1, 1]} : vector<2x24xf32> to vector<2x8xf32>
    %1735 = arith.addf %1733, %1734 : vector<2x8xf32>
    %1736 = arith.negf %1735 : vector<2x8xf32>
    %1737 = math.exp %1736 : vector<2x8xf32>
    %cst_379 = arith.constant 1.000000e+00 : f32
    %1738 = vector.broadcast %cst_379 : f32 to vector<2x8xf32>
    %1739 = arith.addf %1738, %1737 : vector<2x8xf32>
    %1740 = arith.divf %1738, %1739 : vector<2x8xf32>
    %1741 = vector.extract_strided_slice %1721 {offsets = [0, 16], sizes = [2, 8], strides = [1, 1]} : vector<2x24xf32> to vector<2x8xf32>
    %1742 = vector.extract_strided_slice %1724 {offsets = [0, 16], sizes = [2, 8], strides = [1, 1]} : vector<2x24xf32> to vector<2x8xf32>
    %1743 = arith.mulf %1732, %1742 : vector<2x8xf32>
    %1744 = arith.addf %1741, %1743 : vector<2x8xf32>
    %1745 = math.tanh %1744 : vector<2x8xf32>
    %cst_380 = arith.constant 1.000000e+00 : f32
    %1746 = vector.broadcast %cst_380 : f32 to vector<2x8xf32>
    %1747 = arith.subf %1746, %1740 : vector<2x8xf32>
    %1748 = arith.mulf %1747, %1745 : vector<2x8xf32>
    %1749 = arith.mulf %1740, %1713 : vector<2x8xf32>
    %1750 = arith.addf %1748, %1749 : vector<2x8xf32>
    %cst_381 = arith.constant dense<0.000000e+00> : vector<2x8xf32>
    %1751 = tpu.matmul %1750, %23, %cst_381 {dimension_numbers = #tpu.dot_dimension_numbers<[1], [0], [0], [1], [0, 0, 1, 1], [], []>} : vector<2x8xf32>, vector<8x8xf32>, vector<2x8xf32> -> vector<2x8xf32>
    %1752 = vector.broadcast %24 : vector<1x8xf32> to vector<2x8xf32>
    %1753 = arith.addf %1751, %1752 : vector<2x8xf32>
    %cst_382 = arith.constant 0.000000e+00 : f32
    %1754 = vector.broadcast %cst_382 : f32 to vector<2x8xf32>
    %1755 = arith.maximumf %1753, %1754 : vector<2x8xf32>
    %cst_383 = arith.constant dense<0.000000e+00> : vector<2x24xf32>
    %1756 = tpu.matmul %1755, %19, %cst_383 {dimension_numbers = #tpu.dot_dimension_numbers<[1], [0], [0], [1], [0, 0, 1, 1], [], []>} : vector<2x8xf32>, vector<8x24xf32>, vector<2x24xf32> -> vector<2x24xf32>
    %1757 = vector.broadcast %21 : vector<1x24xf32> to vector<2x24xf32>
    %1758 = arith.addf %1756, %1757 : vector<2x24xf32>
    %cst_384 = arith.constant dense<0.000000e+00> : vector<2x24xf32>
    %1759 = tpu.matmul %1750, %20, %cst_384 {dimension_numbers = #tpu.dot_dimension_numbers<[1], [0], [0], [1], [0, 0, 1, 1], [], []>} : vector<2x8xf32>, vector<8x24xf32>, vector<2x24xf32> -> vector<2x24xf32>
    %1760 = vector.broadcast %22 : vector<1x24xf32> to vector<2x24xf32>
    %1761 = arith.addf %1759, %1760 : vector<2x24xf32>
    %1762 = vector.extract_strided_slice %1758 {offsets = [0, 0], sizes = [2, 8], strides = [1, 1]} : vector<2x24xf32> to vector<2x8xf32>
    %1763 = vector.extract_strided_slice %1761 {offsets = [0, 0], sizes = [2, 8], strides = [1, 1]} : vector<2x24xf32> to vector<2x8xf32>
    %1764 = arith.addf %1762, %1763 : vector<2x8xf32>
    %1765 = arith.negf %1764 : vector<2x8xf32>
    %1766 = math.exp %1765 : vector<2x8xf32>
    %cst_385 = arith.constant 1.000000e+00 : f32
    %1767 = vector.broadcast %cst_385 : f32 to vector<2x8xf32>
    %1768 = arith.addf %1767, %1766 : vector<2x8xf32>
    %1769 = arith.divf %1767, %1768 : vector<2x8xf32>
    %1770 = vector.extract_strided_slice %1758 {offsets = [0, 8], sizes = [2, 8], strides = [1, 1]} : vector<2x24xf32> to vector<2x8xf32>
    %1771 = vector.extract_strided_slice %1761 {offsets = [0, 8], sizes = [2, 8], strides = [1, 1]} : vector<2x24xf32> to vector<2x8xf32>
    %1772 = arith.addf %1770, %1771 : vector<2x8xf32>
    %1773 = arith.negf %1772 : vector<2x8xf32>
    %1774 = math.exp %1773 : vector<2x8xf32>
    %cst_386 = arith.constant 1.000000e+00 : f32
    %1775 = vector.broadcast %cst_386 : f32 to vector<2x8xf32>
    %1776 = arith.addf %1775, %1774 : vector<2x8xf32>
    %1777 = arith.divf %1775, %1776 : vector<2x8xf32>
    %1778 = vector.extract_strided_slice %1758 {offsets = [0, 16], sizes = [2, 8], strides = [1, 1]} : vector<2x24xf32> to vector<2x8xf32>
    %1779 = vector.extract_strided_slice %1761 {offsets = [0, 16], sizes = [2, 8], strides = [1, 1]} : vector<2x24xf32> to vector<2x8xf32>
    %1780 = arith.mulf %1769, %1779 : vector<2x8xf32>
    %1781 = arith.addf %1778, %1780 : vector<2x8xf32>
    %1782 = math.tanh %1781 : vector<2x8xf32>
    %cst_387 = arith.constant 1.000000e+00 : f32
    %1783 = vector.broadcast %cst_387 : f32 to vector<2x8xf32>
    %1784 = arith.subf %1783, %1777 : vector<2x8xf32>
    %1785 = arith.mulf %1784, %1782 : vector<2x8xf32>
    %1786 = arith.mulf %1777, %1750 : vector<2x8xf32>
    %1787 = arith.addf %1785, %1786 : vector<2x8xf32>
    %1788 = tpu.concatenate %1676, %1713, %1750, %1787 in 1 : vector<2x8xf32>, vector<2x8xf32>, vector<2x8xf32>, vector<2x8xf32> -> vector<2x32xf32>
    %c14_388 = arith.constant 14 : index
    %c0_389 = arith.constant 0 : index
    %1789 = vector.load %arg6[%c14_388, %c0_389] : memref<16x32xf32, #tpu.memory_space<vmem>>, vector<2x32xf32>
    tpu.vector_store %arg6[%c14_388, %c0_389], %1788 {strides = array<i32>} : memref<16x32xf32, #tpu.memory_space<vmem>>, vector<2x32xf32>,
    %c0_390 = arith.constant 0 : index
    %c0_391 = arith.constant 0 : index
    %1790 = vector.load %arg5[%c0_390, %c0_391] : memref<16x32xf32, #tpu.memory_space<vmem>>, vector<16x32xf32>
    %c0_392 = arith.constant 0 : index
    %c0_393 = arith.constant 0 : index
    %1791 = vector.load %arg6[%c0_392, %c0_393] : memref<16x32xf32, #tpu.memory_space<vmem>>, vector<16x32xf32>
    %c272 = arith.constant 272 : index
    %c0_394 = arith.constant 0 : index
    %1792 = vector.load %arg1[%c272, %c0_394] : memref<696x128xf32, #tpu.memory_space<vmem>>, vector<32x32xf32>
    %cst_395 = arith.constant dense<0.000000e+00> : vector<16x32xf32>
    %1793 = tpu.matmul %1790, %1792, %cst_395 {dimension_numbers = #tpu.dot_dimension_numbers<[1], [0], [0], [1], [0, 0, 1, 1], [], []>} : vector<16x32xf32>, vector<32x32xf32>, vector<16x32xf32> -> vector<16x32xf32>
    %c304 = arith.constant 304 : index
    %c0_396 = arith.constant 0 : index
    %1794 = vector.load %arg1[%c304, %c0_396] : memref<696x128xf32, #tpu.memory_space<vmem>>, vector<1x32xf32>
    %1795 = vector.broadcast %1794 : vector<1x32xf32> to vector<16x32xf32>
    %1796 = arith.addf %1793, %1795 : vector<16x32xf32>
    %cst_397 = arith.constant 0.000000e+00 : f32
    %1797 = vector.broadcast %cst_397 : f32 to vector<16x32xf32>
    %1798 = arith.maximumf %1796, %1797 : vector<16x32xf32>
    %c312 = arith.constant 312 : index
    %c0_398 = arith.constant 0 : index
    %1799 = vector.load %arg1[%c312, %c0_398] : memref<696x128xf32, #tpu.memory_space<vmem>>, vector<32x32xf32>
    %cst_399 = arith.constant dense<0.000000e+00> : vector<16x32xf32>
    %1800 = tpu.matmul %1791, %1799, %cst_399 {dimension_numbers = #tpu.dot_dimension_numbers<[1], [0], [0], [1], [0, 0, 1, 1], [], []>} : vector<16x32xf32>, vector<32x32xf32>, vector<16x32xf32> -> vector<16x32xf32>
    %c344 = arith.constant 344 : index
    %c0_400 = arith.constant 0 : index
    %1801 = vector.load %arg1[%c344, %c0_400] : memref<696x128xf32, #tpu.memory_space<vmem>>, vector<1x32xf32>
    %1802 = vector.broadcast %1801 : vector<1x32xf32> to vector<16x32xf32>
    %1803 = arith.addf %1800, %1802 : vector<16x32xf32>
    %cst_401 = arith.constant 0.000000e+00 : f32
    %1804 = vector.broadcast %cst_401 : f32 to vector<16x32xf32>
    %1805 = arith.maximumf %1803, %1804 : vector<16x32xf32>
    %c384 = arith.constant 384 : index
    %c0_402 = arith.constant 0 : index
    %1806 = vector.load %arg1[%c384, %c0_402] : memref<696x128xf32, #tpu.memory_space<vmem>>, vector<1x1xf32>
    %1807 = math.tanh %1805 : vector<16x32xf32>
    %c352 = arith.constant 352 : index
    %c0_403 = arith.constant 0 : index
    %1808 = vector.load %arg1[%c352, %c0_403] : memref<696x128xf32, #tpu.memory_space<vmem>>, vector<32x4xf32>
    %cst_404 = arith.constant dense<0.000000e+00> : vector<16x4xf32>
    %1809 = tpu.matmul %1807, %1808, %cst_404 {dimension_numbers = #tpu.dot_dimension_numbers<[1], [0], [0], [1], [0, 0, 1, 1], [], []>} : vector<16x32xf32>, vector<32x4xf32>, vector<16x4xf32> -> vector<16x4xf32>
    %1810 = vector.broadcast %1806 : vector<1x1xf32> to vector<16x4xf32>
    %1811 = arith.addf %1809, %1810 : vector<16x4xf32>
    %cst_405 = arith.constant 0.000000e+00 : f32
    %1812 = vector.broadcast %cst_405 : f32 to vector<16x4xf32>
    %1813 = arith.maximumf %1811, %1812 : vector<16x4xf32>
    %cst_406 = arith.constant 0.000000e+00 : f32
    %1814 = vector.broadcast %cst_406 : f32 to vector<1x1xf32>
    %1815 = arith.maximumf %1806, %1814 : vector<1x1xf32>
    %c568 = arith.constant 568 : index
    %c0_407 = arith.constant 0 : index
    %1816 = vector.load %arg1[%c568, %c0_407] : memref<696x128xf32, #tpu.memory_space<vmem>>, vector<32x32xf32>
    %c600 = arith.constant 600 : index
    %c0_408 = arith.constant 0 : index
    %1817 = vector.load %arg1[%c600, %c0_408] : memref<696x128xf32, #tpu.memory_space<vmem>>, vector<1x32xf32>
    %c608 = arith.constant 608 : index
    %c0_409 = arith.constant 0 : index
    %1818 = vector.load %arg1[%c608, %c0_409] : memref<696x128xf32, #tpu.memory_space<vmem>>, vector<8x96xf32>
    %c616 = arith.constant 616 : index
    %c0_410 = arith.constant 0 : index
    %1819 = vector.load %arg1[%c616, %c0_410] : memref<696x128xf32, #tpu.memory_space<vmem>>, vector<32x96xf32>
    %c648 = arith.constant 648 : index
    %c0_411 = arith.constant 0 : index
    %1820 = vector.load %arg1[%c648, %c0_411] : memref<696x128xf32, #tpu.memory_space<vmem>>, vector<32x96xf32>
    %c680 = arith.constant 680 : index
    %c0_412 = arith.constant 0 : index
    %1821 = vector.load %arg1[%c680, %c0_412] : memref<696x128xf32, #tpu.memory_space<vmem>>, vector<1x96xf32>
    %c688 = arith.constant 688 : index
    %c0_413 = arith.constant 0 : index
    %1822 = vector.load %arg1[%c688, %c0_413] : memref<696x128xf32, #tpu.memory_space<vmem>>, vector<1x96xf32>
    %1823 = tpu.iota {dimensions = array<i32: 1>} : vector<16x4xi32>
    %cst_414 = arith.constant dense<0xFF800000> : vector<16xf32>
    %1824 = vector.multi_reduction <maximumf>, %1813, %cst_414 [1] : vector<16x4xf32> to vector<16xf32>
    %1825 = vector.shape_cast %1824 : vector<16xf32> to vector<16x1xf32>
    %1826 = vector.broadcast %1825 : vector<16x1xf32> to vector<16x4xf32>
    %1827 = arith.subf %1813, %1826 : vector<16x4xf32>
    %1828 = math.exp %1827 : vector<16x4xf32>
    %cst_415 = arith.constant dense<0.000000e+00> : vector<16xf32>
    %1829 = vector.multi_reduction <add>, %1828, %cst_415 [1] : vector<16x4xf32> to vector<16xf32>
    %1830 = vector.shape_cast %1829 : vector<16xf32> to vector<16x1xf32>
    %1831 = vector.broadcast %1830 : vector<16x1xf32> to vector<16x4xf32>
    %1832 = arith.divf %1828, %1831 : vector<16x4xf32>
    %1833 = vector.extract_strided_slice %1832 {offsets = [0, 0], sizes = [16, 1], strides = [1, 1]} : vector<16x4xf32> to vector<16x1xf32>
    %1834 = vector.extract_strided_slice %1805 {offsets = [0, 0], sizes = [16, 8], strides = [1, 1]} : vector<16x32xf32> to vector<16x8xf32>
    %1835 = vector.broadcast %1833 : vector<16x1xf32> to vector<16x8xf32>
    %1836 = arith.mulf %1835, %1834 : vector<16x8xf32>
    %cst_416 = arith.constant 0.000000e+00 : f32
    %1837 = vector.broadcast %cst_416 : f32 to vector<16x8xf32>
    %1838 = arith.addf %1837, %1836 : vector<16x8xf32>
    %1839 = vector.extract_strided_slice %1832 {offsets = [0, 1], sizes = [16, 1], strides = [1, 1]} : vector<16x4xf32> to vector<16x1xf32>
    %1840 = vector.extract_strided_slice %1805 {offsets = [0, 8], sizes = [16, 8], strides = [1, 1]} : vector<16x32xf32> to vector<16x8xf32>
    %1841 = vector.broadcast %1839 : vector<16x1xf32> to vector<16x8xf32>
    %1842 = arith.mulf %1841, %1840 : vector<16x8xf32>
    %1843 = arith.addf %1838, %1842 : vector<16x8xf32>
    %1844 = vector.extract_strided_slice %1832 {offsets = [0, 2], sizes = [16, 1], strides = [1, 1]} : vector<16x4xf32> to vector<16x1xf32>
    %1845 = vector.extract_strided_slice %1805 {offsets = [0, 16], sizes = [16, 8], strides = [1, 1]} : vector<16x32xf32> to vector<16x8xf32>
    %1846 = vector.broadcast %1844 : vector<16x1xf32> to vector<16x8xf32>
    %1847 = arith.mulf %1846, %1845 : vector<16x8xf32>
    %1848 = arith.addf %1843, %1847 : vector<16x8xf32>
    %1849 = vector.extract_strided_slice %1832 {offsets = [0, 3], sizes = [16, 1], strides = [1, 1]} : vector<16x4xf32> to vector<16x1xf32>
    %1850 = vector.extract_strided_slice %1805 {offsets = [0, 24], sizes = [16, 8], strides = [1, 1]} : vector<16x32xf32> to vector<16x8xf32>
    %1851 = vector.broadcast %1849 : vector<16x1xf32> to vector<16x8xf32>
    %1852 = arith.mulf %1851, %1850 : vector<16x8xf32>
    %1853 = arith.addf %1848, %1852 : vector<16x8xf32>
    %cst_417 = arith.constant dense<0.000000e+00> : vector<16x32xf32>
    %1854 = tpu.matmul %1798, %1816, %cst_417 {dimension_numbers = #tpu.dot_dimension_numbers<[1], [0], [0], [1], [0, 0, 1, 1], [], []>} : vector<16x32xf32>, vector<32x32xf32>, vector<16x32xf32> -> vector<16x32xf32>
    %1855 = vector.broadcast %1817 : vector<1x32xf32> to vector<16x32xf32>
    %1856 = arith.addf %1854, %1855 : vector<16x32xf32>
    %cst_418 = arith.constant 0.000000e+00 : f32
    %1857 = vector.broadcast %cst_418 : f32 to vector<16x32xf32>
    %1858 = arith.maximumf %1856, %1857 : vector<16x32xf32>
    %cst_419 = arith.constant dense<0.000000e+00> : vector<16x96xf32>
    %1859 = tpu.matmul %1853, %1818, %cst_419 {dimension_numbers = #tpu.dot_dimension_numbers<[1], [0], [0], [1], [0, 0, 1, 1], [], []>} : vector<16x8xf32>, vector<8x96xf32>, vector<16x96xf32> -> vector<16x96xf32>
    %cst_420 = arith.constant dense<0.000000e+00> : vector<16x96xf32>
    %1860 = tpu.matmul %1858, %1819, %cst_420 {dimension_numbers = #tpu.dot_dimension_numbers<[1], [0], [0], [1], [0, 0, 1, 1], [], []>} : vector<16x32xf32>, vector<32x96xf32>, vector<16x96xf32> -> vector<16x96xf32>
    %1861 = arith.addf %1859, %1860 : vector<16x96xf32>
    %1862 = vector.broadcast %1821 : vector<1x96xf32> to vector<16x96xf32>
    %1863 = arith.addf %1861, %1862 : vector<16x96xf32>
    %cst_421 = arith.constant dense<0.000000e+00> : vector<16x96xf32>
    %1864 = tpu.matmul %1798, %1820, %cst_421 {dimension_numbers = #tpu.dot_dimension_numbers<[1], [0], [0], [1], [0, 0, 1, 1], [], []>} : vector<16x32xf32>, vector<32x96xf32>, vector<16x96xf32> -> vector<16x96xf32>
    %1865 = vector.broadcast %1822 : vector<1x96xf32> to vector<16x96xf32>
    %1866 = arith.addf %1864, %1865 : vector<16x96xf32>
    %1867 = vector.extract_strided_slice %1863 {offsets = [0, 0], sizes = [16, 32], strides = [1, 1]} : vector<16x96xf32> to vector<16x32xf32>
    %1868 = vector.extract_strided_slice %1866 {offsets = [0, 0], sizes = [16, 32], strides = [1, 1]} : vector<16x96xf32> to vector<16x32xf32>
    %1869 = arith.addf %1867, %1868 : vector<16x32xf32>
    %1870 = arith.negf %1869 : vector<16x32xf32>
    %1871 = math.exp %1870 : vector<16x32xf32>
    %cst_422 = arith.constant 1.000000e+00 : f32
    %1872 = vector.broadcast %cst_422 : f32 to vector<16x32xf32>
    %1873 = arith.addf %1872, %1871 : vector<16x32xf32>
    %1874 = arith.divf %1872, %1873 : vector<16x32xf32>
    %1875 = vector.extract_strided_slice %1863 {offsets = [0, 32], sizes = [16, 32], strides = [1, 1]} : vector<16x96xf32> to vector<16x32xf32>
    %1876 = vector.extract_strided_slice %1866 {offsets = [0, 32], sizes = [16, 32], strides = [1, 1]} : vector<16x96xf32> to vector<16x32xf32>
    %1877 = arith.addf %1875, %1876 : vector<16x32xf32>
    %1878 = arith.negf %1877 : vector<16x32xf32>
    %1879 = math.exp %1878 : vector<16x32xf32>
    %cst_423 = arith.constant 1.000000e+00 : f32
    %1880 = vector.broadcast %cst_423 : f32 to vector<16x32xf32>
    %1881 = arith.addf %1880, %1879 : vector<16x32xf32>
    %1882 = arith.divf %1880, %1881 : vector<16x32xf32>
    %1883 = vector.extract_strided_slice %1863 {offsets = [0, 64], sizes = [16, 32], strides = [1, 1]} : vector<16x96xf32> to vector<16x32xf32>
    %1884 = vector.extract_strided_slice %1866 {offsets = [0, 64], sizes = [16, 32], strides = [1, 1]} : vector<16x96xf32> to vector<16x32xf32>
    %1885 = arith.mulf %1874, %1884 : vector<16x32xf32>
    %1886 = arith.addf %1883, %1885 : vector<16x32xf32>
    %1887 = math.tanh %1886 : vector<16x32xf32>
    %cst_424 = arith.constant 1.000000e+00 : f32
    %1888 = vector.broadcast %cst_424 : f32 to vector<16x32xf32>
    %1889 = arith.subf %1888, %1882 : vector<16x32xf32>
    %1890 = arith.mulf %1889, %1887 : vector<16x32xf32>
    %1891 = arith.mulf %1882, %1798 : vector<16x32xf32>
    %1892 = arith.addf %1890, %1891 : vector<16x32xf32>
    %c1_i32 = arith.constant 1 : i32
    %1893 = vector.broadcast %c1_i32 : i32 to vector<16x4xi32>
    %1894 = arith.cmpi sge, %1823, %1893 : vector<16x4xi32>
    %1895 = vector.shape_cast %1815 : vector<1x1xf32> to vector<1x1xf32>
    %1896 = vector.broadcast %1895 : vector<1x1xf32> to vector<16x4xf32>
    %1897 = arith.select %1894, %1813, %1896 : vector<16x4xi1>, vector<16x4xf32>
    %cst_425 = arith.constant dense<0xFF800000> : vector<16xf32>
    %1898 = vector.multi_reduction <maximumf>, %1897, %cst_425 [1] : vector<16x4xf32> to vector<16xf32>
    %1899 = vector.shape_cast %1898 : vector<16xf32> to vector<16x1xf32>
    %1900 = vector.broadcast %1899 : vector<16x1xf32> to vector<16x4xf32>
    %1901 = arith.subf %1897, %1900 : vector<16x4xf32>
    %1902 = math.exp %1901 : vector<16x4xf32>
    %cst_426 = arith.constant dense<0.000000e+00> : vector<16xf32>
    %1903 = vector.multi_reduction <add>, %1902, %cst_426 [1] : vector<16x4xf32> to vector<16xf32>
    %1904 = vector.shape_cast %1903 : vector<16xf32> to vector<16x1xf32>
    %1905 = vector.broadcast %1904 : vector<16x1xf32> to vector<16x4xf32>
    %1906 = arith.divf %1902, %1905 : vector<16x4xf32>
    %1907 = vector.extract_strided_slice %1906 {offsets = [0, 1], sizes = [16, 1], strides = [1, 1]} : vector<16x4xf32> to vector<16x1xf32>
    %1908 = vector.extract_strided_slice %1805 {offsets = [0, 8], sizes = [16, 8], strides = [1, 1]} : vector<16x32xf32> to vector<16x8xf32>
    %1909 = vector.broadcast %1907 : vector<16x1xf32> to vector<16x8xf32>
    %1910 = arith.mulf %1909, %1908 : vector<16x8xf32>
    %cst_427 = arith.constant 0.000000e+00 : f32
    %1911 = vector.broadcast %cst_427 : f32 to vector<16x8xf32>
    %1912 = arith.addf %1911, %1910 : vector<16x8xf32>
    %1913 = vector.extract_strided_slice %1906 {offsets = [0, 2], sizes = [16, 1], strides = [1, 1]} : vector<16x4xf32> to vector<16x1xf32>
    %1914 = vector.extract_strided_slice %1805 {offsets = [0, 16], sizes = [16, 8], strides = [1, 1]} : vector<16x32xf32> to vector<16x8xf32>
    %1915 = vector.broadcast %1913 : vector<16x1xf32> to vector<16x8xf32>
    %1916 = arith.mulf %1915, %1914 : vector<16x8xf32>
    %1917 = arith.addf %1912, %1916 : vector<16x8xf32>
    %1918 = vector.extract_strided_slice %1906 {offsets = [0, 3], sizes = [16, 1], strides = [1, 1]} : vector<16x4xf32> to vector<16x1xf32>
    %1919 = vector.extract_strided_slice %1805 {offsets = [0, 24], sizes = [16, 8], strides = [1, 1]} : vector<16x32xf32> to vector<16x8xf32>
    %1920 = vector.broadcast %1918 : vector<16x1xf32> to vector<16x8xf32>
    %1921 = arith.mulf %1920, %1919 : vector<16x8xf32>
    %1922 = arith.addf %1917, %1921 : vector<16x8xf32>
    %cst_428 = arith.constant dense<0.000000e+00> : vector<16x32xf32>
    %1923 = tpu.matmul %1892, %1816, %cst_428 {dimension_numbers = #tpu.dot_dimension_numbers<[1], [0], [0], [1], [0, 0, 1, 1], [], []>} : vector<16x32xf32>, vector<32x32xf32>, vector<16x32xf32> -> vector<16x32xf32>
    %1924 = vector.broadcast %1817 : vector<1x32xf32> to vector<16x32xf32>
    %1925 = arith.addf %1923, %1924 : vector<16x32xf32>
    %cst_429 = arith.constant 0.000000e+00 : f32
    %1926 = vector.broadcast %cst_429 : f32 to vector<16x32xf32>
    %1927 = arith.maximumf %1925, %1926 : vector<16x32xf32>
    %cst_430 = arith.constant dense<0.000000e+00> : vector<16x96xf32>
    %1928 = tpu.matmul %1922, %1818, %cst_430 {dimension_numbers = #tpu.dot_dimension_numbers<[1], [0], [0], [1], [0, 0, 1, 1], [], []>} : vector<16x8xf32>, vector<8x96xf32>, vector<16x96xf32> -> vector<16x96xf32>
    %cst_431 = arith.constant dense<0.000000e+00> : vector<16x96xf32>
    %1929 = tpu.matmul %1927, %1819, %cst_431 {dimension_numbers = #tpu.dot_dimension_numbers<[1], [0], [0], [1], [0, 0, 1, 1], [], []>} : vector<16x32xf32>, vector<32x96xf32>, vector<16x96xf32> -> vector<16x96xf32>
    %1930 = arith.addf %1928, %1929 : vector<16x96xf32>
    %1931 = vector.broadcast %1821 : vector<1x96xf32> to vector<16x96xf32>
    %1932 = arith.addf %1930, %1931 : vector<16x96xf32>
    %cst_432 = arith.constant dense<0.000000e+00> : vector<16x96xf32>
    %1933 = tpu.matmul %1892, %1820, %cst_432 {dimension_numbers = #tpu.dot_dimension_numbers<[1], [0], [0], [1], [0, 0, 1, 1], [], []>} : vector<16x32xf32>, vector<32x96xf32>, vector<16x96xf32> -> vector<16x96xf32>
    %1934 = vector.broadcast %1822 : vector<1x96xf32> to vector<16x96xf32>
    %1935 = arith.addf %1933, %1934 : vector<16x96xf32>
    %1936 = vector.extract_strided_slice %1932 {offsets = [0, 0], sizes = [16, 32], strides = [1, 1]} : vector<16x96xf32> to vector<16x32xf32>
    %1937 = vector.extract_strided_slice %1935 {offsets = [0, 0], sizes = [16, 32], strides = [1, 1]} : vector<16x96xf32> to vector<16x32xf32>
    %1938 = arith.addf %1936, %1937 : vector<16x32xf32>
    %1939 = arith.negf %1938 : vector<16x32xf32>
    %1940 = math.exp %1939 : vector<16x32xf32>
    %cst_433 = arith.constant 1.000000e+00 : f32
    %1941 = vector.broadcast %cst_433 : f32 to vector<16x32xf32>
    %1942 = arith.addf %1941, %1940 : vector<16x32xf32>
    %1943 = arith.divf %1941, %1942 : vector<16x32xf32>
    %1944 = vector.extract_strided_slice %1932 {offsets = [0, 32], sizes = [16, 32], strides = [1, 1]} : vector<16x96xf32> to vector<16x32xf32>
    %1945 = vector.extract_strided_slice %1935 {offsets = [0, 32], sizes = [16, 32], strides = [1, 1]} : vector<16x96xf32> to vector<16x32xf32>
    %1946 = arith.addf %1944, %1945 : vector<16x32xf32>
    %1947 = arith.negf %1946 : vector<16x32xf32>
    %1948 = math.exp %1947 : vector<16x32xf32>
    %cst_434 = arith.constant 1.000000e+00 : f32
    %1949 = vector.broadcast %cst_434 : f32 to vector<16x32xf32>
    %1950 = arith.addf %1949, %1948 : vector<16x32xf32>
    %1951 = arith.divf %1949, %1950 : vector<16x32xf32>
    %1952 = vector.extract_strided_slice %1932 {offsets = [0, 64], sizes = [16, 32], strides = [1, 1]} : vector<16x96xf32> to vector<16x32xf32>
    %1953 = vector.extract_strided_slice %1935 {offsets = [0, 64], sizes = [16, 32], strides = [1, 1]} : vector<16x96xf32> to vector<16x32xf32>
    %1954 = arith.mulf %1943, %1953 : vector<16x32xf32>
    %1955 = arith.addf %1952, %1954 : vector<16x32xf32>
    %1956 = math.tanh %1955 : vector<16x32xf32>
    %cst_435 = arith.constant 1.000000e+00 : f32
    %1957 = vector.broadcast %cst_435 : f32 to vector<16x32xf32>
    %1958 = arith.subf %1957, %1951 : vector<16x32xf32>
    %1959 = arith.mulf %1958, %1956 : vector<16x32xf32>
    %1960 = arith.mulf %1951, %1892 : vector<16x32xf32>
    %1961 = arith.addf %1959, %1960 : vector<16x32xf32>
    %c2_i32 = arith.constant 2 : i32
    %1962 = vector.broadcast %c2_i32 : i32 to vector<16x4xi32>
    %1963 = arith.cmpi sge, %1823, %1962 : vector<16x4xi32>
    %1964 = vector.shape_cast %1815 : vector<1x1xf32> to vector<1x1xf32>
    %1965 = vector.broadcast %1964 : vector<1x1xf32> to vector<16x4xf32>
    %1966 = arith.select %1963, %1813, %1965 : vector<16x4xi1>, vector<16x4xf32>
    %cst_436 = arith.constant dense<0xFF800000> : vector<16xf32>
    %1967 = vector.multi_reduction <maximumf>, %1966, %cst_436 [1] : vector<16x4xf32> to vector<16xf32>
    %1968 = vector.shape_cast %1967 : vector<16xf32> to vector<16x1xf32>
    %1969 = vector.broadcast %1968 : vector<16x1xf32> to vector<16x4xf32>
    %1970 = arith.subf %1966, %1969 : vector<16x4xf32>
    %1971 = math.exp %1970 : vector<16x4xf32>
    %cst_437 = arith.constant dense<0.000000e+00> : vector<16xf32>
    %1972 = vector.multi_reduction <add>, %1971, %cst_437 [1] : vector<16x4xf32> to vector<16xf32>
    %1973 = vector.shape_cast %1972 : vector<16xf32> to vector<16x1xf32>
    %1974 = vector.broadcast %1973 : vector<16x1xf32> to vector<16x4xf32>
    %1975 = arith.divf %1971, %1974 : vector<16x4xf32>
    %1976 = vector.extract_strided_slice %1975 {offsets = [0, 2], sizes = [16, 1], strides = [1, 1]} : vector<16x4xf32> to vector<16x1xf32>
    %1977 = vector.extract_strided_slice %1805 {offsets = [0, 16], sizes = [16, 8], strides = [1, 1]} : vector<16x32xf32> to vector<16x8xf32>
    %1978 = vector.broadcast %1976 : vector<16x1xf32> to vector<16x8xf32>
    %1979 = arith.mulf %1978, %1977 : vector<16x8xf32>
    %cst_438 = arith.constant 0.000000e+00 : f32
    %1980 = vector.broadcast %cst_438 : f32 to vector<16x8xf32>
    %1981 = arith.addf %1980, %1979 : vector<16x8xf32>
    %1982 = vector.extract_strided_slice %1975 {offsets = [0, 3], sizes = [16, 1], strides = [1, 1]} : vector<16x4xf32> to vector<16x1xf32>
    %1983 = vector.extract_strided_slice %1805 {offsets = [0, 24], sizes = [16, 8], strides = [1, 1]} : vector<16x32xf32> to vector<16x8xf32>
    %1984 = vector.broadcast %1982 : vector<16x1xf32> to vector<16x8xf32>
    %1985 = arith.mulf %1984, %1983 : vector<16x8xf32>
    %1986 = arith.addf %1981, %1985 : vector<16x8xf32>
    %cst_439 = arith.constant dense<0.000000e+00> : vector<16x32xf32>
    %1987 = tpu.matmul %1961, %1816, %cst_439 {dimension_numbers = #tpu.dot_dimension_numbers<[1], [0], [0], [1], [0, 0, 1, 1], [], []>} : vector<16x32xf32>, vector<32x32xf32>, vector<16x32xf32> -> vector<16x32xf32>
    %1988 = vector.broadcast %1817 : vector<1x32xf32> to vector<16x32xf32>
    %1989 = arith.addf %1987, %1988 : vector<16x32xf32>
    %cst_440 = arith.constant 0.000000e+00 : f32
    %1990 = vector.broadcast %cst_440 : f32 to vector<16x32xf32>
    %1991 = arith.maximumf %1989, %1990 : vector<16x32xf32>
    %cst_441 = arith.constant dense<0.000000e+00> : vector<16x96xf32>
    %1992 = tpu.matmul %1986, %1818, %cst_441 {dimension_numbers = #tpu.dot_dimension_numbers<[1], [0], [0], [1], [0, 0, 1, 1], [], []>} : vector<16x8xf32>, vector<8x96xf32>, vector<16x96xf32> -> vector<16x96xf32>
    %cst_442 = arith.constant dense<0.000000e+00> : vector<16x96xf32>
    %1993 = tpu.matmul %1991, %1819, %cst_442 {dimension_numbers = #tpu.dot_dimension_numbers<[1], [0], [0], [1], [0, 0, 1, 1], [], []>} : vector<16x32xf32>, vector<32x96xf32>, vector<16x96xf32> -> vector<16x96xf32>
    %1994 = arith.addf %1992, %1993 : vector<16x96xf32>
    %1995 = vector.broadcast %1821 : vector<1x96xf32> to vector<16x96xf32>
    %1996 = arith.addf %1994, %1995 : vector<16x96xf32>
    %cst_443 = arith.constant dense<0.000000e+00> : vector<16x96xf32>
    %1997 = tpu.matmul %1961, %1820, %cst_443 {dimension_numbers = #tpu.dot_dimension_numbers<[1], [0], [0], [1], [0, 0, 1, 1], [], []>} : vector<16x32xf32>, vector<32x96xf32>, vector<16x96xf32> -> vector<16x96xf32>
    %1998 = vector.broadcast %1822 : vector<1x96xf32> to vector<16x96xf32>
    %1999 = arith.addf %1997, %1998 : vector<16x96xf32>
    %2000 = vector.extract_strided_slice %1996 {offsets = [0, 0], sizes = [16, 32], strides = [1, 1]} : vector<16x96xf32> to vector<16x32xf32>
    %2001 = vector.extract_strided_slice %1999 {offsets = [0, 0], sizes = [16, 32], strides = [1, 1]} : vector<16x96xf32> to vector<16x32xf32>
    %2002 = arith.addf %2000, %2001 : vector<16x32xf32>
    %2003 = arith.negf %2002 : vector<16x32xf32>
    %2004 = math.exp %2003 : vector<16x32xf32>
    %cst_444 = arith.constant 1.000000e+00 : f32
    %2005 = vector.broadcast %cst_444 : f32 to vector<16x32xf32>
    %2006 = arith.addf %2005, %2004 : vector<16x32xf32>
    %2007 = arith.divf %2005, %2006 : vector<16x32xf32>
    %2008 = vector.extract_strided_slice %1996 {offsets = [0, 32], sizes = [16, 32], strides = [1, 1]} : vector<16x96xf32> to vector<16x32xf32>
    %2009 = vector.extract_strided_slice %1999 {offsets = [0, 32], sizes = [16, 32], strides = [1, 1]} : vector<16x96xf32> to vector<16x32xf32>
    %2010 = arith.addf %2008, %2009 : vector<16x32xf32>
    %2011 = arith.negf %2010 : vector<16x32xf32>
    %2012 = math.exp %2011 : vector<16x32xf32>
    %cst_445 = arith.constant 1.000000e+00 : f32
    %2013 = vector.broadcast %cst_445 : f32 to vector<16x32xf32>
    %2014 = arith.addf %2013, %2012 : vector<16x32xf32>
    %2015 = arith.divf %2013, %2014 : vector<16x32xf32>
    %2016 = vector.extract_strided_slice %1996 {offsets = [0, 64], sizes = [16, 32], strides = [1, 1]} : vector<16x96xf32> to vector<16x32xf32>
    %2017 = vector.extract_strided_slice %1999 {offsets = [0, 64], sizes = [16, 32], strides = [1, 1]} : vector<16x96xf32> to vector<16x32xf32>
    %2018 = arith.mulf %2007, %2017 : vector<16x32xf32>
    %2019 = arith.addf %2016, %2018 : vector<16x32xf32>
    %2020 = math.tanh %2019 : vector<16x32xf32>
    %cst_446 = arith.constant 1.000000e+00 : f32
    %2021 = vector.broadcast %cst_446 : f32 to vector<16x32xf32>
    %2022 = arith.subf %2021, %2015 : vector<16x32xf32>
    %2023 = arith.mulf %2022, %2020 : vector<16x32xf32>
    %2024 = arith.mulf %2015, %1961 : vector<16x32xf32>
    %2025 = arith.addf %2023, %2024 : vector<16x32xf32>
    %c3_i32 = arith.constant 3 : i32
    %2026 = vector.broadcast %c3_i32 : i32 to vector<16x4xi32>
    %2027 = arith.cmpi sge, %1823, %2026 : vector<16x4xi32>
    %2028 = vector.shape_cast %1815 : vector<1x1xf32> to vector<1x1xf32>
    %2029 = vector.broadcast %2028 : vector<1x1xf32> to vector<16x4xf32>
    %2030 = arith.select %2027, %1813, %2029 : vector<16x4xi1>, vector<16x4xf32>
    %cst_447 = arith.constant dense<0xFF800000> : vector<16xf32>
    %2031 = vector.multi_reduction <maximumf>, %2030, %cst_447 [1] : vector<16x4xf32> to vector<16xf32>
    %2032 = vector.shape_cast %2031 : vector<16xf32> to vector<16x1xf32>
    %2033 = vector.broadcast %2032 : vector<16x1xf32> to vector<16x4xf32>
    %2034 = arith.subf %2030, %2033 : vector<16x4xf32>
    %2035 = math.exp %2034 : vector<16x4xf32>
    %cst_448 = arith.constant dense<0.000000e+00> : vector<16xf32>
    %2036 = vector.multi_reduction <add>, %2035, %cst_448 [1] : vector<16x4xf32> to vector<16xf32>
    %2037 = vector.shape_cast %2036 : vector<16xf32> to vector<16x1xf32>
    %2038 = vector.broadcast %2037 : vector<16x1xf32> to vector<16x4xf32>
    %2039 = arith.divf %2035, %2038 : vector<16x4xf32>
    %2040 = vector.extract_strided_slice %2039 {offsets = [0, 3], sizes = [16, 1], strides = [1, 1]} : vector<16x4xf32> to vector<16x1xf32>
    %2041 = vector.extract_strided_slice %1805 {offsets = [0, 24], sizes = [16, 8], strides = [1, 1]} : vector<16x32xf32> to vector<16x8xf32>
    %2042 = vector.broadcast %2040 : vector<16x1xf32> to vector<16x8xf32>
    %2043 = arith.mulf %2042, %2041 : vector<16x8xf32>
    %cst_449 = arith.constant 0.000000e+00 : f32
    %2044 = vector.broadcast %cst_449 : f32 to vector<16x8xf32>
    %2045 = arith.addf %2044, %2043 : vector<16x8xf32>
    %cst_450 = arith.constant dense<0.000000e+00> : vector<16x32xf32>
    %2046 = tpu.matmul %2025, %1816, %cst_450 {dimension_numbers = #tpu.dot_dimension_numbers<[1], [0], [0], [1], [0, 0, 1, 1], [], []>} : vector<16x32xf32>, vector<32x32xf32>, vector<16x32xf32> -> vector<16x32xf32>
    %2047 = vector.broadcast %1817 : vector<1x32xf32> to vector<16x32xf32>
    %2048 = arith.addf %2046, %2047 : vector<16x32xf32>
    %cst_451 = arith.constant 0.000000e+00 : f32
    %2049 = vector.broadcast %cst_451 : f32 to vector<16x32xf32>
    %2050 = arith.maximumf %2048, %2049 : vector<16x32xf32>
    %cst_452 = arith.constant dense<0.000000e+00> : vector<16x96xf32>
    %2051 = tpu.matmul %2045, %1818, %cst_452 {dimension_numbers = #tpu.dot_dimension_numbers<[1], [0], [0], [1], [0, 0, 1, 1], [], []>} : vector<16x8xf32>, vector<8x96xf32>, vector<16x96xf32> -> vector<16x96xf32>
    %cst_453 = arith.constant dense<0.000000e+00> : vector<16x96xf32>
    %2052 = tpu.matmul %2050, %1819, %cst_453 {dimension_numbers = #tpu.dot_dimension_numbers<[1], [0], [0], [1], [0, 0, 1, 1], [], []>} : vector<16x32xf32>, vector<32x96xf32>, vector<16x96xf32> -> vector<16x96xf32>
    %2053 = arith.addf %2051, %2052 : vector<16x96xf32>
    %2054 = vector.broadcast %1821 : vector<1x96xf32> to vector<16x96xf32>
    %2055 = arith.addf %2053, %2054 : vector<16x96xf32>
    %cst_454 = arith.constant dense<0.000000e+00> : vector<16x96xf32>
    %2056 = tpu.matmul %2025, %1820, %cst_454 {dimension_numbers = #tpu.dot_dimension_numbers<[1], [0], [0], [1], [0, 0, 1, 1], [], []>} : vector<16x32xf32>, vector<32x96xf32>, vector<16x96xf32> -> vector<16x96xf32>
    %2057 = vector.broadcast %1822 : vector<1x96xf32> to vector<16x96xf32>
    %2058 = arith.addf %2056, %2057 : vector<16x96xf32>
    %2059 = vector.extract_strided_slice %2055 {offsets = [0, 0], sizes = [16, 32], strides = [1, 1]} : vector<16x96xf32> to vector<16x32xf32>
    %2060 = vector.extract_strided_slice %2058 {offsets = [0, 0], sizes = [16, 32], strides = [1, 1]} : vector<16x96xf32> to vector<16x32xf32>
    %2061 = arith.addf %2059, %2060 : vector<16x32xf32>
    %2062 = arith.negf %2061 : vector<16x32xf32>
    %2063 = math.exp %2062 : vector<16x32xf32>
    %cst_455 = arith.constant 1.000000e+00 : f32
    %2064 = vector.broadcast %cst_455 : f32 to vector<16x32xf32>
    %2065 = arith.addf %2064, %2063 : vector<16x32xf32>
    %2066 = arith.divf %2064, %2065 : vector<16x32xf32>
    %2067 = vector.extract_strided_slice %2055 {offsets = [0, 32], sizes = [16, 32], strides = [1, 1]} : vector<16x96xf32> to vector<16x32xf32>
    %2068 = vector.extract_strided_slice %2058 {offsets = [0, 32], sizes = [16, 32], strides = [1, 1]} : vector<16x96xf32> to vector<16x32xf32>
    %2069 = arith.addf %2067, %2068 : vector<16x32xf32>
    %2070 = arith.negf %2069 : vector<16x32xf32>
    %2071 = math.exp %2070 : vector<16x32xf32>
    %cst_456 = arith.constant 1.000000e+00 : f32
    %2072 = vector.broadcast %cst_456 : f32 to vector<16x32xf32>
    %2073 = arith.addf %2072, %2071 : vector<16x32xf32>
    %2074 = arith.divf %2072, %2073 : vector<16x32xf32>
    %2075 = vector.extract_strided_slice %2055 {offsets = [0, 64], sizes = [16, 32], strides = [1, 1]} : vector<16x96xf32> to vector<16x32xf32>
    %2076 = vector.extract_strided_slice %2058 {offsets = [0, 64], sizes = [16, 32], strides = [1, 1]} : vector<16x96xf32> to vector<16x32xf32>
    %2077 = arith.mulf %2066, %2076 : vector<16x32xf32>
    %2078 = arith.addf %2075, %2077 : vector<16x32xf32>
    %2079 = math.tanh %2078 : vector<16x32xf32>
    %cst_457 = arith.constant 1.000000e+00 : f32
    %2080 = vector.broadcast %cst_457 : f32 to vector<16x32xf32>
    %2081 = arith.subf %2080, %2074 : vector<16x32xf32>
    %2082 = arith.mulf %2081, %2079 : vector<16x32xf32>
    %2083 = arith.mulf %2074, %2025 : vector<16x32xf32>
    %2084 = arith.addf %2082, %2083 : vector<16x32xf32>
    %2085 = tpu.concatenate %1892, %1961, %2025, %2084 in 1 : vector<16x32xf32>, vector<16x32xf32>, vector<16x32xf32>, vector<16x32xf32> -> vector<16x128xf32>
    %c0_458 = arith.constant 0 : index
    %c0_459 = arith.constant 0 : index
    %2086 = vector.load %arg0[%c0_458, %c0_459] : memref<16x4xf32, #tpu.memory_space<vmem>>, vector<16x4xf32>
    %2087 = tpu.concatenate %2086, %2086, %2086, %2086 in 1 : vector<16x4xf32>, vector<16x4xf32>, vector<16x4xf32>, vector<16x4xf32> -> vector<16x16xf32>
    %c432 = arith.constant 432 : index
    %c0_460 = arith.constant 0 : index
    %2088 = vector.load %arg1[%c432, %c0_460] : memref<696x128xf32, #tpu.memory_space<vmem>>, vector<128x16xf32>
    %cst_461 = arith.constant dense<0.000000e+00> : vector<16x16xf32>
    %2089 = tpu.matmul %2085, %2088, %cst_461 {dimension_numbers = #tpu.dot_dimension_numbers<[1], [0], [0], [1], [0, 0, 1, 1], [], []>} : vector<16x128xf32>, vector<128x16xf32>, vector<16x16xf32> -> vector<16x16xf32>
    %c560 = arith.constant 560 : index
    %c0_462 = arith.constant 0 : index
    %2090 = vector.load %arg1[%c560, %c0_462] : memref<696x128xf32, #tpu.memory_space<vmem>>, vector<1x16xf32>
    %2091 = vector.broadcast %2090 : vector<1x16xf32> to vector<16x16xf32>
    %2092 = arith.addf %2089, %2091 : vector<16x16xf32>
    %2093 = math.tanh %2092 : vector<16x16xf32>
    %2094 = arith.addf %2093, %2087 : vector<16x16xf32>
    %c0_463 = arith.constant 0 : index
    %c0_464 = arith.constant 0 : index
    %2095 = vector.load %arg3[%c0_463, %c0_464] : memref<16x16xf32, #tpu.memory_space<vmem>>, vector<16x16xf32>
    tpu.vector_store %arg3[%c0_463, %c0_464], %2094 {strides = array<i32>} : memref<16x16xf32, #tpu.memory_space<vmem>>, vector<16x16xf32>,
    %c392 = arith.constant 392 : index
    %c0_465 = arith.constant 0 : index
    %2096 = vector.load %arg1[%c392, %c0_465] : memref<696x128xf32, #tpu.memory_space<vmem>>, vector<32x128xf32>
    %cst_466 = arith.constant dense<0.000000e+00> : vector<16x128xf32>
    %2097 = tpu.matmul %1791, %2096, %cst_466 {dimension_numbers = #tpu.dot_dimension_numbers<[1], [0], [0], [1], [0, 0, 1, 1], [], []>} : vector<16x32xf32>, vector<32x128xf32>, vector<16x128xf32> -> vector<16x128xf32>
    %c424 = arith.constant 424 : index
    %c0_467 = arith.constant 0 : index
    %2098 = vector.load %arg1[%c424, %c0_467] : memref<696x128xf32, #tpu.memory_space<vmem>>, vector<1x128xf32>
    %2099 = vector.broadcast %2098 : vector<1x128xf32> to vector<16x128xf32>
    %2100 = arith.addf %2097, %2099 : vector<16x128xf32>
    %cst_468 = arith.constant 0.000000e+00 : f32
    %2101 = vector.broadcast %cst_468 : f32 to vector<16x128xf32>
    %2102 = arith.maximumf %2100, %2101 : vector<16x128xf32>
    %c432_469 = arith.constant 432 : index
    %c0_470 = arith.constant 0 : index
    %2103 = vector.load %arg1[%c432_469, %c0_470] : memref<696x128xf32, #tpu.memory_space<vmem>>, vector<128x16xf32>
    %cst_471 = arith.constant dense<0.000000e+00> : vector<16x16xf32>
    %2104 = tpu.matmul %2102, %2103, %cst_471 {dimension_numbers = #tpu.dot_dimension_numbers<[1], [0], [0], [1], [0, 0, 1, 1], [], []>} : vector<16x128xf32>, vector<128x16xf32>, vector<16x16xf32> -> vector<16x16xf32>
    %c560_472 = arith.constant 560 : index
    %c0_473 = arith.constant 0 : index
    %2105 = vector.load %arg1[%c560_472, %c0_473] : memref<696x128xf32, #tpu.memory_space<vmem>>, vector<1x16xf32>
    %2106 = vector.broadcast %2105 : vector<1x16xf32> to vector<16x16xf32>
    %2107 = arith.addf %2104, %2106 : vector<16x16xf32>
    %2108 = math.tanh %2107 : vector<16x16xf32>
    %c0_474 = arith.constant 0 : index
    %c0_475 = arith.constant 0 : index
    %2109 = vector.load %arg2[%c0_474, %c0_475] : memref<16x16xf32, #tpu.memory_space<vmem>>, vector<16x16xf32>
    tpu.vector_store %arg2[%c0_474, %c0_475], %2108 {strides = array<i32>} : memref<16x16xf32, #tpu.memory_space<vmem>>, vector<16x16xf32>,
    return
  }
}

</mosaic_0001>

<bundles_post_ra>
// kernel: sgnet_forward.1
= control target key start
LH: loop header
LB: loop body
LE: loop exit
PB: predicated region body
PF: predicated region fallthrough
CT: control target
= control target key end

     0   :  { %9 = vsyncpa [#allocation6], 0  ;;  %s15296_s12 = smov [#allocation5]   ;;  %s17326_s0 = inlined_call_operand.vmem [shape: f32[16,4], index: 0, kind: input, shape index: {}]   ;;  %s17327_s1 = inlined_call_operand.hbm [shape: f32[696,128], index: 1, kind: input, shape index: {}]   ;;  %s17328_s2 = inlined_call_operand.vmem [shape: f32[16,16], index: 2, kind: output, shape index: {0}]   ;;  %s17329_s3 = inlined_call_operand.vmem [shape: f32[16,16], index: 3, kind: output, shape index: {1}]  }
   0x1   :  { %s17_s13 = sshll.u32 %s15296_s12, 4  ;;  %s18_s13 = int_to_ptr.vmem [resolvable:$true] %s17_s13 }
   0x2   :  { %s15282_s14 = scalar_lea.vmem %s18_s13, 11136  ;;  %p15287_p1 = scmp.lt.s32.totalorder %s18_s13, %s18_s13 }
   0x3   :  { %p15283_p0 = scmp.ne.s32.totalorder %s18_s13, %s15282_s14  ;;  %p15288_p2 = scmp.lt.s32.totalorder %s15282_s14, %s15282_s14 }
   0x5   :  { %p15289_p3 = por %p15288_p2, %p15287_p1 }
   0x7   :  { %p15290_p4 = pnand %p15289_p3, %p15283_p0 }
   0x9   :  { %15293 = shalt.err (!%p15290_p4)
}
   0xa   :  { %s15297_s15 = smov 128   ;;  %s15298_s16 = smov 8  }
   0xb   :  { %23 = dma.hbm_to_vmem [thread:$0]  %s17327_s1, 11136, %s18_s13, [#allocation6], %s15297_s15, %s15297_s15, %s15298_s16  }
   0xc   :  { %15294 = dma.done.wait [#allocation6], 11136  }
   0xd   :  { %15295 = vsyncadd [#allocation6], 4294956160  ;;  %vm42_vm0 = vcmask 1043456   ;;  %vm35_vm1 = vcmask 31744   ;;  %v29_v0 = vld [vmem:[#allocation5] sm:$0xf] }
   0xe   :  { %v27_v1 = vld [vmem:[%s17326_s0] sm:$0xff]  ;;  %v28_v2 = vld [vmem:[%s17326_s0 + $0x8] sm:$0xff]  ;;  %13683 = vmatprep.subr.msk.mxu0 %vm42_vm0, %v29_v0  ;;  %v126_v3 = vld [vmem:[#allocation5 + $0x28] sm:$0xff]  ;;  %v15299_v7 = vmov 0.0   ;;  %vm15300_vm2 = vmmov 0   ;;  %vm132_vm3 = vcmask 261120  }
   0xf   :  { %13685 = vmatprep.mubr.msk.f32.mxu0 %vm35_vm1, %v27_v1  ;;  %13684 = vmatpush3.msk.msra.mxu0 %vm42_vm0, %v29_v0  ;;  %v125_v4 = vld [vmem:[#allocation5 + $0x20] sm:$0xff]  ;;  %v124_v5 = vld [vmem:[#allocation5 + $0x18] sm:$0xff]  ;;  %v123_v6 = vld [vmem:[#allocation5 + $0x10] sm:$0xff]  ;;  %vm214_vm4 = vcmask 785408   ;;  %s15301_s1 = smov 64   ;;  %s15302_s23 = smov 96  }
  0x10   :  { %13688 = vmatprep.subr.mxu1 %v126_v3  ;;  %13686 = vmatmul.mubr.msk.f32.vlgmr.msra.gmra.mxu0 %vm35_vm1, %v28_v2  ;;  %v15350_v8 = vld [vmem:[#allocation5 + $0x30] sm:$0xff]  ;;  %v12977_v9 = vld [vmem:[#allocation5 + $0x8] ss:$0 sm:$0xff]  ;;  %v15367_v18 = vld [vmem:[#allocation5 + $0x40] sm:$0xff]  ;;  %vm426_vm5 = vcmask 254976   ;;  %vm245_vm6 = vcmask 64512  }
  0x11   :  { %13689 = vmatpush3.msra.mxu1 %v126_v3  ;;  %13699 = vmatprep.subr.mxu0 %v15299_v7  ;;  %v15357_v16 = vld [vmem:[#allocation5 + $0x50] sm:$0xff]  ;;  %v15361_v17 = vld [vmem:[#allocation5 + $0x48] sm:$0xff]  ;;  %v15371_v19 = vld [vmem:[#allocation5 + $0x38] sm:$0xff]  ;;  %s15303_s24 = smov 112   ;;  %s15304_s25 = smov 16   ;;  %vm1433_vm7 = vcmask 130048  }
  0x12   :  { %13690 = vmatprep.subr.mxu1 %v125_v4  ;;  %13701 = vmatprep.mubr.msk.f32.mxu0 %vm15300_vm2, %v15299_v7  ;;  %v12981_v22 = vld [vmem:[#allocation5 + $0x58] ss:$0 sm:$0xff]  ;;  %v15382_v27 = vld [vmem:[#allocation5 + $0x60] ss:$0 sm:$0xff]  ;;  %v15393_v44 = vld [vmem:[#allocation5 + $0x70] sm:$0xff]  ;;  %s15305_s26 = smov 120  }
  0x13   :  { %13691 = vmatpush3.msra.mxu1 %v125_v4  ;;  %13700 = vmatpush3.msra.mxu0 %v15350_v8  ;;  %v15387_v42 = vld [vmem:[#allocation5 + $0x80] sm:$0xff]  ;;  %v15389_v43 = vld [vmem:[#allocation5 + $0x78] sm:$0xff]  ;;  %v15397_v45 = vld [vmem:[#allocation5 + $0x68] sm:$0xff]  ;;  %vm1435_vm8 = vcmask 195584   ;;  %vm1595_vm9 = vcmask 25600   ;;  %s15310_s28 = smov 104  }
  0x14   :  { %13692 = vmatprep.subr.mxu1 %v124_v5  ;;  %13702 = vmatmul.mubr.f32.vlgmr.msra.gmra.mxu0 %v15299_v7  ;;  %v15416_v53 = vld [vmem:[#allocation5 + $0x98] sm:$0xff]  ;;  %v15418_v54 = vld [vmem:[#allocation5 + $0x90] sm:$0xff]  ;;  %v15427_v55 = vld [vmem:[#allocation5 + $0x88] ss:$0 sm:$0xff]  ;;  %s15311_s4 = smov 32   ;;  %s15312_s10 = smov 4  }
  0x15   :  { %13693 = vmatpush3.msra.mxu1 %v124_v5  ;;  %13726 = vmatprep.subr.mxu0 %v15299_v7  ;;  %v15435_v62 = vld [vmem:[#allocation5 + $0xa8] ss:$0 sm:$0xff]  ;;  %v15439_v2 = vld [vmem:[#allocation5 + $0xa0] ss:$0 sm:$0xff]  ;;  %s15313_s11 = smov 12   ;;  %vm12646_vm13 = vcmask 523264  }
  0x16   :  { %13694 = vmatprep.subr.mxu1 %v123_v6  ;;  %13728 = vmatprep.mubr.msk.f32.mxu0 %vm15300_vm2, %v15299_v7  ;;  %vm12677_vm14 = vcmask 97280  }
  0x17   :  { %13695 = vmatpush3.msra.mxu1 %v123_v6  ;;  %13727 = vmatpush3.msra.mxu0 %v15418_v54 }
  0x18   :  { %13704 = vmatprep.subr.mxu1 %v15299_v7  ;;  %13729 = vmatmul.mubr.f32.vlgmr.msra.gmra.mxu0 %v15299_v7 }
  0x19   :  { %13736 = vmatprep.subr.mxu0 %v15299_v7  ;;  %13738 = vmatprep.mubr.msk.f32.mxu0 %vm15300_vm2, %v15299_v7 }
  0xd0   :  { %v13687_v10 = vpop.f32.mrf.mxu0 }
  0xd1   :  { %v118_v11 = vadd.f32 %v13687_v10, %v12977_v9 }
  0xd2   :  { %v112_v12 = vpop.f32.mrf.mxu0 }
  0xd3   :  { %v113_v13 = vadd.f32 %v12977_v9, %v112_v12  ;;  %v122_v15 = vmax.f32 %v118_v11, 0.0 }
  0xd4   :  { %v315_v20 = vpop.f32.mrf.mxu0 }
  0xd5   :  { %v121_v14 = vmax.f32 %v113_v13, 0.0 }
  0xd6   :  { %v13703_v21 = vpop.f32.mrf.mxu0 }
  0xd7   :  { %13696 = vmatprep.mubr.msk.f32.mxu1 %vm132_vm3, %v121_v14 }
  0xd8   :  { %13697 = vmatmul.mubr.msk.f32.vlgmr.msra.gmra.mxu1 %vm132_vm3, %v122_v15  ;;  %v575_v60 = vpop.f32.mrf.mxu0  ;;  %v15448_v15 = vld [vmem:[#allocation5 + $0xb0] sm:$0xff] }
  0xd9   :  { %13705 = vmatpush3.msra.mxu1 %v15357_v16  ;;  %13712 = vmatprep.mubr.msk.f32.mxu1 %vm15300_vm2, %v15299_v7  ;;  %v15442_v3 = vadd.f32 %v15439_v2, %v575_v60 }
  0xda   :  { %13706 = vmatprep.subr.mxu1 %v15299_v7  ;;  %v13730_v61 = vpop.f32.mrf.mxu0  ;;  %13737 = vmatpush3.msra.mxu0 %v15448_v15 }
  0xdb   :  { %13707 = vmatpush3.msra.mxu1 %v15361_v17  ;;  %13746 = vmatprep.subr.mxu0 %v15299_v7 }
  0xdc   :  { %13708 = vmatprep.subr.mxu1 %v15299_v7 }
  0xdd   :  { %13709 = vmatpush3.msra.mxu1 %v15367_v18 }
  0xde   :  { %13710 = vmatprep.subr.mxu1 %v15299_v7 }
  0xdf   :  { %13711 = vmatpush3.msra.mxu1 %v15371_v19 }
  0xe0   :  { %13713 = vmatmul.mubr.f32.vlgmr.msra.gmra.mxu1 %v15299_v7  ;;  %13715 = vmatprep.subr.mxu1 %v15299_v7 }
  0xe1   :  { %13723 = vmatprep.mubr.msk.f32.mxu1 %vm15300_vm2, %v15299_v7  ;;  %13716 = vmatpush3.msra.mxu1 %v15387_v42 }
  0xe2   :  { %13717 = vmatprep.subr.mxu1 %v15299_v7 }
  0xe3   :  { %13718 = vmatpush3.msra.mxu1 %v15389_v43 }
  0xe4   :  { %13719 = vmatprep.subr.mxu1 %v15299_v7 }
  0xe5   :  { %13720 = vmatpush3.msra.mxu1 %v15393_v44 }
  0xe6   :  { %13721 = vmatprep.subr.mxu1 %v15299_v7 }
  0xe7   :  { %13722 = vmatpush3.msra.mxu1 %v15397_v45 }
  0xe8   :  { %13731 = vmatprep.subr.mxu1 %v15299_v7 }
 0x198   :  { %v13698_v23 = vpop.f32.mrf.mxu1 }
 0x199   :  { %v211_v24 = vadd.f32 %v13698_v23, %v12981_v22 }
 0x19a   :  { %v205_v25 = vpop.f32.mrf.mxu1 }
 0x19b   :  { %216 = vst.msk [vmem:[#allocation2 + $0x8] sm:$0xff] %vm214_vm4, %v211_v24  ;;  %v206_v26 = vadd.f32 %v12981_v22, %v205_v25 }
 0x19d   :  { %215 = vst.msk [vmem:[#allocation2] sm:$0xff] %vm214_vm4, %v206_v26 }
 0x1a0   :  { %v392_v28 = vpop.f32.mrf.mxu1 }
 0x1a1   :  { %v393_v29 = vadd.f32 %v15382_v27, %v392_v28 }
 0x1a2   :  { %v13714_v30 = vpop.f32.mrf.mxu1 }
 0x1a3   :  { %404 = vrot.lane.b32.xlu0 %v393_v29, %s15301_s1 }
 0x1a4   :  { %v244_v31 = vld [vmem:[#allocation2] sm:$0x3] }
 0x1a5   :  { %v319_v32 = vadd.f32 %v315_v20, %v244_v31 }
 0x1a7   :  { %v396_v33 = vadd.f32 %v393_v29, %v319_v32  ;;  %v15468_v29 = vld [vmem:[#allocation5 + $0xb8] ss:$0 sm:$0xff] }
 0x1a9   :  { %v12985_v34 = vmul.f32 -1.442695, %v396_v33 }
 0x1ab   :  { %14816 = vpow2.f32 %v12985_v34 }
 0x1b8   :  { %v14817_v35 = vpop.eup %14816 }
 0x1b9   :  { %v400_v36 = vadd.f32 1.0, %v14817_v35 }
 0x1bb   :  { %14818 = vrcp.f32 %v400_v36 }
 0x1c8   :  { %v14819_v37 = vpop.eup %14818 }
 0x1c9   :  { %v414_v47 = vsub.f32 1.0, %v14819_v37  ;;  %v420_v49 = vmul.f32 0.0, %v14819_v37 }
 0x215   :  { %v405_v38 = vpop.permute.xlu0 %404 }
 0x216   :  { %v407_v39 = vmul.f32 %v14819_v37, %v405_v38 }
 0x218   :  { %409 = vrot.lane.b32.xlu0 %v407_v39, %s15301_s1 }
 0x28a   :  { %v410_v40 = vpop.permute.xlu0 %409 }
 0x28b   :  { %v412_v41 = vadd.f32 %v410_v40, %v319_v32 }
 0x28d   :  { %14820 = vtanh.f32 %v412_v41 }
 0x29a   :  { %v14821_v46 = vpop.eup %14820 }
 0x29b   :  { %416 = vrot.lane.b32.xlu1 %v14821_v46, %s15302_s23 }
 0x30d   :  { %v417_v48 = vpop.permute.xlu1 %416 }
 0x30e   :  { %v419_v50 = vmul.f32 %v417_v48, %v414_v47 }
 0x310   :  { %v15404_v51 = vadd.f32 %v420_v49, %v419_v50 }
 0x312   :  { %423 = vrot.lane.b32.xlu1 %v15404_v51, %s15302_s23 }
 0x384   :  { %v15408_v52 = vpop.permute.xlu1 %423 }
 0x385   :  { %427 = vst.msk [vmem:[#allocation3] sm:$0x3] %vm426_vm5, %v15408_v52  ;;  %13724 = vmatmul.mubr.msk.f32.vlgmr.msra.gmra.mxu1 %vm132_vm3, %v15408_v52 }
 0x386   :  { %13733 = vmatprep.mubr.msk.f32.mxu1 %vm15300_vm2, %v15299_v7  ;;  %13732 = vmatpush3.msra.mxu1 %v15416_v53 }
 0x387   :  { %13741 = vmatprep.subr.mxu1 %v15299_v7 }
 0x445   :  { %v500_v56 = vpop.f32.mrf.mxu1 }
 0x446   :  { %v501_v57 = vadd.f32 %v15427_v55, %v500_v56 }
 0x447   :  { %v13725_v58 = vpop.f32.mrf.mxu1 }
 0x448   :  { %v504_v59 = vmax.f32 %v501_v57, 0.0 }
 0x44a   :  { %13734 = vmatmul.mubr.msk.f32.vlgmr.msra.gmra.mxu1 %vm245_vm6, %v504_v59 }
 0x44b   :  { %13742 = vmatpush3.msra.mxu1 %v15418_v54  ;;  %13743 = vmatprep.mubr.msk.f32.mxu1 %vm15300_vm2, %v15299_v7 }
 0x44c   :  { %13751 = vmatprep.subr.mxu1 %v15299_v7 }
 0x50a   :  { %v652_v63 = vpop.f32.mrf.mxu1 }
 0x50b   :  { %v653_v0 = vadd.f32 %v15435_v62, %v652_v63 }
 0x50c   :  { %v13735_v1 = vpop.f32.mrf.mxu1 }
 0x50d   :  { %664 = vrot.lane.b32.xlu0 %v653_v0, %s15303_s24  ;;  %v656_v4 = vadd.f32 %v653_v0, %v15442_v3 }
 0x50f   :  { %v12991_v5 = vmul.f32 -1.442695, %v656_v4 }
 0x511   :  { %14822 = vpow2.f32 %v12991_v5 }
 0x51e   :  { %v14823_v6 = vpop.eup %14822 }
 0x51f   :  { %v660_v9 = vadd.f32 1.0, %v14823_v6 }
 0x521   :  { %14824 = vrcp.f32 %v660_v9 }
 0x52e   :  { %v14825_v10 = vpop.eup %14824 }
 0x52f   :  { %v674_v22 = vsub.f32 1.0, %v14825_v10 }
 0x57f   :  { %v665_v11 = vpop.permute.xlu0 %664 }
 0x580   :  { %v667_v12 = vmul.f32 %v14825_v10, %v665_v11 }
 0x582   :  { %669 = vrot.lane.b32.xlu1 %v667_v12, %s15304_s25 }
 0x586   :  { %680 = vrot.lane.b32.xlu1 %v504_v59, %s15298_s16 }
 0x5f4   :  { %v670_v13 = vpop.permute.xlu1 %669 }
 0x5f5   :  { %v672_v14 = vadd.f32 %v670_v13, %v15442_v3 }
 0x5f7   :  { %14826 = vtanh.f32 %v672_v14 }
 0x5f8   :  { %v681_v21 = vpop.permute.xlu1 %680 }
 0x5f9   :  { %v683_v24 = vmul.f32 %v14825_v10, %v681_v21 }
 0x604   :  { %v14827_v20 = vpop.eup %14826 }
 0x605   :  { %676 = vrot.lane.b32.xlu0 %v14827_v20, %s15305_s26 }
 0x677   :  { %v677_v23 = vpop.permute.xlu0 %676 }
 0x678   :  { %v679_v25 = vmul.f32 %v677_v23, %v674_v22 }
 0x67a   :  { %v684_v26 = vadd.f32 %v683_v24, %v679_v25 }
 0x67c   :  { %690 = vrot.lane.b32.xlu0 %v684_v26, %s15305_s26 }
 0x6ee   :  { %v15454_v28 = vpop.permute.xlu0 %690 }
 0x6ef   :  { %13739 = vmatmul.mubr.msk.f32.vlgmr.msra.gmra.mxu0 %vm245_vm6, %v15454_v28 }
 0x6f0   :  { %13747 = vmatpush3.msra.mxu0 %v15416_v53  ;;  %13748 = vmatprep.mubr.msk.f32.mxu0 %vm15300_vm2, %v15299_v7 }
 0x6f1   :  { %13756 = vmatprep.subr.mxu0 %v15299_v7 }
 0x6f3   :  { %13749 = vmatmul.mubr.msk.f32.vlgmr.msra.gmra.mxu0 %vm245_vm6, %v15454_v28 }
 0x6f4   :  { %13757 = vmatpush3.msra.mxu0 %v15418_v54  ;;  %13758 = vmatprep.mubr.msk.f32.mxu0 %vm15300_vm2, %v15299_v7 }
 0x6f5   :  { %13766 = vmatprep.subr.mxu0 %v15299_v7 }
 0x7af   :  { %v760_v30 = vpop.f32.mrf.mxu0 }
 0x7b0   :  { %v761_v31 = vadd.f32 %v15468_v29, %v760_v30 }
 0x7b1   :  { %v13740_v32 = vpop.f32.mrf.mxu0 }
 0x7b2   :  { %v764_v33 = vmax.f32 %v761_v31, 0.0 }
 0x7b3   :  { %v904_v34 = vpop.f32.mrf.mxu0 }
 0x7b4   :  { %v905_v35 = vadd.f32 %v15435_v62, %v904_v34  ;;  %13744 = vmatmul.mubr.msk.f32.vlgmr.msra.gmra.mxu1 %vm245_vm6, %v764_v33 }
 0x7b5   :  { %v13750_v36 = vpop.f32.mrf.mxu0  ;;  %13752 = vmatpush3.msra.mxu1 %v15448_v15  ;;  %13753 = vmatprep.mubr.msk.f32.mxu1 %vm15300_vm2, %v15299_v7 }
 0x7b6   :  { %916 = vrot.lane.b32.xlu1 %v905_v35, %s15303_s24  ;;  %13761 = vmatprep.subr.mxu1 %v15299_v7 }
 0x828   :  { %v917_v49 = vpop.permute.xlu1 %916 }
 0x874   :  { %v834_v37 = vpop.f32.mrf.mxu1 }
 0x875   :  { %v835_v38 = vadd.f32 %v15439_v2, %v834_v37 }
 0x876   :  { %v13745_v39 = vpop.f32.mrf.mxu1 }
 0x877   :  { %v908_v40 = vadd.f32 %v905_v35, %v835_v38 }
 0x879   :  { %v12996_v41 = vmul.f32 -1.442695, %v908_v40 }
 0x87b   :  { %14828 = vpow2.f32 %v12996_v41 }
 0x888   :  { %v14829_v46 = vpop.eup %14828 }
 0x889   :  { %v912_v47 = vadd.f32 1.0, %v14829_v46 }
 0x88b   :  { %14830 = vrcp.f32 %v912_v47 }
 0x898   :  { %v14831_v48 = vpop.eup %14830 }
 0x899   :  { %v919_v50 = vmul.f32 %v14831_v48, %v917_v49  ;;  %v926_v59 = vsub.f32 1.0, %v14831_v48  ;;  %v932_v61 = vmul.f32 %v14831_v48, %v684_v26 }
 0x89b   :  { %921 = vrot.lane.b32.xlu0 %v919_v50, %s15304_s25 }
 0x90d   :  { %v922_v56 = vpop.permute.xlu0 %921 }
 0x90e   :  { %v924_v57 = vadd.f32 %v922_v56, %v835_v38 }
 0x910   :  { %14832 = vtanh.f32 %v924_v57 }
 0x91d   :  { %v14833_v58 = vpop.eup %14832 }
 0x91e   :  { %928 = vrot.lane.b32.xlu1 %v14833_v58, %s15305_s26 }
 0x990   :  { %v929_v60 = vpop.permute.xlu1 %928 }
 0x991   :  { %v931_v63 = vmul.f32 %v929_v60, %v926_v59 }
 0x993   :  { %v15481_v0 = vadd.f32 %v932_v61, %v931_v63 }
 0x995   :  { %935 = vrot.lane.b32.xlu0 %v15481_v0, %s15305_s26 }
 0xa07   :  { %v936_v1 = vpop.permute.xlu0 %935 }
 0xa08   :  { %13754 = vmatmul.mubr.msk.f32.vlgmr.msra.gmra.mxu1 %vm245_vm6, %v936_v1 }
 0xa09   :  { %13762 = vmatpush3.msra.mxu1 %v15416_v53  ;;  %13763 = vmatprep.mubr.msk.f32.mxu1 %vm15300_vm2, %v15299_v7 }
 0xa0a   :  { %13771 = vmatprep.subr.mxu1 %v15299_v7 }
 0xa0c   :  { %13764 = vmatmul.mubr.msk.f32.vlgmr.msra.gmra.mxu1 %vm245_vm6, %v936_v1 }
 0xa0d   :  { %13772 = vmatpush3.msra.mxu1 %v15418_v54  ;;  %13773 = vmatprep.mubr.msk.f32.mxu1 %vm15300_vm2, %v15299_v7 }
 0xa0e   :  { %13781 = vmatprep.subr.mxu1 %v15299_v7 }
 0xac8   :  { %v1005_v4 = vpop.f32.mrf.mxu1 }
 0xac9   :  { %v1006_v5 = vadd.f32 %v15468_v29, %v1005_v4 }
 0xaca   :  { %v13755_v6 = vpop.f32.mrf.mxu1 }
 0xacb   :  { %v1009_v9 = vmax.f32 %v1006_v5, 0.0 }
 0xacc   :  { %v1149_v10 = vpop.f32.mrf.mxu1 }
 0xacd   :  { %v1150_v11 = vadd.f32 %v15435_v62, %v1149_v10  ;;  %13759 = vmatmul.mubr.msk.f32.vlgmr.msra.gmra.mxu0 %vm245_vm6, %v1009_v9  ;;  %v15525_v10 = vld [vmem:[#allocation5 + $0xd8] sm:$0xff] }
 0xace   :  { %v13765_v12 = vpop.f32.mrf.mxu1  ;;  %13767 = vmatpush3.msra.mxu0 %v15448_v15  ;;  %13768 = vmatprep.mubr.msk.f32.mxu0 %vm15300_vm2, %v15299_v7 }
 0xacf   :  { %1161 = vrot.lane.b32.xlu1 %v1150_v11, %s15303_s24  ;;  %13776 = vmatprep.subr.mxu0 %v15299_v7  ;;  %v15531_v12 = vld [vmem:[#allocation5 + $0xc8] sm:$0xff] }
 0xb41   :  { %v1162_v26 = vpop.permute.xlu1 %1161 }
 0xb8d   :  { %v1079_v13 = vpop.f32.mrf.mxu0 }
 0xb8e   :  { %v1080_v14 = vadd.f32 %v15439_v2, %v1079_v13 }
 0xb8f   :  { %v13760_v20 = vpop.f32.mrf.mxu0 }
 0xb90   :  { %v1153_v21 = vadd.f32 %v1150_v11, %v1080_v14  ;;  %v15527_v11 = vld [vmem:[#allocation5 + $0xd0] sm:$0xff] }
 0xb92   :  { %v13000_v22 = vmul.f32 -1.442695, %v1153_v21 }
 0xb94   :  { %14834 = vpow2.f32 %v13000_v22 }
 0xba1   :  { %v14835_v23 = vpop.eup %14834 }
 0xba2   :  { %v1157_v24 = vadd.f32 1.0, %v14835_v23 }
 0xba4   :  { %14836 = vrcp.f32 %v1157_v24 }
 0xbb1   :  { %v14837_v25 = vpop.eup %14836 }
 0xbb2   :  { %v1164_v30 = vmul.f32 %v14837_v25, %v1162_v26  ;;  %v1171_v34 = vsub.f32 1.0, %v14837_v25  ;;  %v1177_v36 = vmul.f32 %v14837_v25, %v15481_v0  ;;  %v1432_v26 = vsel %vm245_vm6, %v15454_v28, %v15481_v0  ;;  %v15560_v28 = vld [vmem:[#allocation5 + $0xf0] sm:$0xff]  ;;  %v243_v0 = vld [vmem:[#allocation5 + $0x108] sm:$0x1] }
 0xbb3   :  { %14740 = vpush %v243_v0 }
 0xbb4   :  { %1166 = vrot.lane.b32.xlu0 %v1164_v30, %s15304_s25 }
 0xbe4   :  { %s14741_s27 = spop %14740 }
 0xc26   :  { %v1167_v31 = vpop.permute.xlu0 %1166 }
 0xc27   :  { %v1169_v32 = vadd.f32 %v1167_v31, %v1080_v14  ;;  %v15538_v14 = vld [vmem:[#allocation5 + $0xc0] sm:$0xff] }
 0xc29   :  { %14838 = vtanh.f32 %v1169_v32 }
 0xc36   :  { %v14839_v33 = vpop.eup %14838 }
 0xc37   :  { %1173 = vrot.lane.b32.xlu1 %v14839_v33, %s15305_s26  ;;  %v15554_v33 = vld [vmem:[#allocation5 + $0x100] sm:$0xff] }
 0xca9   :  { %v1174_v35 = vpop.permute.xlu1 %1173 }
 0xcaa   :  { %v1176_v37 = vmul.f32 %v1174_v35, %v1171_v34  ;;  %v15556_v34 = vld [vmem:[#allocation5 + $0xf8] sm:$0xff]  ;;  %v15570_v35 = vld [vmem:[#allocation5 + $0xe0] ss:$0 sm:$0xff] }
 0xcac   :  { %v1178_v38 = vadd.f32 %v1177_v36, %v1176_v37 }
 0xcae   :  { %1180 = vrot.lane.b32.xlu0 %v1178_v38, %s15305_s26 }
 0xd20   :  { %v1181_v39 = vpop.permute.xlu0 %1180 }
 0xd21   :  { %13769 = vmatmul.mubr.msk.f32.vlgmr.msra.gmra.mxu0 %vm245_vm6, %v1181_v39 }
 0xd22   :  { %13777 = vmatpush3.msra.mxu0 %v15416_v53  ;;  %13778 = vmatprep.mubr.msk.f32.mxu0 %vm15300_vm2, %v15299_v7 }
 0xd23   :  { %13792 = vmatprep.subr.mxu0 %v15299_v7 }
 0xd25   :  { %13779 = vmatmul.mubr.msk.f32.vlgmr.msra.gmra.mxu0 %vm245_vm6, %v1181_v39 }
 0xd26   :  { %13800 = vmatprep.mubr.msk.f32.mxu0 %vm15300_vm2, %v15299_v7  ;;  %13793 = vmatpush3.msra.mxu0 %v15554_v33 }
 0xd27   :  { %13794 = vmatprep.subr.mxu0 %v15299_v7 }
 0xd28   :  { %13795 = vmatpush3.msra.mxu0 %v15556_v34 }
 0xd29   :  { %13796 = vmatprep.subr.mxu0 %v15299_v7 }
 0xd2a   :  { %13797 = vmatpush3.msra.mxu0 %v15560_v28 }
 0xd2b   :  { %13798 = vmatprep.subr.mxu0 %v15299_v7 }
 0xde1   :  { %v1250_v40 = vpop.f32.mrf.mxu0 }
 0xde2   :  { %v1251_v41 = vadd.f32 %v15468_v29, %v1250_v40 }
 0xde3   :  { %v13770_v46 = vpop.f32.mrf.mxu0 }
 0xde4   :  { %v1254_v47 = vmax.f32 %v1251_v41, 0.0 }
 0xde5   :  { %v1394_v48 = vpop.f32.mrf.mxu0 }
 0xde6   :  { %v1395_v49 = vadd.f32 %v15435_v62, %v1394_v48  ;;  %13774 = vmatmul.mubr.msk.f32.vlgmr.msra.gmra.mxu1 %vm245_vm6, %v1254_v47 }
 0xde7   :  { %v13780_v50 = vpop.f32.mrf.mxu0  ;;  %13789 = vmatprep.mubr.msk.f32.mxu1 %vm15300_vm2, %v15299_v7  ;;  %13782 = vmatpush3.msra.mxu1 %v15525_v10 }
 0xde8   :  { %1406 = vrot.lane.b32.xlu1 %v1395_v49, %s15303_s24  ;;  %13783 = vmatprep.subr.mxu1 %v15299_v7 }
 0xde9   :  { %13784 = vmatpush3.msra.mxu1 %v15527_v11 }
 0xdea   :  { %13785 = vmatprep.subr.mxu1 %v15299_v7 }
 0xdeb   :  { %13786 = vmatpush3.msra.mxu1 %v15531_v12 }
 0xdec   :  { %13787 = vmatprep.subr.mxu1 %v15299_v7 }
 0xded   :  { %13788 = vmatpush3.msra.mxu1 %v15538_v14 }
 0xdee   :  { %13803 = vmatprep.subr.mxu1 %v15299_v7 }
 0xe5a   :  { %v1407_v4 = vpop.permute.xlu1 %1406 }
 0xea6   :  { %v1324_v56 = vpop.f32.mrf.mxu1 }
 0xea7   :  { %v1325_v57 = vadd.f32 %v15439_v2, %v1324_v56 }
 0xea8   :  { %v13775_v58 = vpop.f32.mrf.mxu1 }
 0xea9   :  { %v1398_v59 = vadd.f32 %v1395_v49, %v1325_v57  ;;  %v15306_v58 = vmov 2  }
 0xeaa   :  { %14765 = vset.pattern.permute.xlu1 %v15306_v58 }
 0xeab   :  { %v13004_v60 = vmul.f32 -1.442695, %v1398_v59  ;;  %v15307_v59 = vmov 1  }
 0xeac   :  { %14764 = vset.pattern.permute.xlu0 %v15307_v59 }
 0xead   :  { %14840 = vpow2.f32 %v13004_v60 }
 0xeba   :  { %v14841_v61 = vpop.eup %14840 }
 0xebb   :  { %v1402_v63 = vadd.f32 1.0, %v14841_v61 }
 0xebd   :  { %14842 = vrcp.f32 %v1402_v63 }
 0xeca   :  { %v14843_v1 = vpop.eup %14842 }
 0xecb   :  { %v1409_v5 = vmul.f32 %v14843_v1, %v1407_v4  ;;  %v1416_v20 = vsub.f32 1.0, %v14843_v1  ;;  %v1422_v22 = vmul.f32 %v14843_v1, %v1178_v38  ;;  %v15308_v1 = vmov 3  }
 0xecc   :  { %v15309_v4 = vmov 0  }
 0xecd   :  { %1411 = vrot.lane.b32.xlu0 %v1409_v5, %s15304_s25 }
 0xed1   :  { %1425 = vrot.lane.b32.xlu0 %v1178_v38, %s15298_s16 }
 0xf3f   :  { %v1412_v6 = vpop.permute.xlu0 %1411 }
 0xf40   :  { %v1414_v9 = vadd.f32 %v1412_v6, %v1325_v57 }
 0xf42   :  { %14844 = vtanh.f32 %v1414_v9 }
 0xf43   :  { %v1426_v25 = vpop.permute.xlu0 %1425 }
 0xf44   :  { %v1434_v30 = vsel %vm1433_vm7, %v1432_v26, %v1426_v25 }
 0xf4f   :  { %v14845_v13 = vpop.eup %14844 }
 0xf50   :  { %1418 = vrot.lane.b32.xlu1 %v14845_v13, %s15305_s26 }
 0xfc2   :  { %v1419_v21 = vpop.permute.xlu1 %1418 }
 0xfc3   :  { %v1421_v23 = vmul.f32 %v1419_v21, %v1416_v20 }
 0xfc5   :  { %v1423_v24 = vadd.f32 %v1422_v22, %v1421_v23 }
 0xfc7   :  { %1429 = vrot.lane.b32.xlu1 %v1423_v24, %s15304_s25 }
0x1039   :  { %v1430_v31 = vpop.permute.xlu1 %1429 }
0x103a   :  { %v1436_v32 = vsel %vm1435_vm8, %v1434_v30, %v1430_v31 }
0x103b   :  { %1437 = vst.msk [vmem:[#allocation4] sm:$0x3] %vm426_vm5, %v1436_v32  ;;  %13790 = vmatmul.mubr.msk.f32.vlgmr.msra.gmra.mxu1 %vm132_vm3, %v1436_v32 }
0x103c   :  { %13804 = vmatpush3.msra.mxu1 %v15350_v8  ;;  %13805 = vmatprep.mubr.msk.f32.mxu1 %vm15300_vm2, %v15299_v7  ;;  %v15564_v8 = vld [vmem:[#allocation5 + $0xe8] sm:$0xff] }
0x103d   :  { %13819 = vmatprep.subr.mxu1 %v15299_v7  ;;  %13799 = vmatpush3.msra.mxu0 %v15564_v8 }
0x103e   :  { %13808 = vmatprep.subr.mxu0 %v15299_v7 }
0x10fb   :  { %v1511_v36 = vpop.f32.mrf.mxu1 }
0x10fc   :  { %v1512_v37 = vadd.f32 %v15570_v35, %v1511_v36 }
0x10fd   :  { %v13791_v38 = vpop.f32.mrf.mxu1 }
0x10fe   :  { %v15573_v39 = vmax.f32 %v1512_v37, 0.0 }
0x1100   :  { %14846 = vtanh.f32 %v15573_v39 }
0x110d   :  { %v14847_v40 = vpop.eup %14846 }
0x110e   :  { %13801 = vmatmul.mubr.msk.f32.vlgmr.msra.gmra.mxu0 %vm132_vm3, %v14847_v40 }
0x110f   :  { %13809 = vmatpush3.msra.mxu0 %v15357_v16  ;;  %13816 = vmatprep.mubr.msk.f32.mxu0 %vm15300_vm2, %v15299_v7  ;;  %v15593_v16 = vstv %s14741_s27 }
0x1110   :  { %13810 = vmatprep.subr.mxu0 %v15299_v7 }
0x1111   :  { %13811 = vmatpush3.msra.mxu0 %v15361_v17 }
0x1112   :  { %13812 = vmatprep.subr.mxu0 %v15299_v7 }
0x1113   :  { %13813 = vmatpush3.msra.mxu0 %v15367_v18 }
0x1114   :  { %13814 = vmatprep.subr.mxu0 %v15299_v7 }
0x1115   :  { %13815 = vmatpush3.msra.mxu0 %v15371_v19 }
0x1116   :  { %13817 = vmatmul.mubr.msk.f32.vlgmr.msra.gmra.mxu0 %vm132_vm3, %v15408_v52  ;;  %13830 = vmatprep.subr.mxu0 %v15299_v7 }
0x1117   :  { %13831 = vmatpush3.msra.mxu0 %v15416_v53  ;;  %13832 = vmatprep.mubr.msk.f32.mxu0 %vm15300_vm2, %v15299_v7 }
0x1118   :  { %13840 = vmatprep.subr.mxu0 %v15299_v7 }
0x11ce   :  { %v1590_v17 = vpop.f32.mrf.mxu0 }
0x11cf   :  { %v1591_v18 = vadd.f32 %v1590_v17, %v15593_v16 }
0x11d0   :  { %v13802_v41 = vpop.f32.mrf.mxu0 }
0x11d1   :  { %v1594_v19 = vmax.f32 %v1591_v18, 0.0 }
0x11d3   :  { %v1596_v52 = vsel %vm1595_vm9, %v1594_v19, -inf }
0x11d4   :  { %1597 = vmax.xlane.f32.xlu0 %v1596_v52 }
0x11d6   :  { %v1785_v46 = vpop.f32.mrf.mxu0 }
0x11d7   :  { %v1786_v22 = vadd.f32 %v15382_v27, %v1785_v46  ;;  %v1644_v27 = vld [vmem:[#allocation2 + $0x2] sm:$0x3] }
0x11d8   :  { %v13818_v47 = vpop.f32.mrf.mxu0 }
0x125d   :  { %v1598_v48 = vpop.xlane.xlu0 %1597 }
0x125e   :  { %v1599_v49 = vsub.f32 %v1594_v19, %v1598_v48 }
0x1260   :  { %v1600_v50 = vmul.f32 1.442695, %v1599_v49 }
0x1262   :  { %14848 = vpow2.f32 %v1600_v50 }
0x126f   :  { %v14849_v56 = vpop.eup %14848 }
0x1270   :  { %v1602_v57 = vsel %vm1595_vm9, %v14849_v56, 0.0 }
0x1271   :  { %1603 = vadd.xlane.f32.xlu1 %v1602_v57 }
0x12fa   :  { %v1604_v60 = vpop.xlane.xlu1 %1603 }
0x12fb   :  { %14850 = vrcp.f32 %v1604_v60 }
0x1308   :  { %v14851_v61 = vpop.eup %14850 }
0x1309   :  { %v1606_v63 = vmul.f32 %v14851_v61, %v14849_v56 }
0x130b   :  { %1625 = vperm.xlu1 %14765, %v1606_v63   ;;  %1615 = vperm.xlu0 %14764, %v1606_v63  }
0x130f   :  { %14766 = vset.pattern.permute.xlu1 %v15308_v1 }
0x1310   :  { %1635 = vperm.xlu1 %14766, %v1606_v63  }
0x1314   :  { %14767 = vset.pattern.permute.xlu1 %v15309_v4 }
0x1315   :  { %1609 = vperm.xlu1 %14767, %v1606_v63  }
0x1319   :  { %14768 = vset.pattern.permute.xlu1 %v15306_v58 }
0x1386   :  { %v1626_v5 = vpop.permute.xlu1 %1625  ;;  %v1616_v6 = vpop.permute.xlu0 %1615 }
0x1387   :  { %v1618_v9 = vmul.f32 %v1616_v6, %v15573_v39  ;;  %v1628_v13 = vmul.f32 %v1626_v5, %v15573_v39 }
0x1389   :  { %1620 = vrot.lane.b32.xlu1 %v1618_v9, %s15305_s26 }
0x138b   :  { %v1636_v20 = vpop.permute.xlu1 %1635 }
0x138c   :  { %v1638_v21 = vmul.f32 %v1636_v20, %v15573_v39 }
0x138d   :  { %1630 = vrot.lane.b32.xlu1 %v1628_v13, %s15303_s24 }
0x1390   :  { %v1610_v23 = vpop.permute.xlu1 %1609 }
0x1391   :  { %1640 = vrot.lane.b32.xlu1 %v1638_v21, %s15310_s28  ;;  %v1612_v25 = vmul.f32 %v1610_v23, %v15573_v39 }
0x1395   :  { %1797 = vrot.lane.b32.xlu1 %v1786_v22, %s15301_s1 }
0x13fb   :  { %v1621_v24 = vpop.permute.xlu1 %1620 }
0x13fc   :  { %v1623_v30 = vadd.f32 %v1621_v24, %v1612_v25 }
0x13ff   :  { %v1631_v26 = vpop.permute.xlu1 %1630 }
0x1400   :  { %v1633_v31 = vadd.f32 %v1631_v26, %v1623_v30 }
0x1403   :  { %v1641_v32 = vpop.permute.xlu1 %1640 }
0x1404   :  { %v1643_v0 = vadd.f32 %v1641_v32, %v1633_v31 }
0x1406   :  { %13806 = vmatmul.mubr.msk.f32.vlgmr.msra.gmra.mxu1 %vm245_vm6, %v1643_v0 }
0x1407   :  { %13820 = vmatpush3.msra.mxu1 %v15387_v42  ;;  %13827 = vmatprep.mubr.msk.f32.mxu1 %vm15300_vm2, %v15299_v7  ;;  %v1798_v18 = vpop.permute.xlu1 %1797 }
0x1408   :  { %13821 = vmatprep.subr.mxu1 %v15299_v7 }
0x1409   :  { %13822 = vmatpush3.msra.mxu1 %v15389_v43 }
0x140a   :  { %13823 = vmatprep.subr.mxu1 %v15299_v7 }
0x140b   :  { %13824 = vmatpush3.msra.mxu1 %v15393_v44 }
0x140c   :  { %13825 = vmatprep.subr.mxu1 %v15299_v7 }
0x140d   :  { %13826 = vmatpush3.msra.mxu1 %v15397_v45 }
0x140e   :  { %13835 = vmatprep.subr.mxu1 %v15299_v7 }
0x14c6   :  { %v1714_v36 = vpop.f32.mrf.mxu1 }
0x14c7   :  { %v1718_v42 = vadd.f32 %v1714_v36, %v1644_v27 }
0x14c8   :  { %v13807_v37 = vpop.f32.mrf.mxu1 }
0x14c9   :  { %v1789_v38 = vadd.f32 %v1786_v22, %v1718_v42 }
0x14cb   :  { %v13010_v39 = vmul.f32 -1.442695, %v1789_v38 }
0x14cd   :  { %14852 = vpow2.f32 %v13010_v39 }
0x14da   :  { %v14853_v40 = vpop.eup %14852 }
0x14db   :  { %v1793_v17 = vadd.f32 1.0, %v14853_v40 }
0x14dd   :  { %14854 = vrcp.f32 %v1793_v17 }
0x14ea   :  { %v14855_v43 = vpop.eup %14854 }
0x14eb   :  { %v1800_v41 = vmul.f32 %v14855_v43, %v1798_v18  ;;  %v1807_v52 = vsub.f32 1.0, %v14855_v43  ;;  %v1813_v47 = vmul.f32 %v14855_v43, %v15404_v51 }
0x14ed   :  { %1802 = vrot.lane.b32.xlu0 %v1800_v41, %s15301_s1 }
0x155f   :  { %v1803_v44 = vpop.permute.xlu0 %1802 }
0x1560   :  { %v1805_v19 = vadd.f32 %v1803_v44, %v1718_v42 }
0x1562   :  { %14856 = vtanh.f32 %v1805_v19 }
0x156f   :  { %v14857_v45 = vpop.eup %14856 }
0x1570   :  { %1809 = vrot.lane.b32.xlu1 %v14857_v45, %s15302_s23 }
0x15e2   :  { %v1810_v46 = vpop.permute.xlu1 %1809 }
0x15e3   :  { %v1812_v48 = vmul.f32 %v1810_v46, %v1807_v52 }
0x15e5   :  { %v15626_v49 = vadd.f32 %v1813_v47, %v1812_v48 }
0x15e7   :  { %1816 = vrot.lane.b32.xlu0 %v15626_v49, %s15302_s23 }
0x1659   :  { %v15630_v50 = vpop.permute.xlu0 %1816 }
0x165a   :  { %1819 = vst.msk [vmem:[#allocation3 + $0x2] sm:$0x3] %vm426_vm5, %v15630_v50  ;;  %13828 = vmatmul.mubr.msk.f32.vlgmr.msra.gmra.mxu1 %vm132_vm3, %v15630_v50 }
0x165b   :  { %13836 = vmatpush3.msra.mxu1 %v15448_v15  ;;  %13837 = vmatprep.mubr.msk.f32.mxu1 %vm15300_vm2, %v15299_v7 }
0x165c   :  { %13845 = vmatprep.subr.mxu1 %v15299_v7 }
0x171a   :  { %v1888_v51 = vpop.f32.mrf.mxu1 }
0x171b   :  { %v1889_v56 = vadd.f32 %v15427_v55, %v1888_v51 }
0x171c   :  { %v13829_v57 = vpop.f32.mrf.mxu1 }
0x171d   :  { %v1892_v60 = vmax.f32 %v1889_v56, 0.0 }
0x171f   :  { %13833 = vmatmul.mubr.msk.f32.vlgmr.msra.gmra.mxu0 %vm245_vm6, %v1892_v60 }
0x1720   :  { %13841 = vmatpush3.msra.mxu0 %v15418_v54  ;;  %13842 = vmatprep.mubr.msk.f32.mxu0 %vm15300_vm2, %v15299_v7 }
0x1721   :  { %13850 = vmatprep.subr.mxu0 %v15299_v7 }
0x17df   :  { %v1962_v61 = vpop.f32.mrf.mxu0 }
0x17e0   :  { %v1963_v63 = vadd.f32 %v15435_v62, %v1962_v61 }
0x17e1   :  { %v13834_v5 = vpop.f32.mrf.mxu0 }
0x17e2   :  { %1974 = vrot.lane.b32.xlu1 %v1963_v63, %s15303_s24  ;;  %v1966_v6 = vadd.f32 %v1963_v63, %v15442_v3 }
0x17e4   :  { %v13013_v55 = vmul.f32 -1.442695, %v1966_v6 }
0x17e6   :  { %14858 = vpow2.f32 %v13013_v55 }
0x17f3   :  { %v14859_v9 = vpop.eup %14858 }
0x17f4   :  { %v1970_v13 = vadd.f32 1.0, %v14859_v9 }
0x17f6   :  { %14860 = vrcp.f32 %v1970_v13 }
0x1803   :  { %v14861_v20 = vpop.eup %14860 }
0x1804   :  { %v1984_v30 = vsub.f32 1.0, %v14861_v20 }
0x1854   :  { %v1975_v21 = vpop.permute.xlu1 %1974 }
0x1855   :  { %v1977_v22 = vmul.f32 %v14861_v20, %v1975_v21 }
0x1857   :  { %1979 = vrot.lane.b32.xlu0 %v1977_v22, %s15304_s25 }
0x185b   :  { %1990 = vrot.lane.b32.xlu0 %v1892_v60, %s15298_s16 }
0x18c9   :  { %v1980_v23 = vpop.permute.xlu0 %1979 }
0x18ca   :  { %v1982_v24 = vadd.f32 %v1980_v23, %v15442_v3 }
0x18cc   :  { %14862 = vtanh.f32 %v1982_v24 }
0x18cd   :  { %v1991_v26 = vpop.permute.xlu0 %1990 }
0x18ce   :  { %v1993_v32 = vmul.f32 %v14861_v20, %v1991_v26 }
0x18d9   :  { %v14863_v25 = vpop.eup %14862 }
0x18da   :  { %1986 = vrot.lane.b32.xlu1 %v14863_v25, %s15305_s26 }
0x194c   :  { %v1987_v31 = vpop.permute.xlu1 %1986 }
0x194d   :  { %v1989_v0 = vmul.f32 %v1987_v31, %v1984_v30 }
0x194f   :  { %v1994_v27 = vadd.f32 %v1993_v32, %v1989_v0 }
0x1951   :  { %1996 = vrot.lane.b32.xlu1 %v1994_v27, %s15305_s26 }
0x19c3   :  { %v15654_v36 = vpop.permute.xlu1 %1996 }
0x19c4   :  { %13838 = vmatmul.mubr.msk.f32.vlgmr.msra.gmra.mxu1 %vm245_vm6, %v15654_v36 }
0x19c5   :  { %13846 = vmatpush3.msra.mxu1 %v15416_v53  ;;  %13847 = vmatprep.mubr.msk.f32.mxu1 %vm15300_vm2, %v15299_v7 }
0x19c6   :  { %13855 = vmatprep.subr.mxu1 %v15299_v7 }
0x19c8   :  { %13848 = vmatmul.mubr.msk.f32.vlgmr.msra.gmra.mxu1 %vm245_vm6, %v15654_v36 }
0x19c9   :  { %13856 = vmatpush3.msra.mxu1 %v15418_v54  ;;  %13857 = vmatprep.mubr.msk.f32.mxu1 %vm15300_vm2, %v15299_v7 }
0x19ca   :  { %13865 = vmatprep.subr.mxu1 %v15299_v7 }
0x1a84   :  { %v2066_v42 = vpop.f32.mrf.mxu1 }
0x1a85   :  { %v2067_v37 = vadd.f32 %v15468_v29, %v2066_v42 }
0x1a86   :  { %v13839_v38 = vpop.f32.mrf.mxu1 }
0x1a87   :  { %v2070_v39 = vmax.f32 %v2067_v37, 0.0 }
0x1a88   :  { %v2210_v40 = vpop.f32.mrf.mxu1 }
0x1a89   :  { %v2211_v17 = vadd.f32 %v15435_v62, %v2210_v40  ;;  %13843 = vmatmul.mubr.msk.f32.vlgmr.msra.gmra.mxu0 %vm245_vm6, %v2070_v39 }
0x1a8a   :  { %v13849_v43 = vpop.f32.mrf.mxu1  ;;  %13851 = vmatpush3.msra.mxu0 %v15448_v15  ;;  %13852 = vmatprep.mubr.msk.f32.mxu0 %vm15300_vm2, %v15299_v7 }
0x1a8b   :  { %2222 = vrot.lane.b32.xlu0 %v2211_v17, %s15303_s24  ;;  %13860 = vmatprep.subr.mxu0 %v15299_v7 }
0x1afd   :  { %v2223_v48 = vpop.permute.xlu0 %2222 }
0x1b49   :  { %v2140_v18 = vpop.f32.mrf.mxu0 }
0x1b4a   :  { %v2141_v41 = vadd.f32 %v15439_v2, %v2140_v18 }
0x1b4b   :  { %v13844_v44 = vpop.f32.mrf.mxu0 }
0x1b4c   :  { %v2214_v19 = vadd.f32 %v2211_v17, %v2141_v41 }
0x1b4e   :  { %v13017_v45 = vmul.f32 -1.442695, %v2214_v19 }
0x1b50   :  { %14864 = vpow2.f32 %v13017_v45 }
0x1b5d   :  { %v14865_v52 = vpop.eup %14864 }
0x1b5e   :  { %v2218_v46 = vadd.f32 1.0, %v14865_v52 }
0x1b60   :  { %14866 = vrcp.f32 %v2218_v46 }
0x1b6d   :  { %v14867_v47 = vpop.eup %14866 }
0x1b6e   :  { %v2225_v51 = vmul.f32 %v14867_v47, %v2223_v48  ;;  %v2232_v61 = vsub.f32 1.0, %v14867_v47  ;;  %v2238_v5 = vmul.f32 %v14867_v47, %v1994_v27 }
0x1b70   :  { %2227 = vrot.lane.b32.xlu1 %v2225_v51, %s15304_s25 }
0x1be2   :  { %v2228_v56 = vpop.permute.xlu1 %2227 }
0x1be3   :  { %v2230_v57 = vadd.f32 %v2228_v56, %v2141_v41 }
0x1be5   :  { %14868 = vtanh.f32 %v2230_v57 }
0x1bf2   :  { %v14869_v60 = vpop.eup %14868 }
0x1bf3   :  { %2234 = vrot.lane.b32.xlu0 %v14869_v60, %s15305_s26 }
0x1c65   :  { %v2235_v63 = vpop.permute.xlu0 %2234 }
0x1c66   :  { %v2237_v6 = vmul.f32 %v2235_v63, %v2232_v61 }
0x1c68   :  { %v15679_v55 = vadd.f32 %v2238_v5, %v2237_v6 }
0x1c6a   :  { %2241 = vrot.lane.b32.xlu1 %v15679_v55, %s15305_s26 }
0x1cdc   :  { %v2242_v9 = vpop.permute.xlu1 %2241 }
0x1cdd   :  { %13853 = vmatmul.mubr.msk.f32.vlgmr.msra.gmra.mxu0 %vm245_vm6, %v2242_v9 }
0x1cde   :  { %13861 = vmatpush3.msra.mxu0 %v15416_v53  ;;  %13862 = vmatprep.mubr.msk.f32.mxu0 %vm15300_vm2, %v15299_v7 }
0x1cdf   :  { %13870 = vmatprep.subr.mxu0 %v15299_v7 }
0x1ce1   :  { %13863 = vmatmul.mubr.msk.f32.vlgmr.msra.gmra.mxu0 %vm245_vm6, %v2242_v9 }
0x1ce2   :  { %13871 = vmatpush3.msra.mxu0 %v15418_v54  ;;  %13872 = vmatprep.mubr.msk.f32.mxu0 %vm15300_vm2, %v15299_v7 }
0x1ce3   :  { %13880 = vmatprep.subr.mxu0 %v15299_v7 }
0x1d9d   :  { %v2311_v13 = vpop.f32.mrf.mxu0 }
0x1d9e   :  { %v2312_v20 = vadd.f32 %v15468_v29, %v2311_v13  ;;  %v2738_v13 = vsel %vm245_vm6, %v15654_v36, %v15679_v55 }
0x1d9f   :  { %v13854_v21 = vpop.f32.mrf.mxu0 }
0x1da0   :  { %v2315_v22 = vmax.f32 %v2312_v20, 0.0 }
0x1da1   :  { %v2455_v23 = vpop.f32.mrf.mxu0 }
0x1da2   :  { %v2456_v24 = vadd.f32 %v15435_v62, %v2455_v23  ;;  %13858 = vmatmul.mubr.msk.f32.vlgmr.msra.gmra.mxu1 %vm245_vm6, %v2315_v22  ;;  %v15748_v23 = vld [vmem:[#allocation5 + $0x30] sm:$0xff] }
0x1da3   :  { %v13864_v25 = vpop.f32.mrf.mxu0  ;;  %13866 = vmatpush3.msra.mxu1 %v15448_v15  ;;  %13867 = vmatprep.mubr.msk.f32.mxu1 %vm15300_vm2, %v15299_v7 }
0x1da4   :  { %2467 = vrot.lane.b32.xlu0 %v2456_v24, %s15303_s24  ;;  %13875 = vmatprep.subr.mxu1 %v15299_v7 }
0x1e16   :  { %v2468_v37 = vpop.permute.xlu0 %2467 }
0x1e62   :  { %v2385_v54 = vpop.f32.mrf.mxu1 }
0x1e63   :  { %v2386_v26 = vadd.f32 %v15439_v2, %v2385_v54 }
0x1e64   :  { %v13859_v30 = vpop.f32.mrf.mxu1 }
0x1e65   :  { %v2459_v31 = vadd.f32 %v2456_v24, %v2386_v26  ;;  %v15765_v30 = vld [vmem:[#allocation5 + $0x48] sm:$0xff] }
0x1e67   :  { %v13021_v32 = vmul.f32 -1.442695, %v2459_v31  ;;  %v15773_v31 = vld [vmem:[#allocation5 + $0x38] sm:$0xff] }
0x1e69   :  { %14870 = vpow2.f32 %v13021_v32  ;;  %v15779_v32 = vld [vmem:[#allocation5 + $0x98] sm:$0xff] }
0x1e76   :  { %v14871_v0 = vpop.eup %14870 }
0x1e77   :  { %v2463_v27 = vadd.f32 1.0, %v14871_v0 }
0x1e79   :  { %14872 = vrcp.f32 %v2463_v27 }
0x1e86   :  { %v14873_v42 = vpop.eup %14872 }
0x1e87   :  { %v2470_v15 = vmul.f32 %v14873_v42, %v2468_v37  ;;  %v2477_v17 = vsub.f32 1.0, %v14873_v42  ;;  %v2483_v18 = vmul.f32 %v14873_v42, %v15679_v55 }
0x1e89   :  { %2472 = vrot.lane.b32.xlu1 %v2470_v15, %s15304_s25 }
0x1efb   :  { %v2473_v38 = vpop.permute.xlu1 %2472 }
0x1efc   :  { %v2475_v39 = vadd.f32 %v2473_v38, %v2386_v26  ;;  %v15759_v26 = vld [vmem:[#allocation5 + $0x50] sm:$0xff] }
0x1efe   :  { %14874 = vtanh.f32 %v2475_v39 }
0x1f0b   :  { %v14875_v40 = vpop.eup %14874 }
0x1f0c   :  { %2479 = vrot.lane.b32.xlu0 %v14875_v40, %s15305_s26 }
0x1f7e   :  { %v2480_v43 = vpop.permute.xlu0 %2479 }
0x1f7f   :  { %v2482_v41 = vmul.f32 %v2480_v43, %v2477_v17 }
0x1f81   :  { %v2484_v44 = vadd.f32 %v2483_v18, %v2482_v41 }
0x1f83   :  { %2486 = vrot.lane.b32.xlu1 %v2484_v44, %s15305_s26 }
0x1ff5   :  { %v2487_v19 = vpop.permute.xlu1 %2486 }
0x1ff6   :  { %13868 = vmatmul.mubr.msk.f32.vlgmr.msra.gmra.mxu1 %vm245_vm6, %v2487_v19 }
0x1ff7   :  { %13876 = vmatpush3.msra.mxu1 %v15416_v53  ;;  %13877 = vmatprep.mubr.msk.f32.mxu1 %vm15300_vm2, %v15299_v7 }
0x1ff8   :  { %13891 = vmatprep.subr.mxu1 %v15299_v7 }
0x1ffa   :  { %13878 = vmatmul.mubr.msk.f32.vlgmr.msra.gmra.mxu1 %vm245_vm6, %v2487_v19 }
0x1ffb   :  { %13892 = vmatpush3.msra.mxu1 %v15554_v33  ;;  %13899 = vmatprep.mubr.msk.f32.mxu1 %vm15300_vm2, %v15299_v7 }
0x1ffc   :  { %13893 = vmatprep.subr.mxu1 %v15299_v7 }
0x1ffd   :  { %13894 = vmatpush3.msra.mxu1 %v15556_v34 }
0x1ffe   :  { %13895 = vmatprep.subr.mxu1 %v15299_v7 }
0x1fff   :  { %13896 = vmatpush3.msra.mxu1 %v15560_v28 }
0x2000   :  { %13897 = vmatprep.subr.mxu1 %v15299_v7 }
0x2001   :  { %13898 = vmatpush3.msra.mxu1 %v15564_v8 }
0x2002   :  { %13907 = vmatprep.subr.mxu1 %v15299_v7 }
0x20b6   :  { %v2556_v53 = vpop.f32.mrf.mxu1 }
0x20b7   :  { %v2557_v33 = vadd.f32 %v15468_v29, %v2556_v53 }
0x20b8   :  { %v13869_v45 = vpop.f32.mrf.mxu1 }
0x20b9   :  { %v2560_v52 = vmax.f32 %v2557_v33, 0.0 }
0x20ba   :  { %v2700_v46 = vpop.f32.mrf.mxu1 }
0x20bb   :  { %v2701_v47 = vadd.f32 %v15435_v62, %v2700_v46  ;;  %13873 = vmatmul.mubr.msk.f32.vlgmr.msra.gmra.mxu0 %vm245_vm6, %v2560_v52 }
0x20bc   :  { %v13879_v34 = vpop.f32.mrf.mxu1  ;;  %13881 = vmatpush3.msra.mxu0 %v15525_v10  ;;  %13888 = vmatprep.mubr.msk.f32.mxu0 %vm15300_vm2, %v15299_v7 }
0x20bd   :  { %2712 = vrot.lane.b32.xlu0 %v2701_v47, %s15303_s24  ;;  %13882 = vmatprep.subr.mxu0 %v15299_v7  ;;  %v15798_v34 = vld [vmem:[#allocation5 + $0x60] ss:$0 sm:$0xff] }
0x20be   :  { %13883 = vmatpush3.msra.mxu0 %v15527_v11 }
0x20bf   :  { %13884 = vmatprep.subr.mxu0 %v15299_v7 }
0x20c0   :  { %13885 = vmatpush3.msra.mxu0 %v15531_v12 }
0x20c1   :  { %13886 = vmatprep.subr.mxu0 %v15299_v7 }
0x20c2   :  { %13887 = vmatpush3.msra.mxu0 %v15538_v14 }
0x20c3   :  { %13902 = vmatprep.subr.mxu0 %v15299_v7 }
0x212f   :  { %v2713_v56 = vpop.permute.xlu0 %2712 }
0x217b   :  { %v2630_v62 = vpop.f32.mrf.mxu0 }
0x217c   :  { %v2631_v29 = vadd.f32 %v15439_v2, %v2630_v62 }
0x217d   :  { %v13874_v10 = vpop.f32.mrf.mxu0 }
0x217e   :  { %v2704_v28 = vadd.f32 %v2701_v47, %v2631_v29 }
0x2180   :  { %v13025_v8 = vmul.f32 -1.442695, %v2704_v28 }
0x2182   :  { %14876 = vpow2.f32 %v13025_v8 }
0x218f   :  { %v14877_v48 = vpop.eup %14876 }
0x2190   :  { %v2708_v51 = vadd.f32 1.0, %v14877_v48 }
0x2192   :  { %14878 = vrcp.f32 %v2708_v51 }
0x219f   :  { %v14879_v11 = vpop.eup %14878 }
0x21a0   :  { %v2715_v57 = vmul.f32 %v14879_v11, %v2713_v56  ;;  %v2722_v2 = vsub.f32 1.0, %v14879_v11  ;;  %v2728_v63 = vmul.f32 %v14879_v11, %v2484_v44 }
0x21a2   :  { %2717 = vrot.lane.b32.xlu1 %v2715_v57, %s15304_s25  ;;  %v15804_v57 = vld [vmem:[#allocation5 + $0x80] sm:$0xff] }
0x21a6   :  { %2731 = vrot.lane.b32.xlu1 %v2484_v44, %s15298_s16 }
0x2214   :  { %v2718_v12 = vpop.permute.xlu1 %2717 }
0x2215   :  { %v2720_v14 = vadd.f32 %v2718_v12, %v2631_v29  ;;  %v15810_v12 = vld [vmem:[#allocation5 + $0x78] sm:$0xff] }
0x2217   :  { %14880 = vtanh.f32 %v2720_v14  ;;  %v15814_v14 = vld [vmem:[#allocation5 + $0x70] sm:$0xff] }
0x2218   :  { %v2732_v9 = vpop.permute.xlu1 %2731 }
0x2219   :  { %v2739_v20 = vsel %vm1433_vm7, %v2738_v13, %v2732_v9 }
0x2224   :  { %v14881_v60 = vpop.eup %14880 }
0x2225   :  { %2724 = vrot.lane.b32.xlu0 %v14881_v60, %s15305_s26  ;;  %v15818_v60 = vld [vmem:[#allocation5 + $0x68] sm:$0xff] }
0x2297   :  { %v2725_v61 = vpop.permute.xlu0 %2724 }
0x2298   :  { %v2727_v5 = vmul.f32 %v2725_v61, %v2722_v2  ;;  %v2939_v2 = vld [vmem:[#allocation2 + $0x4] sm:$0x3] }
0x229a   :  { %v2729_v6 = vadd.f32 %v2728_v63, %v2727_v5 }
0x229c   :  { %2735 = vrot.lane.b32.xlu0 %v2729_v6, %s15304_s25 }
0x230e   :  { %v2736_v21 = vpop.permute.xlu0 %2735 }
0x230f   :  { %v2740_v22 = vsel %vm1435_vm8, %v2739_v20, %v2736_v21 }
0x2310   :  { %2741 = vst.msk [vmem:[#allocation4 + $0x2] sm:$0x3] %vm426_vm5, %v2740_v22  ;;  %13889 = vmatmul.mubr.msk.f32.vlgmr.msra.gmra.mxu0 %vm132_vm3, %v2740_v22 }
0x2311   :  { %13903 = vmatpush3.msra.mxu0 %v15748_v23  ;;  %13904 = vmatprep.mubr.msk.f32.mxu0 %vm15300_vm2, %v15299_v7 }
0x2312   :  { %13918 = vmatprep.subr.mxu0 %v15299_v7 }
0x23d0   :  { %v2811_v24 = vpop.f32.mrf.mxu0 }
0x23d1   :  { %v2812_v36 = vadd.f32 %v15570_v35, %v2811_v24  ;;  %v15769_v35 = vld [vmem:[#allocation5 + $0x40] sm:$0xff] }
0x23d2   :  { %v13890_v55 = vpop.f32.mrf.mxu0 }
0x23d3   :  { %v15755_v25 = vmax.f32 %v2812_v36, 0.0 }
0x23d5   :  { %14882 = vtanh.f32 %v15755_v25 }
0x23e2   :  { %v14883_v54 = vpop.eup %14882 }
0x23e3   :  { %13900 = vmatmul.mubr.msk.f32.vlgmr.msra.gmra.mxu1 %vm132_vm3, %v14883_v54 }
0x23e4   :  { %13908 = vmatpush3.msra.mxu1 %v15759_v26  ;;  %13915 = vmatprep.mubr.msk.f32.mxu1 %vm15300_vm2, %v15299_v7 }
0x23e5   :  { %13909 = vmatprep.subr.mxu1 %v15299_v7 }
0x23e6   :  { %13910 = vmatpush3.msra.mxu1 %v15765_v30 }
0x23e7   :  { %13911 = vmatprep.subr.mxu1 %v15299_v7 }
0x23e8   :  { %13912 = vmatpush3.msra.mxu1 %v15769_v35 }
0x23e9   :  { %13913 = vmatprep.subr.mxu1 %v15299_v7 }
0x23ea   :  { %13914 = vmatpush3.msra.mxu1 %v15773_v31 }
0x23eb   :  { %13916 = vmatmul.mubr.msk.f32.vlgmr.msra.gmra.mxu1 %vm132_vm3, %v15630_v50  ;;  %13929 = vmatprep.subr.mxu1 %v15299_v7 }
0x23ec   :  { %13930 = vmatpush3.msra.mxu1 %v15779_v32  ;;  %13931 = vmatprep.mubr.msk.f32.mxu1 %vm15300_vm2, %v15299_v7 }
0x23ed   :  { %13939 = vmatprep.subr.mxu1 %v15299_v7 }
0x24a3   :  { %v2886_v0 = vpop.f32.mrf.mxu1 }
0x24a4   :  { %v2887_v27 = vadd.f32 %v2886_v0, %v15593_v16 }
0x24a5   :  { %v13901_v42 = vpop.f32.mrf.mxu1 }
0x24a6   :  { %v2890_v37 = vmax.f32 %v2887_v27, 0.0 }
0x24a8   :  { %v2891_v15 = vsel %vm1595_vm9, %v2890_v37, -inf }
0x24a9   :  { %2892 = vmax.xlane.f32.xlu1 %v2891_v15 }
0x24ab   :  { %v3080_v50 = vpop.f32.mrf.mxu1 }
0x24ac   :  { %v3081_v62 = vadd.f32 %v15798_v34, %v3080_v50  ;;  %v15835_v50 = vld [vmem:[#allocation5 + $0xb0] sm:$0xff] }
0x24ad   :  { %v13917_v38 = vpop.f32.mrf.mxu1 }
0x24ae   :  { %v15841_v38 = vld [vmem:[#allocation5 + $0x88] ss:$0 sm:$0xff] }
0x2532   :  { %v2893_v39 = vpop.xlane.xlu1 %2892 }
0x2533   :  { %v2894_v40 = vsub.f32 %v2890_v37, %v2893_v39 }
0x2535   :  { %v2895_v17 = vmul.f32 1.442695, %v2894_v40 }
0x2537   :  { %14884 = vpow2.f32 %v2895_v17 }
0x2544   :  { %v14885_v43 = vpop.eup %14884 }
0x2545   :  { %v2897_v18 = vsel %vm1595_vm9, %v14885_v43, 0.0 }
0x2546   :  { %2898 = vadd.xlane.f32.xlu0 %v2897_v18 }
0x25cf   :  { %v2899_v41 = vpop.xlane.xlu0 %2898 }
0x25d0   :  { %14886 = vrcp.f32 %v2899_v41  ;;  %v15851_v41 = vld [vmem:[#allocation5 + $0xa8] ss:$0 sm:$0xff] }
0x25dd   :  { %v14887_v44 = vpop.eup %14886 }
0x25de   :  { %v2901_v19 = vmul.f32 %v14887_v44, %v14885_v43  ;;  %v15845_v43 = vld [vmem:[#allocation5 + $0x90] sm:$0xff] }
0x25e0   :  { %2920 = vperm.xlu1 %14768, %v2901_v19   ;;  %2910 = vperm.xlu0 %14764, %v2901_v19  }
0x25e4   :  { %14769 = vset.pattern.permute.xlu1 %v15308_v1  ;;  %14770 = vset.pattern.permute.xlu0 %v15309_v4 }
0x25e5   :  { %2930 = vperm.xlu1 %14769, %v2901_v19   ;;  %2904 = vperm.xlu0 %14770, %v2901_v19  }
0x25e9   :  { %14772 = vset.pattern.permute.xlu1 %v15306_v58  ;;  %14771 = vset.pattern.permute.xlu0 %v15307_v59 }
0x265b   :  { %v2921_v53 = vpop.permute.xlu1 %2920  ;;  %v2911_v33 = vpop.permute.xlu0 %2910 }
0x265c   :  { %v2913_v45 = vmul.f32 %v2911_v33, %v15755_v25  ;;  %v2923_v52 = vmul.f32 %v2921_v53, %v15755_v25 }
0x265e   :  { %2915 = vrot.lane.b32.xlu1 %v2913_v45, %s15305_s26 }
0x2660   :  { %v2931_v46 = vpop.permute.xlu1 %2930  ;;  %v2905_v29 = vpop.permute.xlu0 %2904 }
0x2661   :  { %v2933_v47 = vmul.f32 %v2931_v46, %v15755_v25  ;;  %v2907_v28 = vmul.f32 %v2905_v29, %v15755_v25 }
0x2662   :  { %2925 = vrot.lane.b32.xlu1 %v2923_v52, %s15303_s24 }
0x2663   :  { %2935 = vrot.lane.b32.xlu0 %v2933_v47, %s15310_s28 }
0x2666   :  { %3092 = vrot.lane.b32.xlu1 %v3081_v62, %s15301_s1 }
0x26d0   :  { %v2916_v10 = vpop.permute.xlu1 %2915 }
0x26d1   :  { %v2918_v8 = vadd.f32 %v2916_v10, %v2907_v28 }
0x26d4   :  { %v2926_v48 = vpop.permute.xlu1 %2925 }
0x26d5   :  { %v2928_v51 = vadd.f32 %v2926_v48, %v2918_v8  ;;  %v2936_v11 = vpop.permute.xlu0 %2935 }
0x26d7   :  { %v2938_v56 = vadd.f32 %v2936_v11, %v2928_v51 }
0x26d8   :  { %v3093_v22 = vpop.permute.xlu1 %3092 }
0x26d9   :  { %13905 = vmatmul.mubr.msk.f32.vlgmr.msra.gmra.mxu0 %vm245_vm6, %v2938_v56 }
0x26da   :  { %13919 = vmatpush3.msra.mxu0 %v15804_v57  ;;  %13926 = vmatprep.mubr.msk.f32.mxu0 %vm15300_vm2, %v15299_v7 }
0x26db   :  { %13920 = vmatprep.subr.mxu0 %v15299_v7 }
0x26dc   :  { %13921 = vmatpush3.msra.mxu0 %v15810_v12 }
0x26dd   :  { %13922 = vmatprep.subr.mxu0 %v15299_v7 }
0x26de   :  { %13923 = vmatpush3.msra.mxu0 %v15814_v14 }
0x26df   :  { %13924 = vmatprep.subr.mxu0 %v15299_v7 }
0x26e0   :  { %13925 = vmatpush3.msra.mxu0 %v15818_v60 }
0x26e1   :  { %13934 = vmatprep.subr.mxu0 %v15299_v7 }
0x2799   :  { %v3009_v61 = vpop.f32.mrf.mxu0 }
0x279a   :  { %v3013_v63 = vadd.f32 %v3009_v61, %v2939_v2 }
0x279b   :  { %v13906_v5 = vpop.f32.mrf.mxu0 }
0x279c   :  { %v3084_v6 = vadd.f32 %v3081_v62, %v3013_v63  ;;  %v15875_v5 = vld [vmem:[#allocation5 + $0xb8] ss:$0 sm:$0xff] }
0x279e   :  { %v13030_v9 = vmul.f32 -1.442695, %v3084_v6 }
0x27a0   :  { %14888 = vpow2.f32 %v13030_v9 }
0x27ad   :  { %v14889_v13 = vpop.eup %14888 }
0x27ae   :  { %v3088_v20 = vadd.f32 1.0, %v14889_v13 }
0x27b0   :  { %14890 = vrcp.f32 %v3088_v20 }
0x27bd   :  { %v14891_v21 = vpop.eup %14890 }
0x27be   :  { %v3095_v24 = vmul.f32 %v14891_v21, %v3093_v22  ;;  %v3102_v54 = vsub.f32 1.0, %v14891_v21  ;;  %v3108_v27 = vmul.f32 %v14891_v21, %v15626_v49 }
0x27c0   :  { %3097 = vrot.lane.b32.xlu0 %v3095_v24, %s15301_s1 }
0x2832   :  { %v3098_v36 = vpop.permute.xlu0 %3097 }
0x2833   :  { %v3100_v55 = vadd.f32 %v3098_v36, %v3013_v63  ;;  %v15885_v36 = vld [vmem:[#allocation5 + $0xa0] ss:$0 sm:$0xff] }
0x2835   :  { %14892 = vtanh.f32 %v3100_v55 }
0x2842   :  { %v14893_v25 = vpop.eup %14892 }
0x2843   :  { %3104 = vrot.lane.b32.xlu1 %v14893_v25, %s15302_s23 }
0x28b5   :  { %v3105_v0 = vpop.permute.xlu1 %3104 }
0x28b6   :  { %v3107_v42 = vmul.f32 %v3105_v0, %v3102_v54 }
0x28b8   :  { %v15825_v37 = vadd.f32 %v3108_v27, %v3107_v42 }
0x28ba   :  { %3111 = vrot.lane.b32.xlu0 %v15825_v37, %s15302_s23 }
0x292c   :  { %v15829_v15 = vpop.permute.xlu0 %3111 }
0x292d   :  { %3114 = vst.msk [vmem:[#allocation3 + $0x4] sm:$0x3] %vm426_vm5, %v15829_v15  ;;  %13927 = vmatmul.mubr.msk.f32.vlgmr.msra.gmra.mxu0 %vm132_vm3, %v15829_v15 }
0x292e   :  { %13935 = vmatpush3.msra.mxu0 %v15835_v50  ;;  %13936 = vmatprep.mubr.msk.f32.mxu0 %vm15300_vm2, %v15299_v7 }
0x292f   :  { %13944 = vmatprep.subr.mxu0 %v15299_v7 }
0x29ed   :  { %v3183_v49 = vpop.f32.mrf.mxu0 }
0x29ee   :  { %v3184_v39 = vadd.f32 %v15841_v38, %v3183_v49 }
0x29ef   :  { %v13928_v40 = vpop.f32.mrf.mxu0 }
0x29f0   :  { %v3187_v17 = vmax.f32 %v3184_v39, 0.0 }
0x29f2   :  { %13932 = vmatmul.mubr.msk.f32.vlgmr.msra.gmra.mxu1 %vm245_vm6, %v3187_v17 }
0x29f3   :  { %13940 = vmatpush3.msra.mxu1 %v15845_v43  ;;  %13941 = vmatprep.mubr.msk.f32.mxu1 %vm15300_vm2, %v15299_v7 }
0x29f4   :  { %13949 = vmatprep.subr.mxu1 %v15299_v7 }
0x2ab2   :  { %v3257_v18 = vpop.f32.mrf.mxu1 }
0x2ab3   :  { %v3258_v44 = vadd.f32 %v15851_v41, %v3257_v18 }
0x2ab4   :  { %v13933_v19 = vpop.f32.mrf.mxu1 }
0x2ab5   :  { %3269 = vrot.lane.b32.xlu1 %v3258_v44, %s15303_s24  ;;  %v3261_v53 = vadd.f32 %v3258_v44, %v15442_v3 }
0x2ab7   :  { %v13033_v33 = vmul.f32 -1.442695, %v3261_v53 }
0x2ab9   :  { %14894 = vpow2.f32 %v13033_v33 }
0x2ac6   :  { %v14895_v45 = vpop.eup %14894 }
0x2ac7   :  { %v3265_v52 = vadd.f32 1.0, %v14895_v45 }
0x2ac9   :  { %14896 = vrcp.f32 %v3265_v52 }
0x2ad6   :  { %v14897_v46 = vpop.eup %14896 }
0x2ad7   :  { %v3279_v48 = vsub.f32 1.0, %v14897_v46 }
0x2b27   :  { %v3270_v47 = vpop.permute.xlu1 %3269 }
0x2b28   :  { %v3272_v62 = vmul.f32 %v14897_v46, %v3270_v47 }
0x2b2a   :  { %3274 = vrot.lane.b32.xlu0 %v3272_v62, %s15304_s25 }
0x2b2e   :  { %3285 = vrot.lane.b32.xlu0 %v3187_v17, %s15298_s16 }
0x2b9c   :  { %v3275_v29 = vpop.permute.xlu0 %3274 }
0x2b9d   :  { %v3277_v10 = vadd.f32 %v3275_v29, %v15442_v3 }
0x2b9f   :  { %14898 = vtanh.f32 %v3277_v10 }
0x2ba0   :  { %v3286_v8 = vpop.permute.xlu0 %3285 }
0x2ba1   :  { %v3288_v11 = vmul.f32 %v14897_v46, %v3286_v8 }
0x2bac   :  { %v14899_v28 = vpop.eup %14898 }
0x2bad   :  { %3281 = vrot.lane.b32.xlu1 %v14899_v28, %s15305_s26 }
0x2c1f   :  { %v3282_v51 = vpop.permute.xlu1 %3281 }
0x2c20   :  { %v3284_v56 = vmul.f32 %v3282_v51, %v3279_v48 }
0x2c22   :  { %v3289_v2 = vadd.f32 %v3288_v11, %v3284_v56 }
0x2c24   :  { %3291 = vrot.lane.b32.xlu1 %v3289_v2, %s15305_s26 }
0x2c96   :  { %v15861_v61 = vpop.permute.xlu1 %3291 }
0x2c97   :  { %13937 = vmatmul.mubr.msk.f32.vlgmr.msra.gmra.mxu0 %vm245_vm6, %v15861_v61 }
0x2c98   :  { %13945 = vmatpush3.msra.mxu0 %v15779_v32  ;;  %13946 = vmatprep.mubr.msk.f32.mxu0 %vm15300_vm2, %v15299_v7 }
0x2c99   :  { %13954 = vmatprep.subr.mxu0 %v15299_v7 }
0x2c9b   :  { %13947 = vmatmul.mubr.msk.f32.vlgmr.msra.gmra.mxu0 %vm245_vm6, %v15861_v61 }
0x2c9c   :  { %13955 = vmatpush3.msra.mxu0 %v15845_v43  ;;  %13956 = vmatprep.mubr.msk.f32.mxu0 %vm15300_vm2, %v15299_v7 }
0x2c9d   :  { %13964 = vmatprep.subr.mxu0 %v15299_v7 }
0x2d57   :  { %v3361_v63 = vpop.f32.mrf.mxu0 }
0x2d58   :  { %v3362_v6 = vadd.f32 %v15875_v5, %v3361_v63 }
0x2d59   :  { %v13938_v9 = vpop.f32.mrf.mxu0 }
0x2d5a   :  { %v3365_v13 = vmax.f32 %v3362_v6, 0.0 }
0x2d5b   :  { %v3505_v20 = vpop.f32.mrf.mxu0 }
0x2d5c   :  { %v3506_v21 = vadd.f32 %v15851_v41, %v3505_v20  ;;  %13942 = vmatmul.mubr.msk.f32.vlgmr.msra.gmra.mxu1 %vm245_vm6, %v3365_v13 }
0x2d5d   :  { %v13948_v22 = vpop.f32.mrf.mxu0  ;;  %13950 = vmatpush3.msra.mxu1 %v15835_v50  ;;  %13951 = vmatprep.mubr.msk.f32.mxu1 %vm15300_vm2, %v15299_v7 }
0x2d5e   :  { %3517 = vrot.lane.b32.xlu0 %v3506_v21, %s15303_s24  ;;  %13959 = vmatprep.subr.mxu1 %v15299_v7 }
0x2dd0   :  { %v3518_v39 = vpop.permute.xlu0 %3517 }
0x2e1c   :  { %v3435_v24 = vpop.f32.mrf.mxu1 }
0x2e1d   :  { %v3436_v55 = vadd.f32 %v15885_v36, %v3435_v24 }
0x2e1e   :  { %v13943_v25 = vpop.f32.mrf.mxu1 }
0x2e1f   :  { %v3509_v54 = vadd.f32 %v3506_v21, %v3436_v55 }
0x2e21   :  { %v13037_v0 = vmul.f32 -1.442695, %v3509_v54 }
0x2e23   :  { %14900 = vpow2.f32 %v13037_v0 }
0x2e30   :  { %v14901_v27 = vpop.eup %14900 }
0x2e31   :  { %v3513_v42 = vadd.f32 1.0, %v14901_v27 }
0x2e33   :  { %14902 = vrcp.f32 %v3513_v42 }
0x2e40   :  { %v14903_v49 = vpop.eup %14902 }
0x2e41   :  { %v3520_v40 = vmul.f32 %v14903_v49, %v3518_v39  ;;  %v3527_v19 = vsub.f32 1.0, %v14903_v49  ;;  %v3533_v33 = vmul.f32 %v14903_v49, %v3289_v2  ;;  %v15926_v39 = vld [vmem:[#allocation5 + $0x100] sm:$0xff] }
0x2e43   :  { %3522 = vrot.lane.b32.xlu1 %v3520_v40, %s15304_s25  ;;  %v15932_v40 = vld [vmem:[#allocation5 + $0xf8] sm:$0xff] }
0x2eb5   :  { %v3523_v17 = vpop.permute.xlu1 %3522 }
0x2eb6   :  { %v3525_v18 = vadd.f32 %v3523_v17, %v3436_v55  ;;  %v15936_v17 = vld [vmem:[#allocation5 + $0xf0] sm:$0xff] }
0x2eb8   :  { %14904 = vtanh.f32 %v3525_v18  ;;  %v15940_v18 = vld [vmem:[#allocation5 + $0xe8] sm:$0xff] }
0x2ec5   :  { %v14905_v44 = vpop.eup %14904 }
0x2ec6   :  { %3529 = vrot.lane.b32.xlu0 %v14905_v44, %s15305_s26 }
0x2f38   :  { %v3530_v53 = vpop.permute.xlu0 %3529 }
0x2f39   :  { %v3532_v45 = vmul.f32 %v3530_v53, %v3527_v19 }
0x2f3b   :  { %v15890_v52 = vadd.f32 %v3533_v33, %v3532_v45 }
0x2f3d   :  { %3536 = vrot.lane.b32.xlu1 %v15890_v52, %s15305_s26 }
0x2faf   :  { %v3537_v46 = vpop.permute.xlu1 %3536 }
0x2fb0   :  { %13952 = vmatmul.mubr.msk.f32.vlgmr.msra.gmra.mxu1 %vm245_vm6, %v3537_v46 }
0x2fb1   :  { %13960 = vmatpush3.msra.mxu1 %v15779_v32  ;;  %13961 = vmatprep.mubr.msk.f32.mxu1 %vm15300_vm2, %v15299_v7 }
0x2fb2   :  { %13969 = vmatprep.subr.mxu1 %v15299_v7 }
0x2fb4   :  { %13962 = vmatmul.mubr.msk.f32.vlgmr.msra.gmra.mxu1 %vm245_vm6, %v3537_v46 }
0x2fb5   :  { %13970 = vmatpush3.msra.mxu1 %v15845_v43  ;;  %13971 = vmatprep.mubr.msk.f32.mxu1 %vm15300_vm2, %v15299_v7 }
0x2fb6   :  { %13979 = vmatprep.subr.mxu1 %v15299_v7 }
0x3070   :  { %v3606_v47 = vpop.f32.mrf.mxu1 }
0x3071   :  { %v3607_v62 = vadd.f32 %v15875_v5, %v3606_v47 }
0x3072   :  { %v13953_v29 = vpop.f32.mrf.mxu1 }
0x3073   :  { %v3610_v10 = vmax.f32 %v3607_v62, 0.0  ;;  %v15947_v62 = vld [vmem:[#allocation5 + $0xd8] sm:$0xff]  ;;  %v15954_v29 = vld [vmem:[#allocation5 + $0xd0] sm:$0xff] }
0x3074   :  { %v3750_v28 = vpop.f32.mrf.mxu1 }
0x3075   :  { %v3751_v8 = vadd.f32 %v15851_v41, %v3750_v28  ;;  %13957 = vmatmul.mubr.msk.f32.vlgmr.msra.gmra.mxu0 %vm245_vm6, %v3610_v10  ;;  %v15958_v10 = vld [vmem:[#allocation5 + $0xc8] sm:$0xff]  ;;  %v15962_v28 = vld [vmem:[#allocation5 + $0xc0] sm:$0xff] }
0x3076   :  { %v13963_v48 = vpop.f32.mrf.mxu1  ;;  %13965 = vmatpush3.msra.mxu0 %v15835_v50  ;;  %13966 = vmatprep.mubr.msk.f32.mxu0 %vm15300_vm2, %v15299_v7 }
0x3077   :  { %3762 = vrot.lane.b32.xlu0 %v3751_v8, %s15303_s24  ;;  %13974 = vmatprep.subr.mxu0 %v15299_v7 }
0x30e9   :  { %v3763_v20 = vpop.permute.xlu0 %3762 }
0x3135   :  { %v3680_v51 = vpop.f32.mrf.mxu0 }
0x3136   :  { %v3681_v11 = vadd.f32 %v15885_v36, %v3680_v51 }
0x3137   :  { %v13958_v56 = vpop.f32.mrf.mxu0 }
0x3138   :  { %v3754_v2 = vadd.f32 %v3751_v8, %v3681_v11 }
0x313a   :  { %v13041_v63 = vmul.f32 -1.442695, %v3754_v2 }
0x313c   :  { %14906 = vpow2.f32 %v13041_v63 }
0x3149   :  { %v14907_v6 = vpop.eup %14906 }
0x314a   :  { %v3758_v9 = vadd.f32 1.0, %v14907_v6 }
0x314c   :  { %14908 = vrcp.f32 %v3758_v9 }
0x3159   :  { %v14909_v13 = vpop.eup %14908 }
0x315a   :  { %v3765_v21 = vmul.f32 %v14909_v13, %v3763_v20  ;;  %v3772_v25 = vsub.f32 1.0, %v14909_v13  ;;  %v3778_v0 = vmul.f32 %v14909_v13, %v15890_v52 }
0x315c   :  { %3767 = vrot.lane.b32.xlu1 %v3765_v21, %s15304_s25 }
0x31ce   :  { %v3768_v22 = vpop.permute.xlu1 %3767 }
0x31cf   :  { %v3770_v24 = vadd.f32 %v3768_v22, %v3681_v11 }
0x31d1   :  { %14910 = vtanh.f32 %v3770_v24 }
0x31de   :  { %v14911_v55 = vpop.eup %14910 }
0x31df   :  { %3774 = vrot.lane.b32.xlu0 %v14911_v55, %s15305_s26 }
0x3251   :  { %v3775_v54 = vpop.permute.xlu0 %3774 }
0x3252   :  { %v3777_v27 = vmul.f32 %v3775_v54, %v3772_v25 }
0x3254   :  { %v15916_v42 = vadd.f32 %v3778_v0, %v3777_v27 }
0x3256   :  { %3781 = vrot.lane.b32.xlu1 %v15916_v42, %s15305_s26 }
0x32c8   :  { %v3782_v49 = vpop.permute.xlu1 %3781 }
0x32c9   :  { %13967 = vmatmul.mubr.msk.f32.vlgmr.msra.gmra.mxu0 %vm245_vm6, %v3782_v49 }
0x32ca   :  { %13975 = vmatpush3.msra.mxu0 %v15779_v32  ;;  %13976 = vmatprep.mubr.msk.f32.mxu0 %vm15300_vm2, %v15299_v7 }
0x32cb   :  { %13990 = vmatprep.subr.mxu0 %v15299_v7 }
0x32cd   :  { %13977 = vmatmul.mubr.msk.f32.vlgmr.msra.gmra.mxu0 %vm245_vm6, %v3782_v49  ;;  %v4033_v49 = vsel %vm245_vm6, %v15861_v61, %v15890_v52 }
0x32ce   :  { %13991 = vmatpush3.msra.mxu0 %v15926_v39  ;;  %13998 = vmatprep.mubr.msk.f32.mxu0 %vm15300_vm2, %v15299_v7 }
0x32cf   :  { %13992 = vmatprep.subr.mxu0 %v15299_v7 }
0x32d0   :  { %13993 = vmatpush3.msra.mxu0 %v15932_v40 }
0x32d1   :  { %13994 = vmatprep.subr.mxu0 %v15299_v7 }
0x32d2   :  { %13995 = vmatpush3.msra.mxu0 %v15936_v17 }
0x32d3   :  { %13996 = vmatprep.subr.mxu0 %v15299_v7 }
0x32d4   :  { %13997 = vmatpush3.msra.mxu0 %v15940_v18 }
0x32d5   :  { %14006 = vmatprep.subr.mxu0 %v15299_v7 }
0x3389   :  { %v3851_v44 = vpop.f32.mrf.mxu0 }
0x338a   :  { %v3852_v19 = vadd.f32 %v15875_v5, %v3851_v44 }
0x338b   :  { %v13968_v53 = vpop.f32.mrf.mxu0 }
0x338c   :  { %v3855_v33 = vmax.f32 %v3852_v19, 0.0 }
0x338d   :  { %v3995_v45 = vpop.f32.mrf.mxu0 }
0x338e   :  { %v3996_v46 = vadd.f32 %v15851_v41, %v3995_v45  ;;  %13972 = vmatmul.mubr.msk.f32.vlgmr.msra.gmra.mxu1 %vm245_vm6, %v3855_v33  ;;  %v15984_v33 = vld [vmem:[#allocation5 + $0xe0] ss:$0 sm:$0xff] }
0x338f   :  { %v13978_v47 = vpop.f32.mrf.mxu0  ;;  %13980 = vmatpush3.msra.mxu1 %v15947_v62  ;;  %13987 = vmatprep.mubr.msk.f32.mxu1 %vm15300_vm2, %v15299_v7 }
0x3390   :  { %4007 = vrot.lane.b32.xlu0 %v3996_v46, %s15303_s24  ;;  %13981 = vmatprep.subr.mxu1 %v15299_v7 }
0x3391   :  { %13982 = vmatpush3.msra.mxu1 %v15954_v29 }
0x3392   :  { %13983 = vmatprep.subr.mxu1 %v15299_v7 }
0x3393   :  { %13984 = vmatpush3.msra.mxu1 %v15958_v10 }
0x3394   :  { %13985 = vmatprep.subr.mxu1 %v15299_v7 }
0x3395   :  { %13986 = vmatpush3.msra.mxu1 %v15962_v28 }
0x3396   :  { %14001 = vmatprep.subr.mxu1 %v15299_v7 }
0x3402   :  { %v4008_v9 = vpop.permute.xlu0 %4007 }
0x344e   :  { %v3925_v8 = vpop.f32.mrf.mxu1 }
0x344f   :  { %v3926_v48 = vadd.f32 %v15885_v36, %v3925_v8 }
0x3450   :  { %v13973_v51 = vpop.f32.mrf.mxu1 }
0x3451   :  { %v3999_v11 = vadd.f32 %v3996_v46, %v3926_v48 }
0x3453   :  { %v13045_v56 = vmul.f32 -1.442695, %v3999_v11 }
0x3455   :  { %14912 = vpow2.f32 %v13045_v56 }
0x3462   :  { %v14913_v2 = vpop.eup %14912 }
0x3463   :  { %v4003_v63 = vadd.f32 1.0, %v14913_v2 }
0x3465   :  { %14914 = vrcp.f32 %v4003_v63 }
0x3472   :  { %v14915_v6 = vpop.eup %14914 }
0x3473   :  { %v4010_v13 = vmul.f32 %v14915_v6, %v4008_v9  ;;  %v4017_v24 = vsub.f32 1.0, %v14915_v6  ;;  %v4023_v25 = vmul.f32 %v14915_v6, %v15916_v42 }
0x3475   :  { %4012 = vrot.lane.b32.xlu1 %v4010_v13, %s15304_s25 }
0x3479   :  { %4026 = vrot.lane.b32.xlu1 %v15916_v42, %s15298_s16 }
0x34e7   :  { %v4013_v20 = vpop.permute.xlu1 %4012 }
0x34e8   :  { %v4015_v21 = vadd.f32 %v4013_v20, %v3926_v48 }
0x34ea   :  { %14916 = vtanh.f32 %v4015_v21 }
0x34eb   :  { %v4027_v27 = vpop.permute.xlu1 %4026 }
0x34ec   :  { %v4034_v44 = vsel %vm1433_vm7, %v4033_v49, %v4027_v27 }
0x34f7   :  { %v14917_v22 = vpop.eup %14916 }
0x34f8   :  { %4019 = vrot.lane.b32.xlu0 %v14917_v22, %s15305_s26 }
0x356a   :  { %v4020_v55 = vpop.permute.xlu0 %4019 }
0x356b   :  { %v4022_v54 = vmul.f32 %v4020_v55, %v4017_v24 }
0x356d   :  { %v4024_v0 = vadd.f32 %v4023_v25, %v4022_v54 }
0x356f   :  { %4030 = vrot.lane.b32.xlu0 %v4024_v0, %s15304_s25 }
0x35e1   :  { %v4031_v19 = vpop.permute.xlu0 %4030 }
0x35e2   :  { %v4035_v53 = vsel %vm1435_vm8, %v4034_v44, %v4031_v19 }
0x35e3   :  { %4036 = vst.msk [vmem:[#allocation4 + $0x4] sm:$0x3] %vm426_vm5, %v4035_v53  ;;  %13988 = vmatmul.mubr.msk.f32.vlgmr.msra.gmra.mxu1 %vm132_vm3, %v4035_v53 }
0x35e4   :  { %14002 = vmatpush3.msra.mxu1 %v15748_v23  ;;  %14003 = vmatprep.mubr.msk.f32.mxu1 %vm15300_vm2, %v15299_v7 }
0x35e5   :  { %14017 = vmatprep.subr.mxu1 %v15299_v7 }
0x36a3   :  { %v4106_v42 = vpop.f32.mrf.mxu1 }
0x36a4   :  { %v4107_v61 = vadd.f32 %v15984_v33, %v4106_v42 }
0x36a5   :  { %v13989_v52 = vpop.f32.mrf.mxu1 }
0x36a6   :  { %v4110_v45 = vmax.f32 %v4107_v61, 0.0 }
0x36a8   :  { %14918 = vtanh.f32 %v4110_v45 }
0x36b5   :  { %v14919_v46 = vpop.eup %14918 }
0x36b6   :  { %13999 = vmatmul.mubr.msk.f32.vlgmr.msra.gmra.mxu0 %vm132_vm3, %v14919_v46 }
0x36b7   :  { %14007 = vmatpush3.msra.mxu0 %v15759_v26  ;;  %14014 = vmatprep.mubr.msk.f32.mxu0 %vm15300_vm2, %v15299_v7 }
0x36b8   :  { %14008 = vmatprep.subr.mxu0 %v15299_v7 }
0x36b9   :  { %14009 = vmatpush3.msra.mxu0 %v15765_v30 }
0x36ba   :  { %14010 = vmatprep.subr.mxu0 %v15299_v7 }
0x36bb   :  { %14011 = vmatpush3.msra.mxu0 %v15769_v35 }
0x36bc   :  { %14012 = vmatprep.subr.mxu0 %v15299_v7 }
0x36bd   :  { %14013 = vmatpush3.msra.mxu0 %v15773_v31 }
0x36be   :  { %14015 = vmatmul.mubr.msk.f32.vlgmr.msra.gmra.mxu0 %vm132_vm3, %v15829_v15  ;;  %14028 = vmatprep.subr.mxu0 %v15299_v7 }
0x36bf   :  { %14029 = vmatpush3.msra.mxu0 %v15779_v32  ;;  %14030 = vmatprep.mubr.msk.f32.mxu0 %vm15300_vm2, %v15299_v7 }
0x36c0   :  { %14038 = vmatprep.subr.mxu0 %v15299_v7 }
0x3776   :  { %v4181_v23 = vpop.f32.mrf.mxu0 }
0x3777   :  { %v4182_v26 = vadd.f32 %v4181_v23, %v15593_v16 }
0x3778   :  { %v14000_v30 = vpop.f32.mrf.mxu0 }
0x3779   :  { %v4185_v35 = vmax.f32 %v4182_v26, 0.0 }
0x377b   :  { %v4186_v47 = vsel %vm1595_vm9, %v4185_v35, -inf }
0x377c   :  { %4187 = vmax.xlane.f32.xlu1 %v4186_v47 }
0x377e   :  { %v4375_v31 = vpop.f32.mrf.mxu0 }
0x377f   :  { %v4376_v55 = vadd.f32 %v15798_v34, %v4375_v31  ;;  %v4234_v34 = vld [vmem:[#allocation2 + $0x6] sm:$0x3] }
0x3780   :  { %v14016_v8 = vpop.f32.mrf.mxu0 }
0x3805   :  { %v4188_v15 = vpop.xlane.xlu1 %4187 }
0x3806   :  { %v4189_v48 = vsub.f32 %v4185_v35, %v4188_v15 }
0x3808   :  { %v4190_v51 = vmul.f32 1.442695, %v4189_v48 }
0x380a   :  { %14920 = vpow2.f32 %v4190_v51 }
0x3817   :  { %v14921_v11 = vpop.eup %14920 }
0x3818   :  { %v4192_v56 = vsel %vm1595_vm9, %v14921_v11, 0.0 }
0x3819   :  { %4193 = vadd.xlane.f32.xlu0 %v4192_v56 }
0x38a2   :  { %v4194_v2 = vpop.xlane.xlu0 %4193 }
0x38a3   :  { %14922 = vrcp.f32 %v4194_v2 }
0x38b0   :  { %v14923_v63 = vpop.eup %14922 }
0x38b1   :  { %v4196_v6 = vmul.f32 %v14923_v63, %v14921_v11 }
0x38b3   :  { %4215 = vperm.xlu1 %14772, %v4196_v6   ;;  %4205 = vperm.xlu0 %14771, %v4196_v6  }
0x38b7   :  { %14773 = vset.pattern.permute.xlu1 %v15308_v1 }
0x38b8   :  { %4225 = vperm.xlu1 %14773, %v4196_v6  }
0x38bc   :  { %14774 = vset.pattern.permute.xlu1 %v15309_v4 }
0x38bd   :  { %4199 = vperm.xlu1 %14774, %v4196_v6  }
0x38c1   :  { %14775 = vset.pattern.permute.xlu1 %v15306_v58 }
0x392e   :  { %v4216_v9 = vpop.permute.xlu1 %4215  ;;  %v4206_v13 = vpop.permute.xlu0 %4205 }
0x392f   :  { %v4208_v20 = vmul.f32 %v4206_v13, %v4110_v45  ;;  %v4218_v21 = vmul.f32 %v4216_v9, %v4110_v45 }
0x3931   :  { %4210 = vrot.lane.b32.xlu1 %v4208_v20, %s15305_s26 }
0x3933   :  { %v4226_v22 = vpop.permute.xlu1 %4225 }
0x3934   :  { %v4228_v24 = vmul.f32 %v4226_v22, %v4110_v45 }
0x3935   :  { %4220 = vrot.lane.b32.xlu1 %v4218_v21, %s15303_s24 }
0x3938   :  { %v4200_v25 = vpop.permute.xlu1 %4199 }
0x3939   :  { %4230 = vrot.lane.b32.xlu1 %v4228_v24, %s15310_s28  ;;  %v4202_v0 = vmul.f32 %v4200_v25, %v4110_v45 }
0x393d   :  { %4387 = vrot.lane.b32.xlu1 %v4376_v55, %s15301_s1 }
0x39a3   :  { %v4211_v54 = vpop.permute.xlu1 %4210 }
0x39a4   :  { %v4213_v49 = vadd.f32 %v4211_v54, %v4202_v0 }
0x39a7   :  { %v4221_v27 = vpop.permute.xlu1 %4220 }
0x39a8   :  { %v4223_v44 = vadd.f32 %v4221_v27, %v4213_v49 }
0x39ab   :  { %v4231_v19 = vpop.permute.xlu1 %4230 }
0x39ac   :  { %v4233_v53 = vadd.f32 %v4231_v19, %v4223_v44 }
0x39ae   :  { %14004 = vmatmul.mubr.msk.f32.vlgmr.msra.gmra.mxu1 %vm245_vm6, %v4233_v53 }
0x39af   :  { %14018 = vmatpush3.msra.mxu1 %v15804_v57  ;;  %14025 = vmatprep.mubr.msk.f32.mxu1 %vm15300_vm2, %v15299_v7  ;;  %v4388_v26 = vpop.permute.xlu1 %4387 }
0x39b0   :  { %14019 = vmatprep.subr.mxu1 %v15299_v7 }
0x39b1   :  { %14020 = vmatpush3.msra.mxu1 %v15810_v12 }
0x39b2   :  { %14021 = vmatprep.subr.mxu1 %v15299_v7 }
0x39b3   :  { %14022 = vmatpush3.msra.mxu1 %v15814_v14 }
0x39b4   :  { %14023 = vmatprep.subr.mxu1 %v15299_v7 }
0x39b5   :  { %14024 = vmatpush3.msra.mxu1 %v15818_v60 }
0x39b6   :  { %14033 = vmatprep.subr.mxu1 %v15299_v7 }
0x3a6e   :  { %v4304_v42 = vpop.f32.mrf.mxu1 }
0x3a6f   :  { %v4308_v57 = vadd.f32 %v4304_v42, %v4234_v34 }
0x3a70   :  { %v14005_v61 = vpop.f32.mrf.mxu1 }
0x3a71   :  { %v4379_v52 = vadd.f32 %v4376_v55, %v4308_v57 }
0x3a73   :  { %v13050_v45 = vmul.f32 -1.442695, %v4379_v52 }
0x3a75   :  { %14924 = vpow2.f32 %v13050_v45 }
0x3a82   :  { %v14925_v46 = vpop.eup %14924 }
0x3a83   :  { %v4383_v23 = vadd.f32 1.0, %v14925_v46 }
0x3a85   :  { %14926 = vrcp.f32 %v4383_v23 }
0x3a92   :  { %v14927_v12 = vpop.eup %14926 }
0x3a93   :  { %v4390_v30 = vmul.f32 %v14927_v12, %v4388_v26  ;;  %v4397_v47 = vsub.f32 1.0, %v14927_v12  ;;  %v4403_v8 = vmul.f32 %v14927_v12, %v15825_v37 }
0x3a95   :  { %4392 = vrot.lane.b32.xlu0 %v4390_v30, %s15301_s1 }
0x3b07   :  { %v4393_v14 = vpop.permute.xlu0 %4392 }
0x3b08   :  { %v4395_v35 = vadd.f32 %v4393_v14, %v4308_v57 }
0x3b0a   :  { %14928 = vtanh.f32 %v4395_v35 }
0x3b17   :  { %v14929_v60 = vpop.eup %14928 }
0x3b18   :  { %4399 = vrot.lane.b32.xlu1 %v14929_v60, %s15302_s23 }
0x3b8a   :  { %v4400_v31 = vpop.permute.xlu1 %4399 }
0x3b8b   :  { %v4402_v15 = vmul.f32 %v4400_v31, %v4397_v47 }
0x3b8d   :  { %v16029_v48 = vadd.f32 %v4403_v8, %v4402_v15 }
0x3b8f   :  { %4406 = vrot.lane.b32.xlu0 %v16029_v48, %s15302_s23 }
0x3c01   :  { %v16033_v51 = vpop.permute.xlu0 %4406 }
0x3c02   :  { %4409 = vst.msk [vmem:[#allocation3 + $0x6] sm:$0x3] %vm426_vm5, %v16033_v51  ;;  %14026 = vmatmul.mubr.msk.f32.vlgmr.msra.gmra.mxu1 %vm132_vm3, %v16033_v51 }
0x3c03   :  { %14034 = vmatpush3.msra.mxu1 %v15835_v50  ;;  %14035 = vmatprep.mubr.msk.f32.mxu1 %vm15300_vm2, %v15299_v7 }
0x3c04   :  { %14043 = vmatprep.subr.mxu1 %v15299_v7 }
0x3cc2   :  { %v4478_v37 = vpop.f32.mrf.mxu1 }
0x3cc3   :  { %v4479_v11 = vadd.f32 %v15841_v38, %v4478_v37 }
0x3cc4   :  { %v14027_v56 = vpop.f32.mrf.mxu1 }
0x3cc5   :  { %v4482_v2 = vmax.f32 %v4479_v11, 0.0 }
0x3cc7   :  { %14031 = vmatmul.mubr.msk.f32.vlgmr.msra.gmra.mxu0 %vm245_vm6, %v4482_v2 }
0x3cc8   :  { %14039 = vmatpush3.msra.mxu0 %v15845_v43  ;;  %14040 = vmatprep.mubr.msk.f32.mxu0 %vm15300_vm2, %v15299_v7 }
0x3cc9   :  { %14048 = vmatprep.subr.mxu0 %v15299_v7 }
0x3d87   :  { %v4552_v63 = vpop.f32.mrf.mxu0 }
0x3d88   :  { %v4553_v6 = vadd.f32 %v15851_v41, %v4552_v63 }
0x3d89   :  { %v14032_v9 = vpop.f32.mrf.mxu0 }
0x3d8a   :  { %4564 = vrot.lane.b32.xlu1 %v4553_v6, %s15303_s24  ;;  %v4556_v13 = vadd.f32 %v4553_v6, %v15442_v3 }
0x3d8c   :  { %v13053_v38 = vmul.f32 -1.442695, %v4556_v13 }
0x3d8e   :  { %14930 = vpow2.f32 %v13053_v38 }
0x3d9b   :  { %v14931_v20 = vpop.eup %14930 }
0x3d9c   :  { %v4560_v21 = vadd.f32 1.0, %v14931_v20 }
0x3d9e   :  { %14932 = vrcp.f32 %v4560_v21 }
0x3dab   :  { %v14933_v22 = vpop.eup %14932 }
0x3dac   :  { %v4574_v49 = vsub.f32 1.0, %v14933_v22 }
0x3dfc   :  { %v4565_v24 = vpop.permute.xlu1 %4564 }
0x3dfd   :  { %v4567_v55 = vmul.f32 %v14933_v22, %v4565_v24 }
0x3dff   :  { %4569 = vrot.lane.b32.xlu0 %v4567_v55, %s15304_s25 }
0x3e03   :  { %4580 = vrot.lane.b32.xlu0 %v4482_v2, %s15298_s16 }
0x3e71   :  { %v4570_v25 = vpop.permute.xlu0 %4569 }
0x3e72   :  { %v4572_v54 = vadd.f32 %v4570_v25, %v15442_v3 }
0x3e74   :  { %14934 = vtanh.f32 %v4572_v54 }
0x3e75   :  { %v4581_v27 = vpop.permute.xlu0 %4580 }
0x3e76   :  { %v4583_v19 = vmul.f32 %v14933_v22, %v4581_v27 }
0x3e81   :  { %v14935_v0 = vpop.eup %14934 }
0x3e82   :  { %4576 = vrot.lane.b32.xlu1 %v14935_v0, %s15305_s26 }
0x3ef4   :  { %v4577_v44 = vpop.permute.xlu1 %4576 }
0x3ef5   :  { %v4579_v53 = vmul.f32 %v4577_v44, %v4574_v49 }
0x3ef7   :  { %v4584_v34 = vadd.f32 %v4583_v19, %v4579_v53 }
0x3ef9   :  { %4586 = vrot.lane.b32.xlu1 %v4584_v34, %s15305_s26 }
0x3f6b   :  { %v16057_v42 = vpop.permute.xlu1 %4586 }
0x3f6c   :  { %14036 = vmatmul.mubr.msk.f32.vlgmr.msra.gmra.mxu1 %vm245_vm6, %v16057_v42 }
0x3f6d   :  { %14044 = vmatpush3.msra.mxu1 %v15779_v32  ;;  %14045 = vmatprep.mubr.msk.f32.mxu1 %vm15300_vm2, %v15299_v7 }
0x3f6e   :  { %14053 = vmatprep.subr.mxu1 %v15299_v7 }
0x3f70   :  { %14046 = vmatmul.mubr.msk.f32.vlgmr.msra.gmra.mxu1 %vm245_vm6, %v16057_v42 }
0x3f71   :  { %14054 = vmatpush3.msra.mxu1 %v15845_v43  ;;  %14055 = vmatprep.mubr.msk.f32.mxu1 %vm15300_vm2, %v15299_v7 }
0x3f72   :  { %14063 = vmatprep.subr.mxu1 %v15299_v7 }
0x402c   :  { %v4656_v57 = vpop.f32.mrf.mxu1 }
0x402d   :  { %v4657_v61 = vadd.f32 %v15875_v5, %v4656_v57 }
0x402e   :  { %v14037_v52 = vpop.f32.mrf.mxu1 }
0x402f   :  { %v4660_v45 = vmax.f32 %v4657_v61, 0.0 }
0x4030   :  { %v4800_v46 = vpop.f32.mrf.mxu1 }
0x4031   :  { %v4801_v23 = vadd.f32 %v15851_v41, %v4800_v46  ;;  %14041 = vmatmul.mubr.msk.f32.vlgmr.msra.gmra.mxu0 %vm245_vm6, %v4660_v45 }
0x4032   :  { %v14047_v12 = vpop.f32.mrf.mxu1  ;;  %14049 = vmatpush3.msra.mxu0 %v15835_v50  ;;  %14050 = vmatprep.mubr.msk.f32.mxu0 %vm15300_vm2, %v15299_v7 }
0x4033   :  { %4812 = vrot.lane.b32.xlu0 %v4801_v23, %s15303_s24  ;;  %14058 = vmatprep.subr.mxu0 %v15299_v7 }
0x40a5   :  { %v4813_v15 = vpop.permute.xlu0 %4812 }
0x40f1   :  { %v4730_v26 = vpop.f32.mrf.mxu0 }
0x40f2   :  { %v4731_v30 = vadd.f32 %v15885_v36, %v4730_v26 }
0x40f3   :  { %v14042_v14 = vpop.f32.mrf.mxu0 }
0x40f4   :  { %v4804_v35 = vadd.f32 %v4801_v23, %v4731_v30 }
0x40f6   :  { %v13057_v60 = vmul.f32 -1.442695, %v4804_v35  ;;  %v16110_v35 = vld [vmem:[#allocation5 + $0x98] sm:$0xff] }
0x40f8   :  { %14936 = vpow2.f32 %v13057_v60 }
0x4105   :  { %v14937_v47 = vpop.eup %14936 }
0x4106   :  { %v4808_v31 = vadd.f32 1.0, %v14937_v47 }
0x4108   :  { %14938 = vrcp.f32 %v4808_v31 }
0x4115   :  { %v14939_v8 = vpop.eup %14938 }
0x4116   :  { %v4815_v37 = vmul.f32 %v14939_v8, %v4813_v15  ;;  %v4822_v63 = vsub.f32 1.0, %v14939_v8  ;;  %v4828_v9 = vmul.f32 %v14939_v8, %v4584_v34 }
0x4118   :  { %4817 = vrot.lane.b32.xlu1 %v4815_v37, %s15304_s25 }
0x418a   :  { %v4818_v11 = vpop.permute.xlu1 %4817 }
0x418b   :  { %v4820_v56 = vadd.f32 %v4818_v11, %v4731_v30 }
0x418d   :  { %14940 = vtanh.f32 %v4820_v56 }
0x419a   :  { %v14941_v2 = vpop.eup %14940 }
0x419b   :  { %4824 = vrot.lane.b32.xlu0 %v14941_v2, %s15305_s26 }
0x420d   :  { %v4825_v6 = vpop.permute.xlu0 %4824 }
0x420e   :  { %v4827_v13 = vmul.f32 %v4825_v6, %v4822_v63 }
0x4210   :  { %v16082_v38 = vadd.f32 %v4828_v9, %v4827_v13 }
0x4212   :  { %4831 = vrot.lane.b32.xlu1 %v16082_v38, %s15305_s26 }
0x4284   :  { %v4832_v20 = vpop.permute.xlu1 %4831 }
0x4285   :  { %14051 = vmatmul.mubr.msk.f32.vlgmr.msra.gmra.mxu0 %vm245_vm6, %v4832_v20 }
0x4286   :  { %14059 = vmatpush3.msra.mxu0 %v15779_v32  ;;  %14060 = vmatprep.mubr.msk.f32.mxu0 %vm15300_vm2, %v15299_v7 }
0x4287   :  { %14068 = vmatprep.subr.mxu0 %v15299_v7 }
0x4289   :  { %14061 = vmatmul.mubr.msk.f32.vlgmr.msra.gmra.mxu0 %vm245_vm6, %v4832_v20 }
0x428a   :  { %14069 = vmatpush3.msra.mxu0 %v15845_v43  ;;  %14070 = vmatprep.mubr.msk.f32.mxu0 %vm15300_vm2, %v15299_v7 }
0x428b   :  { %14078 = vmatprep.subr.mxu0 %v15299_v7 }
0x4345   :  { %v4901_v21 = vpop.f32.mrf.mxu0 }
0x4346   :  { %v4902_v22 = vadd.f32 %v15875_v5, %v4901_v21 }
0x4347   :  { %v14052_v24 = vpop.f32.mrf.mxu0 }
0x4348   :  { %v4905_v55 = vmax.f32 %v4902_v22, 0.0  ;;  %v5328_v22 = vsel %vm245_vm6, %v16057_v42, %v16082_v38 }
0x4349   :  { %v5045_v32 = vpop.f32.mrf.mxu0 }
0x434a   :  { %v5046_v25 = vadd.f32 %v15851_v41, %v5045_v32  ;;  %14056 = vmatmul.mubr.msk.f32.vlgmr.msra.gmra.mxu1 %vm245_vm6, %v4905_v55 }
0x434b   :  { %v14062_v54 = vpop.f32.mrf.mxu0  ;;  %14064 = vmatpush3.msra.mxu1 %v15835_v50  ;;  %14065 = vmatprep.mubr.msk.f32.mxu1 %vm15300_vm2, %v15299_v7 }
0x434c   :  { %5057 = vrot.lane.b32.xlu0 %v5046_v25, %s15303_s24  ;;  %14073 = vmatprep.subr.mxu1 %v15299_v7 }
0x43be   :  { %v5058_v57 = vpop.permute.xlu0 %5057 }
0x440a   :  { %v4975_v43 = vpop.f32.mrf.mxu1 }
0x440b   :  { %v4976_v0 = vadd.f32 %v15885_v36, %v4975_v43 }
0x440c   :  { %v14057_v27 = vpop.f32.mrf.mxu1 }
0x440d   :  { %v5049_v49 = vadd.f32 %v5046_v25, %v4976_v0  ;;  %v16153_v25 = vld [vmem:[#allocation5 + $0x30] sm:$0xff] }
0x440e   :  { %v16161_v27 = vld [vmem:[#allocation5 + $0x50] sm:$0xff] }
0x440f   :  { %v13061_v44 = vmul.f32 -1.442695, %v5049_v49  ;;  %v16167_v49 = vld [vmem:[#allocation5 + $0x48] sm:$0xff] }
0x4411   :  { %14942 = vpow2.f32 %v13061_v44  ;;  %v16175_v44 = vld [vmem:[#allocation5 + $0x38] sm:$0xff] }
0x441e   :  { %v14943_v19 = vpop.eup %14942 }
0x441f   :  { %v5053_v53 = vadd.f32 1.0, %v14943_v19 }
0x4421   :  { %14944 = vrcp.f32 %v5053_v53 }
0x442e   :  { %v14945_v34 = vpop.eup %14944 }
0x442f   :  { %v5060_v50 = vmul.f32 %v14945_v34, %v5058_v57  ;;  %v5067_v46 = vsub.f32 1.0, %v14945_v34  ;;  %v5073_v12 = vmul.f32 %v14945_v34, %v16082_v38 }
0x4431   :  { %5062 = vrot.lane.b32.xlu1 %v5060_v50, %s15304_s25 }
0x44a3   :  { %v5063_v61 = vpop.permute.xlu1 %5062 }
0x44a4   :  { %v5065_v52 = vadd.f32 %v5063_v61, %v4976_v0 }
0x44a6   :  { %14946 = vtanh.f32 %v5065_v52 }
0x44b3   :  { %v14947_v45 = vpop.eup %14946 }
0x44b4   :  { %5069 = vrot.lane.b32.xlu0 %v14947_v45, %s15305_s26 }
0x4526   :  { %v5070_v23 = vpop.permute.xlu0 %5069 }
0x4527   :  { %v5072_v26 = vmul.f32 %v5070_v23, %v5067_v46 }
0x4529   :  { %v5074_v30 = vadd.f32 %v5073_v12, %v5072_v26 }
0x452b   :  { %5076 = vrot.lane.b32.xlu1 %v5074_v30, %s15305_s26 }
0x459d   :  { %v5077_v14 = vpop.permute.xlu1 %5076 }
0x459e   :  { %14066 = vmatmul.mubr.msk.f32.vlgmr.msra.gmra.mxu1 %vm245_vm6, %v5077_v14 }
0x459f   :  { %14074 = vmatpush3.msra.mxu1 %v16110_v35  ;;  %14075 = vmatprep.mubr.msk.f32.mxu1 %vm15300_vm2, %v15299_v7 }
0x45a0   :  { %14089 = vmatprep.subr.mxu1 %v15299_v7 }
0x45a2   :  { %14076 = vmatmul.mubr.msk.f32.vlgmr.msra.gmra.mxu1 %vm245_vm6, %v5077_v14 }
0x45a3   :  { %14090 = vmatpush3.msra.mxu1 %v15926_v39  ;;  %14097 = vmatprep.mubr.msk.f32.mxu1 %vm15300_vm2, %v15299_v7 }
0x45a4   :  { %14091 = vmatprep.subr.mxu1 %v15299_v7 }
0x45a5   :  { %14092 = vmatpush3.msra.mxu1 %v15932_v40 }
0x45a6   :  { %14093 = vmatprep.subr.mxu1 %v15299_v7 }
0x45a7   :  { %14094 = vmatpush3.msra.mxu1 %v15936_v17 }
0x45a8   :  { %14095 = vmatprep.subr.mxu1 %v15299_v7 }
0x45a9   :  { %14096 = vmatpush3.msra.mxu1 %v15940_v18 }
0x45aa   :  { %14105 = vmatprep.subr.mxu1 %v15299_v7 }
0x465e   :  { %v5146_v60 = vpop.f32.mrf.mxu1 }
0x465f   :  { %v5147_v39 = vadd.f32 %v15875_v5, %v5146_v60 }
0x4660   :  { %v14067_v47 = vpop.f32.mrf.mxu1 }
0x4661   :  { %v5150_v31 = vmax.f32 %v5147_v39, 0.0 }
0x4662   :  { %v5290_v8 = vpop.f32.mrf.mxu1 }
0x4663   :  { %v5291_v15 = vadd.f32 %v15851_v41, %v5290_v8  ;;  %14071 = vmatmul.mubr.msk.f32.vlgmr.msra.gmra.mxu0 %vm245_vm6, %v5150_v31 }
0x4664   :  { %v14077_v40 = vpop.f32.mrf.mxu1  ;;  %14079 = vmatpush3.msra.mxu0 %v15947_v62  ;;  %14086 = vmatprep.mubr.msk.f32.mxu0 %vm15300_vm2, %v15299_v7 }
0x4665   :  { %5302 = vrot.lane.b32.xlu0 %v5291_v15, %s15303_s24  ;;  %14080 = vmatprep.subr.mxu0 %v15299_v7  ;;  %v16195_v40 = vld [vmem:[#allocation5 + $0x60] ss:$0 sm:$0xff] }
0x4666   :  { %14081 = vmatpush3.msra.mxu0 %v15954_v29 }
0x4667   :  { %14082 = vmatprep.subr.mxu0 %v15299_v7 }
0x4668   :  { %14083 = vmatpush3.msra.mxu0 %v15958_v10 }
0x4669   :  { %14084 = vmatprep.subr.mxu0 %v15299_v7 }
0x466a   :  { %14085 = vmatpush3.msra.mxu0 %v15962_v28 }
0x466b   :  { %14100 = vmatprep.subr.mxu0 %v15299_v7 }
0x46d7   :  { %v5303_v56 = vpop.permute.xlu0 %5302 }
0x4723   :  { %v5220_v41 = vpop.f32.mrf.mxu0 }
0x4724   :  { %v5221_v5 = vadd.f32 %v15885_v36, %v5220_v41 }
0x4725   :  { %v14072_v17 = vpop.f32.mrf.mxu0 }
0x4726   :  { %v5294_v18 = vadd.f32 %v5291_v15, %v5221_v5 }
0x4728   :  { %v13065_v62 = vmul.f32 -1.442695, %v5294_v18 }
0x472a   :  { %14948 = vpow2.f32 %v13065_v62 }
0x4737   :  { %v14949_v37 = vpop.eup %14948 }
0x4738   :  { %v5298_v11 = vadd.f32 1.0, %v14949_v37 }
0x473a   :  { %14950 = vrcp.f32 %v5298_v11 }
0x4747   :  { %v14951_v29 = vpop.eup %14950 }
0x4748   :  { %v5305_v2 = vmul.f32 %v14951_v29, %v5303_v56  ;;  %v5312_v36 = vsub.f32 1.0, %v14951_v29  ;;  %v5318_v9 = vmul.f32 %v14951_v29, %v5074_v30 }
0x474a   :  { %5307 = vrot.lane.b32.xlu1 %v5305_v2, %s15304_s25  ;;  %v16200_v2 = vld [vmem:[#allocation5 + $0x80] sm:$0xff] }
0x474e   :  { %5321 = vrot.lane.b32.xlu1 %v5074_v30, %s15298_s16 }
0x47bc   :  { %v5308_v10 = vpop.permute.xlu1 %5307 }
0x47bd   :  { %v5310_v28 = vadd.f32 %v5308_v10, %v5221_v5  ;;  %v16206_v10 = vld [vmem:[#allocation5 + $0x78] sm:$0xff] }
0x47bf   :  { %14952 = vtanh.f32 %v5310_v28  ;;  %v16210_v28 = vld [vmem:[#allocation5 + $0x70] sm:$0xff] }
0x47c0   :  { %v5322_v21 = vpop.permute.xlu1 %5321 }
0x47c1   :  { %v5329_v24 = vsel %vm1433_vm7, %v5328_v22, %v5322_v21 }
0x47cc   :  { %v14953_v63 = vpop.eup %14952 }
0x47cd   :  { %5314 = vrot.lane.b32.xlu0 %v14953_v63, %s15305_s26  ;;  %v16214_v63 = vld [vmem:[#allocation5 + $0x68] sm:$0xff] }
0x483f   :  { %v5315_v6 = vpop.permute.xlu0 %5314 }
0x4840   :  { %v5317_v13 = vmul.f32 %v5315_v6, %v5312_v36  ;;  %v5529_v36 = vld [vmem:[#allocation2 + $0x8] sm:$0x3] }
0x4842   :  { %v5319_v20 = vadd.f32 %v5318_v9, %v5317_v13 }
0x4844   :  { %5325 = vrot.lane.b32.xlu0 %v5319_v20, %s15304_s25 }
0x48b6   :  { %v5326_v55 = vpop.permute.xlu0 %5325 }
0x48b7   :  { %v5330_v32 = vsel %vm1435_vm8, %v5329_v24, %v5326_v55 }
0x48b8   :  { %5331 = vst.msk [vmem:[#allocation4 + $0x6] sm:$0x3] %vm426_vm5, %v5330_v32  ;;  %14087 = vmatmul.mubr.msk.f32.vlgmr.msra.gmra.mxu0 %vm132_vm3, %v5330_v32 }
0x48b9   :  { %14101 = vmatpush3.msra.mxu0 %v16153_v25  ;;  %14102 = vmatprep.mubr.msk.f32.mxu0 %vm15300_vm2, %v15299_v7 }
0x48ba   :  { %14116 = vmatprep.subr.mxu0 %v15299_v7 }
0x4978   :  { %v5401_v54 = vpop.f32.mrf.mxu0 }
0x4979   :  { %v5402_v42 = vadd.f32 %v15984_v33, %v5401_v54  ;;  %v16171_v33 = vld [vmem:[#allocation5 + $0x40] sm:$0xff] }
0x497a   :  { %v14088_v38 = vpop.f32.mrf.mxu0 }
0x497b   :  { %v5405_v43 = vmax.f32 %v5402_v42, 0.0 }
0x497d   :  { %14954 = vtanh.f32 %v5405_v43 }
0x498a   :  { %v14955_v0 = vpop.eup %14954 }
0x498b   :  { %14098 = vmatmul.mubr.msk.f32.vlgmr.msra.gmra.mxu1 %vm132_vm3, %v14955_v0 }
0x498c   :  { %14106 = vmatpush3.msra.mxu1 %v16161_v27  ;;  %14113 = vmatprep.mubr.msk.f32.mxu1 %vm15300_vm2, %v15299_v7 }
0x498d   :  { %14107 = vmatprep.subr.mxu1 %v15299_v7 }
0x498e   :  { %14108 = vmatpush3.msra.mxu1 %v16167_v49 }
0x498f   :  { %14109 = vmatprep.subr.mxu1 %v15299_v7 }
0x4990   :  { %14110 = vmatpush3.msra.mxu1 %v16171_v33 }
0x4991   :  { %14111 = vmatprep.subr.mxu1 %v15299_v7 }
0x4992   :  { %14112 = vmatpush3.msra.mxu1 %v16175_v44 }
0x4993   :  { %14114 = vmatmul.mubr.msk.f32.vlgmr.msra.gmra.mxu1 %vm132_vm3, %v16033_v51  ;;  %14127 = vmatprep.subr.mxu1 %v15299_v7 }
0x4994   :  { %14128 = vmatpush3.msra.mxu1 %v16110_v35  ;;  %14129 = vmatprep.mubr.msk.f32.mxu1 %vm15300_vm2, %v15299_v7 }
0x4995   :  { %14137 = vmatprep.subr.mxu1 %v15299_v7 }
0x4a4b   :  { %v5476_v19 = vpop.f32.mrf.mxu1 }
0x4a4c   :  { %v5477_v53 = vadd.f32 %v5476_v19, %v15593_v16 }
0x4a4d   :  { %v14099_v34 = vpop.f32.mrf.mxu1 }
0x4a4e   :  { %v5480_v57 = vmax.f32 %v5477_v53, 0.0 }
0x4a50   :  { %v5481_v50 = vsel %vm1595_vm9, %v5480_v57, -inf }
0x4a51   :  { %5482 = vmax.xlane.f32.xlu1 %v5481_v50 }
0x4a53   :  { %v5670_v61 = vpop.f32.mrf.mxu1 }
0x4a54   :  { %v5671_v41 = vadd.f32 %v16195_v40, %v5670_v61  ;;  %v16231_v61 = vld [vmem:[#allocation5 + $0xb0] sm:$0xff] }
0x4a55   :  { %v14115_v52 = vpop.f32.mrf.mxu1 }
0x4a56   :  { %v16237_v52 = vld [vmem:[#allocation5 + $0x88] ss:$0 sm:$0xff] }
0x4ada   :  { %v5483_v51 = vpop.xlane.xlu1 %5482 }
0x4adb   :  { %v5484_v45 = vsub.f32 %v5480_v57, %v5483_v51 }
0x4add   :  { %v5485_v46 = vmul.f32 1.442695, %v5484_v45 }
0x4adf   :  { %14956 = vpow2.f32 %v5485_v46 }
0x4aec   :  { %v14957_v23 = vpop.eup %14956 }
0x4aed   :  { %v5487_v12 = vsel %vm1595_vm9, %v14957_v23, 0.0 }
0x4aee   :  { %5488 = vadd.xlane.f32.xlu0 %v5487_v12 }
0x4b77   :  { %v5489_v26 = vpop.xlane.xlu0 %5488 }
0x4b78   :  { %14958 = vrcp.f32 %v5489_v26  ;;  %v16247_v26 = vld [vmem:[#allocation5 + $0xa8] ss:$0 sm:$0xff] }
0x4b85   :  { %v14959_v30 = vpop.eup %14958 }
0x4b86   :  { %v5491_v14 = vmul.f32 %v14959_v30, %v14957_v23  ;;  %v16241_v23 = vld [vmem:[#allocation5 + $0x90] sm:$0xff] }
0x4b88   :  { %5510 = vperm.xlu1 %14775, %v5491_v14   ;;  %5500 = vperm.xlu0 %14771, %v5491_v14  }
0x4b8c   :  { %14776 = vset.pattern.permute.xlu1 %v15308_v1  ;;  %14777 = vset.pattern.permute.xlu0 %v15309_v4 }
0x4b8d   :  { %5520 = vperm.xlu1 %14776, %v5491_v14   ;;  %5494 = vperm.xlu0 %14777, %v5491_v14  }
0x4b91   :  { %14779 = vset.pattern.permute.xlu1 %v15306_v58  ;;  %14778 = vset.pattern.permute.xlu0 %v15307_v59 }
0x4c03   :  { %v5511_v60 = vpop.permute.xlu1 %5510  ;;  %v5501_v39 = vpop.permute.xlu0 %5500 }
0x4c04   :  { %v5503_v47 = vmul.f32 %v5501_v39, %v5405_v43  ;;  %v5513_v31 = vmul.f32 %v5511_v60, %v5405_v43 }
0x4c06   :  { %5505 = vrot.lane.b32.xlu1 %v5503_v47, %s15305_s26 }
0x4c08   :  { %v5521_v8 = vpop.permute.xlu1 %5520  ;;  %v5495_v5 = vpop.permute.xlu0 %5494 }
0x4c09   :  { %v5523_v15 = vmul.f32 %v5521_v8, %v5405_v43  ;;  %v5497_v18 = vmul.f32 %v5495_v5, %v5405_v43 }
0x4c0a   :  { %5515 = vrot.lane.b32.xlu1 %v5513_v31, %s15303_s24 }
0x4c0b   :  { %5525 = vrot.lane.b32.xlu0 %v5523_v15, %s15310_s28 }
0x4c0e   :  { %5682 = vrot.lane.b32.xlu1 %v5671_v41, %s15301_s1 }
0x4c78   :  { %v5506_v17 = vpop.permute.xlu1 %5505 }
0x4c79   :  { %v5508_v62 = vadd.f32 %v5506_v17, %v5497_v18 }
0x4c7c   :  { %v5516_v37 = vpop.permute.xlu1 %5515 }
0x4c7d   :  { %v5518_v11 = vadd.f32 %v5516_v37, %v5508_v62  ;;  %v5526_v29 = vpop.permute.xlu0 %5525 }
0x4c7f   :  { %v5528_v56 = vadd.f32 %v5526_v29, %v5518_v11 }
0x4c80   :  { %v5683_v32 = vpop.permute.xlu1 %5682 }
0x4c81   :  { %14103 = vmatmul.mubr.msk.f32.vlgmr.msra.gmra.mxu0 %vm245_vm6, %v5528_v56 }
0x4c82   :  { %14117 = vmatpush3.msra.mxu0 %v16200_v2  ;;  %14124 = vmatprep.mubr.msk.f32.mxu0 %vm15300_vm2, %v15299_v7 }
0x4c83   :  { %14118 = vmatprep.subr.mxu0 %v15299_v7 }
0x4c84   :  { %14119 = vmatpush3.msra.mxu0 %v16206_v10 }
0x4c85   :  { %14120 = vmatprep.subr.mxu0 %v15299_v7 }
0x4c86   :  { %14121 = vmatpush3.msra.mxu0 %v16210_v28 }
0x4c87   :  { %14122 = vmatprep.subr.mxu0 %v15299_v7 }
0x4c88   :  { %14123 = vmatpush3.msra.mxu0 %v16214_v63 }
0x4c89   :  { %14132 = vmatprep.subr.mxu0 %v15299_v7 }
0x4d41   :  { %v5599_v6 = vpop.f32.mrf.mxu0 }
0x4d42   :  { %v5603_v9 = vadd.f32 %v5599_v6, %v5529_v36 }
0x4d43   :  { %v14104_v13 = vpop.f32.mrf.mxu0 }
0x4d44   :  { %v5674_v20 = vadd.f32 %v5671_v41, %v5603_v9  ;;  %v16271_v13 = vld [vmem:[#allocation5 + $0xb8] ss:$0 sm:$0xff] }
0x4d46   :  { %v13070_v21 = vmul.f32 -1.442695, %v5674_v20 }
0x4d48   :  { %14960 = vpow2.f32 %v13070_v21 }
0x4d55   :  { %v14961_v22 = vpop.eup %14960 }
0x4d56   :  { %v5678_v24 = vadd.f32 1.0, %v14961_v22 }
0x4d58   :  { %14962 = vrcp.f32 %v5678_v24 }
0x4d65   :  { %v14963_v55 = vpop.eup %14962 }
0x4d66   :  { %v5685_v54 = vmul.f32 %v14963_v55, %v5683_v32  ;;  %v5692_v0 = vsub.f32 1.0, %v14963_v55  ;;  %v5698_v53 = vmul.f32 %v14963_v55, %v16029_v48 }
0x4d68   :  { %5687 = vrot.lane.b32.xlu0 %v5685_v54, %s15301_s1 }
0x4dda   :  { %v5688_v42 = vpop.permute.xlu0 %5687 }
0x4ddb   :  { %v5690_v38 = vadd.f32 %v5688_v42, %v5603_v9  ;;  %v16281_v42 = vld [vmem:[#allocation5 + $0xa0] ss:$0 sm:$0xff] }
0x4ddd   :  { %14964 = vtanh.f32 %v5690_v38 }
0x4dea   :  { %v14965_v43 = vpop.eup %14964 }
0x4deb   :  { %5694 = vrot.lane.b32.xlu1 %v14965_v43, %s15302_s23 }
0x4e5d   :  { %v5695_v19 = vpop.permute.xlu1 %5694 }
0x4e5e   :  { %v5697_v34 = vmul.f32 %v5695_v19, %v5692_v0 }
0x4e60   :  { %v16221_v57 = vadd.f32 %v5698_v53, %v5697_v34 }
0x4e62   :  { %5701 = vrot.lane.b32.xlu0 %v16221_v57, %s15302_s23 }
0x4ed4   :  { %v16225_v50 = vpop.permute.xlu0 %5701 }
0x4ed5   :  { %5704 = vst.msk [vmem:[#allocation3 + $0x8] sm:$0x3] %vm426_vm5, %v16225_v50  ;;  %14125 = vmatmul.mubr.msk.f32.vlgmr.msra.gmra.mxu0 %vm132_vm3, %v16225_v50 }
0x4ed6   :  { %14133 = vmatpush3.msra.mxu0 %v16231_v61  ;;  %14134 = vmatprep.mubr.msk.f32.mxu0 %vm15300_vm2, %v15299_v7 }
0x4ed7   :  { %14142 = vmatprep.subr.mxu0 %v15299_v7 }
0x4f95   :  { %v5773_v48 = vpop.f32.mrf.mxu0 }
0x4f96   :  { %v5774_v51 = vadd.f32 %v16237_v52, %v5773_v48 }
0x4f97   :  { %v14126_v45 = vpop.f32.mrf.mxu0 }
0x4f98   :  { %v5777_v46 = vmax.f32 %v5774_v51, 0.0 }
0x4f9a   :  { %14130 = vmatmul.mubr.msk.f32.vlgmr.msra.gmra.mxu1 %vm245_vm6, %v5777_v46 }
0x4f9b   :  { %14138 = vmatpush3.msra.mxu1 %v16241_v23  ;;  %14139 = vmatprep.mubr.msk.f32.mxu1 %vm15300_vm2, %v15299_v7 }
0x4f9c   :  { %14147 = vmatprep.subr.mxu1 %v15299_v7 }
0x505a   :  { %v5847_v12 = vpop.f32.mrf.mxu1 }
0x505b   :  { %v5848_v30 = vadd.f32 %v16247_v26, %v5847_v12 }
0x505c   :  { %v14131_v14 = vpop.f32.mrf.mxu1 }
0x505d   :  { %5859 = vrot.lane.b32.xlu1 %v5848_v30, %s15303_s24  ;;  %v5851_v60 = vadd.f32 %v5848_v30, %v15442_v3 }
0x505f   :  { %v13073_v39 = vmul.f32 -1.442695, %v5851_v60 }
0x5061   :  { %14966 = vpow2.f32 %v13073_v39 }
0x506e   :  { %v14967_v47 = vpop.eup %14966 }
0x506f   :  { %v5855_v31 = vadd.f32 1.0, %v14967_v47 }
0x5071   :  { %14968 = vrcp.f32 %v5855_v31 }
0x507e   :  { %v14969_v8 = vpop.eup %14968 }
0x507f   :  { %v5869_v37 = vsub.f32 1.0, %v14969_v8 }
0x50cf   :  { %v5860_v15 = vpop.permute.xlu1 %5859 }
0x50d0   :  { %v5862_v41 = vmul.f32 %v14969_v8, %v5860_v15 }
0x50d2   :  { %5864 = vrot.lane.b32.xlu0 %v5862_v41, %s15304_s25 }
0x50d6   :  { %5875 = vrot.lane.b32.xlu0 %v5777_v46, %s15298_s16 }
0x5144   :  { %v5865_v5 = vpop.permute.xlu0 %5864 }
0x5145   :  { %v5867_v17 = vadd.f32 %v5865_v5, %v15442_v3 }
0x5147   :  { %14970 = vtanh.f32 %v5867_v17 }
0x5148   :  { %v5876_v62 = vpop.permute.xlu0 %5875 }
0x5149   :  { %v5878_v29 = vmul.f32 %v14969_v8, %v5876_v62 }
0x5154   :  { %v14971_v18 = vpop.eup %14970 }
0x5155   :  { %5871 = vrot.lane.b32.xlu1 %v14971_v18, %s15305_s26 }
0x51c7   :  { %v5872_v11 = vpop.permute.xlu1 %5871 }
0x51c8   :  { %v5874_v56 = vmul.f32 %v5872_v11, %v5869_v37 }
0x51ca   :  { %v5879_v36 = vadd.f32 %v5878_v29, %v5874_v56 }
0x51cc   :  { %5881 = vrot.lane.b32.xlu1 %v5879_v36, %s15305_s26 }
0x523e   :  { %v16257_v6 = vpop.permute.xlu1 %5881 }
0x523f   :  { %14135 = vmatmul.mubr.msk.f32.vlgmr.msra.gmra.mxu0 %vm245_vm6, %v16257_v6 }
0x5240   :  { %14143 = vmatpush3.msra.mxu0 %v16110_v35  ;;  %14144 = vmatprep.mubr.msk.f32.mxu0 %vm15300_vm2, %v15299_v7 }
0x5241   :  { %14152 = vmatprep.subr.mxu0 %v15299_v7 }
0x5243   :  { %14145 = vmatmul.mubr.msk.f32.vlgmr.msra.gmra.mxu0 %vm245_vm6, %v16257_v6 }
0x5244   :  { %14153 = vmatpush3.msra.mxu0 %v16241_v23  ;;  %14154 = vmatprep.mubr.msk.f32.mxu0 %vm15300_vm2, %v15299_v7 }
0x5245   :  { %14162 = vmatprep.subr.mxu0 %v15299_v7 }
0x52ff   :  { %v5951_v9 = vpop.f32.mrf.mxu0 }
0x5300   :  { %v5952_v20 = vadd.f32 %v16271_v13, %v5951_v9 }
0x5301   :  { %v14136_v21 = vpop.f32.mrf.mxu0 }
0x5302   :  { %v5955_v22 = vmax.f32 %v5952_v20, 0.0 }
0x5303   :  { %v6095_v24 = vpop.f32.mrf.mxu0 }
0x5304   :  { %v6096_v55 = vadd.f32 %v16247_v26, %v6095_v24  ;;  %14140 = vmatmul.mubr.msk.f32.vlgmr.msra.gmra.mxu1 %vm245_vm6, %v5955_v22 }
0x5305   :  { %v14146_v32 = vpop.f32.mrf.mxu0  ;;  %14148 = vmatpush3.msra.mxu1 %v16231_v61  ;;  %14149 = vmatprep.mubr.msk.f32.mxu1 %vm15300_vm2, %v15299_v7 }
0x5306   :  { %6107 = vrot.lane.b32.xlu0 %v6096_v55, %s15303_s24  ;;  %14157 = vmatprep.subr.mxu1 %v15299_v7 }
0x5378   :  { %v6108_v51 = vpop.permute.xlu0 %6107 }
0x53c4   :  { %v6025_v54 = vpop.f32.mrf.mxu1 }
0x53c5   :  { %v6026_v38 = vadd.f32 %v16281_v42, %v6025_v54 }
0x53c6   :  { %v14141_v43 = vpop.f32.mrf.mxu1 }
0x53c7   :  { %v6099_v0 = vadd.f32 %v6096_v55, %v6026_v38 }
0x53c9   :  { %v13077_v19 = vmul.f32 -1.442695, %v6099_v0 }
0x53cb   :  { %14972 = vpow2.f32 %v13077_v19 }
0x53d8   :  { %v14973_v53 = vpop.eup %14972 }
0x53d9   :  { %v6103_v34 = vadd.f32 1.0, %v14973_v53 }
0x53db   :  { %14974 = vrcp.f32 %v6103_v34 }
0x53e8   :  { %v14975_v48 = vpop.eup %14974 }
0x53e9   :  { %v6110_v45 = vmul.f32 %v14975_v48, %v6108_v51  ;;  %v6117_v14 = vsub.f32 1.0, %v14975_v48  ;;  %v6123_v39 = vmul.f32 %v14975_v48, %v5879_v36  ;;  %v16322_v51 = vld [vmem:[#allocation5 + $0x100] sm:$0xff] }
0x53eb   :  { %6112 = vrot.lane.b32.xlu1 %v6110_v45, %s15304_s25  ;;  %v16328_v45 = vld [vmem:[#allocation5 + $0xf8] sm:$0xff] }
0x545d   :  { %v6113_v46 = vpop.permute.xlu1 %6112 }
0x545e   :  { %v6115_v12 = vadd.f32 %v6113_v46, %v6026_v38  ;;  %v16332_v46 = vld [vmem:[#allocation5 + $0xf0] sm:$0xff] }
0x5460   :  { %14976 = vtanh.f32 %v6115_v12  ;;  %v16336_v12 = vld [vmem:[#allocation5 + $0xe8] sm:$0xff] }
0x546d   :  { %v14977_v30 = vpop.eup %14976 }
0x546e   :  { %6119 = vrot.lane.b32.xlu0 %v14977_v30, %s15305_s26 }
0x54e0   :  { %v6120_v60 = vpop.permute.xlu0 %6119 }
0x54e1   :  { %v6122_v47 = vmul.f32 %v6120_v60, %v6117_v14 }
0x54e3   :  { %v16286_v31 = vadd.f32 %v6123_v39, %v6122_v47 }
0x54e5   :  { %6126 = vrot.lane.b32.xlu1 %v16286_v31, %s15305_s26 }
0x5557   :  { %v6127_v8 = vpop.permute.xlu1 %6126 }
0x5558   :  { %14150 = vmatmul.mubr.msk.f32.vlgmr.msra.gmra.mxu1 %vm245_vm6, %v6127_v8 }
0x5559   :  { %14158 = vmatpush3.msra.mxu1 %v16110_v35  ;;  %14159 = vmatprep.mubr.msk.f32.mxu1 %vm15300_vm2, %v15299_v7 }
0x555a   :  { %14167 = vmatprep.subr.mxu1 %v15299_v7 }
0x555c   :  { %14160 = vmatmul.mubr.msk.f32.vlgmr.msra.gmra.mxu1 %vm245_vm6, %v6127_v8 }
0x555d   :  { %14168 = vmatpush3.msra.mxu1 %v16241_v23  ;;  %14169 = vmatprep.mubr.msk.f32.mxu1 %vm15300_vm2, %v15299_v7 }
0x555e   :  { %14177 = vmatprep.subr.mxu1 %v15299_v7 }
0x5618   :  { %v6196_v15 = vpop.f32.mrf.mxu1 }
0x5619   :  { %v6197_v41 = vadd.f32 %v16271_v13, %v6196_v15 }
0x561a   :  { %v14151_v5 = vpop.f32.mrf.mxu1 }
0x561b   :  { %v6200_v17 = vmax.f32 %v6197_v41, 0.0  ;;  %v16343_v41 = vld [vmem:[#allocation5 + $0xd8] sm:$0xff]  ;;  %v16350_v5 = vld [vmem:[#allocation5 + $0xd0] sm:$0xff] }
0x561c   :  { %v6340_v18 = vpop.f32.mrf.mxu1 }
0x561d   :  { %v6341_v62 = vadd.f32 %v16247_v26, %v6340_v18  ;;  %14155 = vmatmul.mubr.msk.f32.vlgmr.msra.gmra.mxu0 %vm245_vm6, %v6200_v17  ;;  %v16354_v17 = vld [vmem:[#allocation5 + $0xc8] sm:$0xff]  ;;  %v16358_v18 = vld [vmem:[#allocation5 + $0xc0] sm:$0xff] }
0x561e   :  { %v14161_v37 = vpop.f32.mrf.mxu1  ;;  %14163 = vmatpush3.msra.mxu0 %v16231_v61  ;;  %14164 = vmatprep.mubr.msk.f32.mxu0 %vm15300_vm2, %v15299_v7 }
0x561f   :  { %6352 = vrot.lane.b32.xlu0 %v6341_v62, %s15303_s24  ;;  %14172 = vmatprep.subr.mxu0 %v15299_v7 }
0x5691   :  { %v6353_v24 = vpop.permute.xlu0 %6352 }
0x56dd   :  { %v6270_v11 = vpop.f32.mrf.mxu0 }
0x56de   :  { %v6271_v29 = vadd.f32 %v16281_v42, %v6270_v11 }
0x56df   :  { %v14156_v56 = vpop.f32.mrf.mxu0 }
0x56e0   :  { %v6344_v36 = vadd.f32 %v6341_v62, %v6271_v29 }
0x56e2   :  { %v13081_v9 = vmul.f32 -1.442695, %v6344_v36 }
0x56e4   :  { %14978 = vpow2.f32 %v13081_v9 }
0x56f1   :  { %v14979_v20 = vpop.eup %14978 }
0x56f2   :  { %v6348_v21 = vadd.f32 1.0, %v14979_v20 }
0x56f4   :  { %14980 = vrcp.f32 %v6348_v21 }
0x5701   :  { %v14981_v22 = vpop.eup %14980 }
0x5702   :  { %v6355_v55 = vmul.f32 %v14981_v22, %v6353_v24  ;;  %v6362_v43 = vsub.f32 1.0, %v14981_v22  ;;  %v6368_v19 = vmul.f32 %v14981_v22, %v16286_v31 }
0x5704   :  { %6357 = vrot.lane.b32.xlu1 %v6355_v55, %s15304_s25 }
0x5776   :  { %v6358_v32 = vpop.permute.xlu1 %6357 }
0x5777   :  { %v6360_v54 = vadd.f32 %v6358_v32, %v6271_v29 }
0x5779   :  { %14982 = vtanh.f32 %v6360_v54 }
0x5786   :  { %v14983_v38 = vpop.eup %14982 }
0x5787   :  { %6364 = vrot.lane.b32.xlu0 %v14983_v38, %s15305_s26 }
0x57f9   :  { %v6365_v0 = vpop.permute.xlu0 %6364 }
0x57fa   :  { %v6367_v53 = vmul.f32 %v6365_v0, %v6362_v43 }
0x57fc   :  { %v16312_v34 = vadd.f32 %v6368_v19, %v6367_v53 }
0x57fe   :  { %6371 = vrot.lane.b32.xlu1 %v16312_v34, %s15305_s26 }
0x5870   :  { %v6372_v48 = vpop.permute.xlu1 %6371 }
0x5871   :  { %14165 = vmatmul.mubr.msk.f32.vlgmr.msra.gmra.mxu0 %vm245_vm6, %v6372_v48 }
0x5872   :  { %14173 = vmatpush3.msra.mxu0 %v16110_v35  ;;  %14174 = vmatprep.mubr.msk.f32.mxu0 %vm15300_vm2, %v15299_v7 }
0x5873   :  { %14188 = vmatprep.subr.mxu0 %v15299_v7 }
0x5875   :  { %14175 = vmatmul.mubr.msk.f32.vlgmr.msra.gmra.mxu0 %vm245_vm6, %v6372_v48  ;;  %v6623_v48 = vsel %vm245_vm6, %v16257_v6, %v16286_v31 }
0x5876   :  { %14189 = vmatpush3.msra.mxu0 %v16322_v51  ;;  %14196 = vmatprep.mubr.msk.f32.mxu0 %vm15300_vm2, %v15299_v7 }
0x5877   :  { %14190 = vmatprep.subr.mxu0 %v15299_v7 }
0x5878   :  { %14191 = vmatpush3.msra.mxu0 %v16328_v45 }
0x5879   :  { %14192 = vmatprep.subr.mxu0 %v15299_v7 }
0x587a   :  { %14193 = vmatpush3.msra.mxu0 %v16332_v46 }
0x587b   :  { %14194 = vmatprep.subr.mxu0 %v15299_v7 }
0x587c   :  { %14195 = vmatpush3.msra.mxu0 %v16336_v12 }
0x587d   :  { %14204 = vmatprep.subr.mxu0 %v15299_v7 }
0x5931   :  { %v6441_v30 = vpop.f32.mrf.mxu0 }
0x5932   :  { %v6442_v14 = vadd.f32 %v16271_v13, %v6441_v30 }
0x5933   :  { %v14166_v60 = vpop.f32.mrf.mxu0 }
0x5934   :  { %v6445_v39 = vmax.f32 %v6442_v14, 0.0 }
0x5935   :  { %v6585_v47 = vpop.f32.mrf.mxu0 }
0x5936   :  { %v6586_v8 = vadd.f32 %v16247_v26, %v6585_v47  ;;  %14170 = vmatmul.mubr.msk.f32.vlgmr.msra.gmra.mxu1 %vm245_vm6, %v6445_v39  ;;  %v16380_v39 = vld [vmem:[#allocation5 + $0xe0] ss:$0 sm:$0xff] }
0x5937   :  { %v14176_v15 = vpop.f32.mrf.mxu0  ;;  %14178 = vmatpush3.msra.mxu1 %v16343_v41  ;;  %14185 = vmatprep.mubr.msk.f32.mxu1 %vm15300_vm2, %v15299_v7 }
0x5938   :  { %6597 = vrot.lane.b32.xlu0 %v6586_v8, %s15303_s24  ;;  %14179 = vmatprep.subr.mxu1 %v15299_v7 }
0x5939   :  { %14180 = vmatpush3.msra.mxu1 %v16350_v5 }
0x593a   :  { %14181 = vmatprep.subr.mxu1 %v15299_v7 }
0x593b   :  { %14182 = vmatpush3.msra.mxu1 %v16354_v17 }
0x593c   :  { %14183 = vmatprep.subr.mxu1 %v15299_v7 }
0x593d   :  { %14184 = vmatpush3.msra.mxu1 %v16358_v18 }
0x593e   :  { %14199 = vmatprep.subr.mxu1 %v15299_v7 }
0x59aa   :  { %v6598_v21 = vpop.permute.xlu0 %6597 }
0x59f6   :  { %v6515_v62 = vpop.f32.mrf.mxu1 }
0x59f7   :  { %v6516_v37 = vadd.f32 %v16281_v42, %v6515_v62 }
0x59f8   :  { %v14171_v11 = vpop.f32.mrf.mxu1 }
0x59f9   :  { %v6589_v29 = vadd.f32 %v6586_v8, %v6516_v37 }
0x59fb   :  { %v13085_v56 = vmul.f32 -1.442695, %v6589_v29 }
0x59fd   :  { %14984 = vpow2.f32 %v13085_v56 }
0x5a0a   :  { %v14985_v36 = vpop.eup %14984 }
0x5a0b   :  { %v6593_v9 = vadd.f32 1.0, %v14985_v36 }
0x5a0d   :  { %14986 = vrcp.f32 %v6593_v9 }
0x5a1a   :  { %v14987_v20 = vpop.eup %14986 }
0x5a1b   :  { %v6600_v22 = vmul.f32 %v14987_v20, %v6598_v21  ;;  %v6607_v54 = vsub.f32 1.0, %v14987_v20  ;;  %v6613_v43 = vmul.f32 %v14987_v20, %v16312_v34 }
0x5a1d   :  { %6602 = vrot.lane.b32.xlu1 %v6600_v22, %s15304_s25 }
0x5a21   :  { %6616 = vrot.lane.b32.xlu1 %v16312_v34, %s15298_s16 }
0x5a8f   :  { %v6603_v24 = vpop.permute.xlu1 %6602 }
0x5a90   :  { %v6605_v55 = vadd.f32 %v6603_v24, %v6516_v37 }
0x5a92   :  { %14988 = vtanh.f32 %v6605_v55 }
0x5a93   :  { %v6617_v53 = vpop.permute.xlu1 %6616 }
0x5a94   :  { %v6624_v30 = vsel %vm1433_vm7, %v6623_v48, %v6617_v53 }
0x5a9f   :  { %v14989_v32 = vpop.eup %14988 }
0x5aa0   :  { %6609 = vrot.lane.b32.xlu0 %v14989_v32, %s15305_s26 }
0x5b12   :  { %v6610_v38 = vpop.permute.xlu0 %6609 }
0x5b13   :  { %v6612_v0 = vmul.f32 %v6610_v38, %v6607_v54 }
0x5b15   :  { %v6614_v19 = vadd.f32 %v6613_v43, %v6612_v0 }
0x5b17   :  { %6620 = vrot.lane.b32.xlu0 %v6614_v19, %s15304_s25 }
0x5b89   :  { %v6621_v14 = vpop.permute.xlu0 %6620 }
0x5b8a   :  { %v6625_v60 = vsel %vm1435_vm8, %v6624_v30, %v6621_v14 }
0x5b8b   :  { %6626 = vst.msk [vmem:[#allocation4 + $0x8] sm:$0x3] %vm426_vm5, %v6625_v60  ;;  %14186 = vmatmul.mubr.msk.f32.vlgmr.msra.gmra.mxu1 %vm132_vm3, %v6625_v60 }
0x5b8c   :  { %14200 = vmatpush3.msra.mxu1 %v16153_v25  ;;  %14201 = vmatprep.mubr.msk.f32.mxu1 %vm15300_vm2, %v15299_v7 }
0x5b8d   :  { %14215 = vmatprep.subr.mxu1 %v15299_v7 }
0x5c4b   :  { %v6696_v34 = vpop.f32.mrf.mxu1 }
0x5c4c   :  { %v6697_v6 = vadd.f32 %v16380_v39, %v6696_v34 }
0x5c4d   :  { %v14187_v31 = vpop.f32.mrf.mxu1 }
0x5c4e   :  { %v6700_v47 = vmax.f32 %v6697_v6, 0.0 }
0x5c50   :  { %14990 = vtanh.f32 %v6700_v47 }
0x5c5d   :  { %v14991_v8 = vpop.eup %14990 }
0x5c5e   :  { %14197 = vmatmul.mubr.msk.f32.vlgmr.msra.gmra.mxu0 %vm132_vm3, %v14991_v8 }
0x5c5f   :  { %14205 = vmatpush3.msra.mxu0 %v16161_v27  ;;  %14212 = vmatprep.mubr.msk.f32.mxu0 %vm15300_vm2, %v15299_v7 }
0x5c60   :  { %14206 = vmatprep.subr.mxu0 %v15299_v7 }
0x5c61   :  { %14207 = vmatpush3.msra.mxu0 %v16167_v49 }
0x5c62   :  { %14208 = vmatprep.subr.mxu0 %v15299_v7 }
0x5c63   :  { %14209 = vmatpush3.msra.mxu0 %v16171_v33 }
0x5c64   :  { %14210 = vmatprep.subr.mxu0 %v15299_v7 }
0x5c65   :  { %14211 = vmatpush3.msra.mxu0 %v16175_v44 }
0x5c66   :  { %14213 = vmatmul.mubr.msk.f32.vlgmr.msra.gmra.mxu0 %vm132_vm3, %v16225_v50  ;;  %14226 = vmatprep.subr.mxu0 %v15299_v7 }
0x5c67   :  { %14227 = vmatpush3.msra.mxu0 %v16110_v35  ;;  %14228 = vmatprep.mubr.msk.f32.mxu0 %vm15300_vm2, %v15299_v7 }
0x5c68   :  { %14236 = vmatprep.subr.mxu0 %v15299_v7 }
0x5d1e   :  { %v6771_v25 = vpop.f32.mrf.mxu0 }
0x5d1f   :  { %v6772_v27 = vadd.f32 %v6771_v25, %v15593_v16 }
0x5d20   :  { %v14198_v49 = vpop.f32.mrf.mxu0 }
0x5d21   :  { %v6775_v33 = vmax.f32 %v6772_v27, 0.0 }
0x5d23   :  { %v6776_v15 = vsel %vm1595_vm9, %v6775_v33, -inf }
0x5d24   :  { %6777 = vmax.xlane.f32.xlu1 %v6776_v15 }
0x5d26   :  { %v6965_v44 = vpop.f32.mrf.mxu0 }
0x5d27   :  { %v6966_v38 = vadd.f32 %v16195_v40, %v6965_v44  ;;  %v6824_v40 = vld [vmem:[#allocation2 + $0xa] sm:$0x3] }
0x5d28   :  { %v14214_v62 = vpop.f32.mrf.mxu0 }
0x5dad   :  { %v6778_v50 = vpop.xlane.xlu1 %6777 }
0x5dae   :  { %v6779_v37 = vsub.f32 %v6775_v33, %v6778_v50 }
0x5db0   :  { %v6780_v11 = vmul.f32 1.442695, %v6779_v37 }
0x5db2   :  { %14992 = vpow2.f32 %v6780_v11 }
0x5dbf   :  { %v14993_v29 = vpop.eup %14992 }
0x5dc0   :  { %v6782_v56 = vsel %vm1595_vm9, %v14993_v29, 0.0 }
0x5dc1   :  { %6783 = vadd.xlane.f32.xlu0 %v6782_v56 }
0x5e4a   :  { %v6784_v36 = vpop.xlane.xlu0 %6783 }
0x5e4b   :  { %14994 = vrcp.f32 %v6784_v36 }
0x5e58   :  { %v14995_v9 = vpop.eup %14994 }
0x5e59   :  { %v6786_v20 = vmul.f32 %v14995_v9, %v14993_v29 }
0x5e5b   :  { %6805 = vperm.xlu1 %14779, %v6786_v20   ;;  %6795 = vperm.xlu0 %14778, %v6786_v20  }
0x5e5f   :  { %14780 = vset.pattern.permute.xlu1 %v15308_v1 }
0x5e60   :  { %6815 = vperm.xlu1 %14780, %v6786_v20  }
0x5e64   :  { %14781 = vset.pattern.permute.xlu1 %v15309_v4 }
0x5e65   :  { %6789 = vperm.xlu1 %14781, %v6786_v20  }
0x5e69   :  { %14782 = vset.pattern.permute.xlu1 %v15306_v58 }
0x5ed6   :  { %v6806_v21 = vpop.permute.xlu1 %6805  ;;  %v6796_v22 = vpop.permute.xlu0 %6795 }
0x5ed7   :  { %v6798_v24 = vmul.f32 %v6796_v22, %v6700_v47  ;;  %v6808_v55 = vmul.f32 %v6806_v21, %v6700_v47 }
0x5ed9   :  { %6800 = vrot.lane.b32.xlu1 %v6798_v24, %s15305_s26 }
0x5edb   :  { %v6816_v32 = vpop.permute.xlu1 %6815 }
0x5edc   :  { %v6818_v54 = vmul.f32 %v6816_v32, %v6700_v47 }
0x5edd   :  { %6810 = vrot.lane.b32.xlu1 %v6808_v55, %s15303_s24 }
0x5ee0   :  { %v6790_v43 = vpop.permute.xlu1 %6789 }
0x5ee1   :  { %6820 = vrot.lane.b32.xlu1 %v6818_v54, %s15310_s28  ;;  %v6792_v19 = vmul.f32 %v6790_v43, %v6700_v47 }
0x5ee5   :  { %6977 = vrot.lane.b32.xlu1 %v6966_v38, %s15301_s1 }
0x5f4b   :  { %v6801_v0 = vpop.permute.xlu1 %6800 }
0x5f4c   :  { %v6803_v48 = vadd.f32 %v6801_v0, %v6792_v19 }
0x5f4f   :  { %v6811_v53 = vpop.permute.xlu1 %6810 }
0x5f50   :  { %v6813_v30 = vadd.f32 %v6811_v53, %v6803_v48 }
0x5f53   :  { %v6821_v14 = vpop.permute.xlu1 %6820 }
0x5f54   :  { %v6823_v60 = vadd.f32 %v6821_v14, %v6813_v30 }
0x5f56   :  { %14202 = vmatmul.mubr.msk.f32.vlgmr.msra.gmra.mxu1 %vm245_vm6, %v6823_v60 }
0x5f57   :  { %14216 = vmatpush3.msra.mxu1 %v16200_v2  ;;  %14223 = vmatprep.mubr.msk.f32.mxu1 %vm15300_vm2, %v15299_v7  ;;  %v6978_v27 = vpop.permute.xlu1 %6977 }
0x5f58   :  { %14217 = vmatprep.subr.mxu1 %v15299_v7 }
0x5f59   :  { %14218 = vmatpush3.msra.mxu1 %v16206_v10 }
0x5f5a   :  { %14219 = vmatprep.subr.mxu1 %v15299_v7 }
0x5f5b   :  { %14220 = vmatpush3.msra.mxu1 %v16210_v28 }
0x5f5c   :  { %14221 = vmatprep.subr.mxu1 %v15299_v7 }
0x5f5d   :  { %14222 = vmatpush3.msra.mxu1 %v16214_v63 }
0x5f5e   :  { %14231 = vmatprep.subr.mxu1 %v15299_v7 }
0x6016   :  { %v6894_v34 = vpop.f32.mrf.mxu1 }
0x6017   :  { %v6898_v2 = vadd.f32 %v6894_v34, %v6824_v40 }
0x6018   :  { %v14203_v6 = vpop.f32.mrf.mxu1 }
0x6019   :  { %v6969_v31 = vadd.f32 %v6966_v38, %v6898_v2 }
0x601b   :  { %v13090_v47 = vmul.f32 -1.442695, %v6969_v31 }
0x601d   :  { %14996 = vpow2.f32 %v13090_v47 }
0x602a   :  { %v14997_v8 = vpop.eup %14996 }
0x602b   :  { %v6973_v25 = vadd.f32 1.0, %v14997_v8 }
0x602d   :  { %14998 = vrcp.f32 %v6973_v25 }
0x603a   :  { %v14999_v10 = vpop.eup %14998 }
0x603b   :  { %v6980_v49 = vmul.f32 %v14999_v10, %v6978_v27  ;;  %v6987_v15 = vsub.f32 1.0, %v14999_v10  ;;  %v6993_v62 = vmul.f32 %v14999_v10, %v16221_v57 }
0x603d   :  { %6982 = vrot.lane.b32.xlu1 %v6980_v49, %s15301_s1 }
0x60af   :  { %v6983_v28 = vpop.permute.xlu1 %6982 }
0x60b0   :  { %v6985_v33 = vadd.f32 %v6983_v28, %v6898_v2 }
0x60b2   :  { %15000 = vtanh.f32 %v6985_v33 }
0x60bf   :  { %v15001_v63 = vpop.eup %15000 }
0x60c0   :  { %6989 = vrot.lane.b32.xlu0 %v15001_v63, %s15302_s23 }
0x6132   :  { %v6990_v44 = vpop.permute.xlu0 %6989 }
0x6133   :  { %v6992_v50 = vmul.f32 %v6990_v44, %v6987_v15 }
0x6135   :  { %v16425_v37 = vadd.f32 %v6993_v62, %v6992_v50 }
0x6137   :  { %6996 = vrot.lane.b32.xlu1 %v16425_v37, %s15302_s23 }
0x61a9   :  { %v16429_v11 = vpop.permute.xlu1 %6996 }
0x61aa   :  { %6999 = vst.msk [vmem:[#allocation3 + $0xa] sm:$0x3] %vm426_vm5, %v16429_v11  ;;  %14224 = vmatmul.mubr.msk.f32.vlgmr.msra.gmra.mxu1 %vm132_vm3, %v16429_v11 }
0x61ab   :  { %14232 = vmatpush3.msra.mxu1 %v16231_v61  ;;  %14233 = vmatprep.mubr.msk.f32.mxu1 %vm15300_vm2, %v15299_v7 }
0x61ac   :  { %14241 = vmatprep.subr.mxu1 %v15299_v7 }
0x626a   :  { %v7068_v57 = vpop.f32.mrf.mxu1 }
0x626b   :  { %v7069_v29 = vadd.f32 %v16237_v52, %v7068_v57 }
0x626c   :  { %v14225_v56 = vpop.f32.mrf.mxu1 }
0x626d   :  { %v7072_v36 = vmax.f32 %v7069_v29, 0.0 }
0x626f   :  { %14229 = vmatmul.mubr.msk.f32.vlgmr.msra.gmra.mxu0 %vm245_vm6, %v7072_v36 }
0x6270   :  { %14237 = vmatpush3.msra.mxu0 %v16241_v23  ;;  %14238 = vmatprep.mubr.msk.f32.mxu0 %vm15300_vm2, %v15299_v7 }
0x6271   :  { %14246 = vmatprep.subr.mxu0 %v15299_v7 }
0x632f   :  { %v7142_v9 = vpop.f32.mrf.mxu0 }
0x6330   :  { %v7143_v20 = vadd.f32 %v16247_v26, %v7142_v9 }
0x6331   :  { %v14230_v21 = vpop.f32.mrf.mxu0 }
0x6332   :  { %7154 = vrot.lane.b32.xlu0 %v7143_v20, %s15303_s24  ;;  %v7146_v22 = vadd.f32 %v7143_v20, %v15442_v3 }
0x6334   :  { %v13093_v52 = vmul.f32 -1.442695, %v7146_v22 }
0x6336   :  { %15002 = vpow2.f32 %v13093_v52 }
0x6343   :  { %v15003_v24 = vpop.eup %15002 }
0x6344   :  { %v7150_v55 = vadd.f32 1.0, %v15003_v24  ;;  %v16483_v24 = vld [vmem:[#allocation5 + $0x98] sm:$0xff] }
0x6346   :  { %15004 = vrcp.f32 %v7150_v55 }
0x6353   :  { %v15005_v32 = vpop.eup %15004 }
0x6354   :  { %v7164_v48 = vsub.f32 1.0, %v15005_v32 }
0x63a4   :  { %v7155_v54 = vpop.permute.xlu0 %7154 }
0x63a5   :  { %v7157_v38 = vmul.f32 %v15005_v32, %v7155_v54 }
0x63a7   :  { %7159 = vrot.lane.b32.xlu1 %v7157_v38, %s15304_s25 }
0x63ab   :  { %7170 = vrot.lane.b32.xlu1 %v7072_v36, %s15298_s16 }
0x6419   :  { %v7160_v43 = vpop.permute.xlu1 %7159 }
0x641a   :  { %v7162_v0 = vadd.f32 %v7160_v43, %v15442_v3 }
0x641c   :  { %15006 = vtanh.f32 %v7162_v0 }
0x641d   :  { %v7171_v53 = vpop.permute.xlu1 %7170 }
0x641e   :  { %v7173_v14 = vmul.f32 %v15005_v32, %v7171_v53 }
0x6429   :  { %v15007_v19 = vpop.eup %15006 }
0x642a   :  { %7166 = vrot.lane.b32.xlu0 %v15007_v19, %s15305_s26 }
0x649c   :  { %v7167_v30 = vpop.permute.xlu0 %7166 }
0x649d   :  { %v7169_v60 = vmul.f32 %v7167_v30, %v7164_v48 }
0x649f   :  { %v7174_v40 = vadd.f32 %v7173_v14, %v7169_v60 }
0x64a1   :  { %7176 = vrot.lane.b32.xlu0 %v7174_v40, %s15305_s26 }
0x6513   :  { %v16453_v34 = vpop.permute.xlu0 %7176 }
0x6514   :  { %14234 = vmatmul.mubr.msk.f32.vlgmr.msra.gmra.mxu1 %vm245_vm6, %v16453_v34 }
0x6515   :  { %14242 = vmatpush3.msra.mxu1 %v16110_v35  ;;  %14243 = vmatprep.mubr.msk.f32.mxu1 %vm15300_vm2, %v15299_v7 }
0x6516   :  { %14251 = vmatprep.subr.mxu1 %v15299_v7 }
0x6518   :  { %14244 = vmatmul.mubr.msk.f32.vlgmr.msra.gmra.mxu1 %vm245_vm6, %v16453_v34 }
0x6519   :  { %14252 = vmatpush3.msra.mxu1 %v16241_v23  ;;  %14253 = vmatprep.mubr.msk.f32.mxu1 %vm15300_vm2, %v15299_v7 }
0x651a   :  { %14261 = vmatprep.subr.mxu1 %v15299_v7 }
0x65d4   :  { %v7246_v2 = vpop.f32.mrf.mxu1 }
0x65d5   :  { %v7247_v6 = vadd.f32 %v16271_v13, %v7246_v2 }
0x65d6   :  { %v14235_v31 = vpop.f32.mrf.mxu1 }
0x65d7   :  { %v7250_v35 = vmax.f32 %v7247_v6, 0.0 }
0x65d8   :  { %v7390_v47 = vpop.f32.mrf.mxu1 }
0x65d9   :  { %v7391_v8 = vadd.f32 %v16247_v26, %v7390_v47  ;;  %14239 = vmatmul.mubr.msk.f32.vlgmr.msra.gmra.mxu0 %vm245_vm6, %v7250_v35 }
0x65da   :  { %v14245_v25 = vpop.f32.mrf.mxu1  ;;  %14247 = vmatpush3.msra.mxu0 %v16231_v61  ;;  %14248 = vmatprep.mubr.msk.f32.mxu0 %vm15300_vm2, %v15299_v7 }
0x65db   :  { %7402 = vrot.lane.b32.xlu1 %v7391_v8, %s15303_s24  ;;  %14256 = vmatprep.subr.mxu0 %v15299_v7 }
0x664d   :  { %v7403_v62 = vpop.permute.xlu1 %7402 }
0x6699   :  { %v7320_v10 = vpop.f32.mrf.mxu0 }
0x669a   :  { %v7321_v27 = vadd.f32 %v16281_v42, %v7320_v10 }
0x669b   :  { %v14240_v49 = vpop.f32.mrf.mxu0 }
0x669c   :  { %v7394_v28 = vadd.f32 %v7391_v8, %v7321_v27 }
0x669e   :  { %v13097_v33 = vmul.f32 -1.442695, %v7394_v28 }
0x66a0   :  { %15008 = vpow2.f32 %v13097_v33 }
0x66ad   :  { %v15009_v63 = vpop.eup %15008 }
0x66ae   :  { %v7398_v15 = vadd.f32 1.0, %v15009_v63 }
0x66b0   :  { %15010 = vrcp.f32 %v7398_v15 }
0x66bd   :  { %v15011_v44 = vpop.eup %15010 }
0x66be   :  { %v7405_v50 = vmul.f32 %v15011_v44, %v7403_v62  ;;  %v7412_v36 = vsub.f32 1.0, %v15011_v44  ;;  %v7418_v20 = vmul.f32 %v15011_v44, %v7174_v40 }
0x66c0   :  { %7407 = vrot.lane.b32.xlu0 %v7405_v50, %s15304_s25 }
0x6732   :  { %v7408_v57 = vpop.permute.xlu0 %7407 }
0x6733   :  { %v7410_v29 = vadd.f32 %v7408_v57, %v7321_v27 }
0x6735   :  { %15012 = vtanh.f32 %v7410_v29 }
0x6742   :  { %v15013_v56 = vpop.eup %15012 }
0x6743   :  { %7414 = vrot.lane.b32.xlu1 %v15013_v56, %s15305_s26 }
0x67b5   :  { %v7415_v9 = vpop.permute.xlu1 %7414 }
0x67b6   :  { %v7417_v21 = vmul.f32 %v7415_v9, %v7412_v36 }
0x67b8   :  { %v16478_v22 = vadd.f32 %v7418_v20, %v7417_v21 }
0x67ba   :  { %7421 = vrot.lane.b32.xlu0 %v16478_v22, %s15305_s26 }
0x682c   :  { %v7422_v52 = vpop.permute.xlu0 %7421 }
0x682d   :  { %14249 = vmatmul.mubr.msk.f32.vlgmr.msra.gmra.mxu0 %vm245_vm6, %v7422_v52 }
0x682e   :  { %14257 = vmatpush3.msra.mxu0 %v16483_v24  ;;  %14258 = vmatprep.mubr.msk.f32.mxu0 %vm15300_vm2, %v15299_v7 }
0x682f   :  { %14266 = vmatprep.subr.mxu0 %v15299_v7 }
0x6831   :  { %14259 = vmatmul.mubr.msk.f32.vlgmr.msra.gmra.mxu0 %vm245_vm6, %v7422_v52 }
0x6832   :  { %14267 = vmatpush3.msra.mxu0 %v16241_v23  ;;  %14268 = vmatprep.mubr.msk.f32.mxu0 %vm15300_vm2, %v15299_v7 }
0x6833   :  { %14276 = vmatprep.subr.mxu0 %v15299_v7 }
0x68ed   :  { %v7491_v55 = vpop.f32.mrf.mxu0 }
0x68ee   :  { %v7492_v32 = vadd.f32 %v16271_v13, %v7491_v55 }
0x68ef   :  { %v14250_v54 = vpop.f32.mrf.mxu0 }
0x68f0   :  { %v7495_v38 = vmax.f32 %v7492_v32, 0.0  ;;  %v7918_v32 = vsel %vm245_vm6, %v16453_v34, %v16478_v22 }
0x68f1   :  { %v7635_v43 = vpop.f32.mrf.mxu0 }
0x68f2   :  { %v7636_v0 = vadd.f32 %v16247_v26, %v7635_v43  ;;  %14254 = vmatmul.mubr.msk.f32.vlgmr.msra.gmra.mxu1 %vm245_vm6, %v7495_v38 }
0x68f3   :  { %v14260_v19 = vpop.f32.mrf.mxu0  ;;  %14262 = vmatpush3.msra.mxu1 %v16231_v61  ;;  %14263 = vmatprep.mubr.msk.f32.mxu1 %vm15300_vm2, %v15299_v7 }
0x68f4   :  { %7647 = vrot.lane.b32.xlu1 %v7636_v0, %s15303_s24  ;;  %14271 = vmatprep.subr.mxu1 %v15299_v7 }
0x6966   :  { %v7648_v6 = vpop.permute.xlu1 %7647 }
0x69b2   :  { %v7565_v23 = vpop.f32.mrf.mxu1 }
0x69b3   :  { %v7566_v53 = vadd.f32 %v16281_v42, %v7565_v23 }
0x69b4   :  { %v14255_v48 = vpop.f32.mrf.mxu1 }
0x69b5   :  { %v7639_v30 = vadd.f32 %v7636_v0, %v7566_v53  ;;  %v16549_v0 = vld [vmem:[#allocation5 + $0x30] sm:$0xff] }
0x69b6   :  { %v16557_v48 = vld [vmem:[#allocation5 + $0x50] sm:$0xff] }
0x69b7   :  { %v13101_v14 = vmul.f32 -1.442695, %v7639_v30  ;;  %v16563_v30 = vld [vmem:[#allocation5 + $0x48] sm:$0xff] }
0x69b9   :  { %15014 = vpow2.f32 %v13101_v14  ;;  %v16571_v14 = vld [vmem:[#allocation5 + $0x38] sm:$0xff] }
0x69c6   :  { %v15015_v60 = vpop.eup %15014 }
0x69c7   :  { %v7643_v40 = vadd.f32 1.0, %v15015_v60 }
0x69c9   :  { %15016 = vrcp.f32 %v7643_v40 }
0x69d6   :  { %v15017_v2 = vpop.eup %15016 }
0x69d7   :  { %v7650_v61 = vmul.f32 %v15017_v2, %v7648_v6  ;;  %v7657_v8 = vsub.f32 1.0, %v15017_v2  ;;  %v7663_v10 = vmul.f32 %v15017_v2, %v16478_v22 }
0x69d9   :  { %7652 = vrot.lane.b32.xlu0 %v7650_v61, %s15304_s25 }
0x6a4b   :  { %v7653_v31 = vpop.permute.xlu0 %7652 }
0x6a4c   :  { %v7655_v35 = vadd.f32 %v7653_v31, %v7566_v53 }
0x6a4e   :  { %15018 = vtanh.f32 %v7655_v35 }
0x6a5b   :  { %v15019_v47 = vpop.eup %15018 }
0x6a5c   :  { %7659 = vrot.lane.b32.xlu1 %v15019_v47, %s15305_s26 }
0x6ace   :  { %v7660_v25 = vpop.permute.xlu1 %7659 }
0x6acf   :  { %v7662_v27 = vmul.f32 %v7660_v25, %v7657_v8 }
0x6ad1   :  { %v7664_v49 = vadd.f32 %v7663_v10, %v7662_v27 }
0x6ad3   :  { %7666 = vrot.lane.b32.xlu0 %v7664_v49, %s15305_s26 }
0x6b45   :  { %v7667_v28 = vpop.permute.xlu0 %7666 }
0x6b46   :  { %14264 = vmatmul.mubr.msk.f32.vlgmr.msra.gmra.mxu1 %vm245_vm6, %v7667_v28 }
0x6b47   :  { %14272 = vmatpush3.msra.mxu1 %v16483_v24  ;;  %14273 = vmatprep.mubr.msk.f32.mxu1 %vm15300_vm2, %v15299_v7 }
0x6b48   :  { %14287 = vmatprep.subr.mxu1 %v15299_v7 }
0x6b4a   :  { %14274 = vmatmul.mubr.msk.f32.vlgmr.msra.gmra.mxu1 %vm245_vm6, %v7667_v28 }
0x6b4b   :  { %14288 = vmatpush3.msra.mxu1 %v16322_v51  ;;  %14295 = vmatprep.mubr.msk.f32.mxu1 %vm15300_vm2, %v15299_v7 }
0x6b4c   :  { %14289 = vmatprep.subr.mxu1 %v15299_v7 }
0x6b4d   :  { %14290 = vmatpush3.msra.mxu1 %v16328_v45 }
0x6b4e   :  { %14291 = vmatprep.subr.mxu1 %v15299_v7 }
0x6b4f   :  { %14292 = vmatpush3.msra.mxu1 %v16332_v46 }
0x6b50   :  { %14293 = vmatprep.subr.mxu1 %v15299_v7 }
0x6b51   :  { %14294 = vmatpush3.msra.mxu1 %v16336_v12 }
0x6b52   :  { %14303 = vmatprep.subr.mxu1 %v15299_v7 }
0x6c06   :  { %v7736_v33 = vpop.f32.mrf.mxu1 }
0x6c07   :  { %v7737_v51 = vadd.f32 %v16271_v13, %v7736_v33 }
0x6c08   :  { %v14265_v63 = vpop.f32.mrf.mxu1 }
0x6c09   :  { %v7740_v15 = vmax.f32 %v7737_v51, 0.0 }
0x6c0a   :  { %v7880_v44 = vpop.f32.mrf.mxu1 }
0x6c0b   :  { %v7881_v62 = vadd.f32 %v16247_v26, %v7880_v44  ;;  %14269 = vmatmul.mubr.msk.f32.vlgmr.msra.gmra.mxu0 %vm245_vm6, %v7740_v15  ;;  %v16590_v44 = vld [vmem:[#allocation5 + $0x60] ss:$0 sm:$0xff] }
0x6c0c   :  { %v14275_v45 = vpop.f32.mrf.mxu1  ;;  %14277 = vmatpush3.msra.mxu0 %v16343_v41  ;;  %14284 = vmatprep.mubr.msk.f32.mxu0 %vm15300_vm2, %v15299_v7 }
0x6c0d   :  { %7892 = vrot.lane.b32.xlu1 %v7881_v62, %s15303_s24  ;;  %14278 = vmatprep.subr.mxu0 %v15299_v7 }
0x6c0e   :  { %14279 = vmatpush3.msra.mxu0 %v16350_v5 }
0x6c0f   :  { %14280 = vmatprep.subr.mxu0 %v15299_v7 }
0x6c10   :  { %14281 = vmatpush3.msra.mxu0 %v16354_v17 }
0x6c11   :  { %14282 = vmatprep.subr.mxu0 %v15299_v7 }
0x6c12   :  { %14283 = vmatpush3.msra.mxu0 %v16358_v18 }
0x6c13   :  { %14298 = vmatprep.subr.mxu0 %v15299_v7 }
0x6c7f   :  { %v7893_v29 = vpop.permute.xlu1 %7892 }
0x6ccb   :  { %v7810_v26 = vpop.f32.mrf.mxu0 }
0x6ccc   :  { %v7811_v13 = vadd.f32 %v16281_v42, %v7810_v26 }
0x6ccd   :  { %v14270_v46 = vpop.f32.mrf.mxu0 }
0x6cce   :  { %v7884_v12 = vadd.f32 %v7881_v62, %v7811_v13 }
0x6cd0   :  { %v13105_v41 = vmul.f32 -1.442695, %v7884_v12 }
0x6cd2   :  { %15020 = vpow2.f32 %v13105_v41 }
0x6cdf   :  { %v15021_v50 = vpop.eup %15020 }
0x6ce0   :  { %v7888_v57 = vadd.f32 1.0, %v15021_v50 }
0x6ce2   :  { %15022 = vrcp.f32 %v7888_v57 }
0x6cef   :  { %v15023_v5 = vpop.eup %15022 }
0x6cf0   :  { %v7895_v56 = vmul.f32 %v15023_v5, %v7893_v29  ;;  %v7902_v42 = vsub.f32 1.0, %v15023_v5  ;;  %v7908_v20 = vmul.f32 %v15023_v5, %v7664_v49 }
0x6cf2   :  { %7897 = vrot.lane.b32.xlu0 %v7895_v56, %s15304_s25  ;;  %v16596_v56 = vld [vmem:[#allocation5 + $0x80] sm:$0xff] }
0x6cf6   :  { %7911 = vrot.lane.b32.xlu0 %v7664_v49, %s15298_s16 }
0x6d64   :  { %v7898_v17 = vpop.permute.xlu0 %7897 }
0x6d65   :  { %v7900_v18 = vadd.f32 %v7898_v17, %v7811_v13  ;;  %v16602_v17 = vld [vmem:[#allocation5 + $0x78] sm:$0xff] }
0x6d67   :  { %15024 = vtanh.f32 %v7900_v18  ;;  %v16606_v18 = vld [vmem:[#allocation5 + $0x70] sm:$0xff] }
0x6d68   :  { %v7912_v55 = vpop.permute.xlu0 %7911 }
0x6d69   :  { %v7919_v54 = vsel %vm1433_vm7, %v7918_v32, %v7912_v55 }
0x6d74   :  { %v15025_v36 = vpop.eup %15024 }
0x6d75   :  { %7904 = vrot.lane.b32.xlu1 %v15025_v36, %s15305_s26  ;;  %v16610_v36 = vld [vmem:[#allocation5 + $0x68] sm:$0xff] }
0x6de7   :  { %v7905_v9 = vpop.permute.xlu1 %7904 }
0x6de8   :  { %v7907_v21 = vmul.f32 %v7905_v9, %v7902_v42  ;;  %v8119_v42 = vld [vmem:[#allocation2 + $0xc] sm:$0x3] }
0x6dea   :  { %v7909_v52 = vadd.f32 %v7908_v20, %v7907_v21 }
0x6dec   :  { %7915 = vrot.lane.b32.xlu1 %v7909_v52, %s15304_s25 }
0x6e5e   :  { %v7916_v38 = vpop.permute.xlu1 %7915 }
0x6e5f   :  { %v7920_v43 = vsel %vm1435_vm8, %v7919_v54, %v7916_v38 }
0x6e60   :  { %7921 = vst.msk [vmem:[#allocation4 + $0xa] sm:$0x3] %vm426_vm5, %v7920_v43  ;;  %14285 = vmatmul.mubr.msk.f32.vlgmr.msra.gmra.mxu0 %vm132_vm3, %v7920_v43 }
0x6e61   :  { %14299 = vmatpush3.msra.mxu0 %v16549_v0  ;;  %14300 = vmatprep.mubr.msk.f32.mxu0 %vm15300_vm2, %v15299_v7 }
0x6e62   :  { %14314 = vmatprep.subr.mxu0 %v15299_v7 }
0x6f20   :  { %v7991_v19 = vpop.f32.mrf.mxu0 }
0x6f21   :  { %v7992_v34 = vadd.f32 %v16380_v39, %v7991_v19  ;;  %v16567_v39 = vld [vmem:[#allocation5 + $0x40] sm:$0xff] }
0x6f22   :  { %v14286_v22 = vpop.f32.mrf.mxu0 }
0x6f23   :  { %v7995_v23 = vmax.f32 %v7992_v34, 0.0 }
0x6f25   :  { %15026 = vtanh.f32 %v7995_v23 }
0x6f32   :  { %v15027_v53 = vpop.eup %15026 }
0x6f33   :  { %14296 = vmatmul.mubr.msk.f32.vlgmr.msra.gmra.mxu1 %vm132_vm3, %v15027_v53 }
0x6f34   :  { %14304 = vmatpush3.msra.mxu1 %v16557_v48  ;;  %14311 = vmatprep.mubr.msk.f32.mxu1 %vm15300_vm2, %v15299_v7 }
0x6f35   :  { %14305 = vmatprep.subr.mxu1 %v15299_v7 }
0x6f36   :  { %14306 = vmatpush3.msra.mxu1 %v16563_v30 }
0x6f37   :  { %14307 = vmatprep.subr.mxu1 %v15299_v7 }
0x6f38   :  { %14308 = vmatpush3.msra.mxu1 %v16567_v39 }
0x6f39   :  { %14309 = vmatprep.subr.mxu1 %v15299_v7 }
0x6f3a   :  { %14310 = vmatpush3.msra.mxu1 %v16571_v14 }
0x6f3b   :  { %14312 = vmatmul.mubr.msk.f32.vlgmr.msra.gmra.mxu1 %vm132_vm3, %v16429_v11  ;;  %14325 = vmatprep.subr.mxu1 %v15299_v7 }
0x6f3c   :  { %14326 = vmatpush3.msra.mxu1 %v16483_v24  ;;  %14327 = vmatprep.mubr.msk.f32.mxu1 %vm15300_vm2, %v15299_v7 }
0x6f3d   :  { %14335 = vmatprep.subr.mxu1 %v15299_v7 }
0x6ff3   :  { %v8066_v60 = vpop.f32.mrf.mxu1 }
0x6ff4   :  { %v8067_v40 = vadd.f32 %v8066_v60, %v15593_v16 }
0x6ff5   :  { %v14297_v2 = vpop.f32.mrf.mxu1 }
0x6ff6   :  { %v8070_v6 = vmax.f32 %v8067_v40, 0.0 }
0x6ff8   :  { %v8071_v61 = vsel %vm1595_vm9, %v8070_v6, -inf }
0x6ff9   :  { %8072 = vmax.xlane.f32.xlu0 %v8071_v61 }
0x6ffb   :  { %v8260_v31 = vpop.f32.mrf.mxu1 }
0x6ffc   :  { %v8261_v62 = vadd.f32 %v16590_v44, %v8260_v31  ;;  %v16627_v31 = vld [vmem:[#allocation5 + $0xb0] sm:$0xff] }
0x6ffd   :  { %v14313_v35 = vpop.f32.mrf.mxu1 }
0x6ffe   :  { %v16633_v35 = vld [vmem:[#allocation5 + $0x88] ss:$0 sm:$0xff] }
0x7082   :  { %v8073_v11 = vpop.xlane.xlu0 %8072 }
0x7083   :  { %v8074_v47 = vsub.f32 %v8070_v6, %v8073_v11 }
0x7085   :  { %v8075_v8 = vmul.f32 1.442695, %v8074_v47 }
0x7087   :  { %15028 = vpow2.f32 %v8075_v8 }
0x7094   :  { %v15029_v25 = vpop.eup %15028 }
0x7095   :  { %v8077_v10 = vsel %vm1595_vm9, %v15029_v25, 0.0 }
0x7096   :  { %8078 = vadd.xlane.f32.xlu1 %v8077_v10 }
0x711f   :  { %v8079_v27 = vpop.xlane.xlu1 %8078 }
0x7120   :  { %15030 = vrcp.f32 %v8079_v27  ;;  %v16643_v27 = vld [vmem:[#allocation5 + $0xa8] ss:$0 sm:$0xff] }
0x712d   :  { %v15031_v49 = vpop.eup %15030 }
0x712e   :  { %v8081_v28 = vmul.f32 %v15031_v49, %v15029_v25  ;;  %v16637_v25 = vld [vmem:[#allocation5 + $0x90] sm:$0xff] }
0x7130   :  { %8100 = vperm.xlu1 %14782, %v8081_v28   ;;  %8090 = vperm.xlu0 %14778, %v8081_v28  }
0x7134   :  { %14784 = vset.pattern.permute.xlu1 %v15309_v4  ;;  %14783 = vset.pattern.permute.xlu0 %v15308_v1 }
0x7135   :  { %8084 = vperm.xlu1 %14784, %v8081_v28   ;;  %8110 = vperm.xlu0 %14783, %v8081_v28  }
0x7139   :  { %14786 = vset.pattern.permute.xlu1 %v15306_v58  ;;  %14785 = vset.pattern.permute.xlu0 %v15307_v59 }
0x71ab   :  { %v8101_v33 = vpop.permute.xlu1 %8100  ;;  %v8091_v51 = vpop.permute.xlu0 %8090 }
0x71ac   :  { %v8103_v63 = vmul.f32 %v8101_v33, %v7995_v23  ;;  %v8093_v15 = vmul.f32 %v8091_v51, %v7995_v23 }
0x71ae   :  { %8105 = vrot.lane.b32.xlu0 %v8103_v63, %s15303_s24  ;;  %8095 = vrot.lane.b32.xlu1 %v8093_v15, %s15305_s26 }
0x71b0   :  { %v8111_v45 = vpop.permute.xlu0 %8110  ;;  %v8085_v13 = vpop.permute.xlu1 %8084 }
0x71b1   :  { %v8113_v26 = vmul.f32 %v8111_v45, %v7995_v23  ;;  %v8087_v46 = vmul.f32 %v8085_v13, %v7995_v23 }
0x71b2   :  { %8272 = vrot.lane.b32.xlu0 %v8261_v62, %s15301_s1 }
0x71b3   :  { %8115 = vrot.lane.b32.xlu1 %v8113_v26, %s15310_s28 }
0x7220   :  { %v8096_v12 = vpop.permute.xlu1 %8095  ;;  %v8106_v50 = vpop.permute.xlu0 %8105 }
0x7221   :  { %v8098_v41 = vadd.f32 %v8096_v12, %v8087_v46 }
0x7223   :  { %v8108_v57 = vadd.f32 %v8106_v50, %v8098_v41 }
0x7224   :  { %v8273_v43 = vpop.permute.xlu0 %8272 }
0x7225   :  { %v8116_v5 = vpop.permute.xlu1 %8115 }
0x7226   :  { %v8118_v29 = vadd.f32 %v8116_v5, %v8108_v57 }
0x7228   :  { %14301 = vmatmul.mubr.msk.f32.vlgmr.msra.gmra.mxu0 %vm245_vm6, %v8118_v29 }
0x7229   :  { %14315 = vmatpush3.msra.mxu0 %v16596_v56  ;;  %14322 = vmatprep.mubr.msk.f32.mxu0 %vm15300_vm2, %v15299_v7 }
0x722a   :  { %14316 = vmatprep.subr.mxu0 %v15299_v7 }
0x722b   :  { %14317 = vmatpush3.msra.mxu0 %v16602_v17 }
0x722c   :  { %14318 = vmatprep.subr.mxu0 %v15299_v7 }
0x722d   :  { %14319 = vmatpush3.msra.mxu0 %v16606_v18 }
0x722e   :  { %14320 = vmatprep.subr.mxu0 %v15299_v7 }
0x722f   :  { %14321 = vmatpush3.msra.mxu0 %v16610_v36 }
0x7230   :  { %14330 = vmatprep.subr.mxu0 %v15299_v7 }
0x72e8   :  { %v8189_v9 = vpop.f32.mrf.mxu0 }
0x72e9   :  { %v8193_v20 = vadd.f32 %v8189_v9, %v8119_v42 }
0x72ea   :  { %v14302_v21 = vpop.f32.mrf.mxu0 }
0x72eb   :  { %v8264_v52 = vadd.f32 %v8261_v62, %v8193_v20  ;;  %v16667_v21 = vld [vmem:[#allocation5 + $0xb8] ss:$0 sm:$0xff] }
0x72ed   :  { %v13110_v55 = vmul.f32 -1.442695, %v8264_v52 }
0x72ef   :  { %15032 = vpow2.f32 %v13110_v55 }
0x72fc   :  { %v15033_v32 = vpop.eup %15032 }
0x72fd   :  { %v8268_v54 = vadd.f32 1.0, %v15033_v32 }
0x72ff   :  { %15034 = vrcp.f32 %v8268_v54 }
0x730c   :  { %v15035_v38 = vpop.eup %15034 }
0x730d   :  { %v8275_v19 = vmul.f32 %v15035_v38, %v8273_v43  ;;  %v8282_v53 = vsub.f32 1.0, %v15035_v38  ;;  %v8288_v40 = vmul.f32 %v15035_v38, %v16425_v37 }
0x730f   :  { %8277 = vrot.lane.b32.xlu1 %v8275_v19, %s15301_s1 }
0x7381   :  { %v8278_v34 = vpop.permute.xlu1 %8277 }
0x7382   :  { %v8280_v22 = vadd.f32 %v8278_v34, %v8193_v20  ;;  %v16677_v34 = vld [vmem:[#allocation5 + $0xa0] ss:$0 sm:$0xff] }
0x7384   :  { %15036 = vtanh.f32 %v8280_v22 }
0x7391   :  { %v15037_v23 = vpop.eup %15036 }
0x7392   :  { %8284 = vrot.lane.b32.xlu0 %v15037_v23, %s15302_s23 }
0x7404   :  { %v8285_v60 = vpop.permute.xlu0 %8284 }
0x7405   :  { %v8287_v2 = vmul.f32 %v8285_v60, %v8282_v53 }
0x7407   :  { %v16617_v6 = vadd.f32 %v8288_v40, %v8287_v2 }
0x7409   :  { %8291 = vrot.lane.b32.xlu1 %v16617_v6, %s15302_s23 }
0x747b   :  { %v16621_v61 = vpop.permute.xlu1 %8291 }
0x747c   :  { %8294 = vst.msk [vmem:[#allocation3 + $0xc] sm:$0x3] %vm426_vm5, %v16621_v61  ;;  %14323 = vmatmul.mubr.msk.f32.vlgmr.msra.gmra.mxu0 %vm132_vm3, %v16621_v61 }
0x747d   :  { %14331 = vmatpush3.msra.mxu0 %v16627_v31  ;;  %14332 = vmatprep.mubr.msk.f32.mxu0 %vm15300_vm2, %v15299_v7 }
0x747e   :  { %14340 = vmatprep.subr.mxu0 %v15299_v7 }
0x753c   :  { %v8363_v37 = vpop.f32.mrf.mxu0 }
0x753d   :  { %v8364_v11 = vadd.f32 %v16633_v35, %v8363_v37 }
0x753e   :  { %v14324_v47 = vpop.f32.mrf.mxu0 }
0x753f   :  { %v8367_v8 = vmax.f32 %v8364_v11, 0.0 }
0x7541   :  { %14328 = vmatmul.mubr.msk.f32.vlgmr.msra.gmra.mxu1 %vm245_vm6, %v8367_v8 }
0x7542   :  { %14336 = vmatpush3.msra.mxu1 %v16637_v25  ;;  %14337 = vmatprep.mubr.msk.f32.mxu1 %vm15300_vm2, %v15299_v7 }
0x7543   :  { %14345 = vmatprep.subr.mxu1 %v15299_v7 }
0x7601   :  { %v8437_v10 = vpop.f32.mrf.mxu1 }
0x7602   :  { %v8438_v49 = vadd.f32 %v16643_v27, %v8437_v10 }
0x7603   :  { %v14329_v28 = vpop.f32.mrf.mxu1 }
0x7604   :  { %8449 = vrot.lane.b32.xlu0 %v8438_v49, %s15303_s24  ;;  %v8441_v33 = vadd.f32 %v8438_v49, %v15442_v3 }
0x7606   :  { %v13113_v51 = vmul.f32 -1.442695, %v8441_v33 }
0x7608   :  { %15038 = vpow2.f32 %v13113_v51 }
0x7615   :  { %v15039_v63 = vpop.eup %15038 }
0x7616   :  { %v8445_v15 = vadd.f32 1.0, %v15039_v63 }
0x7618   :  { %15040 = vrcp.f32 %v8445_v15 }
0x7625   :  { %v15041_v62 = vpop.eup %15040 }
0x7626   :  { %v8459_v50 = vsub.f32 1.0, %v15041_v62 }
0x7676   :  { %v8450_v45 = vpop.permute.xlu0 %8449 }
0x7677   :  { %v8452_v26 = vmul.f32 %v15041_v62, %v8450_v45 }
0x7679   :  { %8454 = vrot.lane.b32.xlu1 %v8452_v26, %s15304_s25 }
0x767d   :  { %8465 = vrot.lane.b32.xlu1 %v8367_v8, %s15298_s16 }
0x76eb   :  { %v8455_v13 = vpop.permute.xlu1 %8454 }
0x76ec   :  { %v8457_v46 = vadd.f32 %v8455_v13, %v15442_v3 }
0x76ee   :  { %15042 = vtanh.f32 %v8457_v46 }
0x76ef   :  { %v8466_v41 = vpop.permute.xlu1 %8465 }
0x76f0   :  { %v8468_v5 = vmul.f32 %v15041_v62, %v8466_v41 }
0x76fb   :  { %v15043_v12 = vpop.eup %15042 }
0x76fc   :  { %8461 = vrot.lane.b32.xlu0 %v15043_v12, %s15305_s26 }
0x776e   :  { %v8462_v57 = vpop.permute.xlu0 %8461 }
0x776f   :  { %v8464_v29 = vmul.f32 %v8462_v57, %v8459_v50 }
0x7771   :  { %v8469_v42 = vadd.f32 %v8468_v5, %v8464_v29 }
0x7773   :  { %8471 = vrot.lane.b32.xlu0 %v8469_v42, %s15305_s26 }
0x77e5   :  { %v16653_v9 = vpop.permute.xlu0 %8471 }
0x77e6   :  { %14333 = vmatmul.mubr.msk.f32.vlgmr.msra.gmra.mxu0 %vm245_vm6, %v16653_v9 }
0x77e7   :  { %14341 = vmatpush3.msra.mxu0 %v16483_v24  ;;  %14342 = vmatprep.mubr.msk.f32.mxu0 %vm15300_vm2, %v15299_v7 }
0x77e8   :  { %14350 = vmatprep.subr.mxu0 %v15299_v7 }
0x77ea   :  { %14343 = vmatmul.mubr.msk.f32.vlgmr.msra.gmra.mxu0 %vm245_vm6, %v16653_v9 }
0x77eb   :  { %14351 = vmatpush3.msra.mxu0 %v16637_v25  ;;  %14352 = vmatprep.mubr.msk.f32.mxu0 %vm15300_vm2, %v15299_v7 }
0x77ec   :  { %14360 = vmatprep.subr.mxu0 %v15299_v7 }
0x78a6   :  { %v8541_v20 = vpop.f32.mrf.mxu0 }
0x78a7   :  { %v8542_v52 = vadd.f32 %v16667_v21, %v8541_v20 }
0x78a8   :  { %v14334_v55 = vpop.f32.mrf.mxu0 }
0x78a9   :  { %v8545_v32 = vmax.f32 %v8542_v52, 0.0 }
0x78aa   :  { %v8685_v54 = vpop.f32.mrf.mxu0 }
0x78ab   :  { %v8686_v38 = vadd.f32 %v16643_v27, %v8685_v54  ;;  %14338 = vmatmul.mubr.msk.f32.vlgmr.msra.gmra.mxu1 %vm245_vm6, %v8545_v32 }
0x78ac   :  { %v14344_v43 = vpop.f32.mrf.mxu0  ;;  %14346 = vmatpush3.msra.mxu1 %v16627_v31  ;;  %14347 = vmatprep.mubr.msk.f32.mxu1 %vm15300_vm2, %v15299_v7 }
0x78ad   :  { %8697 = vrot.lane.b32.xlu1 %v8686_v38, %s15303_s24  ;;  %14355 = vmatprep.subr.mxu1 %v15299_v7 }
0x791f   :  { %v8698_v11 = vpop.permute.xlu1 %8697 }
0x796b   :  { %v8615_v19 = vpop.f32.mrf.mxu1 }
0x796c   :  { %v8616_v22 = vadd.f32 %v16677_v34, %v8615_v19 }
0x796d   :  { %v14339_v23 = vpop.f32.mrf.mxu1 }
0x796e   :  { %v8689_v53 = vadd.f32 %v8686_v38, %v8616_v22 }
0x7970   :  { %v13117_v60 = vmul.f32 -1.442695, %v8689_v53 }
0x7972   :  { %15044 = vpow2.f32 %v13117_v60 }
0x797f   :  { %v15045_v40 = vpop.eup %15044 }
0x7980   :  { %v8693_v2 = vadd.f32 1.0, %v15045_v40 }
0x7982   :  { %15046 = vrcp.f32 %v8693_v2 }
0x798f   :  { %v15047_v37 = vpop.eup %15046 }
0x7990   :  { %v8700_v47 = vmul.f32 %v15047_v37, %v8698_v11  ;;  %v8707_v28 = vsub.f32 1.0, %v15047_v37  ;;  %v8713_v51 = vmul.f32 %v15047_v37, %v8469_v42  ;;  %v15259_v11 = vld [vmem:[#allocation5 + $0x100] sm:$0xff] }
0x7992   :  { %8702 = vrot.lane.b32.xlu0 %v8700_v47, %s15304_s25  ;;  %v15260_v47 = vld [vmem:[#allocation5 + $0xf8] sm:$0xff] }
0x7a04   :  { %v8703_v8 = vpop.permute.xlu0 %8702 }
0x7a05   :  { %v8705_v10 = vadd.f32 %v8703_v8, %v8616_v22  ;;  %v15261_v8 = vld [vmem:[#allocation5 + $0xf0] sm:$0xff] }
0x7a07   :  { %15048 = vtanh.f32 %v8705_v10  ;;  %v15262_v10 = vld [vmem:[#allocation5 + $0xe8] sm:$0xff] }
0x7a14   :  { %v15049_v49 = vpop.eup %15048 }
0x7a15   :  { %8709 = vrot.lane.b32.xlu1 %v15049_v49, %s15305_s26 }
0x7a87   :  { %v8710_v33 = vpop.permute.xlu1 %8709 }
0x7a88   :  { %v8712_v63 = vmul.f32 %v8710_v33, %v8707_v28 }
0x7a8a   :  { %v16682_v15 = vadd.f32 %v8713_v51, %v8712_v63 }
0x7a8c   :  { %8716 = vrot.lane.b32.xlu0 %v16682_v15, %s15305_s26 }
0x7afe   :  { %v8717_v62 = vpop.permute.xlu0 %8716 }
0x7aff   :  { %14348 = vmatmul.mubr.msk.f32.vlgmr.msra.gmra.mxu1 %vm245_vm6, %v8717_v62 }
0x7b00   :  { %14356 = vmatpush3.msra.mxu1 %v16483_v24  ;;  %14357 = vmatprep.mubr.msk.f32.mxu1 %vm15300_vm2, %v15299_v7 }
0x7b01   :  { %14365 = vmatprep.subr.mxu1 %v15299_v7 }
0x7b03   :  { %14358 = vmatmul.mubr.msk.f32.vlgmr.msra.gmra.mxu1 %vm245_vm6, %v8717_v62 }
0x7b04   :  { %14366 = vmatpush3.msra.mxu1 %v16637_v25  ;;  %14367 = vmatprep.mubr.msk.f32.mxu1 %vm15300_vm2, %v15299_v7 }
0x7b05   :  { %14375 = vmatprep.subr.mxu1 %v15299_v7 }
0x7bbf   :  { %v8786_v45 = vpop.f32.mrf.mxu1 }
0x7bc0   :  { %v8787_v26 = vadd.f32 %v16667_v21, %v8786_v45 }
0x7bc1   :  { %v14349_v13 = vpop.f32.mrf.mxu1 }
0x7bc2   :  { %v8790_v46 = vmax.f32 %v8787_v26, 0.0  ;;  %v15263_v26 = vld [vmem:[#allocation5 + $0xd8] sm:$0xff]  ;;  %v15264_v13 = vld [vmem:[#allocation5 + $0xd0] sm:$0xff] }
0x7bc3   :  { %v8930_v12 = vpop.f32.mrf.mxu1 }
0x7bc4   :  { %v8931_v41 = vadd.f32 %v16643_v27, %v8930_v12  ;;  %14353 = vmatmul.mubr.msk.f32.vlgmr.msra.gmra.mxu0 %vm245_vm6, %v8790_v46  ;;  %v15265_v46 = vld [vmem:[#allocation5 + $0xc8] sm:$0xff]  ;;  %v15266_v12 = vld [vmem:[#allocation5 + $0xc0] sm:$0xff] }
0x7bc5   :  { %v14359_v50 = vpop.f32.mrf.mxu1  ;;  %14361 = vmatpush3.msra.mxu0 %v16627_v31  ;;  %14362 = vmatprep.mubr.msk.f32.mxu0 %vm15300_vm2, %v15299_v7 }
0x7bc6   :  { %8942 = vrot.lane.b32.xlu1 %v8931_v41, %s15303_s24  ;;  %14370 = vmatprep.subr.mxu0 %v15299_v7 }
0x7c38   :  { %v8943_v54 = vpop.permute.xlu1 %8942 }
0x7c84   :  { %v8860_v57 = vpop.f32.mrf.mxu0 }
0x7c85   :  { %v8861_v5 = vadd.f32 %v16677_v34, %v8860_v57 }
0x7c86   :  { %v14354_v29 = vpop.f32.mrf.mxu0 }
0x7c87   :  { %v8934_v42 = vadd.f32 %v8931_v41, %v8861_v5 }
0x7c89   :  { %v13121_v20 = vmul.f32 -1.442695, %v8934_v42 }
0x7c8b   :  { %15050 = vpow2.f32 %v13121_v20 }
0x7c98   :  { %v15051_v52 = vpop.eup %15050 }
0x7c99   :  { %v8938_v55 = vadd.f32 1.0, %v15051_v52 }
0x7c9b   :  { %15052 = vrcp.f32 %v8938_v55 }
0x7ca8   :  { %v15053_v32 = vpop.eup %15052 }
0x7ca9   :  { %v8945_v38 = vmul.f32 %v15053_v32, %v8943_v54  ;;  %v8952_v23 = vsub.f32 1.0, %v15053_v32  ;;  %v8958_v60 = vmul.f32 %v15053_v32, %v16682_v15 }
0x7cab   :  { %8947 = vrot.lane.b32.xlu0 %v8945_v38, %s15304_s25 }
0x7d1d   :  { %v8948_v43 = vpop.permute.xlu0 %8947 }
0x7d1e   :  { %v8950_v19 = vadd.f32 %v8948_v43, %v8861_v5 }
0x7d20   :  { %15054 = vtanh.f32 %v8950_v19 }
0x7d2d   :  { %v15055_v22 = vpop.eup %15054 }
0x7d2e   :  { %8954 = vrot.lane.b32.xlu1 %v15055_v22, %s15305_s26 }
0x7da0   :  { %v8955_v53 = vpop.permute.xlu1 %8954 }
0x7da1   :  { %v8957_v40 = vmul.f32 %v8955_v53, %v8952_v23 }
0x7da3   :  { %v16708_v2 = vadd.f32 %v8958_v60, %v8957_v40 }
0x7da5   :  { %8961 = vrot.lane.b32.xlu0 %v16708_v2, %s15305_s26 }
0x7e17   :  { %v8962_v37 = vpop.permute.xlu0 %8961 }
0x7e18   :  { %14363 = vmatmul.mubr.msk.f32.vlgmr.msra.gmra.mxu0 %vm245_vm6, %v8962_v37 }
0x7e19   :  { %14371 = vmatpush3.msra.mxu0 %v16483_v24  ;;  %14372 = vmatprep.mubr.msk.f32.mxu0 %vm15300_vm2, %v15299_v7 }
0x7e1a   :  { %14386 = vmatprep.subr.mxu0 %v15299_v7 }
0x7e1c   :  { %14373 = vmatmul.mubr.msk.f32.vlgmr.msra.gmra.mxu0 %vm245_vm6, %v8962_v37  ;;  %v9213_v37 = vsel %vm245_vm6, %v16653_v9, %v16682_v15 }
0x7e1d   :  { %14387 = vmatpush3.msra.mxu0 %v15259_v11  ;;  %14394 = vmatprep.mubr.msk.f32.mxu0 %vm15300_vm2, %v15299_v7 }
0x7e1e   :  { %14388 = vmatprep.subr.mxu0 %v15299_v7 }
0x7e1f   :  { %14389 = vmatpush3.msra.mxu0 %v15260_v47 }
0x7e20   :  { %14390 = vmatprep.subr.mxu0 %v15299_v7 }
0x7e21   :  { %14391 = vmatpush3.msra.mxu0 %v15261_v8 }
0x7e22   :  { %14392 = vmatprep.subr.mxu0 %v15299_v7 }
0x7e23   :  { %14393 = vmatpush3.msra.mxu0 %v15262_v10  ;;  %v15267_v10 = vld [vmem:[#allocation5 + $0xe0] ss:$0 sm:$0xff] }
0x7e24   :  { %14402 = vmatprep.subr.mxu0 %v15299_v7 }
0x7ed8   :  { %v9031_v49 = vpop.f32.mrf.mxu0 }
0x7ed9   :  { %v9032_v28 = vadd.f32 %v16667_v21, %v9031_v49 }
0x7eda   :  { %v14364_v33 = vpop.f32.mrf.mxu0 }
0x7edb   :  { %v9035_v51 = vmax.f32 %v9032_v28, 0.0 }
0x7edc   :  { %v9175_v63 = vpop.f32.mrf.mxu0 }
0x7edd   :  { %v9176_v62 = vadd.f32 %v16643_v27, %v9175_v63  ;;  %14368 = vmatmul.mubr.msk.f32.vlgmr.msra.gmra.mxu1 %vm245_vm6, %v9035_v51 }
0x7ede   :  { %v14374_v45 = vpop.f32.mrf.mxu0  ;;  %14376 = vmatpush3.msra.mxu1 %v15263_v26  ;;  %14383 = vmatprep.mubr.msk.f32.mxu1 %vm15300_vm2, %v15299_v7 }
0x7edf   :  { %9187 = vrot.lane.b32.xlu1 %v9176_v62, %s15303_s24  ;;  %14377 = vmatprep.subr.mxu1 %v15299_v7 }
0x7ee0   :  { %14378 = vmatpush3.msra.mxu1 %v15264_v13 }
0x7ee1   :  { %14379 = vmatprep.subr.mxu1 %v15299_v7 }
0x7ee2   :  { %14380 = vmatpush3.msra.mxu1 %v15265_v46 }
0x7ee3   :  { %14381 = vmatprep.subr.mxu1 %v15299_v7 }
0x7ee4   :  { %14382 = vmatpush3.msra.mxu1 %v15266_v12 }
0x7ee5   :  { %14397 = vmatprep.subr.mxu1 %v15299_v7 }
0x7f51   :  { %v9188_v55 = vpop.permute.xlu1 %9187 }
0x7f9d   :  { %v9105_v41 = vpop.f32.mrf.mxu1 }
0x7f9e   :  { %v9106_v50 = vadd.f32 %v16677_v34, %v9105_v41 }
0x7f9f   :  { %v14369_v57 = vpop.f32.mrf.mxu1 }
0x7fa0   :  { %v9179_v5 = vadd.f32 %v9176_v62, %v9106_v50 }
0x7fa2   :  { %v13125_v29 = vmul.f32 -1.442695, %v9179_v5 }
0x7fa4   :  { %15056 = vpow2.f32 %v13125_v29 }
0x7fb1   :  { %v15057_v42 = vpop.eup %15056 }
0x7fb2   :  { %v9183_v20 = vadd.f32 1.0, %v15057_v42 }
0x7fb4   :  { %15058 = vrcp.f32 %v9183_v20 }
0x7fc1   :  { %v15059_v52 = vpop.eup %15058 }
0x7fc2   :  { %v9190_v32 = vmul.f32 %v15059_v52, %v9188_v55  ;;  %v9197_v19 = vsub.f32 1.0, %v15059_v52  ;;  %v9203_v23 = vmul.f32 %v15059_v52, %v16708_v2 }
0x7fc4   :  { %9192 = vrot.lane.b32.xlu0 %v9190_v32, %s15304_s25 }
0x7fc8   :  { %9206 = vrot.lane.b32.xlu0 %v16708_v2, %s15298_s16 }
0x8036   :  { %v9193_v54 = vpop.permute.xlu0 %9192 }
0x8037   :  { %v9195_v38 = vadd.f32 %v9193_v54, %v9106_v50 }
0x8039   :  { %15060 = vtanh.f32 %v9195_v38 }
0x803a   :  { %v9207_v40 = vpop.permute.xlu0 %9206 }
0x803b   :  { %v9214_v11 = vsel %vm1433_vm7, %v9213_v37, %v9207_v40 }
0x8046   :  { %v15061_v43 = vpop.eup %15060 }
0x8047   :  { %9199 = vrot.lane.b32.xlu1 %v15061_v43, %s15305_s26  ;;  %v9414_v43 = vld [vmem:[#allocation2 + $0xe] sm:$0x3] }
0x80b9   :  { %v9200_v22 = vpop.permute.xlu1 %9199 }
0x80ba   :  { %v9202_v53 = vmul.f32 %v9200_v22, %v9197_v19 }
0x80bc   :  { %v9204_v60 = vadd.f32 %v9203_v23, %v9202_v53 }
0x80be   :  { %9210 = vrot.lane.b32.xlu1 %v9204_v60, %s15304_s25 }
0x8130   :  { %v9211_v47 = vpop.permute.xlu1 %9210 }
0x8131   :  { %v9215_v8 = vsel %vm1435_vm8, %v9214_v11, %v9211_v47 }
0x8132   :  { %9216 = vst.msk [vmem:[#allocation4 + $0xc] sm:$0x3] %vm426_vm5, %v9215_v8  ;;  %14384 = vmatmul.mubr.msk.f32.vlgmr.msra.gmra.mxu1 %vm132_vm3, %v9215_v8 }
0x8133   :  { %14398 = vmatpush3.msra.mxu1 %v16549_v0  ;;  %14399 = vmatprep.mubr.msk.f32.mxu1 %vm15300_vm2, %v15299_v7 }
0x8134   :  { %14413 = vmatprep.subr.mxu1 %v15299_v7 }
0x81f2   :  { %v9286_v2 = vpop.f32.mrf.mxu1 }
0x81f3   :  { %v9287_v49 = vadd.f32 %v15267_v10, %v9286_v2 }
0x81f4   :  { %v14385_v9 = vpop.f32.mrf.mxu1 }
0x81f5   :  { %v9290_v15 = vmax.f32 %v9287_v49, 0.0 }
0x81f7   :  { %15062 = vtanh.f32 %v9290_v15 }
0x8204   :  { %v15063_v28 = vpop.eup %15062 }
0x8205   :  { %14395 = vmatmul.mubr.msk.f32.vlgmr.msra.gmra.mxu0 %vm132_vm3, %v15063_v28 }
0x8206   :  { %14403 = vmatpush3.msra.mxu0 %v16557_v48  ;;  %14410 = vmatprep.mubr.msk.f32.mxu0 %vm15300_vm2, %v15299_v7 }
0x8207   :  { %14404 = vmatprep.subr.mxu0 %v15299_v7 }
0x8208   :  { %14405 = vmatpush3.msra.mxu0 %v16563_v30 }
0x8209   :  { %14406 = vmatprep.subr.mxu0 %v15299_v7 }
0x820a   :  { %14407 = vmatpush3.msra.mxu0 %v16567_v39 }
0x820b   :  { %14408 = vmatprep.subr.mxu0 %v15299_v7 }
0x820c   :  { %14409 = vmatpush3.msra.mxu0 %v16571_v14 }
0x820d   :  { %14411 = vmatmul.mubr.msk.f32.vlgmr.msra.gmra.mxu0 %vm132_vm3, %v16621_v61  ;;  %14424 = vmatprep.subr.mxu0 %v15299_v7 }
0x820e   :  { %14425 = vmatpush3.msra.mxu0 %v16483_v24  ;;  %14426 = vmatprep.mubr.msk.f32.mxu0 %vm15300_vm2, %v15299_v7 }
0x820f   :  { %14434 = vmatprep.subr.mxu0 %v15299_v7 }
0x82c5   :  { %v9361_v0 = vpop.f32.mrf.mxu0 }
0x82c6   :  { %v9362_v48 = vadd.f32 %v9361_v0, %v15593_v16 }
0x82c7   :  { %v14396_v30 = vpop.f32.mrf.mxu0 }
0x82c8   :  { %v9365_v39 = vmax.f32 %v9362_v48, 0.0 }
0x82ca   :  { %v9366_v33 = vsel %vm1595_vm9, %v9365_v39, -inf }
0x82cb   :  { %9367 = vmax.xlane.f32.xlu0 %v9366_v33 }
0x82cd   :  { %v9555_v14 = vpop.f32.mrf.mxu0 }
0x82ce   :  { %v9556_v16 = vadd.f32 %v16590_v44, %v9555_v14 }
0x82cf   :  { %v14412_v51 = vpop.f32.mrf.mxu0 }
0x8354   :  { %v9368_v61 = vpop.xlane.xlu0 %9367 }
0x8355   :  { %v9369_v63 = vsub.f32 %v9365_v39, %v9368_v61 }
0x8357   :  { %v9370_v62 = vmul.f32 1.442695, %v9369_v63 }
0x8359   :  { %15064 = vpow2.f32 %v9370_v62 }
0x8366   :  { %v15065_v24 = vpop.eup %15064 }
0x8367   :  { %v9372_v45 = vsel %vm1595_vm9, %v15065_v24, 0.0 }
0x8368   :  { %9373 = vadd.xlane.f32.xlu1 %v9372_v45 }
0x83f1   :  { %v9374_v26 = vpop.xlane.xlu1 %9373 }
0x83f2   :  { %15066 = vrcp.f32 %v9374_v26 }
0x83ff   :  { %v15067_v13 = vpop.eup %15066 }
0x8400   :  { %v9376_v46 = vmul.f32 %v15067_v13, %v15065_v24 }
0x8402   :  { %9395 = vperm.xlu1 %14786, %v9376_v46   ;;  %9385 = vperm.xlu0 %14785, %v9376_v46  }
0x8406   :  { %14787 = vset.pattern.permute.xlu1 %v15308_v1  ;;  %9567 = vrot.lane.b32.xlu0 %v9556_v16, %s15301_s1 }
0x8407   :  { %9405 = vperm.xlu1 %14787, %v9376_v46  }
0x840b   :  { %14788 = vset.pattern.permute.xlu1 %v15309_v4 }
0x840c   :  { %9379 = vperm.xlu1 %14788, %v9376_v46  }
0x8410   :  { %14789 = vset.pattern.permute.xlu1 %v15306_v58 }
0x847d   :  { %v9396_v12 = vpop.permute.xlu1 %9395  ;;  %v9386_v41 = vpop.permute.xlu0 %9385 }
0x847e   :  { %v9388_v50 = vmul.f32 %v9386_v41, %v9290_v15  ;;  %v9398_v57 = vmul.f32 %v9396_v12, %v9290_v15 }
0x8480   :  { %9390 = vrot.lane.b32.xlu1 %v9388_v50, %s15305_s26 }
0x8481   :  { %v9568_v37 = vpop.permute.xlu0 %9567 }
0x8482   :  { %v9406_v5 = vpop.permute.xlu1 %9405 }
0x8483   :  { %v9408_v44 = vmul.f32 %v9406_v5, %v9290_v15 }
0x8484   :  { %9400 = vrot.lane.b32.xlu1 %v9398_v57, %s15303_s24 }
0x8487   :  { %v9380_v29 = vpop.permute.xlu1 %9379 }
0x8488   :  { %9410 = vrot.lane.b32.xlu1 %v9408_v44, %s15310_s28  ;;  %v9382_v20 = vmul.f32 %v9380_v29, %v9290_v15  ;;  %v16819_v44 = vld [vmem:[#allocation5 + $0x98] sm:$0xff] }
0x84f2   :  { %v9391_v42 = vpop.permute.xlu1 %9390 }
0x84f3   :  { %v9393_v55 = vadd.f32 %v9391_v42, %v9382_v20 }
0x84f6   :  { %v9401_v52 = vpop.permute.xlu1 %9400 }
0x84f7   :  { %v9403_v32 = vadd.f32 %v9401_v52, %v9393_v55 }
0x84fa   :  { %v9411_v54 = vpop.permute.xlu1 %9410 }
0x84fb   :  { %v9413_v38 = vadd.f32 %v9411_v54, %v9403_v32 }
0x84fd   :  { %14400 = vmatmul.mubr.msk.f32.vlgmr.msra.gmra.mxu1 %vm245_vm6, %v9413_v38 }
0x84fe   :  { %14414 = vmatpush3.msra.mxu1 %v16596_v56  ;;  %14421 = vmatprep.mubr.msk.f32.mxu1 %vm15300_vm2, %v15299_v7 }
0x84ff   :  { %14415 = vmatprep.subr.mxu1 %v15299_v7 }
0x8500   :  { %14416 = vmatpush3.msra.mxu1 %v16602_v17 }
0x8501   :  { %14417 = vmatprep.subr.mxu1 %v15299_v7 }
0x8502   :  { %14418 = vmatpush3.msra.mxu1 %v16606_v18 }
0x8503   :  { %14419 = vmatprep.subr.mxu1 %v15299_v7 }
0x8504   :  { %14420 = vmatpush3.msra.mxu1 %v16610_v36 }
0x8505   :  { %14429 = vmatprep.subr.mxu1 %v15299_v7 }
0x85bd   :  { %v9484_v19 = vpop.f32.mrf.mxu1 }
0x85be   :  { %v9488_v56 = vadd.f32 %v9484_v19, %v9414_v43 }
0x85bf   :  { %v14401_v22 = vpop.f32.mrf.mxu1 }
0x85c0   :  { %v9559_v23 = vadd.f32 %v9556_v16, %v9488_v56 }
0x85c2   :  { %v13130_v53 = vmul.f32 -1.442695, %v9559_v23 }
0x85c4   :  { %15068 = vpow2.f32 %v13130_v53 }
0x85d1   :  { %v15069_v60 = vpop.eup %15068 }
0x85d2   :  { %v9563_v40 = vadd.f32 1.0, %v15069_v60 }
0x85d4   :  { %15070 = vrcp.f32 %v9563_v40 }
0x85e1   :  { %v15071_v17 = vpop.eup %15070 }
0x85e2   :  { %v9570_v11 = vmul.f32 %v15071_v17, %v9568_v37  ;;  %v9577_v8 = vsub.f32 1.0, %v15071_v17  ;;  %v9583_v10 = vmul.f32 %v15071_v17, %v16617_v6 }
0x85e4   :  { %9572 = vrot.lane.b32.xlu1 %v9570_v11, %s15301_s1 }
0x8656   :  { %v9573_v18 = vpop.permute.xlu1 %9572 }
0x8657   :  { %v9575_v47 = vadd.f32 %v9573_v18, %v9488_v56 }
0x8659   :  { %15072 = vtanh.f32 %v9575_v47 }
0x8666   :  { %v15073_v36 = vpop.eup %15072 }
0x8667   :  { %9579 = vrot.lane.b32.xlu0 %v15073_v36, %s15302_s23 }
0x86d9   :  { %v9580_v2 = vpop.permute.xlu0 %9579 }
0x86da   :  { %v9582_v49 = vmul.f32 %v9580_v2, %v9577_v8 }
0x86dc   :  { %v9584_v9 = vadd.f32 %v9583_v10, %v9582_v49 }
0x86de   :  { %9586 = vrot.lane.b32.xlu1 %v9584_v9, %s15302_s23 }
0x8750   :  { %v9587_v15 = vpop.permute.xlu1 %9586 }
0x8751   :  { %9589 = vst.msk [vmem:[#allocation3 + $0xe] sm:$0x3] %vm426_vm5, %v9587_v15  ;;  %14422 = vmatmul.mubr.msk.f32.vlgmr.msra.gmra.mxu1 %vm132_vm3, %v9587_v15 }
0x8752   :  { %14430 = vmatpush3.msra.mxu1 %v16627_v31  ;;  %14431 = vmatprep.mubr.msk.f32.mxu1 %vm15300_vm2, %v15299_v7 }
0x8753   :  { %14439 = vmatprep.subr.mxu1 %v15299_v7 }
0x8811   :  { %v9658_v28 = vpop.f32.mrf.mxu1 }
0x8812   :  { %v9659_v0 = vadd.f32 %v16633_v35, %v9658_v28 }
0x8813   :  { %v14423_v6 = vpop.f32.mrf.mxu1 }
0x8814   :  { %v9662_v48 = vmax.f32 %v9659_v0, 0.0 }
0x8816   :  { %14427 = vmatmul.mubr.msk.f32.vlgmr.msra.gmra.mxu0 %vm245_vm6, %v9662_v48 }
0x8817   :  { %14435 = vmatpush3.msra.mxu0 %v16637_v25  ;;  %14436 = vmatprep.mubr.msk.f32.mxu0 %vm15300_vm2, %v15299_v7 }
0x8818   :  { %14444 = vmatprep.subr.mxu0 %v15299_v7 }
0x88d6   :  { %v9732_v30 = vpop.f32.mrf.mxu0 }
0x88d7   :  { %v9733_v39 = vadd.f32 %v16643_v27, %v9732_v30 }
0x88d8   :  { %v14428_v33 = vpop.f32.mrf.mxu0 }
0x88d9   :  { %9744 = vrot.lane.b32.xlu0 %v9733_v39, %s15303_s24  ;;  %v9736_v14 = vadd.f32 %v9733_v39, %v15442_v3 }
0x88db   :  { %v13133_v35 = vmul.f32 -1.442695, %v9736_v14 }
0x88dd   :  { %15074 = vpow2.f32 %v13133_v35 }
0x88ea   :  { %v15075_v51 = vpop.eup %15074 }
0x88eb   :  { %v9740_v61 = vadd.f32 1.0, %v15075_v51 }
0x88ed   :  { %15076 = vrcp.f32 %v9740_v61 }
0x88fa   :  { %v15077_v63 = vpop.eup %15076 }
0x88fb   :  { %v9754_v16 = vsub.f32 1.0, %v15077_v63 }
0x894b   :  { %v9745_v62 = vpop.permute.xlu0 %9744 }
0x894c   :  { %v9747_v24 = vmul.f32 %v15077_v63, %v9745_v62 }
0x894e   :  { %9749 = vrot.lane.b32.xlu1 %v9747_v24, %s15304_s25 }
0x8952   :  { %9760 = vrot.lane.b32.xlu1 %v9662_v48, %s15298_s16 }
0x89c0   :  { %v9750_v45 = vpop.permute.xlu1 %9749 }
0x89c1   :  { %v9752_v26 = vadd.f32 %v9750_v45, %v15442_v3 }
0x89c3   :  { %15078 = vtanh.f32 %v9752_v26 }
0x89c4   :  { %v9761_v46 = vpop.permute.xlu1 %9760 }
0x89c5   :  { %v9763_v41 = vmul.f32 %v15077_v63, %v9761_v46 }
0x89d0   :  { %v15079_v13 = vpop.eup %15078 }
0x89d1   :  { %9756 = vrot.lane.b32.xlu0 %v15079_v13, %s15305_s26 }
0x8a43   :  { %v9757_v12 = vpop.permute.xlu0 %9756 }
0x8a44   :  { %v9759_v50 = vmul.f32 %v9757_v12, %v9754_v16 }
0x8a46   :  { %v9764_v57 = vadd.f32 %v9763_v41, %v9759_v50  ;;  %v10514_v50 = vld [vmem:[#allocation4] sm:$0xff] }
0x8a48   :  { %9766 = vrot.lane.b32.xlu0 %v9764_v57, %s15305_s26 }
0x8aba   :  { %v16815_v5 = vpop.permute.xlu0 %9766 }
0x8abb   :  { %14432 = vmatmul.mubr.msk.f32.vlgmr.msra.gmra.mxu1 %vm245_vm6, %v16815_v5 }
0x8abc   :  { %14440 = vmatpush3.msra.mxu1 %v16819_v44  ;;  %14441 = vmatprep.mubr.msk.f32.mxu1 %vm15300_vm2, %v15299_v7 }
0x8abd   :  { %14449 = vmatprep.subr.mxu1 %v15299_v7 }
0x8abf   :  { %14442 = vmatmul.mubr.msk.f32.vlgmr.msra.gmra.mxu1 %vm245_vm6, %v16815_v5 }
0x8ac0   :  { %14450 = vmatpush3.msra.mxu1 %v16637_v25  ;;  %14451 = vmatprep.mubr.msk.f32.mxu1 %vm15300_vm2, %v15299_v7 }
0x8ac1   :  { %14459 = vmatprep.subr.mxu1 %v15299_v7 }
0x8b7b   :  { %v9836_v3 = vpop.f32.mrf.mxu1 }
0x8b7c   :  { %v9837_v29 = vadd.f32 %v16667_v21, %v9836_v3 }
0x8b7d   :  { %v14433_v42 = vpop.f32.mrf.mxu1 }
0x8b7e   :  { %v9840_v20 = vmax.f32 %v9837_v29, 0.0 }
0x8b7f   :  { %v9980_v52 = vpop.f32.mrf.mxu1 }
0x8b80   :  { %v9981_v55 = vadd.f32 %v16643_v27, %v9980_v52  ;;  %14437 = vmatmul.mubr.msk.f32.vlgmr.msra.gmra.mxu0 %vm245_vm6, %v9840_v20 }
0x8b81   :  { %v14443_v32 = vpop.f32.mrf.mxu1  ;;  %14445 = vmatpush3.msra.mxu0 %v16627_v31  ;;  %14446 = vmatprep.mubr.msk.f32.mxu0 %vm15300_vm2, %v15299_v7 }
0x8b82   :  { %9992 = vrot.lane.b32.xlu1 %v9981_v55, %s15303_s24  ;;  %14454 = vmatprep.subr.mxu0 %v15299_v7 }
0x8bf4   :  { %v9993_v60 = vpop.permute.xlu1 %9992 }
0x8c40   :  { %v9910_v54 = vpop.f32.mrf.mxu0 }
0x8c41   :  { %v9911_v38 = vadd.f32 %v16677_v34, %v9910_v54  ;;  %v10517_v54 = vld [vmem:[#allocation5 + $0x118] sm:$0xff] }
0x8c42   :  { %v14438_v43 = vpop.f32.mrf.mxu0 }
0x8c43   :  { %v9984_v19 = vadd.f32 %v9981_v55, %v9911_v38  ;;  %v10518_v55 = vld [vmem:[#allocation5 + $0x120] sm:$0xff] }
0x8c45   :  { %v13137_v56 = vmul.f32 -1.442695, %v9984_v19 }
0x8c47   :  { %15080 = vpow2.f32 %v13137_v56 }
0x8c54   :  { %v15081_v22 = vpop.eup %15080 }
0x8c55   :  { %v9988_v23 = vadd.f32 1.0, %v15081_v22 }
0x8c57   :  { %15082 = vrcp.f32 %v9988_v23 }
0x8c64   :  { %v15083_v53 = vpop.eup %15082 }
0x8c65   :  { %v9995_v40 = vmul.f32 %v15083_v53, %v9993_v60  ;;  %v10002_v18 = vsub.f32 1.0, %v15083_v53  ;;  %v10008_v36 = vmul.f32 %v15083_v53, %v9764_v57  ;;  %v10519_v57 = vld [vmem:[#allocation5 + $0x128] sm:$0xff] }
0x8c67   :  { %9997 = vrot.lane.b32.xlu0 %v9995_v40, %s15304_s25 }
0x8cd9   :  { %v9998_v17 = vpop.permute.xlu0 %9997 }
0x8cda   :  { %v10000_v37 = vadd.f32 %v9998_v17, %v9911_v38  ;;  %v10516_v38 = vld [vmem:[#allocation5 + $0x110] sm:$0xff] }
0x8cdc   :  { %15084 = vtanh.f32 %v10000_v37 }
0x8ce9   :  { %v15085_v11 = vpop.eup %15084 }
0x8cea   :  { %10004 = vrot.lane.b32.xlu1 %v15085_v11, %s15305_s26 }
0x8d5c   :  { %v10005_v47 = vpop.permute.xlu1 %10004 }
0x8d5d   :  { %v10007_v8 = vmul.f32 %v10005_v47, %v10002_v18  ;;  %v10610_v47 = vld [vmem:[#allocation5 + $0x148] sm:$0xff] }
0x8d5f   :  { %v16842_v2 = vadd.f32 %v10008_v36, %v10007_v8  ;;  %v10609_v36 = vld [vmem:[#allocation5 + $0x140] sm:$0xff]  ;;  %v10608_v8 = vld [vmem:[#allocation5 + $0x138] sm:$0xff] }
0x8d61   :  { %10011 = vrot.lane.b32.xlu0 %v16842_v2, %s15305_s26 }
0x8dd3   :  { %v10012_v10 = vpop.permute.xlu0 %10011 }
0x8dd4   :  { %14447 = vmatmul.mubr.msk.f32.vlgmr.msra.gmra.mxu0 %vm245_vm6, %v10012_v10 }
0x8dd5   :  { %14455 = vmatpush3.msra.mxu0 %v16819_v44  ;;  %14456 = vmatprep.mubr.msk.f32.mxu0 %vm15300_vm2, %v15299_v7 }
0x8dd6   :  { %14464 = vmatprep.subr.mxu0 %v15299_v7 }
0x8dd8   :  { %14457 = vmatmul.mubr.msk.f32.vlgmr.msra.gmra.mxu0 %vm245_vm6, %v10012_v10  ;;  %v16888_v10 = vld [vmem:[#allocation5 + $0x250] sm:$0xff] }
0x8dd9   :  { %14465 = vmatpush3.msra.mxu0 %v16637_v25  ;;  %14466 = vmatprep.mubr.msk.f32.mxu0 %vm15300_vm2, %v15299_v7 }
0x8dda   :  { %14474 = vmatprep.subr.mxu0 %v10519_v57 }
0x8e94   :  { %v10081_v49 = vpop.f32.mrf.mxu0 }
0x8e95   :  { %v10082_v9 = vadd.f32 %v16667_v21, %v10081_v49 }
0x8e96   :  { %v14448_v15 = vpop.f32.mrf.mxu0 }
0x8e97   :  { %v10085_v28 = vmax.f32 %v10082_v9, 0.0 }
0x8e98   :  { %v10225_v0 = vpop.f32.mrf.mxu0 }
0x8e99   :  { %v10226_v6 = vadd.f32 %v16643_v27, %v10225_v0  ;;  %14452 = vmatmul.mubr.msk.f32.vlgmr.msra.gmra.mxu1 %vm245_vm6, %v10085_v28 }
0x8e9a   :  { %v14458_v48 = vpop.f32.mrf.mxu0  ;;  %14460 = vmatpush3.msra.mxu1 %v16627_v31  ;;  %14461 = vmatprep.mubr.msk.f32.mxu1 %vm15300_vm2, %v15299_v7 }
0x8e9b   :  { %10237 = vrot.lane.b32.xlu1 %v10226_v6, %s15303_s24  ;;  %14469 = vmatprep.subr.mxu1 %v15299_v7 }
0x8f0d   :  { %v10238_v63 = vpop.permute.xlu1 %10237 }
0x8f59   :  { %v10155_v25 = vpop.f32.mrf.mxu1 }
0x8f5a   :  { %v10156_v30 = vadd.f32 %v16677_v34, %v10155_v25  ;;  %v10508_v25 = vsel %vm245_vm6, %v16815_v5, %v16842_v2  ;;  %v16907_v5 = vld [vmem:[#allocation5 + $0x240] sm:$0xff] }
0x8f5b   :  { %v14453_v39 = vpop.f32.mrf.mxu1 }
0x8f5c   :  { %v10229_v33 = vadd.f32 %v10226_v6, %v10156_v30 }
0x8f5e   :  { %v13141_v14 = vmul.f32 -1.442695, %v10229_v33 }
0x8f60   :  { %15086 = vpow2.f32 %v13141_v14 }
0x8f6d   :  { %v15087_v35 = vpop.eup %15086 }
0x8f6e   :  { %v10233_v51 = vadd.f32 1.0, %v15087_v35  ;;  %v13146_v35 = vld [vmem:[#allocation5 + $0x130] ss:$0 sm:$0xff] }
0x8f70   :  { %15088 = vrcp.f32 %v10233_v51 }
0x8f7d   :  { %v15089_v61 = vpop.eup %15088 }
0x8f7e   :  { %v10240_v31 = vmul.f32 %v15089_v61, %v10238_v63  ;;  %v10247_v26 = vsub.f32 1.0, %v15089_v61  ;;  %v10253_v46 = vmul.f32 %v15089_v61, %v16842_v2 }
0x8f80   :  { %10242 = vrot.lane.b32.xlu0 %v10240_v31, %s15304_s25  ;;  %v16901_v31 = vld [vmem:[#allocation5 + $0x248] sm:$0xff] }
0x8ff2   :  { %v10243_v62 = vpop.permute.xlu0 %10242 }
0x8ff3   :  { %v10245_v24 = vadd.f32 %v10243_v62, %v10156_v30  ;;  %v16911_v62 = vld [vmem:[#allocation5 + $0x238] sm:$0xff] }
0x8ff5   :  { %15090 = vtanh.f32 %v10245_v24 }
0x9002   :  { %v15091_v45 = vpop.eup %15090 }
0x9003   :  { %10249 = vrot.lane.b32.xlu1 %v15091_v45, %s15305_s26  ;;  %v10706_v45 = vld [vmem:[#allocation5 + $0x178] sm:$0xff] }
0x9075   :  { %v10250_v13 = vpop.permute.xlu1 %10249 }
0x9076   :  { %v10252_v16 = vmul.f32 %v10250_v13, %v10247_v26  ;;  %v10705_v26 = vld [vmem:[#allocation5 + $0x170] sm:$0xff]  ;;  %v10704_v13 = vld [vmem:[#allocation5 + $0x168] sm:$0xff] }
0x9078   :  { %v16867_v12 = vadd.f32 %v10253_v46, %v10252_v16  ;;  %v10703_v46 = vld [vmem:[#allocation5 + $0x160] sm:$0xff] }
0x9079   :  { %v16921_v16 = vld [vmem:[#allocation5 + $0x280] sm:$0xff] }
0x907a   :  { %10256 = vrot.lane.b32.xlu0 %v16867_v12, %s15305_s26 }
0x90ec   :  { %v10257_v41 = vpop.permute.xlu0 %10256 }
0x90ed   :  { %14462 = vmatmul.mubr.msk.f32.vlgmr.msra.gmra.mxu1 %vm245_vm6, %v10257_v41 }
0x90ee   :  { %14470 = vmatpush3.msra.mxu1 %v16819_v44  ;;  %14471 = vmatprep.mubr.msk.f32.mxu1 %vm15300_vm2, %v15299_v7  ;;  %v10512_v44 = vld [vmem:[#allocation3] sm:$0xff] }
0x90f1   :  { %14472 = vmatmul.mubr.msk.f32.vlgmr.msra.gmra.mxu1 %vm245_vm6, %v10257_v41 }
0x90f2   :  { %14493 = vmatprep.mubr.msk.f32.mxu1 %vm132_vm3, %v10514_v50  ;;  %v13149_v50 = vld [vmem:[#allocation5 + $0x158] ss:$0 sm:$0xff] }
0x91ad   :  { %v10326_v3 = vpop.f32.mrf.mxu1 }
0x91ae   :  { %v10327_v29 = vadd.f32 %v16667_v21, %v10326_v3  ;;  %v10513_v21 = vld [vmem:[#allocation3 + $0x8] sm:$0xff] }
0x91af   :  { %v14463_v42 = vpop.f32.mrf.mxu1 }
0x91b0   :  { %v10330_v20 = vmax.f32 %v10327_v29, 0.0 }
0x91b1   :  { %v10470_v52 = vpop.f32.mrf.mxu1 }
0x91b2   :  { %v10471_v32 = vadd.f32 %v16643_v27, %v10470_v52  ;;  %14467 = vmatmul.mubr.msk.f32.vlgmr.msra.gmra.mxu0 %vm245_vm6, %v10330_v20 }
0x91b3   :  { %14475 = vmatpush3.msra.mxu0 %v10519_v57  ;;  %v14473_v7 = vpop.f32.mrf.mxu1  ;;  %14482 = vmatprep.mubr.msk.f32.mxu0 %vm132_vm3, %v10512_v44  ;;  %v16930_v44 = vld [vmem:[#allocation5 + $0x258] ss:$0 sm:$0xff] }
0x91b4   :  { %14476 = vmatprep.subr.mxu0 %v10518_v55  ;;  %10482 = vrot.lane.b32.xlu1 %v10471_v32, %s15303_s24 }
0x91b5   :  { %14477 = vmatpush3.msra.mxu0 %v10518_v55 }
0x91b6   :  { %14478 = vmatprep.subr.mxu0 %v10517_v54 }
0x91b7   :  { %14479 = vmatpush3.msra.mxu0 %v10517_v54 }
0x91b8   :  { %14480 = vmatprep.subr.mxu0 %v10516_v38 }
0x91b9   :  { %14481 = vmatpush3.msra.mxu0 %v10516_v38 }
0x91ba   :  { %14483 = vmatmul.mubr.msk.f32.vlgmr.msra.gmra.mxu0 %vm132_vm3, %v10513_v21  ;;  %14496 = vmatprep.subr.mxu0 %v10706_v45 }
0x91bb   :  { %14497 = vmatpush3.msra.mxu0 %v10706_v45 }
0x91bc   :  { %14498 = vmatprep.subr.mxu0 %v10705_v26 }
0x91bd   :  { %14499 = vmatpush3.msra.mxu0 %v10705_v26 }
0x91be   :  { %14500 = vmatprep.subr.mxu0 %v10704_v13 }
0x91bf   :  { %14501 = vmatpush3.msra.mxu0 %v10704_v13 }
0x91c0   :  { %14502 = vmatprep.subr.mxu0 %v10703_v46 }
0x91c1   :  { %14503 = vmatpush3.msra.mxu0 %v10703_v46 }
0x91c2   :  { %14518 = vmatprep.subr.mxu0 %v16921_v16 }
0x9226   :  { %v10483_v40 = vpop.permute.xlu1 %10482 }
0x9272   :  { %v10400_v27 = vpop.f32.mrf.mxu0 }
0x9273   :  { %v10401_v43 = vadd.f32 %v16677_v34, %v10400_v27  ;;  %v10611_v34 = vld [vmem:[#allocation5 + $0x150] sm:$0xff]  ;;  %v16934_v27 = vld [vmem:[#allocation5 + $0x278] sm:$0xff] }
0x9274   :  { %v14468_v19 = vpop.f32.mrf.mxu0  ;;  %14485 = vmatprep.subr.mxu1 %v10611_v34 }
0x9275   :  { %v10474_v56 = vadd.f32 %v10471_v32, %v10401_v43  ;;  %14486 = vmatpush3.msra.mxu1 %v10611_v34 }
0x9276   :  { %14487 = vmatprep.subr.mxu1 %v10610_v47 }
0x9277   :  { %v13145_v22 = vmul.f32 -1.442695, %v10474_v56  ;;  %14488 = vmatpush3.msra.mxu1 %v10610_v47  ;;  %v16944_v56 = vld [vmem:[#allocation5 + $0x268] sm:$0xff] }
0x9278   :  { %14489 = vmatprep.subr.mxu1 %v10609_v36 }
0x9279   :  { %15092 = vpow2.f32 %v13145_v22  ;;  %14490 = vmatpush3.msra.mxu1 %v10609_v36 }
0x927a   :  { %14491 = vmatprep.subr.mxu1 %v10608_v8  ;;  %v14484_v48 = vpop.f32.mrf.mxu0 }
0x927b   :  { %14492 = vmatpush3.msra.mxu1 %v10608_v8  ;;  %v10603_v2 = vadd.f32 %v14484_v48, %v13146_v35 }
0x927c   :  { %14507 = vmatprep.subr.mxu1 %v16888_v10  ;;  %v10597_v14 = vpop.f32.mrf.mxu0 }
0x927d   :  { %v10598_v51 = vadd.f32 %v13146_v35, %v10597_v14  ;;  %v16915_v24 = vmax.f32 %v10603_v2, 0.0 }
0x927f   :  { %v16899_v61 = vmax.f32 %v10598_v51, 0.0 }
0x9286   :  { %v15093_v23 = vpop.eup %15092 }
0x9287   :  { %v10478_v53 = vadd.f32 1.0, %v15093_v23  ;;  %v10811_v23 = vlaneseq }
0x9289   :  { %15094 = vrcp.f32 %v10478_v53 }
0x9296   :  { %v15095_v60 = vpop.eup %15094 }
0x9297   :  { %v10485_v17 = vmul.f32 %v15095_v60, %v10483_v40  ;;  %v10492_v49 = vsub.f32 1.0, %v15095_v60  ;;  %v10498_v15 = vmul.f32 %v15095_v60, %v16867_v12  ;;  %v16959_v60 = vand.u32 127, %v10811_v23 }
0x9299   :  { %10487 = vrot.lane.b32.xlu0 %v10485_v17, %s15304_s25  ;;  %vm11766_vm10 = vcmp.ge.s32.totalorder %v16959_v60, 2  ;;  %vm12207_vm11 = vcmp.ge.s32.totalorder %v16959_v60, 3  ;;  %vm11301_vm12 = vcmp.ge.s32.totalorder %v16959_v60, 1 }
0x929d   :  { %10501 = vrot.lane.b32.xlu0 %v16867_v12, %s15298_s16  ;;  %v10700_v12 = vld [vmem:[#allocation5 + $0x180] sm:$0x1] }
0x929e   :  { %14742 = vpush %v10700_v12  ;;  %v10794_v41 = vmax.f32 %v10700_v12, 0.0 }
0x92a0   :  { %14744 = vpush %v10794_v41 }
0x92cf   :  { %s14743_s29 = spop %14742 }
0x92d0   :  { %v10709_v53 = vstv %s14743_s29 }
0x92d1   :  { %s14745_s30 = spop %14744 }
0x930b   :  { %v10488_v37 = vpop.permute.xlu0 %10487 }
0x930c   :  { %v10490_v11 = vadd.f32 %v10488_v37, %v10401_v43  ;;  %v16939_v43 = vld [vmem:[#allocation5 + $0x270] sm:$0xff] }
0x930e   :  { %15096 = vtanh.f32 %v10490_v11  ;;  %v16961_v11 = vstv %s14745_s30 }
0x930f   :  { %v10502_v6 = vpop.permute.xlu0 %10501 }
0x9310   :  { %v10509_v30 = vsel %vm1433_vm7, %v10508_v25, %v10502_v6 }
0x931b   :  { %v15097_v18 = vpop.eup %15096 }
0x931c   :  { %10494 = vrot.lane.b32.xlu1 %v15097_v18, %s15305_s26 }
0x938e   :  { %v10495_v9 = vpop.permute.xlu1 %10494 }
0x938f   :  { %v10497_v28 = vmul.f32 %v10495_v9, %v10492_v49 }
0x9391   :  { %v10499_v0 = vadd.f32 %v10498_v15, %v10497_v28 }
0x9393   :  { %10505 = vrot.lane.b32.xlu1 %v10499_v0, %s15304_s25 }
0x9405   :  { %v10506_v39 = vpop.permute.xlu1 %10505 }
0x9406   :  { %v10510_v33 = vsel %vm1435_vm8, %v10509_v30, %v10506_v39 }
0x9407   :  { %10511 = vst.msk [vmem:[#allocation4 + $0xe] sm:$0x3] %vm426_vm5, %v10510_v33 }
0x940e   :  { %v10515_v63 = vld [vmem:[#allocation4 + $0x8] sm:$0xff] }
0x940f   :  { %14494 = vmatmul.mubr.msk.f32.vlgmr.msra.gmra.mxu1 %vm132_vm3, %v10515_v63 }
0x9410   :  { %14508 = vmatpush3.msra.mxu1 %v16888_v10  ;;  %14515 = vmatprep.mubr.msk.f32.mxu1 %vm132_vm3, %v16899_v61 }
0x9411   :  { %14509 = vmatprep.subr.mxu1 %v16901_v31 }
0x9412   :  { %14510 = vmatpush3.msra.mxu1 %v16901_v31 }
0x9413   :  { %14511 = vmatprep.subr.mxu1 %v16907_v5 }
0x9414   :  { %14512 = vmatpush3.msra.mxu1 %v16907_v5 }
0x9415   :  { %14513 = vmatprep.subr.mxu1 %v16911_v62 }
0x9416   :  { %14514 = vmatpush3.msra.mxu1 %v16911_v62 }
0x9417   :  { %14516 = vmatmul.mubr.msk.f32.vlgmr.msra.gmra.mxu1 %vm132_vm3, %v16915_v24 }
0x94cf   :  { %v14495_v57 = vpop.f32.mrf.mxu1 }
0x94d0   :  { %v10695_v3 = vadd.f32 %v14495_v57, %v13149_v50 }
0x94d1   :  { %v10689_v29 = vpop.f32.mrf.mxu1 }
0x94d2   :  { %v10690_v42 = vadd.f32 %v13149_v50, %v10689_v29  ;;  %v16924_v20 = vmax.f32 %v10695_v3, 0.0  ;;  %v17001_v50 = vld [vmem:[#allocation5 + $0x260] sm:$0xff] }
0x94d3   :  { %14529 = vmatprep.subr.mxu1 %v17001_v50  ;;  %v17009_v29 = vld [vmem:[#allocation5 + $0x2a0] sm:$0xff] }
0x94d4   :  { %v16926_v52 = vmax.f32 %v10690_v42, 0.0  ;;  %14530 = vmatpush3.msra.mxu1 %v17001_v50 }
0x94d5   :  { %14534 = vmatprep.subr.mxu1 %v17009_v29 }
0x94d6   :  { %15098 = vtanh.f32 %v16926_v52 }
0x94d7   :  { %15100 = vtanh.f32 %v16924_v20  ;;  %v14517_v55 = vpop.f32.mrf.mxu1 }
0x94d8   :  { %v10991_v19 = vadd.f32 %v14517_v55, %v16930_v44 }
0x94d9   :  { %v10985_v32 = vpop.f32.mrf.mxu1 }
0x94da   :  { %v10986_v7 = vadd.f32 %v16930_v44, %v10985_v32  ;;  %v10995_v22 = vmax.f32 %v10991_v19, 0.0 }
0x94dc   :  { %v10994_v21 = vmax.f32 %v10986_v7, 0.0 }
0x94e3   :  { %v15099_v54 = vpop.eup %15098 }
0x94e4   :  { %v15101_v38 = vpop.eup %15100  ;;  %14504 = vmatprep.mubr.msk.f32.mxu0 %vm132_vm3, %v15099_v54 }
0x94e5   :  { %14505 = vmatmul.mubr.msk.f32.vlgmr.msra.gmra.mxu0 %vm132_vm3, %v15101_v38 }
0x94e6   :  { %14519 = vmatpush3.msra.mxu0 %v16921_v16  ;;  %14526 = vmatprep.mubr.msk.f32.mxu0 %vm132_vm3, %v10994_v21 }
0x94e7   :  { %14520 = vmatprep.subr.mxu0 %v16934_v27 }
0x94e8   :  { %14521 = vmatpush3.msra.mxu0 %v16934_v27 }
0x94e9   :  { %14522 = vmatprep.subr.mxu0 %v16939_v43 }
0x94ea   :  { %14523 = vmatpush3.msra.mxu0 %v16939_v43 }
0x94eb   :  { %14524 = vmatprep.subr.mxu0 %v16944_v56 }
0x94ec   :  { %14525 = vmatpush3.msra.mxu0 %v16944_v56 }
0x94ed   :  { %14527 = vmatmul.mubr.msk.f32.vlgmr.msra.gmra.mxu0 %vm132_vm3, %v10995_v22  ;;  %14545 = vmatprep.subr.mxu0 %v16888_v10 }
0x94ee   :  { %14546 = vmatpush3.msra.mxu0 %v16888_v10 }
0x94ef   :  { %14547 = vmatprep.subr.mxu0 %v16901_v31 }
0x94f0   :  { %14548 = vmatpush3.msra.mxu0 %v16901_v31 }
0x94f1   :  { %14549 = vmatprep.subr.mxu0 %v16907_v5 }
0x94f2   :  { %14550 = vmatpush3.msra.mxu0 %v16907_v5 }
0x94f3   :  { %14551 = vmatprep.subr.mxu0 %v16911_v62 }
0x94f4   :  { %14552 = vmatpush3.msra.mxu0 %v16911_v62 }
0x94f5   :  { %14567 = vmatprep.subr.mxu0 %v17001_v50 }
0x95a5   :  { %v14506_v40 = vpop.f32.mrf.mxu0 }
0x95a6   :  { %v10789_v17 = vadd.f32 %v14506_v40, %v10709_v53 }
0x95a7   :  { %v10783_v37 = vpop.f32.mrf.mxu0 }
0x95a8   :  { %v16964_v18 = vmax.f32 %v10789_v17, 0.0  ;;  %v10784_v34 = vadd.f32 %v10783_v37, %v10709_v53 }
0x95aa   :  { %v16967_v47 = vmax.f32 %v10784_v34, 0.0  ;;  %v10816_v36 = vsel %vm35_vm1, %v16964_v18, -inf  ;;  %v16973_v8 = vsel %vm11766_vm10, %v16964_v18, %v16961_v11  ;;  %v16977_v49 = vsel %vm12207_vm11, %v16964_v18, %v16961_v11 }
0x95ab   :  { %10817 = vmax.xlane.f32.xlu1 %v10816_v36 }
0x95ac   :  { %v10813_v9 = vsel %vm35_vm1, %v16967_v47, -inf  ;;  %v16983_v15 = vsel %vm11766_vm10, %v16967_v47, %v16961_v11  ;;  %v16987_v28 = vsel %vm12207_vm11, %v16967_v47, %v16961_v11 }
0x95ad   :  { %10814 = vmax.xlane.f32.xlu0 %v10813_v9 }
0x9634   :  { %v10818_v0 = vpop.xlane.xlu1 %10817 }
0x9635   :  { %v10820_v6 = vsub.f32 %v16964_v18, %v10818_v0 }
0x9636   :  { %v10815_v48 = vpop.xlane.xlu0 %10814 }
0x9637   :  { %v10819_v25 = vsub.f32 %v16967_v47, %v10815_v48  ;;  %v10823_v30 = vmul.f32 1.442695, %v10820_v6 }
0x9639   :  { %v10821_v39 = vmul.f32 1.442695, %v10819_v25 }
0x963b   :  { %15102 = vpow2.f32 %v10821_v39 }
0x963c   :  { %15104 = vpow2.f32 %v10823_v30 }
0x9648   :  { %v15103_v33 = vpop.eup %15102 }
0x9649   :  { %v10825_v14 = vsel %vm35_vm1, %v15103_v33, 0.0  ;;  %v15105_v35 = vpop.eup %15104 }
0x964a   :  { %10826 = vadd.xlane.f32.xlu0 %v10825_v14  ;;  %v10828_v51 = vsel %vm35_vm1, %v15105_v35, 0.0  ;;  %v17030_v14 = vld [vmem:[#allocation5 + $0x290] sm:$0xff] }
0x964e   :  { %10829 = vadd.xlane.f32.xlu0 %v10828_v51 }
0x96d3   :  { %v10827_v63 = vpop.xlane.xlu0 %10826 }
0x96d7   :  { %v10830_v2 = vpop.xlane.xlu0 %10829 }
0x96d8   :  { %15106 = vrcp.f32 %v10830_v2  ;;  %v17051_v2 = vld [vmem:[#allocation5 + $0x2b0] ss:$0 sm:$0xff] }
0x96d9   :  { %15108 = vrcp.f32 %v10827_v63 }
0x96e5   :  { %v15107_v45 = vpop.eup %15106 }
0x96e6   :  { %v10834_v26 = vmul.f32 %v15107_v45, %v15105_v35  ;;  %v15109_v13 = vpop.eup %15108  ;;  %v17034_v35 = vld [vmem:[#allocation5 + $0x288] sm:$0xff] }
0x96e7   :  { %v10832_v46 = vmul.f32 %v15109_v13, %v15103_v33  ;;  %v17024_v33 = vld [vmem:[#allocation5 + $0x298] sm:$0xff] }
0x96e8   :  { %10874 = vperm.xlu1 %14789, %v10834_v26   ;;  %10854 = vperm.xlu0 %14785, %v10834_v26  }
0x96ec   :  { %14790 = vset.pattern.permute.xlu1 %v15307_v59  ;;  %14792 = vset.pattern.permute.xlu0 %v15308_v1 }
0x96ed   :  { %10850 = vperm.xlu1 %14790, %v10832_v46   ;;  %10890 = vperm.xlu0 %14792, %v10832_v46  }
0x96f1   :  { %14791 = vset.pattern.permute.xlu1 %v15306_v58  ;;  %14794 = vset.pattern.permute.xlu0 %v15309_v4 }
0x96f2   :  { %10870 = vperm.xlu1 %14791, %v10832_v46   ;;  %10842 = vperm.xlu0 %14794, %v10834_v26  }
0x96f6   :  { %14793 = vset.pattern.permute.xlu1 %v15308_v1  ;;  %14796 = vset.pattern.permute.xlu0 %v15306_v58 }
0x96f7   :  { %10894 = vperm.xlu1 %14793, %v10834_v26  }
0x96fb   :  { %14795 = vset.pattern.permute.xlu1 %v15309_v4 }
0x96fc   :  { %10837 = vperm.xlu1 %14795, %v10832_v46  }
0x9700   :  { %14797 = vset.pattern.permute.xlu1 %v15306_v58 }
0x9763   :  { %v10875_v12 = vpop.permute.xlu1 %10874  ;;  %v10855_v41 = vpop.permute.xlu0 %10854 }
0x9764   :  { %v10858_v57 = vmul.f32 %v10855_v41, %v16924_v20  ;;  %v10878_v42 = vmul.f32 %v10875_v12, %v16924_v20  ;;  %v14528_v12 = vpop.f32.mrf.mxu0 }
0x9766   :  { %10863 = vrot.lane.b32.xlu1 %v10858_v57, %s15305_s26  ;;  %v11068_v57 = vpop.f32.mrf.mxu0 }
0x9768   :  { %v10851_v3 = vpop.permute.xlu1 %10850  ;;  %v10891_v7 = vpop.permute.xlu0 %10890 }
0x9769   :  { %v10857_v4 = vmul.f32 %v10851_v3, %v16926_v52  ;;  %v10897_v54 = vmul.f32 %v10891_v7, %v16926_v52  ;;  %v17057_v3 = vld [vmem:[#allocation5 + $0x2a8] ss:$0 sm:$0xff] }
0x976b   :  { %10861 = vrot.lane.b32.xlu1 %v10857_v4, %s15305_s26 }
0x976d   :  { %v10871_v55 = vpop.permute.xlu1 %10870  ;;  %v10843_v53 = vpop.permute.xlu0 %10842 }
0x976e   :  { %v10877_v32 = vmul.f32 %v10871_v55, %v16926_v52  ;;  %v10846_v17 = vmul.f32 %v10843_v53, %v16924_v20 }
0x976f   :  { %10883 = vrot.lane.b32.xlu1 %v10878_v42, %s15303_s24 }
0x9770   :  { %10881 = vrot.lane.b32.xlu0 %v10877_v32, %s15303_s24 }
0x9772   :  { %v10895_v38 = vpop.permute.xlu1 %10894 }
0x9773   :  { %v10898_v21 = vmul.f32 %v10895_v38, %v16924_v20 }
0x9774   :  { %10901 = vrot.lane.b32.xlu0 %v10897_v54, %s15310_s28 }
0x9775   :  { %10903 = vrot.lane.b32.xlu1 %v10898_v21, %s15310_s28 }
0x9777   :  { %v10838_v19 = vpop.permute.xlu1 %10837 }
0x9778   :  { %v10845_v40 = vmul.f32 %v10838_v19, %v16926_v52 }
0x97d8   :  { %v10864_v22 = vpop.permute.xlu1 %10863 }
0x97d9   :  { %v10868_v9 = vadd.f32 %v10864_v22, %v10846_v17 }
0x97dd   :  { %v10862_v23 = vpop.permute.xlu1 %10861 }
0x97de   :  { %v10867_v34 = vadd.f32 %v10862_v23, %v10845_v40 }
0x97e1   :  { %v10884_v36 = vpop.permute.xlu1 %10883 }
0x97e2   :  { %v10882_v37 = vpop.permute.xlu0 %10881  ;;  %v10888_v6 = vadd.f32 %v10884_v36, %v10868_v9  ;;  %v11306_v9 = vsel %vm11301_vm12, %v16967_v47, %v16961_v11 }
0x97e3   :  { %v10887_v0 = vadd.f32 %v10882_v37, %v10867_v34 }
0x97e6   :  { %v10902_v48 = vpop.permute.xlu0 %10901 }
0x97e7   :  { %v10907_v25 = vadd.f32 %v10902_v48, %v10887_v0  ;;  %v10904_v30 = vpop.permute.xlu1 %10903  ;;  %v11308_v0 = vsel %vm35_vm1, %v11306_v9, -inf }
0x97e8   :  { %v10908_v39 = vadd.f32 %v10904_v30, %v10888_v6  ;;  %v11307_v6 = vsel %vm11301_vm12, %v16964_v18, %v16961_v11 }
0x97e9   :  { %14531 = vmatprep.mubr.msk.f32.mxu1 %vm245_vm6, %v10907_v25  ;;  %v11311_v48 = vsel %vm35_vm1, %v11307_v6, -inf }
0x97ea   :  { %14532 = vmatmul.mubr.msk.f32.vlgmr.msra.gmra.mxu1 %vm245_vm6, %v10908_v39 }
0x97eb   :  { %14535 = vmatpush3.msra.mxu1 %v17009_v29  ;;  %14542 = vmatprep.mubr.msk.f32.mxu1 %vm132_vm3, %v16899_v61 }
0x97ec   :  { %14536 = vmatprep.subr.mxu1 %v17024_v33 }
0x97ed   :  { %14537 = vmatpush3.msra.mxu1 %v17024_v33 }
0x97ee   :  { %14538 = vmatprep.subr.mxu1 %v17030_v14 }
0x97ef   :  { %14539 = vmatpush3.msra.mxu1 %v17030_v14 }
0x97f0   :  { %14540 = vmatprep.subr.mxu1 %v17034_v35 }
0x97f1   :  { %14541 = vmatpush3.msra.mxu1 %v17034_v35 }
0x97f2   :  { %14543 = vmatmul.mubr.msk.f32.vlgmr.msra.gmra.mxu1 %vm132_vm3, %v16915_v24  ;;  %14556 = vmatprep.subr.mxu1 %v16921_v16 }
0x97f3   :  { %14557 = vmatpush3.msra.mxu1 %v16921_v16 }
0x97f4   :  { %14558 = vmatprep.subr.mxu1 %v16934_v27 }
0x97f5   :  { %14559 = vmatpush3.msra.mxu1 %v16934_v27 }
0x97f6   :  { %14560 = vmatprep.subr.mxu1 %v16939_v43 }
0x97f7   :  { %14561 = vmatpush3.msra.mxu1 %v16939_v43 }
0x97f8   :  { %14562 = vmatprep.subr.mxu1 %v16944_v56 }
0x97f9   :  { %14563 = vmatpush3.msra.mxu1 %v16944_v56 }
0x97fa   :  { %14583 = vmatprep.subr.mxu1 %v16888_v10 }
0x98aa   :  { %v14533_v51 = vpop.f32.mrf.mxu1 }
0x98ab   :  { %v11155_v41 = vadd.f32 %v14533_v51, %v14528_v12 }
0x98ac   :  { %v11149_v63 = vpop.f32.mrf.mxu1 }
0x98ad   :  { %v11150_v4 = vadd.f32 %v11149_v63, %v11068_v57  ;;  %v11163_v42 = vadd.f32 %v17057_v3, %v11155_v41 }
0x98af   :  { %v11162_v55 = vadd.f32 %v17057_v3, %v11150_v4 }
0x98b2   :  { %v14544_v45 = vpop.f32.mrf.mxu1 }
0x98b3   :  { %v11240_v26 = vadd.f32 %v14544_v45, %v17051_v2 }
0x98b4   :  { %v11234_v13 = vpop.f32.mrf.mxu1 }
0x98b5   :  { %v11235_v46 = vadd.f32 %v17051_v2, %v11234_v13  ;;  %11261 = vrot.lane.b32.xlu1 %v11240_v26, %s15301_s1  ;;  %v11244_v32 = vadd.f32 %v11240_v26, %v11163_v42 }
0x98b7   :  { %11259 = vrot.lane.b32.xlu0 %v11235_v46, %s15301_s1  ;;  %v11243_v7 = vadd.f32 %v11235_v46, %v11162_v55  ;;  %v13166_v54 = vmul.f32 -1.442695, %v11244_v32 }
0x98b9   :  { %v13165_v38 = vmul.f32 -1.442695, %v11243_v7  ;;  %15110 = vpow2.f32 %v13166_v54 }
0x98bb   :  { %15112 = vpow2.f32 %v13165_v38 }
0x98c6   :  { %v15111_v21 = vpop.eup %15110 }
0x98c7   :  { %v11252_v22 = vadd.f32 1.0, %v15111_v21 }
0x98c8   :  { %v15113_v19 = vpop.eup %15112 }
0x98c9   :  { %v11251_v23 = vadd.f32 1.0, %v15113_v19  ;;  %15114 = vrcp.f32 %v11252_v22 }
0x98cb   :  { %15116 = vrcp.f32 %v11251_v23 }
0x98d6   :  { %v15115_v53 = vpop.eup %15114 }
0x98d7   :  { %v11280_v4 = vsub.f32 1.0, %v15115_v53 }
0x98d8   :  { %v15117_v37 = vpop.eup %15116 }
0x98d9   :  { %v11279_v54 = vsub.f32 1.0, %v15117_v37 }
0x9927   :  { %v11262_v40 = vpop.permute.xlu1 %11261 }
0x9928   :  { %v11266_v17 = vmul.f32 %v15115_v53, %v11262_v40 }
0x9929   :  { %v11260_v34 = vpop.permute.xlu0 %11259 }
0x992a   :  { %v11265_v36 = vmul.f32 %v15117_v37, %v11260_v34  ;;  %11271 = vrot.lane.b32.xlu1 %v11266_v17, %s15301_s1 }
0x992c   :  { %11269 = vrot.lane.b32.xlu0 %v11265_v36, %s15301_s1 }
0x994b   :  { %11309 = vmax.xlane.f32.xlu0 %v11308_v0 }
0x994e   :  { %11312 = vmax.xlane.f32.xlu1 %v11311_v48 }
0x995f   :  { %11291 = vrot.lane.b32.xlu1 %v16899_v61, %s15311_s4 }
0x9963   :  { %11293 = vrot.lane.b32.xlu1 %v16915_v24, %s15311_s4 }
0x999c   :  { %v11272_v60 = vpop.permute.xlu1 %11271 }
0x999d   :  { %v11276_v25 = vadd.f32 %v11272_v60, %v11163_v42 }
0x999e   :  { %v11270_v30 = vpop.permute.xlu0 %11269 }
0x999f   :  { %15118 = vtanh.f32 %v11276_v25  ;;  %v11275_v47 = vadd.f32 %v11270_v30, %v11162_v55 }
0x99a1   :  { %15120 = vtanh.f32 %v11275_v47 }
0x99ac   :  { %v15119_v39 = vpop.eup %15118 }
0x99ad   :  { %11285 = vrot.lane.b32.xlu0 %v15119_v39, %s15302_s23 }
0x99ae   :  { %v15121_v11 = vpop.eup %15120 }
0x99b1   :  { %11283 = vrot.lane.b32.xlu0 %v15121_v11, %s15302_s23 }
0x99d4   :  { %v11310_v18 = vpop.xlane.xlu0 %11309 }
0x99d5   :  { %v11314_v51 = vsub.f32 %v11306_v9, %v11310_v18 }
0x99d7   :  { %v11316_v63 = vmul.f32 1.442695, %v11314_v51  ;;  %v11313_v45 = vpop.xlane.xlu1 %11312 }
0x99d8   :  { %v11315_v61 = vsub.f32 %v11307_v6, %v11313_v45 }
0x99d9   :  { %15122 = vpow2.f32 %v11316_v63 }
0x99da   :  { %v11318_v26 = vmul.f32 1.442695, %v11315_v61 }
0x99db   :  { %v11292_v41 = vpop.permute.xlu1 %11291 }
0x99dc   :  { %15124 = vpow2.f32 %v11318_v26  ;;  %v11297_v21 = vmul.f32 %v15117_v37, %v11292_v41 }
0x99df   :  { %v11294_v57 = vpop.permute.xlu1 %11293 }
0x99e0   :  { %v11298_v55 = vmul.f32 %v15115_v53, %v11294_v57 }
0x99e6   :  { %v15123_v24 = vpop.eup %15122 }
0x99e7   :  { %v11320_v13 = vsel %vm35_vm1, %v15123_v24, 0.0 }
0x99e8   :  { %11321 = vadd.xlane.f32.xlu0 %v11320_v13 }
0x99e9   :  { %v15125_v46 = vpop.eup %15124 }
0x99ea   :  { %v11323_v12 = vsel %vm35_vm1, %v15125_v46, 0.0 }
0x99eb   :  { %11324 = vadd.xlane.f32.xlu1 %v11323_v12 }
0x9a1f   :  { %v11286_v42 = vpop.permute.xlu0 %11285 }
0x9a20   :  { %v11290_v32 = vmul.f32 %v11286_v42, %v11280_v4 }
0x9a22   :  { %v17078_v7 = vadd.f32 %v11298_v55, %v11290_v32 }
0x9a23   :  { %v11284_v38 = vpop.permute.xlu0 %11283 }
0x9a24   :  { %v11289_v19 = vmul.f32 %v11284_v38, %v11279_v54  ;;  %11388 = vrot.lane.b32.xlu1 %v17078_v7, %s15302_s23 }
0x9a26   :  { %v17082_v22 = vadd.f32 %v11297_v21, %v11289_v19 }
0x9a28   :  { %11386 = vrot.lane.b32.xlu0 %v17082_v22, %s15302_s23 }
0x9a71   :  { %v11322_v23 = vpop.xlane.xlu0 %11321 }
0x9a72   :  { %15126 = vrcp.f32 %v11322_v23 }
0x9a74   :  { %v11325_v40 = vpop.xlane.xlu1 %11324 }
0x9a75   :  { %15128 = vrcp.f32 %v11325_v40 }
0x9a7f   :  { %v15127_v53 = vpop.eup %15126 }
0x9a80   :  { %v11327_v17 = vmul.f32 %v15127_v53, %v15123_v24 }
0x9a82   :  { %v15129_v34 = vpop.eup %15128  ;;  %11345 = vperm.xlu0 %14796, %v11327_v17  }
0x9a83   :  { %v11329_v36 = vmul.f32 %v15129_v34, %v15125_v46 }
0x9a85   :  { %11349 = vperm.xlu1 %14797, %v11329_v36  }
0x9a86   :  { %14799 = vset.pattern.permute.xlu0 %v15308_v1 }
0x9a87   :  { %11369 = vperm.xlu0 %14799, %v11329_v36  }
0x9a89   :  { %14798 = vset.pattern.permute.xlu1 %v15308_v1 }
0x9a8a   :  { %11365 = vperm.xlu1 %14798, %v11327_v17  }
0x9a8e   :  { %14800 = vset.pattern.permute.xlu1 %v15307_v59 }
0x9a8f   :  { %11332 = vperm.xlu1 %14800, %v11327_v17  }
0x9a93   :  { %11337 = vperm.xlu1 %14800, %v11329_v36  }
0x9a96   :  { %v17092_v9 = vpop.permute.xlu1 %11388 }
0x9a97   :  { %14801 = vset.pattern.permute.xlu1 %v15308_v1 }
0x9a9a   :  { %v17090_v37 = vpop.permute.xlu0 %11386 }
0x9a9b   :  { %14553 = vmatprep.mubr.msk.f32.mxu0 %vm132_vm3, %v17090_v37 }
0x9a9c   :  { %14554 = vmatmul.mubr.msk.f32.vlgmr.msra.gmra.mxu0 %vm132_vm3, %v17092_v9 }
0x9a9d   :  { %14568 = vmatpush3.msra.mxu0 %v17001_v50 }
0x9a9e   :  { %14572 = vmatprep.subr.mxu0 %v17009_v29 }
0x9afd   :  { %v11346_v0 = vpop.permute.xlu0 %11345 }
0x9afe   :  { %v11352_v59 = vmul.f32 %v11346_v0, %v16926_v52 }
0x9b00   :  { %v11350_v6 = vpop.permute.xlu1 %11349  ;;  %11356 = vrot.lane.b32.xlu0 %v11352_v59, %s15305_s26 }
0x9b01   :  { %v11353_v48 = vmul.f32 %v11350_v6, %v16924_v20 }
0x9b02   :  { %v11370_v60 = vpop.permute.xlu0 %11369 }
0x9b03   :  { %11358 = vrot.lane.b32.xlu1 %v11353_v48, %s15305_s26  ;;  %v11373_v25 = vmul.f32 %v11370_v60, %v16924_v20 }
0x9b05   :  { %v11366_v30 = vpop.permute.xlu1 %11365 }
0x9b06   :  { %v11372_v47 = vmul.f32 %v11366_v30, %v16926_v52 }
0x9b07   :  { %11378 = vrot.lane.b32.xlu1 %v11373_v25, %s15303_s24 }
0x9b08   :  { %11376 = vrot.lane.b32.xlu0 %v11372_v47, %s15303_s24 }
0x9b0a   :  { %v11333_v61 = vpop.permute.xlu1 %11332 }
0x9b0b   :  { %v11340_v12 = vmul.f32 %v11333_v61, %v16926_v52 }
0x9b0e   :  { %v11338_v26 = vpop.permute.xlu1 %11337 }
0x9b0f   :  { %v11341_v13 = vmul.f32 %v11338_v26, %v16924_v20 }
0x9b5c   :  { %v14555_v39 = vpop.f32.mrf.mxu0 }
0x9b5d   :  { %v11466_v11 = vadd.f32 %v14555_v39, %v16930_v44 }
0x9b5e   :  { %v11460_v18 = vpop.f32.mrf.mxu0 }
0x9b5f   :  { %v11461_v51 = vadd.f32 %v16930_v44, %v11460_v18  ;;  %v11470_v45 = vmax.f32 %v11466_v11, 0.0 }
0x9b61   :  { %v11469_v63 = vmax.f32 %v11461_v51, 0.0 }
0x9b63   :  { %14564 = vmatprep.mubr.msk.f32.mxu1 %vm132_vm3, %v11469_v63 }
0x9b64   :  { %14565 = vmatmul.mubr.msk.f32.vlgmr.msra.gmra.mxu1 %vm132_vm3, %v11470_v45 }
0x9b65   :  { %14584 = vmatpush3.msra.mxu1 %v16888_v10 }
0x9b66   :  { %14585 = vmatprep.subr.mxu1 %v16901_v31 }
0x9b67   :  { %14586 = vmatpush3.msra.mxu1 %v16901_v31 }
0x9b68   :  { %14587 = vmatprep.subr.mxu1 %v16907_v5 }
0x9b69   :  { %14588 = vmatpush3.msra.mxu1 %v16907_v5 }
0x9b6a   :  { %14589 = vmatprep.subr.mxu1 %v16911_v62 }
0x9b6b   :  { %14590 = vmatpush3.msra.mxu1 %v16911_v62 }
0x9b6c   :  { %14605 = vmatprep.subr.mxu1 %v17001_v50 }
0x9b72   :  { %v11357_v46 = vpop.permute.xlu0 %11356 }
0x9b73   :  { %v11362_v57 = vadd.f32 %v11357_v46, %v11340_v12  ;;  %v11769_v46 = vsel %vm35_vm1, %v16983_v15, -inf  ;;  %v11772_v12 = vsel %vm35_vm1, %v16973_v8, -inf }
0x9b75   :  { %v11359_v24 = vpop.permute.xlu1 %11358 }
0x9b76   :  { %v11363_v41 = vadd.f32 %v11359_v24, %v11341_v13 }
0x9b79   :  { %v11379_v4 = vpop.permute.xlu1 %11378 }
0x9b7a   :  { %v11383_v42 = vadd.f32 %v11379_v4, %v11363_v41  ;;  %v11377_v55 = vpop.permute.xlu0 %11376 }
0x9b7b   :  { %v11382_v32 = vadd.f32 %v11377_v55, %v11362_v57 }
0x9b7c   :  { %11556 = vrot.lane.b32.xlu1 %v11383_v42, %s15305_s26 }
0x9b7d   :  { %11554 = vrot.lane.b32.xlu0 %v11382_v32, %s15305_s26 }
0x9bee   :  { %v11557_v38 = vpop.permute.xlu1 %11556 }
0x9bef   :  { %v11555_v54 = vpop.permute.xlu0 %11554 }
0x9bf0   :  { %14569 = vmatprep.mubr.msk.f32.mxu0 %vm245_vm6, %v11555_v54 }
0x9bf1   :  { %14570 = vmatmul.mubr.msk.f32.vlgmr.msra.gmra.mxu0 %vm245_vm6, %v11557_v38 }
0x9bf2   :  { %14573 = vmatpush3.msra.mxu0 %v17009_v29  ;;  %14580 = vmatprep.mubr.msk.f32.mxu0 %vm132_vm3, %v17090_v37 }
0x9bf3   :  { %14574 = vmatprep.subr.mxu0 %v17024_v33 }
0x9bf4   :  { %14575 = vmatpush3.msra.mxu0 %v17024_v33 }
0x9bf5   :  { %14576 = vmatprep.subr.mxu0 %v17030_v14 }
0x9bf6   :  { %14577 = vmatpush3.msra.mxu0 %v17030_v14 }
0x9bf7   :  { %14578 = vmatprep.subr.mxu0 %v17034_v35 }
0x9bf8   :  { %14579 = vmatpush3.msra.mxu0 %v17034_v35 }
0x9bf9   :  { %14581 = vmatmul.mubr.msk.f32.vlgmr.msra.gmra.mxu0 %vm132_vm3, %v17092_v9  ;;  %14594 = vmatprep.subr.mxu0 %v16921_v16 }
0x9bfa   :  { %14595 = vmatpush3.msra.mxu0 %v16921_v16 }
0x9bfb   :  { %14596 = vmatprep.subr.mxu0 %v16934_v27 }
0x9bfc   :  { %14597 = vmatpush3.msra.mxu0 %v16934_v27 }
0x9bfd   :  { %14598 = vmatprep.subr.mxu0 %v16939_v43 }
0x9bfe   :  { %14599 = vmatpush3.msra.mxu0 %v16939_v43 }
0x9bff   :  { %14600 = vmatprep.subr.mxu0 %v16944_v56 }
0x9c00   :  { %14601 = vmatpush3.msra.mxu0 %v16944_v56 }
0x9c01   :  { %14621 = vmatprep.subr.mxu0 %v16888_v10 }
0x9c24   :  { %v14566_v34 = vpop.f32.mrf.mxu1 }
0x9c26   :  { %v11543_v0 = vpop.f32.mrf.mxu1 }
0x9cb1   :  { %v14571_v21 = vpop.f32.mrf.mxu0 }
0x9cb2   :  { %v11634_v36 = vadd.f32 %v14571_v21, %v14566_v34 }
0x9cb3   :  { %v11628_v19 = vpop.f32.mrf.mxu0 }
0x9cb4   :  { %v11629_v59 = vadd.f32 %v11628_v19, %v11543_v0  ;;  %v11638_v6 = vadd.f32 %v17057_v3, %v11634_v36 }
0x9cb6   :  { %v11637_v48 = vadd.f32 %v17057_v3, %v11629_v59 }
0x9cb9   :  { %v14582_v23 = vpop.f32.mrf.mxu0 }
0x9cba   :  { %v11711_v40 = vadd.f32 %v14582_v23, %v17051_v2 }
0x9cbb   :  { %v11705_v53 = vpop.f32.mrf.mxu0 }
0x9cbc   :  { %v11706_v17 = vadd.f32 %v17051_v2, %v11705_v53  ;;  %11732 = vrot.lane.b32.xlu1 %v11711_v40, %s15301_s1  ;;  %v11715_v60 = vadd.f32 %v11711_v40, %v11638_v6 }
0x9cbe   :  { %11730 = vrot.lane.b32.xlu0 %v11706_v17, %s15301_s1  ;;  %v11714_v25 = vadd.f32 %v11706_v17, %v11637_v48  ;;  %v13176_v30 = vmul.f32 -1.442695, %v11715_v60 }
0x9cc0   :  { %v13175_v47 = vmul.f32 -1.442695, %v11714_v25  ;;  %15130 = vpow2.f32 %v13176_v30 }
0x9cc2   :  { %15132 = vpow2.f32 %v13175_v47 }
0x9ccd   :  { %v15131_v39 = vpop.eup %15130 }
0x9cce   :  { %v11723_v18 = vadd.f32 1.0, %v15131_v39 }
0x9ccf   :  { %v15133_v11 = vpop.eup %15132 }
0x9cd0   :  { %v11722_v51 = vadd.f32 1.0, %v15133_v11  ;;  %15134 = vrcp.f32 %v11723_v18 }
0x9cd2   :  { %15136 = vrcp.f32 %v11722_v51 }
0x9cdd   :  { %v15135_v63 = vpop.eup %15134 }
0x9cde   :  { %v11751_v0 = vsub.f32 1.0, %v15135_v63 }
0x9cdf   :  { %v15137_v26 = vpop.eup %15136 }
0x9d2e   :  { %v11733_v45 = vpop.permute.xlu1 %11732 }
0x9d2f   :  { %v11737_v61 = vmul.f32 %v15135_v63, %v11733_v45 }
0x9d30   :  { %v11731_v24 = vpop.permute.xlu0 %11730 }
0x9d31   :  { %v11736_v13 = vmul.f32 %v15137_v26, %v11731_v24  ;;  %11742 = vrot.lane.b32.xlu1 %v11737_v61, %s15301_s1 }
0x9d33   :  { %11740 = vrot.lane.b32.xlu0 %v11736_v13, %s15301_s1 }
0x9d52   :  { %11770 = vmax.xlane.f32.xlu0 %v11769_v46 }
0x9d55   :  { %11773 = vmax.xlane.f32.xlu1 %v11772_v12 }
0x9da3   :  { %v11743_v41 = vpop.permute.xlu1 %11742 }
0x9da4   :  { %v11747_v57 = vadd.f32 %v11743_v41, %v11638_v6  ;;  %v11763_v6 = vmul.f32 %v15135_v63, %v17078_v7 }
0x9da5   :  { %v11741_v4 = vpop.permute.xlu0 %11740 }
0x9da6   :  { %15138 = vtanh.f32 %v11747_v57  ;;  %v11746_v42 = vadd.f32 %v11741_v4, %v11637_v48  ;;  %v11750_v48 = vsub.f32 1.0, %v15137_v26 }
0x9da8   :  { %15140 = vtanh.f32 %v11746_v42 }
0x9db3   :  { %v15139_v55 = vpop.eup %15138 }
0x9db4   :  { %11756 = vrot.lane.b32.xlu1 %v15139_v55, %s15302_s23 }
0x9db5   :  { %v15141_v32 = vpop.eup %15140 }
0x9db6   :  { %11754 = vrot.lane.b32.xlu0 %v15141_v32, %s15302_s23 }
0x9ddb   :  { %v11771_v54 = vpop.xlane.xlu0 %11770 }
0x9ddc   :  { %v11775_v38 = vsub.f32 %v16983_v15, %v11771_v54 }
0x9dde   :  { %v11777_v21 = vmul.f32 1.442695, %v11775_v38  ;;  %v11774_v19 = vpop.xlane.xlu1 %11773 }
0x9ddf   :  { %v11776_v23 = vsub.f32 %v16973_v8, %v11774_v19  ;;  %v11762_v8 = vmul.f32 %v15137_v26, %v17082_v22 }
0x9de0   :  { %15142 = vpow2.f32 %v11777_v21 }
0x9de1   :  { %v11779_v40 = vmul.f32 1.442695, %v11776_v23 }
0x9de3   :  { %15144 = vpow2.f32 %v11779_v40 }
0x9ded   :  { %v15143_v53 = vpop.eup %15142 }
0x9dee   :  { %v11781_v17 = vsel %vm35_vm1, %v15143_v53, 0.0 }
0x9def   :  { %11782 = vadd.xlane.f32.xlu0 %v11781_v17 }
0x9df0   :  { %v15145_v34 = vpop.eup %15144 }
0x9df1   :  { %v11784_v36 = vsel %vm35_vm1, %v15145_v34, 0.0 }
0x9df2   :  { %11785 = vadd.xlane.f32.xlu1 %v11784_v36 }
0x9e26   :  { %v11757_v59 = vpop.permute.xlu1 %11756 }
0x9e27   :  { %v11761_v15 = vmul.f32 %v11757_v59, %v11751_v0 }
0x9e28   :  { %v11755_v60 = vpop.permute.xlu0 %11754 }
0x9e29   :  { %v17165_v25 = vadd.f32 %v11763_v6, %v11761_v15  ;;  %v11760_v30 = vmul.f32 %v11755_v60, %v11750_v48 }
0x9e2b   :  { %v17168_v47 = vadd.f32 %v11762_v8, %v11760_v30  ;;  %11829 = vrot.lane.b32.xlu1 %v17165_v25, %s15302_s23 }
0x9e2d   :  { %11827 = vrot.lane.b32.xlu0 %v17168_v47, %s15302_s23 }
0x9e78   :  { %v11783_v39 = vpop.xlane.xlu0 %11782 }
0x9e79   :  { %15146 = vrcp.f32 %v11783_v39 }
0x9e7b   :  { %v11786_v11 = vpop.xlane.xlu1 %11785 }
0x9e7c   :  { %15148 = vrcp.f32 %v11786_v11 }
0x9e86   :  { %v15147_v7 = vpop.eup %15146 }
0x9e87   :  { %v11788_v18 = vmul.f32 %v15147_v7, %v15143_v53 }
0x9e89   :  { %v15149_v51 = vpop.eup %15148  ;;  %11806 = vperm.xlu0 %14799, %v11788_v18  }
0x9e8a   :  { %v11790_v63 = vmul.f32 %v15149_v51, %v15145_v34  ;;  %v12210_v51 = vsel %vm35_vm1, %v16987_v28, -inf }
0x9e8c   :  { %11810 = vperm.xlu1 %14801, %v11790_v63  }
0x9e8d   :  { %14802 = vset.pattern.permute.xlu0 %v15306_v58 }
0x9e8e   :  { %11793 = vperm.xlu0 %14802, %v11788_v18  }
0x9e90   :  { %14803 = vset.pattern.permute.xlu1 %v15306_v58 }
0x9e91   :  { %11798 = vperm.xlu1 %14803, %v11790_v63  }
0x9e92   :  { %14804 = vset.pattern.permute.xlu0 %v15308_v1 }
0x9e95   :  { %14805 = vset.pattern.permute.xlu1 %v15308_v1 }
0x9e9d   :  { %v11830_v45 = vpop.permute.xlu1 %11829 }
0x9e9f   :  { %v11828_v22 = vpop.permute.xlu0 %11827 }
0x9ea0   :  { %14591 = vmatprep.mubr.msk.f32.mxu1 %vm132_vm3, %v11828_v22 }
0x9ea1   :  { %14592 = vmatmul.mubr.msk.f32.vlgmr.msra.gmra.mxu1 %vm132_vm3, %v11830_v45 }
0x9ea2   :  { %14606 = vmatpush3.msra.mxu1 %v17001_v50 }
0x9ea3   :  { %14610 = vmatprep.subr.mxu1 %v17009_v29 }
0x9f04   :  { %v11807_v61 = vpop.permute.xlu0 %11806 }
0x9f05   :  { %v11813_v26 = vmul.f32 %v11807_v61, %v16926_v52 }
0x9f07   :  { %v11811_v24 = vpop.permute.xlu1 %11810  ;;  %11817 = vrot.lane.b32.xlu1 %v11813_v26, %s15305_s26 }
0x9f08   :  { %v11814_v58 = vmul.f32 %v11811_v24, %v16924_v20 }
0x9f0a   :  { %11819 = vrot.lane.b32.xlu0 %v11814_v58, %s15305_s26 }
0x9f0c   :  { %v11799_v4 = vpop.permute.xlu1 %11798 }
0x9f0d   :  { %v11802_v32 = vmul.f32 %v11799_v4, %v16924_v20 }
0x9f61   :  { %v14593_v1 = vpop.f32.mrf.mxu1 }
0x9f62   :  { %v11907_v13 = vadd.f32 %v14593_v1, %v16930_v44 }
0x9f63   :  { %v11901_v46 = vpop.f32.mrf.mxu1 }
0x9f64   :  { %v11902_v12 = vadd.f32 %v16930_v44, %v11901_v46  ;;  %v11911_v57 = vmax.f32 %v11907_v13, 0.0  ;;  %v11794_v44 = vpop.permute.xlu0 %11793 }
0x9f65   :  { %v11801_v42 = vmul.f32 %v11794_v44, %v16926_v52 }
0x9f66   :  { %v11910_v41 = vmax.f32 %v11902_v12, 0.0 }
0x9f68   :  { %14602 = vmatprep.mubr.msk.f32.mxu0 %vm132_vm3, %v11910_v41 }
0x9f69   :  { %14603 = vmatmul.mubr.msk.f32.vlgmr.msra.gmra.mxu0 %vm132_vm3, %v11911_v57 }
0x9f6a   :  { %14622 = vmatpush3.msra.mxu0 %v16888_v10 }
0x9f6b   :  { %14623 = vmatprep.subr.mxu0 %v16901_v31 }
0x9f6c   :  { %14624 = vmatpush3.msra.mxu0 %v16901_v31 }
0x9f6d   :  { %14625 = vmatprep.subr.mxu0 %v16907_v5 }
0x9f6e   :  { %14626 = vmatpush3.msra.mxu0 %v16907_v5 }
0x9f6f   :  { %14627 = vmatprep.subr.mxu0 %v16911_v62 }
0x9f70   :  { %14628 = vmatpush3.msra.mxu0 %v16911_v62 }
0x9f71   :  { %14643 = vmatprep.subr.mxu0 %v17001_v50 }
0x9f79   :  { %v11818_v55 = vpop.permute.xlu1 %11817 }
0x9f7a   :  { %v11823_v10 = vadd.f32 %v11818_v55, %v11801_v42 }
0x9f7c   :  { %11995 = vrot.lane.b32.xlu1 %v11823_v10, %s15303_s24  ;;  %v11820_v31 = vpop.permute.xlu0 %11819 }
0x9f7d   :  { %v11824_v54 = vadd.f32 %v11820_v31, %v11802_v32 }
0x9f7f   :  { %11997 = vrot.lane.b32.xlu0 %v11824_v54, %s15303_s24 }
0x9fee   :  { %v11996_v5 = vpop.permute.xlu1 %11995 }
0x9fef   :  { %14607 = vmatprep.mubr.msk.f32.mxu1 %vm245_vm6, %v11996_v5 }
0x9ff1   :  { %v11998_v62 = vpop.permute.xlu0 %11997 }
0x9ff2   :  { %14608 = vmatmul.mubr.msk.f32.vlgmr.msra.gmra.mxu1 %vm245_vm6, %v11998_v62 }
0x9ff3   :  { %14611 = vmatpush3.msra.mxu1 %v17009_v29  ;;  %14618 = vmatprep.mubr.msk.f32.mxu1 %vm132_vm3, %v11828_v22 }
0x9ff4   :  { %14612 = vmatprep.subr.mxu1 %v17024_v33 }
0x9ff5   :  { %14613 = vmatpush3.msra.mxu1 %v17024_v33 }
0x9ff6   :  { %14614 = vmatprep.subr.mxu1 %v17030_v14 }
0x9ff7   :  { %14615 = vmatpush3.msra.mxu1 %v17030_v14 }
0x9ff8   :  { %14616 = vmatprep.subr.mxu1 %v17034_v35 }
0x9ff9   :  { %14617 = vmatpush3.msra.mxu1 %v17034_v35 }
0x9ffa   :  { %14619 = vmatmul.mubr.msk.f32.vlgmr.msra.gmra.mxu1 %vm132_vm3, %v11830_v45  ;;  %14632 = vmatprep.subr.mxu1 %v16921_v16 }
0x9ffb   :  { %14633 = vmatpush3.msra.mxu1 %v16921_v16 }
0x9ffc   :  { %14634 = vmatprep.subr.mxu1 %v16934_v27 }
0x9ffd   :  { %14635 = vmatpush3.msra.mxu1 %v16934_v27 }
0x9ffe   :  { %14636 = vmatprep.subr.mxu1 %v16939_v43 }
0x9fff   :  { %14637 = vmatpush3.msra.mxu1 %v16939_v43 }
0xa000   :  { %14638 = vmatprep.subr.mxu1 %v16944_v56 }
0xa001   :  { %14639 = vmatpush3.msra.mxu1 %v16944_v56 }
0xa029   :  { %v14604_v27 = vpop.f32.mrf.mxu0 }
0xa02b   :  { %v11984_v17 = vpop.f32.mrf.mxu0 }
0xa0b2   :  { %v14609_v38 = vpop.f32.mrf.mxu1 }
0xa0b3   :  { %v12075_v53 = vadd.f32 %v14609_v38, %v14604_v27 }
0xa0b4   :  { %v12069_v21 = vpop.f32.mrf.mxu1 }
0xa0b5   :  { %v12070_v43 = vadd.f32 %v12069_v21, %v11984_v17  ;;  %v12079_v34 = vadd.f32 %v17057_v3, %v12075_v53 }
0xa0b7   :  { %v12078_v56 = vadd.f32 %v17057_v3, %v12070_v43  ;;  %v12213_v3 = vsel %vm35_vm1, %v16977_v49, -inf }
0xa0ba   :  { %v14620_v19 = vpop.f32.mrf.mxu1 }
0xa0bb   :  { %v12152_v23 = vadd.f32 %v14620_v19, %v17051_v2 }
0xa0bc   :  { %v12146_v40 = vpop.f32.mrf.mxu1 }
0xa0bd   :  { %v12147_v16 = vadd.f32 %v17051_v2, %v12146_v40  ;;  %12173 = vrot.lane.b32.xlu0 %v12152_v23, %s15301_s1  ;;  %v12156_v36 = vadd.f32 %v12152_v23, %v12079_v34 }
0xa0bf   :  { %12171 = vrot.lane.b32.xlu1 %v12147_v16, %s15301_s1  ;;  %v12155_v0 = vadd.f32 %v12147_v16, %v12078_v56  ;;  %v13186_v59 = vmul.f32 -1.442695, %v12156_v36 }
0xa0c1   :  { %v13185_v6 = vmul.f32 -1.442695, %v12155_v0  ;;  %15150 = vpow2.f32 %v13186_v59 }
0xa0c3   :  { %15152 = vpow2.f32 %v13185_v6 }
0xa0ce   :  { %v15151_v15 = vpop.eup %15150 }
0xa0cf   :  { %v12164_v48 = vadd.f32 1.0, %v15151_v15 }
0xa0d0   :  { %v15153_v2 = vpop.eup %15152 }
0xa0d1   :  { %v12163_v60 = vadd.f32 1.0, %v15153_v2  ;;  %15154 = vrcp.f32 %v12164_v48 }
0xa0d3   :  { %15156 = vrcp.f32 %v12163_v60  ;;  %v12883_v60 = vld [vmem:[#allocation5 + $0x228] sm:$0xff] }
0xa0d4   :  { %14659 = vmatprep.subr.mxu1 %v12883_v60 }
0xa0de   :  { %v15155_v8 = vpop.eup %15154 }
0xa0df   :  { %v12192_v13 = vsub.f32 1.0, %v15155_v8  ;;  %v12204_v12 = vmul.f32 %v15155_v8, %v17165_v25 }
0xa0e0   :  { %v15157_v11 = vpop.eup %15156 }
0xa0e1   :  { %v12191_v57 = vsub.f32 1.0, %v15157_v11  ;;  %v12203_v42 = vmul.f32 %v15157_v11, %v17168_v47 }
0xa12f   :  { %v12174_v30 = vpop.permute.xlu0 %12173 }
0xa130   :  { %v12178_v39 = vmul.f32 %v15155_v8, %v12174_v30  ;;  %v12882_v8 = vld [vmem:[#allocation5 + $0x220] sm:$0xff]  ;;  %v12881_v30 = vld [vmem:[#allocation5 + $0x218] sm:$0xff] }
0xa131   :  { %v12172_v7 = vpop.permute.xlu1 %12171 }
0xa132   :  { %v12177_v18 = vmul.f32 %v15157_v11, %v12172_v7  ;;  %12183 = vrot.lane.b32.xlu0 %v12178_v39, %s15301_s1  ;;  %v12879_v39 = vld [vmem:[#allocation5 + $0x208] sm:$0xff]  ;;  %v12785_v7 = vld [vmem:[#allocation5 + $0x1a0] sm:$0xff] }
0xa134   :  { %12181 = vrot.lane.b32.xlu1 %v12177_v18, %s15301_s1  ;;  %v12784_v18 = vld [vmem:[#allocation5 + $0x198] sm:$0xff] }
0xa151   :  { %12214 = vmax.xlane.f32.xlu0 %v12213_v3  ;;  %v12783_v3 = vld [vmem:[#allocation5 + $0x190] sm:$0xff] }
0xa158   :  { %12211 = vmax.xlane.f32.xlu1 %v12210_v51  ;;  %v12877_v51 = vld [vmem:[#allocation5 + $0x1f8] sm:$0xff] }
0xa1a4   :  { %v12184_v63 = vpop.permute.xlu0 %12183 }
0xa1a5   :  { %v12188_v22 = vadd.f32 %v12184_v63, %v12079_v34  ;;  %v15269_v34 = vld [vmem:[#allocation5 + $0x258] ss:$0 sm:$0xff]  ;;  %v12876_v63 = vld [vmem:[#allocation5 + $0x1f0] sm:$0xff] }
0xa1a6   :  { %v12182_v45 = vpop.permute.xlu1 %12181 }
0xa1a7   :  { %15158 = vtanh.f32 %v12188_v22  ;;  %v12187_v61 = vadd.f32 %v12182_v45, %v12078_v56  ;;  %v12875_v22 = vld [vmem:[#allocation5 + $0x1e8] sm:$0xff]  ;;  %v12874_v45 = vld [vmem:[#allocation5 + $0x1e0] sm:$0xff] }
0xa1a9   :  { %15160 = vtanh.f32 %v12187_v61  ;;  %v12873_v61 = vld [vmem:[#allocation5 + $0x1d8] sm:$0xff] }
0xa1b4   :  { %v15159_v26 = vpop.eup %15158 }
0xa1b5   :  { %12197 = vrot.lane.b32.xlu1 %v15159_v26, %s15302_s23  ;;  %v12872_v26 = vld [vmem:[#allocation5 + $0x1d0] sm:$0xff] }
0xa1b6   :  { %v15161_v24 = vpop.eup %15160 }
0xa1b7   :  { %12195 = vrot.lane.b32.xlu0 %v15161_v24, %s15302_s23  ;;  %v12871_v24 = vld [vmem:[#allocation5 + $0x1c8] sm:$0xff] }
0xa1da   :  { %v12215_v1 = vpop.xlane.xlu0 %12214 }
0xa1db   :  { %v12217_v32 = vsub.f32 %v16977_v49, %v12215_v1  ;;  %v12869_v1 = vld [vmem:[#allocation5 + $0x1b8] sm:$0xff] }
0xa1dd   :  { %v12220_v31 = vmul.f32 1.442695, %v12217_v32  ;;  %v13198_v32 = vld [vmem:[#allocation5 + $0x1a8] ss:$0 sm:$0xff] }
0xa1df   :  { %15162 = vpow2.f32 %v12220_v31 }
0xa1e1   :  { %v12212_v58 = vpop.xlane.xlu1 %12211 }
0xa1e2   :  { %v12216_v54 = vsub.f32 %v16987_v28, %v12212_v58  ;;  %v12870_v58 = vld [vmem:[#allocation5 + $0x1c0] sm:$0xff] }
0xa1e4   :  { %v12218_v5 = vmul.f32 1.442695, %v12216_v54 }
0xa1e6   :  { %15164 = vpow2.f32 %v12218_v5 }
0xa1ec   :  { %v15163_v62 = vpop.eup %15162 }
0xa1ed   :  { %v12225_v38 = vsel %vm35_vm1, %v15163_v62, 0.0 }
0xa1f3   :  { %v15165_v21 = vpop.eup %15164 }
0xa1f4   :  { %v12222_v19 = vsel %vm35_vm1, %v15165_v21, 0.0 }
0xa227   :  { %v12198_v46 = vpop.permute.xlu1 %12197 }
0xa228   :  { %v12202_v41 = vmul.f32 %v12198_v46, %v12192_v13  ;;  %v12868_v13 = vld [vmem:[#allocation5 + $0x1b0] sm:$0xff] }
0xa229   :  { %v12196_v44 = vpop.permute.xlu0 %12195 }
0xa22a   :  { %v17236_v4 = vadd.f32 %v12204_v12, %v12202_v41  ;;  %v12201_v55 = vmul.f32 %v12196_v44, %v12191_v57  ;;  %v15272_v44 = vld [vmem:[#allocation5 + $0x2b0] ss:$0 sm:$0xff] }
0xa22c   :  { %v17239_v10 = vadd.f32 %v12203_v42, %v12201_v55  ;;  %12250 = vrot.lane.b32.xlu0 %v17236_v4, %s15302_s23 }
0xa22e   :  { %12248 = vrot.lane.b32.xlu1 %v17239_v10, %s15302_s23 }
0xa24b   :  { %12226 = vadd.xlane.f32.xlu0 %v12225_v38 }
0xa252   :  { %12223 = vadd.xlane.f32.xlu1 %v12222_v19 }
0xa29e   :  { %v12251_v40 = vpop.permute.xlu0 %12250 }
0xa2a0   :  { %v12249_v23 = vpop.permute.xlu1 %12248 }
0xa2a1   :  { %14629 = vmatprep.mubr.msk.f32.mxu0 %vm132_vm3, %v12249_v23 }
0xa2a2   :  { %14630 = vmatmul.mubr.msk.f32.vlgmr.msra.gmra.mxu0 %vm132_vm3, %v12251_v40 }
0xa2a3   :  { %14644 = vmatpush3.msra.mxu0 %v17001_v50 }
0xa2a4   :  { %14648 = vmatprep.subr.mxu0 %v17009_v29 }
0xa2d4   :  { %v12227_v49 = vpop.xlane.xlu0 %12226 }
0xa2d5   :  { %15166 = vrcp.f32 %v12227_v49 }
0xa2db   :  { %v12224_v28 = vpop.xlane.xlu1 %12223 }
0xa2dc   :  { %15168 = vrcp.f32 %v12224_v28  ;;  %v15273_v28 = vld [vmem:[#allocation5 + $0x2a8] ss:$0 sm:$0xff] }
0xa2e2   :  { %v15167_v16 = vpop.eup %15166 }
0xa2e3   :  { %v12231_v27 = vmul.f32 %v15167_v16, %v15163_v62 }
0xa2e5   :  { %12239 = vperm.xlu1 %14805, %v12231_v27  }
0xa2e9   :  { %v15169_v53 = vpop.eup %15168 }
0xa2ea   :  { %v12229_v17 = vmul.f32 %v15169_v53, %v15165_v21 }
0xa2ec   :  { %12234 = vperm.xlu0 %14804, %v12229_v17  }
0xa360   :  { %v12240_v2 = vpop.permute.xlu1 %12239 }
0xa361   :  { %v12243_v48 = vmul.f32 %v12240_v2, %v16924_v20 }
0xa362   :  { %v14631_v43 = vpop.f32.mrf.mxu0 }
0xa363   :  { %v12328_v56 = vadd.f32 %v15269_v34, %v14631_v43 }
0xa364   :  { %v12322_v36 = vpop.f32.mrf.mxu0 }
0xa365   :  { %v12323_v0 = vadd.f32 %v15269_v34, %v12322_v36  ;;  %v12332_v50 = vmax.f32 %v12328_v56, 0.0 }
0xa367   :  { %v12331_v59 = vmax.f32 %v12323_v0, 0.0  ;;  %v12235_v6 = vpop.permute.xlu0 %12234 }
0xa368   :  { %v12242_v15 = vmul.f32 %v12235_v6, %v16926_v52  ;;  %v12880_v52 = vld [vmem:[#allocation5 + $0x210] sm:$0xff] }
0xa369   :  { %14640 = vmatprep.mubr.msk.f32.mxu1 %vm132_vm3, %v12331_v59 }
0xa36a   :  { %14641 = vmatmul.mubr.msk.f32.vlgmr.msra.gmra.mxu1 %vm132_vm3, %v12332_v50  ;;  %12416 = vrot.lane.b32.xlu1 %v12242_v15, %s15310_s28 }
0xa36b   :  { %14660 = vmatpush3.msra.mxu1 %v12883_v60 }
0xa36c   :  { %14661 = vmatprep.subr.mxu1 %v12882_v8 }
0xa36d   :  { %14662 = vmatpush3.msra.mxu1 %v12882_v8 }
0xa36e   :  { %12418 = vrot.lane.b32.xlu1 %v12243_v48, %s15310_s28  ;;  %14663 = vmatprep.subr.mxu1 %v12881_v30 }
0xa36f   :  { %14664 = vmatpush3.msra.mxu1 %v12881_v30 }
0xa370   :  { %14665 = vmatprep.subr.mxu1 %v12880_v52 }
0xa371   :  { %14666 = vmatpush3.msra.mxu1 %v12880_v52 }
0xa372   :  { %14667 = vmatprep.subr.mxu1 %v12879_v39 }
0xa373   :  { %14668 = vmatpush3.msra.mxu1 %v12879_v39 }
0xa3dc   :  { %v12417_v11 = vpop.permute.xlu1 %12416 }
0xa3dd   :  { %14645 = vmatprep.mubr.msk.f32.mxu0 %vm245_vm6, %v12417_v11 }
0xa3e0   :  { %v12419_v20 = vpop.permute.xlu1 %12418 }
0xa3e1   :  { %14646 = vmatmul.mubr.msk.f32.vlgmr.msra.gmra.mxu0 %vm245_vm6, %v12419_v20 }
0xa3e2   :  { %14649 = vmatpush3.msra.mxu0 %v17009_v29  ;;  %14656 = vmatprep.mubr.msk.f32.mxu0 %vm132_vm3, %v12249_v23  ;;  %v15270_v29 = vld [vmem:[#allocation4] sm:$0xff] }
0xa3e3   :  { %14650 = vmatprep.subr.mxu0 %v17024_v33 }
0xa3e4   :  { %14651 = vmatpush3.msra.mxu0 %v17024_v33  ;;  %v12782_v33 = vld [vmem:[#allocation5 + $0x188] sm:$0xff] }
0xa3e5   :  { %14652 = vmatprep.subr.mxu0 %v17030_v14 }
0xa3e6   :  { %14653 = vmatpush3.msra.mxu0 %v17030_v14  ;;  %v15271_v14 = vld [vmem:[#allocation4 + $0x8] sm:$0xff] }
0xa3e7   :  { %14654 = vmatprep.subr.mxu0 %v17034_v35 }
0xa3e8   :  { %14655 = vmatpush3.msra.mxu0 %v17034_v35  ;;  %v12878_v35 = vld [vmem:[#allocation5 + $0x200] sm:$0xff] }
0xa3e9   :  { %14657 = vmatmul.mubr.msk.f32.vlgmr.msra.gmra.mxu0 %vm132_vm3, %v12251_v40  ;;  %14694 = vmatprep.subr.mxu0 %v12785_v7 }
0xa3ea   :  { %14695 = vmatpush3.msra.mxu0 %v12785_v7  ;;  %14702 = vmatprep.mubr.msk.f32.mxu0 %vm132_vm3, %v15270_v29 }
0xa3eb   :  { %14696 = vmatprep.subr.mxu0 %v12784_v18  ;;  %14669 = vmatprep.subr.mxu1 %v12878_v35 }
0xa3ec   :  { %14697 = vmatpush3.msra.mxu0 %v12784_v18  ;;  %14670 = vmatpush3.msra.mxu1 %v12878_v35 }
0xa3ed   :  { %14698 = vmatprep.subr.mxu0 %v12783_v3  ;;  %14671 = vmatprep.subr.mxu1 %v12877_v51 }
0xa3ee   :  { %14699 = vmatpush3.msra.mxu0 %v12783_v3  ;;  %14672 = vmatpush3.msra.mxu1 %v12877_v51 }
0xa3ef   :  { %14700 = vmatprep.subr.mxu0 %v12782_v33  ;;  %14673 = vmatprep.subr.mxu1 %v12876_v63 }
0xa3f0   :  { %14701 = vmatpush3.msra.mxu0 %v12782_v33  ;;  %14674 = vmatpush3.msra.mxu1 %v12876_v63 }
0xa3f1   :  { %14703 = vmatmul.mubr.msk.f32.vlgmr.msra.gmra.mxu0 %vm132_vm3, %v15271_v14  ;;  %14705 = vmatprep.subr.mxu0 %v12883_v60 }
0xa3f2   :  { %14706 = vmatpush3.msra.mxu0 %v12883_v60  ;;  %14675 = vmatprep.subr.mxu1 %v12875_v22 }
0xa3f3   :  { %14707 = vmatprep.subr.mxu0 %v12882_v8  ;;  %14676 = vmatpush3.msra.mxu1 %v12875_v22 }
0xa3f4   :  { %14708 = vmatpush3.msra.mxu0 %v12882_v8  ;;  %14677 = vmatprep.subr.mxu1 %v12874_v45  ;;  %v17276_v8 = vld [vmem:[#allocation5 + $0x230] ss:$0 sm:$0xff] }
0xa3f5   :  { %14709 = vmatprep.subr.mxu0 %v12881_v30  ;;  %14678 = vmatpush3.msra.mxu1 %v12874_v45 }
0xa3f6   :  { %14710 = vmatpush3.msra.mxu0 %v12881_v30  ;;  %14679 = vmatprep.subr.mxu1 %v12873_v61 }
0xa3f7   :  { %14711 = vmatprep.subr.mxu0 %v12880_v52  ;;  %14680 = vmatpush3.msra.mxu1 %v12873_v61 }
0xa3f8   :  { %14712 = vmatpush3.msra.mxu0 %v12880_v52  ;;  %14681 = vmatprep.subr.mxu1 %v12872_v26 }
0xa3f9   :  { %14713 = vmatprep.subr.mxu0 %v12879_v39  ;;  %14682 = vmatpush3.msra.mxu1 %v12872_v26 }
0xa3fa   :  { %14714 = vmatpush3.msra.mxu0 %v12879_v39  ;;  %14683 = vmatprep.subr.mxu1 %v12871_v24 }
0xa3fb   :  { %14715 = vmatprep.subr.mxu0 %v12878_v35  ;;  %14684 = vmatpush3.msra.mxu1 %v12871_v24 }
0xa3fc   :  { %14716 = vmatpush3.msra.mxu0 %v12878_v35  ;;  %14685 = vmatprep.subr.mxu1 %v12870_v58  ;;  %v14806_v35 = vpack.i.bf16 %v17236_v4, %v17239_v10 }
0xa3fd   :  { %14717 = vmatprep.subr.mxu0 %v12877_v51  ;;  %14686 = vmatpush3.msra.mxu1 %v12870_v58 }
0xa3fe   :  { %14718 = vmatpush3.msra.mxu0 %v12877_v51  ;;  %14687 = vmatprep.subr.mxu1 %v12869_v1 }
0xa3ff   :  { %14719 = vmatprep.subr.mxu0 %v12876_v63  ;;  %14688 = vmatpush3.msra.mxu1 %v12869_v1 }
0xa400   :  { %14720 = vmatpush3.msra.mxu0 %v12876_v63  ;;  %14689 = vmatprep.subr.mxu1 %v12868_v13 }
0xa401   :  { %14721 = vmatprep.subr.mxu0 %v12875_v22  ;;  %14690 = vmatpush3.msra.mxu1 %v12868_v13 }
0xa402   :  { %14722 = vmatpush3.msra.mxu0 %v12875_v22 }
0xa403   :  { %14723 = vmatprep.subr.mxu0 %v12874_v45 }
0xa404   :  { %14724 = vmatpush3.msra.mxu0 %v12874_v45  ;;  %v12651_v45 = vld [vmem:[%s17326_s0] sm:$0xff] }
0xa405   :  { %14725 = vmatprep.subr.mxu0 %v12873_v61 }
0xa406   :  { %14726 = vmatpush3.msra.mxu0 %v12873_v61 }
0xa407   :  { %14727 = vmatprep.subr.mxu0 %v12872_v26 }
0xa408   :  { %14728 = vmatpush3.msra.mxu0 %v12872_v26 }
0xa409   :  { %14729 = vmatprep.subr.mxu0 %v12871_v24 }
0xa40a   :  { %14730 = vmatpush3.msra.mxu0 %v12871_v24 }
0xa40b   :  { %14731 = vmatprep.subr.mxu0 %v12870_v58 }
0xa40c   :  { %14732 = vmatpush3.msra.mxu0 %v12870_v58 }
0xa40d   :  { %14733 = vmatprep.subr.mxu0 %v12869_v1 }
0xa40e   :  { %14734 = vmatpush3.msra.mxu0 %v12869_v1 }
0xa40f   :  { %14735 = vmatprep.subr.mxu0 %v12868_v13 }
0xa410   :  { %14736 = vmatpush3.msra.mxu0 %v12868_v13 }
0xa42a   :  { %v14642_v19 = vpop.f32.mrf.mxu1 }
0xa42c   :  { %v12405_v23 = vpop.f32.mrf.mxu1 }
0xa4a1   :  { %v14647_v46 = vpop.f32.mrf.mxu0 }
0xa4a2   :  { %v12496_v49 = vadd.f32 %v14647_v46, %v14642_v19 }
0xa4a3   :  { %v12490_v12 = vpop.f32.mrf.mxu0 }
0xa4a4   :  { %v12491_v40 = vadd.f32 %v12490_v12, %v12405_v23  ;;  %v12500_v53 = vadd.f32 %v15273_v28, %v12496_v49 }
0xa4a6   :  { %v12499_v16 = vadd.f32 %v15273_v28, %v12491_v40 }
0xa4a9   :  { %v14658_v41 = vpop.f32.mrf.mxu0 }
0xa4aa   :  { %v12573_v55 = vadd.f32 %v15272_v44, %v14658_v41 }
0xa4ab   :  { %v12567_v57 = vpop.f32.mrf.mxu0 }
0xa4ac   :  { %v12568_v42 = vadd.f32 %v15272_v44, %v12567_v57  ;;  %v12577_v17 = vadd.f32 %v12573_v55, %v12500_v53  ;;  %v12652_v57 = vld [vmem:[%s17326_s0 + $0x8] sm:$0xff] }
0xa4ae   :  { %12592 = vrot.lane.b32.xlu1 %v12568_v42, %s15301_s1  ;;  %v12576_v27 = vadd.f32 %v12568_v42, %v12499_v16  ;;  %v13196_v34 = vmul.f32 -1.442695, %v12577_v17 }
0xa4b0   :  { %v13195_v43 = vmul.f32 -1.442695, %v12576_v27 }
0xa4b1   :  { %v14704_v31 = vpop.f32.mrf.mxu0 }
0xa4b2   :  { %12594 = vrot.lane.b32.xlu1 %v12573_v55, %s15301_s1  ;;  %v12863_v54 = vadd.f32 %v14704_v31, %v13198_v32  ;;  %15170 = vpow2.f32 %v13195_v43  ;;  %v12645_v55 = vsel %vm132_vm3, %v17092_v9, %v17165_v25 }
0xa4b3   :  { %v12857_v5 = vpop.f32.mrf.mxu0  ;;  %15172 = vpow2.f32 %v13196_v34 }
0xa4b4   :  { %v12858_v62 = vadd.f32 %v13198_v32, %v12857_v5  ;;  %v12867_v21 = vmax.f32 %v12863_v54, 0.0  ;;  %v12644_v54 = vsel %vm132_vm3, %v17090_v37, %v17168_v47 }
0xa4b6   :  { %v12866_v38 = vmax.f32 %v12858_v62, 0.0 }
0xa4b8   :  { %14737 = vmatprep.mubr.f32.mxu0 %v12866_v38 }
0xa4b9   :  { %14738 = vmatmul.mubr.f32.vlgmr.msra.gmra.mxu0 %v12867_v21 }
0xa4bf   :  { %v15171_v56 = vpop.eup %15170 }
0xa4c0   :  { %v12584_v36 = vadd.f32 1.0, %v15171_v56  ;;  %v15173_v0 = vpop.eup %15172 }
0xa4c1   :  { %v12585_v59 = vadd.f32 1.0, %v15173_v0 }
0xa4c2   :  { %15174 = vrcp.f32 %v12584_v36 }
0xa4c3   :  { %15176 = vrcp.f32 %v12585_v59 }
0xa4cf   :  { %v15175_v6 = vpop.eup %15174 }
0xa4d0   :  { %v15177_v2 = vpop.eup %15176  ;;  %v12612_v22 = vsub.f32 1.0, %v15175_v6  ;;  %v12624_v58 = vmul.f32 %v15175_v6, %v17239_v10 }
0xa4d1   :  { %v12613_v26 = vsub.f32 1.0, %v15177_v2  ;;  %v12625_v1 = vmul.f32 %v15177_v2, %v17236_v4 }
0xa520   :  { %v12593_v50 = vpop.permute.xlu1 %12592 }
0xa521   :  { %v12598_v15 = vmul.f32 %v15175_v6, %v12593_v50 }
0xa523   :  { %12602 = vrot.lane.b32.xlu1 %v12598_v15, %s15301_s1 }
0xa524   :  { %v12595_v48 = vpop.permute.xlu1 %12594 }
0xa525   :  { %v12599_v60 = vmul.f32 %v15177_v2, %v12595_v48 }
0xa527   :  { %12604 = vrot.lane.b32.xlu1 %v12599_v60, %s15301_s1 }
0xa579   :  { %v14739_v30 = vpop.f32.mrf.mxu0 }
0xa57a   :  { %v12961_v52 = vadd.f32 %v14739_v30, %v17276_v8 }
0xa57b   :  { %v12955_v39 = vpop.f32.mrf.mxu0 }
0xa57c   :  { %15178 = vtanh.f32 %v12961_v52  ;;  %v12956_v11 = vadd.f32 %v17276_v8, %v12955_v39 }
0xa57e   :  { %15180 = vtanh.f32 %v12956_v11 }
0xa589   :  { %v15179_v20 = vpop.eup %15178 }
0xa58a   :  { %12967 = vst.msk [vmem:[%s17328_s2 + $0x8] sm:$0xff] %vm1433_vm7, %v15179_v20 }
0xa58b   :  { %v15181_v7 = vpop.eup %15180 }
0xa58c   :  { %12966 = vst.msk [vmem:[%s17328_s2] sm:$0xff] %vm1433_vm7, %v15181_v7 }
0xa595   :  { %v12603_v18 = vpop.permute.xlu1 %12602 }
0xa596   :  { %v12608_v29 = vadd.f32 %v12603_v18, %v12499_v16 }
0xa598   :  { %15182 = vtanh.f32 %v12608_v29 }
0xa599   :  { %v12605_v3 = vpop.permute.xlu1 %12604 }
0xa59a   :  { %v12609_v33 = vadd.f32 %v12605_v3, %v12500_v53 }
0xa59c   :  { %15184 = vtanh.f32 %v12609_v33 }
0xa5a5   :  { %v15183_v14 = vpop.eup %15182 }
0xa5a6   :  { %12616 = vrot.lane.b32.xlu1 %v15183_v14, %s15302_s23 }
0xa5a9   :  { %v15185_v51 = vpop.eup %15184 }
0xa5aa   :  { %14807 = vrot.lane.b32.xlu1 %v14806_v35, %s15311_s4  ;;  %12618 = vrot.lane.b32.xlu0 %v15185_v51, %s15302_s23 }
0xa5ae   :  { %12655 = vrot.lane.b32.xlu1 %v12651_v45, %s15312_s10 }
0xa5b2   :  { %12661 = vrot.lane.b32.xlu1 %v12651_v45, %s15298_s16 }
0xa5b6   :  { %12667 = vrot.lane.b32.xlu1 %v12651_v45, %s15313_s11 }
0xa618   :  { %v12617_v63 = vpop.permute.xlu1 %12616 }
0xa619   :  { %v12622_v61 = vmul.f32 %v12617_v63, %v12612_v22 }
0xa61b   :  { %v12626_v46 = vadd.f32 %v12624_v58, %v12622_v61 }
0xa61c   :  { %v12619_v24 = vpop.permute.xlu0 %12618  ;;  %v14808_v10 = vpop.permute.xlu1 %14807 }
0xa61d   :  { %v12623_v13 = vmul.f32 %v12619_v24, %v12613_v26  ;;  %v14810_v4 = vunpack.i.h.bf16 %v14808_v10  ;;  %v14809_v44 = vunpack.i.l.bf16 %v14808_v10 }
0xa61f   :  { %v12627_v12 = vadd.f32 %v12625_v1, %v12623_v13  ;;  %v12648_v5 = vsel %vm12646_vm13, %v12645_v55, %v14810_v4  ;;  %v12647_v62 = vsel %vm12646_vm13, %v12644_v54, %v14809_v44 }
0xa620   :  { %v12656_v25 = vpop.permute.xlu1 %12655 }
0xa621   :  { %v14811_v41 = vpack.i.bf16 %v12627_v12, %v12626_v46  ;;  %v12673_v16 = vsel %vm35_vm1, %v12651_v45, %v12656_v25 }
0xa623   :  { %14812 = vrot.lane.b32.xlu0 %v14811_v41, %s15301_s1 }
0xa624   :  { %v12662_v37 = vpop.permute.xlu1 %12661 }
0xa625   :  { %v12675_v17 = vsel %vm245_vm6, %v12673_v16, %v12662_v37 }
0xa627   :  { %12657 = vrot.lane.b32.xlu0 %v12652_v57, %s15312_s10 }
0xa628   :  { %v12668_v43 = vpop.permute.xlu1 %12667 }
0xa629   :  { %v12678_v59 = vsel %vm12677_vm14, %v12675_v17, %v12668_v43 }
0xa62b   :  { %12663 = vrot.lane.b32.xlu0 %v12652_v57, %s15298_s16 }
0xa62f   :  { %12669 = vrot.lane.b32.xlu0 %v12652_v57, %s15313_s11 }
0xa695   :  { %v14813_v42 = vpop.permute.xlu0 %14812 }
0xa696   :  { %v14815_v32 = vunpack.i.h.bf16 %v14813_v42  ;;  %v14814_v31 = vunpack.i.l.bf16 %v14813_v42 }
0xa698   :  { %v12649_v38 = vsel %vm214_vm4, %v12647_v62, %v14814_v31  ;;  %v12650_v21 = vsel %vm214_vm4, %v12648_v5, %v14815_v32 }
0xa699   :  { %14691 = vmatprep.mubr.f32.mxu1 %v12649_v38  ;;  %v12658_v40 = vpop.permute.xlu0 %12657 }
0xa69a   :  { %14692 = vmatmul.mubr.f32.vlgmr.msra.gmra.mxu1 %v12650_v21  ;;  %v12674_v47 = vsel %vm35_vm1, %v12652_v57, %v12658_v40 }
0xa69d   :  { %v12664_v28 = vpop.permute.xlu0 %12663 }
0xa69e   :  { %v12676_v27 = vsel %vm245_vm6, %v12674_v47, %v12664_v28 }
0xa6a1   :  { %v12670_v53 = vpop.permute.xlu0 %12669 }
0xa6a2   :  { %v12679_v56 = vsel %vm12677_vm14, %v12676_v27, %v12670_v53 }
0xa75a   :  { %v14693_v19 = vpop.f32.mrf.mxu1 }
0xa75b   :  { %v12773_v23 = vadd.f32 %v14693_v19, %v17276_v8 }
0xa75c   :  { %v12767_v49 = vpop.f32.mrf.mxu1 }
0xa75d   :  { %15186 = vtanh.f32 %v12773_v23  ;;  %v12768_v9 = vadd.f32 %v17276_v8, %v12767_v49 }
0xa75f   :  { %15188 = vtanh.f32 %v12768_v9 }
0xa76a   :  { %v15187_v34 = vpop.eup %15186 }
0xa76b   :  { %v12779_v36 = vadd.f32 %v15187_v34, %v12679_v56 }
0xa76c   :  { %v15189_v0 = vpop.eup %15188 }
0xa76d   :  { %12781 = vst.msk [vmem:[%s17329_s3 + $0x8] sm:$0xff] %vm1433_vm7, %v12779_v36  ;;  %v12778_v6 = vadd.f32 %v15189_v0, %v12678_v59 }
0xa76f   :  { %12780 = vst.msk [vmem:[%s17329_s3] sm:$0xff] %vm1433_vm7, %v12778_v6 }
0xa770   :  { %12976 = vsyncpa [#allocation6], 1 }

</bundles_post_ra>
